<compile_context>
chip_gen: v6e
topology: v6e:2x2x1
jax: 0.10.0
libtpu: 0.0.40
codegen_flags: <defaults>
</compile_context>

<pallas_src>
import functools
import math

import jax
import jax.numpy as jnp
from jax import lax
from jax.experimental import pallas as pl
from jax.experimental.pallas import tpu as pltpu


# ----------------------------------------------------------------------------
# Fused conv stack: 3 x (Conv2d valid + folded BN + ReLU), one image per
# grid step, output already in PyTorch C,H,W flatten order, lane-padded.
# ----------------------------------------------------------------------------
def _im2col(x_hwc, ksize):
    """(H, W, Cin) -> (Ho*Wo, ksize*ksize*Cin) patch matrix (single matmul)."""
    H, W, Cin = x_hwc.shape
    Ho, Wo = H - ksize + 1, W - ksize + 1
    cols = []
    for kh in range(ksize):
        for kw in range(ksize):
            cols.append(x_hwc[kh:kh + Ho, kw:kw + Wo, :].reshape(Ho * Wo, Cin))
    return jnp.concatenate(cols, axis=1), Ho, Wo


def fused_conv_stack_kernel(x_ref, w1_ref, s1_ref, w2_ref, s2_ref,
                            w3_ref, s3_ref, o_ref, *, ksize, s_pad):
    # x_ref: (1, H, W, Cin) NHWC image; weights are im2col-reshaped with the
    # BN scale already folded in; s*_ref are the per-channel shifts.
    x = x_ref[0]                                            # (H, W, Cin)

    # conv1 + BN + ReLU ------------------------------------------------------
    patches, ho, wo = _im2col(x, ksize)
    y = jnp.dot(patches, w1_ref[...], preferred_element_type=jnp.float32)
    y = jnp.maximum(y + s1_ref[...], 0.0)                   # (S1, C)
    x = y.reshape(ho, wo, y.shape[-1])

    # conv2 + BN + ReLU ------------------------------------------------------
    patches, ho, wo = _im2col(x, ksize)
    y = jnp.dot(patches, w2_ref[...], preferred_element_type=jnp.float32)
    y = jnp.maximum(y + s2_ref[...], 0.0)                   # (S2, C)
    x = y.reshape(ho, wo, y.shape[-1])

    # conv3 + BN + ReLU, emitted lane-dense as (Cout, spatial) so the flatten
    # matches PyTorch's x.view(N, -1) C,H,W order with no extra transpose.
    patches, ho, wo = _im2col(x, ksize)
    y = lax.dot_general(w3_ref[...], patches,                # (Cout, S3)
                        (((1,), (1,)), ((), ())),
                        preferred_element_type=jnp.float32)
    y = jnp.maximum(y + s3_ref[...], 0.0)

    s = ho * wo
    if s_pad > s:                                            # lane-pad to 128*
        y = jnp.concatenate(
            [y, jnp.zeros((y.shape[0], s_pad - s), jnp.float32)], axis=1)
    o_ref[...] = y.reshape(1, y.shape[0], s_pad)             # (1, C, s_pad)


def fused_conv_stack(x_nhwc, params, *, ksize, s_pad):
    N, H, W, Cin = x_nhwc.shape
    C = params["s3"].shape[0]
    kern = functools.partial(fused_conv_stack_kernel, ksize=ksize, s_pad=s_pad)

    def rep(arr):   # whole (small) parameter, same block for every grid step
        return pl.BlockSpec(arr.shape, lambda n, _nd=arr.ndim: (0,) * _nd)

    return pl.pallas_call(
        kern,
        out_shape=jax.ShapeDtypeStruct((N, C, s_pad), jnp.float32),
        grid=(N,),
        in_specs=[
            pl.BlockSpec((1, H, W, Cin), lambda n: (n, 0, 0, 0)),
            rep(params["w1"]), rep(params["s1"]),
            rep(params["w2"]), rep(params["s2"]),
            rep(params["w3"]), rep(params["s3"]),
        ],
        out_specs=pl.BlockSpec((1, C, s_pad), lambda n: (n, 0, 0)),
        compiler_params=pltpu.CompilerParams(
            dimension_semantics=("parallel",),          # v7x: 2 TCs share batch
            vmem_limit_bytes=32 * 1024 * 1024,
        ),
    )(x_nhwc, params["w1"], params["s1"], params["w2"], params["s2"],
      params["w3"], params["s3"])


# ----------------------------------------------------------------------------
# Dense head: Linear -> ReLU -> Linear, K-tiled over the flattened features.
# The bf16 fc weight is streamed one channel-chunk (s_pad x D) per grid step;
# the activations stay resident; a f32 VMEM scratch accumulates the partial
# products (pl.when init / finalize).  For the production flatten size the
# same structure would additionally tile the spatial axis.
# ----------------------------------------------------------------------------
def mlp_kernel(x_ref, w1_ref, b1_ref, w2_ref, b2_ref, o_ref, acc_ref):
    c = pl.program_id(0)

    @pl.when(c == 0)
    def _init():
        acc_ref[...] = jnp.zeros_like(acc_ref)

    n, _, s_pad = x_ref.shape
    xc = x_ref[:, pl.ds(c, 1), :].reshape(n, s_pad).astype(jnp.bfloat16)
    acc_ref[...] += jnp.dot(xc, w1_ref[0],
                            preferred_element_type=jnp.float32)

    @pl.when(c == pl.num_programs(0) - 1)
    def _finalize():
        h = jnp.maximum(acc_ref[...] + b1_ref[...], 0.0)
        o_ref[...] = jnp.dot(h.astype(jnp.bfloat16), w2_ref[...],
                             preferred_element_type=jnp.float32) + b2_ref[...]


def mlp_head(feats, fc_w, fc_b, out_w, out_b):
    N, C, s_pad = feats.shape
    D = fc_w.shape[-1]
    A = out_w.shape[-1]
    return pl.pallas_call(
        mlp_kernel,
        out_shape=jax.ShapeDtypeStruct((N, A), jnp.float32),
        grid=(C,),
        in_specs=[
            pl.BlockSpec((N, C, s_pad), lambda c: (0, 0, 0)),   # resident acts
            pl.BlockSpec((1, s_pad, D), lambda c: (c, 0, 0)),   # stream weight
            pl.BlockSpec((1, D), lambda c: (0, 0)),
            pl.BlockSpec((D, A), lambda c: (0, 0)),
            pl.BlockSpec((1, A), lambda c: (0, 0)),
        ],
        out_specs=pl.BlockSpec((N, A), lambda c: (0, 0)),
        scratch_shapes=[pltpu.VMEM((N, D), jnp.float32)],
        compiler_params=pltpu.CompilerParams(
            dimension_semantics=("arbitrary",),                 # reduction axis
            vmem_limit_bytes=32 * 1024 * 1024,
        ),
    )(feats, fc_w, fc_b, out_w, out_b)


# ----------------------------------------------------------------------------
# Parameter construction (mirrors the module __init__; BN folded at init)
# ----------------------------------------------------------------------------
def init_params(key, *, num_conv_layers, conv_kernel_size, input_channels,
                output_action, dense_layer, h_out, w_out, s_pad):
    k = conv_kernel_size
    C = num_conv_layers
    eps = 1e-5
    keys = jax.random.split(key, 10)
    p = {}

    def conv_im2col(kw_key, kb_key, cin):
        n = k * k * C
        w = jax.random.normal(kw_key, (C, cin, k, k), jnp.float32) \
            * math.sqrt(2.0 / n)                             # PyTorch init
        bound = 1.0 / math.sqrt(cin * k * k)
        b = jax.random.uniform(kb_key, (C,), jnp.float32, -bound, bound)
        # BatchNorm (eval form, module-init statistics).
        gamma = jnp.ones((C,), jnp.float32)
        beta = jnp.zeros((C,), jnp.float32)
        mean = jnp.zeros((C,), jnp.float32)
        var = jnp.ones((C,), jnp.float32)
        scale = gamma / jnp.sqrt(var + eps)
        # Fold BN scale into the conv weight; bias/mean/beta into the shift.
        w_scaled = w * scale[:, None, None, None]            # (Cout,Cin,k,k)
        # im2col rows ordered (kh, kw, cin) to match the kernel's concat order.
        w_r = jnp.transpose(w_scaled, (2, 3, 1, 0)).reshape(k * k * cin, C)
        shift = (b - mean) * scale + beta
        return w_r, shift

    w1, s1 = conv_im2col(keys[0], keys[1], input_channels)
    w2, s2 = conv_im2col(keys[2], keys[3], C)
    w3, s3 = conv_im2col(keys[4], keys[5], C)
    p["w1"], p["s1"] = w1, s1.reshape(1, C)
    p["w2"], p["s2"] = w2, s2.reshape(1, C)
    # conv3 is applied in transposed orientation -> (Cout, K) weight, (C,1) shift.
    p["w3"], p["s3"] = w3.T, s3.reshape(C, 1)

    # Fully connected layer: PyTorch weight (dense, F) applied as x @ W.T with
    # flatten index c*S + s (C,H,W order).  Store as (C, S_pad, dense) bf16,
    # zero-padded along S, so the MLP kernel streams one channel-chunk/step.
    S = h_out * w_out
    F = C * S
    fc_std = 1.0 / math.sqrt(F)
    fc_w = jax.random.uniform(keys[6], (F, dense_layer), jnp.float32,
                              -fc_std, fc_std)               # == weight.T
    fc_w = fc_w.reshape(C, S, dense_layer)
    fc_w = jnp.pad(fc_w, ((0, 0), (0, s_pad - S), (0, 0)))
    p["fc_w"] = fc_w.astype(jnp.bfloat16)
    p["fc_b"] = jax.random.uniform(keys[7], (1, dense_layer), jnp.float32,
                                   -fc_std, fc_std)
    out_std = 1.0 / math.sqrt(dense_layer)
    p["out_w"] = jax.random.uniform(keys[8], (dense_layer, output_action),
                                    jnp.float32, -out_std, out_std
                                    ).astype(jnp.bfloat16)
    p["out_b"] = jax.random.uniform(keys[9], (1, output_action), jnp.float32,
                                    -out_std, out_std)
    return p


# ----------------------------------------------------------------------------
# Forward pass (mirrors ActorDDPGNetwork.forward)
# ----------------------------------------------------------------------------
@functools.partial(jax.jit, static_argnames=("ksize", "s_pad"))
def actor_ddpg_forward(x_nchw, params, *, ksize, s_pad):
    # PyTorch input is NCHW; convert to NHWC (channels on the lane axis) once.
    x = jnp.transpose(x_nchw, (0, 2, 3, 1)).astype(jnp.float32)
    feats = fused_conv_stack(x, params, ksize=ksize, s_pad=s_pad)
    return mlp_head(feats, params["fc_w"], params["fc_b"],
                    params["out_w"], params["out_b"])


# ----------------------------------------------------------------------------
# Pure-JAX reference (same folded parameters / same bf16 rounding)
# ----------------------------------------------------------------------------
def reference_forward(x_nchw, params, *, ksize, s_pad):
    x = jnp.transpose(x_nchw, (0, 2, 3, 1)).astype(jnp.float32)

    def patches_of(x):
        N, H, W, Cin = x.shape
        Ho, Wo = H - ksize + 1, W - ksize + 1
        cols = [x[:, kh:kh + Ho, kw:kw + Wo, :].reshape(N, Ho * Wo, Cin)
                for kh in range(ksize) for kw in range(ksize)]
        return jnp.concatenate(cols, axis=2), Ho, Wo

    def conv_ref(x, w_r, s):
        patches, Ho, Wo = patches_of(x)
        y = jnp.einsum("nsk,kc->nsc", patches, w_r,
                       preferred_element_type=jnp.float32) + s[None]
        return jnp.maximum(y, 0.0).reshape(x.shape[0], Ho, Wo, -1)

    x = conv_ref(x, params["w1"], params["s1"])
    x = conv_ref(x, params["w2"], params["s2"])
    patches, _, _ = patches_of(x)
    y = jnp.einsum("ck,nsk->ncs", params["w3"], patches,
                   preferred_element_type=jnp.float32) + params["s3"][None]
    y = jnp.maximum(y, 0.0)                                  # (N, C, S)
    feats = jnp.pad(y, ((0, 0), (0, 0), (0, s_pad - y.shape[2])))
    h = jnp.einsum("ncs,csd->nd", feats.astype(jnp.bfloat16), params["fc_w"],
                   preferred_element_type=jnp.float32) + params["fc_b"]
    h = jnp.maximum(h, 0.0)
    return jnp.dot(h.astype(jnp.bfloat16), params["out_w"],
                   preferred_element_type=jnp.float32) + params["out_b"]


if __name__ == "__main__":
    # Small synthetic configuration consistent with the module (the original
    # hardcodes a 234432 flatten size; here it is derived from the image size).
    NUM_CONV_LAYERS = 8      # out_channels of each conv
    CONV_KERNEL = 3
    INPUT_CHANNELS = 4
    OUTPUT_ACTION = 4
    DENSE_LAYER = 32
    IMG_H = IMG_W = 16
    BATCH = 2

    # Spatial size after three valid 3x3 convs: 16 -> 14 -> 12 -> 10
    h_out = IMG_H - 3 * (CONV_KERNEL - 1)
    w_out = IMG_W - 3 * (CONV_KERNEL - 1)
    s_pad = ((h_out * w_out + 127) // 128) * 128   # spatial padded to lane mult

    key = jax.random.PRNGKey(0)
    pkey, xkey = jax.random.split(key)
    params = init_params(
        pkey,
        num_conv_layers=NUM_CONV_LAYERS,
        conv_kernel_size=CONV_KERNEL,
        input_channels=INPUT_CHANNELS,
        output_action=OUTPUT_ACTION,
        dense_layer=DENSE_LAYER,
        h_out=h_out, w_out=w_out, s_pad=s_pad,
    )

    x = jax.random.normal(xkey, (BATCH, INPUT_CHANNELS, IMG_H, IMG_W),
                          jnp.float32)

    out = actor_ddpg_forward(x, params, ksize=CONV_KERNEL, s_pad=s_pad)
    out = jax.block_until_ready(out)

    assert out.shape == (BATCH, OUTPUT_ACTION), out.shape
    assert bool(jnp.all(jnp.isfinite(out)))

    ref = reference_forward(x, params, ksize=CONV_KERNEL, s_pad=s_pad)
    assert bool(jnp.allclose(out, ref, rtol=1e-2, atol=1e-2)), (out, ref)

    print("KERNEL_OK")
</pallas_src>

<mosaic_0001>
module attributes {stable_mosaic.version = 11 : i64} {
  func.func @fused_conv_stack_kernel(%arg0: i32, %arg1: memref<1x16x16x4xf32, #tpu.memory_space<vmem>>, %arg2: memref<36x8xf32, #tpu.memory_space<vmem>>, %arg3: memref<1x8xf32, #tpu.memory_space<vmem>>, %arg4: memref<72x8xf32, #tpu.memory_space<vmem>>, %arg5: memref<1x8xf32, #tpu.memory_space<vmem>>, %arg6: memref<8x72xf32, #tpu.memory_space<vmem>>, %arg7: memref<8x1xf32, #tpu.memory_space<vmem>>, %arg8: memref<1x8x128xf32, #tpu.memory_space<vmem>>) attributes {dimension_semantics = [#tpu.dimension_semantics<parallel>], iteration_bounds = array<i64: 2>, scalar_prefetch = 0 : i64, scratch_operands = 0 : i64, tpu.core_type = #tpu.core_type<tc>, window_params = [{transform_indices = @transform_0, window_bounds = array<i64: 1, 16, 16, 4>}, {pipeline_mode = #tpu.pipeline_mode<synchronous>, transform_indices = @transform_1, window_bounds = array<i64: 36, 8>}, {pipeline_mode = #tpu.pipeline_mode<synchronous>, transform_indices = @transform_2, window_bounds = array<i64: 1, 8>}, {pipeline_mode = #tpu.pipeline_mode<synchronous>, transform_indices = @transform_3, window_bounds = array<i64: 72, 8>}, {pipeline_mode = #tpu.pipeline_mode<synchronous>, transform_indices = @transform_4, window_bounds = array<i64: 1, 8>}, {pipeline_mode = #tpu.pipeline_mode<synchronous>, transform_indices = @transform_5, window_bounds = array<i64: 8, 72>}, {pipeline_mode = #tpu.pipeline_mode<synchronous>, transform_indices = @transform_6, window_bounds = array<i64: 8, 1>}, {transform_indices = @transform_7, window_bounds = array<i64: 1, 8, 128>}]} {
    %c0 = arith.constant 0 : index
    %c0_0 = arith.constant 0 : index
    %c0_1 = arith.constant 0 : index
    %c0_2 = arith.constant 0 : index
    %0 = vector.load %arg1[%c0, %c0_0, %c0_1, %c0_2] : memref<1x16x16x4xf32, #tpu.memory_space<vmem>>, vector<1x16x16x4xf32>
    %1 = vector.shape_cast %0 : vector<1x16x16x4xf32> to vector<16x16x4xf32>
    %2 = vector.extract_strided_slice %1 {offsets = [0, 0, 0], sizes = [14, 14, 4], strides = [1, 1, 1]} : vector<16x16x4xf32> to vector<14x14x4xf32>
    %3 = vector.shape_cast %2 : vector<14x14x4xf32> to vector<196x4xf32>
    %4 = vector.extract_strided_slice %1 {offsets = [0, 1, 0], sizes = [14, 14, 4], strides = [1, 1, 1]} : vector<16x16x4xf32> to vector<14x14x4xf32>
    %5 = vector.shape_cast %4 : vector<14x14x4xf32> to vector<196x4xf32>
    %6 = vector.extract_strided_slice %1 {offsets = [0, 2, 0], sizes = [14, 14, 4], strides = [1, 1, 1]} : vector<16x16x4xf32> to vector<14x14x4xf32>
    %7 = vector.shape_cast %6 : vector<14x14x4xf32> to vector<196x4xf32>
    %8 = vector.extract_strided_slice %1 {offsets = [1, 0, 0], sizes = [14, 14, 4], strides = [1, 1, 1]} : vector<16x16x4xf32> to vector<14x14x4xf32>
    %9 = vector.shape_cast %8 : vector<14x14x4xf32> to vector<196x4xf32>
    %10 = vector.extract_strided_slice %1 {offsets = [1, 1, 0], sizes = [14, 14, 4], strides = [1, 1, 1]} : vector<16x16x4xf32> to vector<14x14x4xf32>
    %11 = vector.shape_cast %10 : vector<14x14x4xf32> to vector<196x4xf32>
    %12 = vector.extract_strided_slice %1 {offsets = [1, 2, 0], sizes = [14, 14, 4], strides = [1, 1, 1]} : vector<16x16x4xf32> to vector<14x14x4xf32>
    %13 = vector.shape_cast %12 : vector<14x14x4xf32> to vector<196x4xf32>
    %14 = vector.extract_strided_slice %1 {offsets = [2, 0, 0], sizes = [14, 14, 4], strides = [1, 1, 1]} : vector<16x16x4xf32> to vector<14x14x4xf32>
    %15 = vector.shape_cast %14 : vector<14x14x4xf32> to vector<196x4xf32>
    %16 = vector.extract_strided_slice %1 {offsets = [2, 1, 0], sizes = [14, 14, 4], strides = [1, 1, 1]} : vector<16x16x4xf32> to vector<14x14x4xf32>
    %17 = vector.shape_cast %16 : vector<14x14x4xf32> to vector<196x4xf32>
    %18 = vector.extract_strided_slice %1 {offsets = [2, 2, 0], sizes = [14, 14, 4], strides = [1, 1, 1]} : vector<16x16x4xf32> to vector<14x14x4xf32>
    %19 = vector.shape_cast %18 : vector<14x14x4xf32> to vector<196x4xf32>
    %20 = tpu.concatenate %3, %5, %7, %9, %11, %13, %15, %17, %19 in 1 : vector<196x4xf32>, vector<196x4xf32>, vector<196x4xf32>, vector<196x4xf32>, vector<196x4xf32>, vector<196x4xf32>, vector<196x4xf32>, vector<196x4xf32>, vector<196x4xf32> -> vector<196x36xf32>
    %c0_3 = arith.constant 0 : index
    %c0_4 = arith.constant 0 : index
    %21 = vector.load %arg2[%c0_3, %c0_4] : memref<36x8xf32, #tpu.memory_space<vmem>>, vector<36x8xf32>
    %cst = arith.constant dense<0.000000e+00> : vector<196x8xf32>
    %22 = tpu.matmul %20, %21, %cst {dimension_numbers = #tpu.dot_dimension_numbers<[1], [0], [0], [1], [0, 0, 1, 1], [], []>} : vector<196x36xf32>, vector<36x8xf32>, vector<196x8xf32> -> vector<196x8xf32>
    %c0_5 = arith.constant 0 : index
    %c0_6 = arith.constant 0 : index
    %23 = vector.load %arg3[%c0_5, %c0_6] : memref<1x8xf32, #tpu.memory_space<vmem>>, vector<1x8xf32>
    %24 = vector.broadcast %23 : vector<1x8xf32> to vector<196x8xf32>
    %25 = arith.addf %22, %24 : vector<196x8xf32>
    %cst_7 = arith.constant 0.000000e+00 : f32
    %26 = vector.broadcast %cst_7 : f32 to vector<196x8xf32>
    %27 = arith.maximumf %25, %26 : vector<196x8xf32>
    %28 = vector.shape_cast %27 : vector<196x8xf32> to vector<14x14x8xf32>
    %29 = vector.extract_strided_slice %28 {offsets = [0, 0, 0], sizes = [12, 12, 8], strides = [1, 1, 1]} : vector<14x14x8xf32> to vector<12x12x8xf32>
    %30 = vector.shape_cast %29 : vector<12x12x8xf32> to vector<144x8xf32>
    %31 = vector.extract_strided_slice %28 {offsets = [0, 1, 0], sizes = [12, 12, 8], strides = [1, 1, 1]} : vector<14x14x8xf32> to vector<12x12x8xf32>
    %32 = vector.shape_cast %31 : vector<12x12x8xf32> to vector<144x8xf32>
    %33 = vector.extract_strided_slice %28 {offsets = [0, 2, 0], sizes = [12, 12, 8], strides = [1, 1, 1]} : vector<14x14x8xf32> to vector<12x12x8xf32>
    %34 = vector.shape_cast %33 : vector<12x12x8xf32> to vector<144x8xf32>
    %35 = vector.extract_strided_slice %28 {offsets = [1, 0, 0], sizes = [12, 12, 8], strides = [1, 1, 1]} : vector<14x14x8xf32> to vector<12x12x8xf32>
    %36 = vector.shape_cast %35 : vector<12x12x8xf32> to vector<144x8xf32>
    %37 = vector.extract_strided_slice %28 {offsets = [1, 1, 0], sizes = [12, 12, 8], strides = [1, 1, 1]} : vector<14x14x8xf32> to vector<12x12x8xf32>
    %38 = vector.shape_cast %37 : vector<12x12x8xf32> to vector<144x8xf32>
    %39 = vector.extract_strided_slice %28 {offsets = [1, 2, 0], sizes = [12, 12, 8], strides = [1, 1, 1]} : vector<14x14x8xf32> to vector<12x12x8xf32>
    %40 = vector.shape_cast %39 : vector<12x12x8xf32> to vector<144x8xf32>
    %41 = vector.extract_strided_slice %28 {offsets = [2, 0, 0], sizes = [12, 12, 8], strides = [1, 1, 1]} : vector<14x14x8xf32> to vector<12x12x8xf32>
    %42 = vector.shape_cast %41 : vector<12x12x8xf32> to vector<144x8xf32>
    %43 = vector.extract_strided_slice %28 {offsets = [2, 1, 0], sizes = [12, 12, 8], strides = [1, 1, 1]} : vector<14x14x8xf32> to vector<12x12x8xf32>
    %44 = vector.shape_cast %43 : vector<12x12x8xf32> to vector<144x8xf32>
    %45 = vector.extract_strided_slice %28 {offsets = [2, 2, 0], sizes = [12, 12, 8], strides = [1, 1, 1]} : vector<14x14x8xf32> to vector<12x12x8xf32>
    %46 = vector.shape_cast %45 : vector<12x12x8xf32> to vector<144x8xf32>
    %47 = tpu.concatenate %30, %32, %34, %36, %38, %40, %42, %44, %46 in 1 : vector<144x8xf32>, vector<144x8xf32>, vector<144x8xf32>, vector<144x8xf32>, vector<144x8xf32>, vector<144x8xf32>, vector<144x8xf32>, vector<144x8xf32>, vector<144x8xf32> -> vector<144x72xf32>
    %c0_8 = arith.constant 0 : index
    %c0_9 = arith.constant 0 : index
    %48 = vector.load %arg4[%c0_8, %c0_9] : memref<72x8xf32, #tpu.memory_space<vmem>>, vector<72x8xf32>
    %cst_10 = arith.constant dense<0.000000e+00> : vector<144x8xf32>
    %49 = tpu.matmul %47, %48, %cst_10 {dimension_numbers = #tpu.dot_dimension_numbers<[1], [0], [0], [1], [0, 0, 1, 1], [], []>} : vector<144x72xf32>, vector<72x8xf32>, vector<144x8xf32> -> vector<144x8xf32>
    %c0_11 = arith.constant 0 : index
    %c0_12 = arith.constant 0 : index
    %50 = vector.load %arg5[%c0_11, %c0_12] : memref<1x8xf32, #tpu.memory_space<vmem>>, vector<1x8xf32>
    %51 = vector.broadcast %50 : vector<1x8xf32> to vector<144x8xf32>
    %52 = arith.addf %49, %51 : vector<144x8xf32>
    %cst_13 = arith.constant 0.000000e+00 : f32
    %53 = vector.broadcast %cst_13 : f32 to vector<144x8xf32>
    %54 = arith.maximumf %52, %53 : vector<144x8xf32>
    %55 = vector.shape_cast %54 : vector<144x8xf32> to vector<12x12x8xf32>
    %56 = vector.extract_strided_slice %55 {offsets = [0, 0, 0], sizes = [10, 10, 8], strides = [1, 1, 1]} : vector<12x12x8xf32> to vector<10x10x8xf32>
    %57 = vector.shape_cast %56 : vector<10x10x8xf32> to vector<100x8xf32>
    %58 = vector.extract_strided_slice %55 {offsets = [0, 1, 0], sizes = [10, 10, 8], strides = [1, 1, 1]} : vector<12x12x8xf32> to vector<10x10x8xf32>
    %59 = vector.shape_cast %58 : vector<10x10x8xf32> to vector<100x8xf32>
    %60 = vector.extract_strided_slice %55 {offsets = [0, 2, 0], sizes = [10, 10, 8], strides = [1, 1, 1]} : vector<12x12x8xf32> to vector<10x10x8xf32>
    %61 = vector.shape_cast %60 : vector<10x10x8xf32> to vector<100x8xf32>
    %62 = vector.extract_strided_slice %55 {offsets = [1, 0, 0], sizes = [10, 10, 8], strides = [1, 1, 1]} : vector<12x12x8xf32> to vector<10x10x8xf32>
    %63 = vector.shape_cast %62 : vector<10x10x8xf32> to vector<100x8xf32>
    %64 = vector.extract_strided_slice %55 {offsets = [1, 1, 0], sizes = [10, 10, 8], strides = [1, 1, 1]} : vector<12x12x8xf32> to vector<10x10x8xf32>
    %65 = vector.shape_cast %64 : vector<10x10x8xf32> to vector<100x8xf32>
    %66 = vector.extract_strided_slice %55 {offsets = [1, 2, 0], sizes = [10, 10, 8], strides = [1, 1, 1]} : vector<12x12x8xf32> to vector<10x10x8xf32>
    %67 = vector.shape_cast %66 : vector<10x10x8xf32> to vector<100x8xf32>
    %68 = vector.extract_strided_slice %55 {offsets = [2, 0, 0], sizes = [10, 10, 8], strides = [1, 1, 1]} : vector<12x12x8xf32> to vector<10x10x8xf32>
    %69 = vector.shape_cast %68 : vector<10x10x8xf32> to vector<100x8xf32>
    %70 = vector.extract_strided_slice %55 {offsets = [2, 1, 0], sizes = [10, 10, 8], strides = [1, 1, 1]} : vector<12x12x8xf32> to vector<10x10x8xf32>
    %71 = vector.shape_cast %70 : vector<10x10x8xf32> to vector<100x8xf32>
    %72 = vector.extract_strided_slice %55 {offsets = [2, 2, 0], sizes = [10, 10, 8], strides = [1, 1, 1]} : vector<12x12x8xf32> to vector<10x10x8xf32>
    %73 = vector.shape_cast %72 : vector<10x10x8xf32> to vector<100x8xf32>
    %74 = tpu.concatenate %57, %59, %61, %63, %65, %67, %69, %71, %73 in 1 : vector<100x8xf32>, vector<100x8xf32>, vector<100x8xf32>, vector<100x8xf32>, vector<100x8xf32>, vector<100x8xf32>, vector<100x8xf32>, vector<100x8xf32>, vector<100x8xf32> -> vector<100x72xf32>
    %c0_14 = arith.constant 0 : index
    %c0_15 = arith.constant 0 : index
    %75 = vector.load %arg6[%c0_14, %c0_15] : memref<8x72xf32, #tpu.memory_space<vmem>>, vector<8x72xf32>
    %cst_16 = arith.constant dense<0.000000e+00> : vector<8x100xf32>
    %76 = tpu.matmul %75, %74, %cst_16 {dimension_numbers = #tpu.dot_dimension_numbers<[1], [1], [0], [0], [0, 0, 1, 0], [], []>} : vector<8x72xf32>, vector<100x72xf32>, vector<8x100xf32> -> vector<8x100xf32>
    %c0_17 = arith.constant 0 : index
    %c0_18 = arith.constant 0 : index
    %77 = vector.load %arg7[%c0_17, %c0_18] : memref<8x1xf32, #tpu.memory_space<vmem>>, vector<8x1xf32>
    %78 = vector.broadcast %77 : vector<8x1xf32> to vector<8x100xf32>
    %79 = arith.addf %76, %78 : vector<8x100xf32>
    %cst_19 = arith.constant 0.000000e+00 : f32
    %80 = vector.broadcast %cst_19 : f32 to vector<8x100xf32>
    %81 = arith.maximumf %79, %80 : vector<8x100xf32>
    %cst_20 = arith.constant 0.000000e+00 : f32
    %82 = vector.broadcast %cst_20 : f32 to vector<8x28xf32>
    %83 = tpu.concatenate %81, %82 in 1 : vector<8x100xf32>, vector<8x28xf32> -> vector<8x128xf32>
    %84 = vector.shape_cast %83 : vector<8x128xf32> to vector<1x8x128xf32>
    %c0_21 = arith.constant 0 : index
    %c0_22 = arith.constant 0 : index
    %c0_23 = arith.constant 0 : index
    %85 = vector.load %arg8[%c0_21, %c0_22, %c0_23] : memref<1x8x128xf32, #tpu.memory_space<vmem>>, vector<1x8x128xf32>
    tpu.vector_store %arg8[%c0_21, %c0_22, %c0_23], %84 {strides = array<i32>} : memref<1x8x128xf32, #tpu.memory_space<vmem>>, vector<1x8x128xf32>,
    return
  }
  func.func @transform_0(%arg0: i32) -> (i32, i32, i32, i32) {
    %c0_i32 = arith.constant 0 : i32
    %c0_i32_0 = arith.constant 0 : i32
    %c0_i32_1 = arith.constant 0 : i32
    %c0_i32_2 = arith.constant 0 : i32
    return %arg0, %c0_i32, %c0_i32_0, %c0_i32_1 : i32, i32, i32, i32
  }
  func.func @transform_1(%arg0: i32) -> (i32, i32) {
    %c0_i32 = arith.constant 0 : i32
    %c0_i32_0 = arith.constant 0 : i32
    %c0_i32_1 = arith.constant 0 : i32
    return %c0_i32, %c0_i32_0 : i32, i32
  }
  func.func @transform_2(%arg0: i32) -> (i32, i32) {
    %c0_i32 = arith.constant 0 : i32
    %c0_i32_0 = arith.constant 0 : i32
    %c0_i32_1 = arith.constant 0 : i32
    return %c0_i32, %c0_i32_0 : i32, i32
  }
  func.func @transform_3(%arg0: i32) -> (i32, i32) {
    %c0_i32 = arith.constant 0 : i32
    %c0_i32_0 = arith.constant 0 : i32
    %c0_i32_1 = arith.constant 0 : i32
    return %c0_i32, %c0_i32_0 : i32, i32
  }
  func.func @transform_4(%arg0: i32) -> (i32, i32) {
    %c0_i32 = arith.constant 0 : i32
    %c0_i32_0 = arith.constant 0 : i32
    %c0_i32_1 = arith.constant 0 : i32
    return %c0_i32, %c0_i32_0 : i32, i32
  }
  func.func @transform_5(%arg0: i32) -> (i32, i32) {
    %c0_i32 = arith.constant 0 : i32
    %c0_i32_0 = arith.constant 0 : i32
    %c0_i32_1 = arith.constant 0 : i32
    return %c0_i32, %c0_i32_0 : i32, i32
  }
  func.func @transform_6(%arg0: i32) -> (i32, i32) {
    %c0_i32 = arith.constant 0 : i32
    %c0_i32_0 = arith.constant 0 : i32
    %c0_i32_1 = arith.constant 0 : i32
    return %c0_i32, %c0_i32_0 : i32, i32
  }
  func.func @transform_7(%arg0: i32) -> (i32, i32, i32) {
    %c0_i32 = arith.constant 0 : i32
    %c0_i32_0 = arith.constant 0 : i32
    %c0_i32_1 = arith.constant 0 : i32
    return %arg0, %c0_i32, %c0_i32_0 : i32, i32, i32
  }
}

module attributes {stable_mosaic.version = 11 : i64} {
  func.func @mlp_kernel(%arg0: i32, %arg1: memref<2x8x128xf32, #tpu.memory_space<vmem>>, %arg2: memref<1x128x32xbf16, #tpu.memory_space<vmem>>, %arg3: memref<1x32xf32, #tpu.memory_space<vmem>>, %arg4: memref<32x4xbf16, #tpu.memory_space<vmem>>, %arg5: memref<1x4xf32, #tpu.memory_space<vmem>>, %arg6: memref<2x4xf32, #tpu.memory_space<vmem>>, %arg7: memref<2x32xf32, #tpu.memory_space<vmem>>) attributes {dimension_semantics = [#tpu.dimension_semantics<arbitrary>], iteration_bounds = array<i64: 8>, scalar_prefetch = 0 : i64, scratch_operands = 1 : i64, tpu.core_type = #tpu.core_type<tc>, window_params = [{pipeline_mode = #tpu.pipeline_mode<synchronous>, transform_indices = @transform_0, window_bounds = array<i64: 2, 8, 128>}, {transform_indices = @transform_1, window_bounds = array<i64: 1, 128, 32>}, {pipeline_mode = #tpu.pipeline_mode<synchronous>, transform_indices = @transform_2, window_bounds = array<i64: 1, 32>}, {pipeline_mode = #tpu.pipeline_mode<synchronous>, transform_indices = @transform_3, window_bounds = array<i64: 32, 4>}, {pipeline_mode = #tpu.pipeline_mode<synchronous>, transform_indices = @transform_4, window_bounds = array<i64: 1, 4>}, {pipeline_mode = #tpu.pipeline_mode<synchronous>, transform_indices = @transform_5, window_bounds = array<i64: 2, 4>}]} {
    %c0_i32 = arith.constant 0 : i32
    %0 = arith.cmpi eq, %arg0, %c0_i32 : i32
    %1 = arith.extui %0 : i1 to i32
    %c0_i32_0 = arith.constant 0 : i32
    %2 = arith.cmpi ne, %1, %c0_i32_0 : i32
    scf.if %2 {
      %cst_10 = arith.constant 0.000000e+00 : f32
      %16 = vector.broadcast %cst_10 : f32 to vector<2x32xf32>
      %c0_11 = arith.constant 0 : index
      %c0_12 = arith.constant 0 : index
      %17 = vector.load %arg7[%c0_11, %c0_12] : memref<2x32xf32, #tpu.memory_space<vmem>>, vector<2x32xf32>
      tpu.vector_store %arg7[%c0_11, %c0_12], %16 {strides = array<i32>} : memref<2x32xf32, #tpu.memory_space<vmem>>, vector<2x32xf32>,
    } else {
    }
    %c0 = arith.constant 0 : index
    %3 = arith.index_cast %arg0 : i32 to index
    %c0_1 = arith.constant 0 : index
    %4 = vector.load %arg1[%c0, %3, %c0_1] : memref<2x8x128xf32, #tpu.memory_space<vmem>>, vector<2x1x128xf32>
    %5 = vector.shape_cast %4 : vector<2x1x128xf32> to vector<2x128xf32>
    %6 = arith.truncf %5 : vector<2x128xf32> to vector<2x128xbf16>
    %c0_2 = arith.constant 0 : index
    %c0_3 = arith.constant 0 : index
    %7 = vector.load %arg7[%c0_2, %c0_3] : memref<2x32xf32, #tpu.memory_space<vmem>>, vector<2x32xf32>
    %c0_4 = arith.constant 0 : index
    %c0_5 = arith.constant 0 : index
    %c0_6 = arith.constant 0 : index
    %8 = vector.load %arg2[%c0_4, %c0_5, %c0_6] : memref<1x128x32xbf16, #tpu.memory_space<vmem>>, vector<1x128x32xbf16>
    %9 = vector.shape_cast %8 : vector<1x128x32xbf16> to vector<128x32xbf16>
    %cst = arith.constant dense<0.000000e+00> : vector<2x32xf32>
    %10 = tpu.matmul %6, %9, %cst {dimension_numbers = #tpu.dot_dimension_numbers<[1], [0], [0], [1], [0, 0, 1, 1], [], []>} : vector<2x128xbf16>, vector<128x32xbf16>, vector<2x32xf32> -> vector<2x32xf32>
    %11 = arith.addf %7, %10 : vector<2x32xf32>
    %c0_7 = arith.constant 0 : index
    %c0_8 = arith.constant 0 : index
    %12 = vector.load %arg7[%c0_7, %c0_8] : memref<2x32xf32, #tpu.memory_space<vmem>>, vector<2x32xf32>
    tpu.vector_store %arg7[%c0_7, %c0_8], %11 {strides = array<i32>} : memref<2x32xf32, #tpu.memory_space<vmem>>, vector<2x32xf32>,
    %c7_i32 = arith.constant 7 : i32
    %13 = arith.cmpi eq, %arg0, %c7_i32 : i32
    %14 = arith.extui %13 : i1 to i32
    %c0_i32_9 = arith.constant 0 : i32
    %15 = arith.cmpi ne, %14, %c0_i32_9 : i32
    scf.if %15 {
      %c0_10 = arith.constant 0 : index
      %c0_11 = arith.constant 0 : index
      %16 = vector.load %arg7[%c0_10, %c0_11] : memref<2x32xf32, #tpu.memory_space<vmem>>, vector<2x32xf32>
      %c0_12 = arith.constant 0 : index
      %c0_13 = arith.constant 0 : index
      %17 = vector.load %arg3[%c0_12, %c0_13] : memref<1x32xf32, #tpu.memory_space<vmem>>, vector<1x32xf32>
      %18 = vector.broadcast %17 : vector<1x32xf32> to vector<2x32xf32>
      %19 = arith.addf %16, %18 : vector<2x32xf32>
      %cst_14 = arith.constant 0.000000e+00 : f32
      %20 = vector.broadcast %cst_14 : f32 to vector<2x32xf32>
      %21 = arith.maximumf %19, %20 : vector<2x32xf32>
      %22 = arith.truncf %21 : vector<2x32xf32> to vector<2x32xbf16>
      %c0_15 = arith.constant 0 : index
      %c0_16 = arith.constant 0 : index
      %23 = vector.load %arg4[%c0_15, %c0_16] : memref<32x4xbf16, #tpu.memory_space<vmem>>, vector<32x4xbf16>
      %cst_17 = arith.constant dense<0.000000e+00> : vector<2x4xf32>
      %24 = tpu.matmul %22, %23, %cst_17 {dimension_numbers = #tpu.dot_dimension_numbers<[1], [0], [0], [1], [0, 0, 1, 1], [], []>} : vector<2x32xbf16>, vector<32x4xbf16>, vector<2x4xf32> -> vector<2x4xf32>
      %c0_18 = arith.constant 0 : index
      %c0_19 = arith.constant 0 : index
      %25 = vector.load %arg5[%c0_18, %c0_19] : memref<1x4xf32, #tpu.memory_space<vmem>>, vector<1x4xf32>
      %26 = vector.broadcast %25 : vector<1x4xf32> to vector<2x4xf32>
      %27 = arith.addf %24, %26 : vector<2x4xf32>
      %c0_20 = arith.constant 0 : index
      %c0_21 = arith.constant 0 : index
      %28 = vector.load %arg6[%c0_20, %c0_21] : memref<2x4xf32, #tpu.memory_space<vmem>>, vector<2x4xf32>
      tpu.vector_store %arg6[%c0_20, %c0_21], %27 {strides = array<i32>} : memref<2x4xf32, #tpu.memory_space<vmem>>, vector<2x4xf32>,
    } else {
    }
    return
  }
  func.func @transform_0(%arg0: i32) -> (i32, i32, i32) {
    %c0_i32 = arith.constant 0 : i32
    %c0_i32_0 = arith.constant 0 : i32
    %c0_i32_1 = arith.constant 0 : i32
    %c0_i32_2 = arith.constant 0 : i32
    return %c0_i32, %c0_i32_0, %c0_i32_1 : i32, i32, i32
  }
  func.func @transform_1(%arg0: i32) -> (i32, i32, i32) {
    %c0_i32 = arith.constant 0 : i32
    %c0_i32_0 = arith.constant 0 : i32
    %c0_i32_1 = arith.constant 0 : i32
    return %arg0, %c0_i32, %c0_i32_0 : i32, i32, i32
  }
  func.func @transform_2(%arg0: i32) -> (i32, i32) {
    %c0_i32 = arith.constant 0 : i32
    %c0_i32_0 = arith.constant 0 : i32
    %c0_i32_1 = arith.constant 0 : i32
    return %c0_i32, %c0_i32_0 : i32, i32
  }
  func.func @transform_3(%arg0: i32) -> (i32, i32) {
    %c0_i32 = arith.constant 0 : i32
    %c0_i32_0 = arith.constant 0 : i32
    %c0_i32_1 = arith.constant 0 : i32
    return %c0_i32, %c0_i32_0 : i32, i32
  }
  func.func @transform_4(%arg0: i32) -> (i32, i32) {
    %c0_i32 = arith.constant 0 : i32
    %c0_i32_0 = arith.constant 0 : i32
    %c0_i32_1 = arith.constant 0 : i32
    return %c0_i32, %c0_i32_0 : i32, i32
  }
  func.func @transform_5(%arg0: i32) -> (i32, i32) {
    %c0_i32 = arith.constant 0 : i32
    %c0_i32_0 = arith.constant 0 : i32
    %c0_i32_1 = arith.constant 0 : i32
    return %c0_i32, %c0_i32_0 : i32, i32
  }
}

</mosaic_0001>

<bundles_post_ra>
// kernel: actor_ddpg_forward.3
= control target key start
LH: loop header
LB: loop body
LE: loop exit
PB: predicated region body
PF: predicated region fallthrough
CT: control target
= control target key end

     0   :  { %10 = vsyncpa [#allocation4], 0  ;;  %s639_s18 = smov 0   ;;  %s697_s0 = inlined_call_operand.vmem [shape: f32[2,8,128], index: 0, kind: input, shape index: {}]   ;;  %s698_s1 = inlined_call_operand.vmem [shape: bf16[8,128,32], index: 1, kind: input, shape index: {}]   ;;  %s699_s2 = inlined_call_operand.vmem [shape: f32[1,32], index: 2, kind: input, shape index: {}]   ;;  %s700_s3 = inlined_call_operand.vmem [shape: bf16[32,4], index: 3, kind: input, shape index: {}]   ;;  %s701_s4 = inlined_call_operand.vmem [shape: f32[1,4], index: 4, kind: input, shape index: {}]   ;;  %s702_s5 = inlined_call_operand.hbm [shape: f32[2,4], index: 5, kind: output, shape index: {}]  }
   0x1 LB: > { %s645_s19 = sadd.s32 4294967295, %s601_s18   ;;  %p474_p0 = scmp.ge.s32.totalorder %s601_s18, 1  ;;  %s601_s18 = sphi %s639_s18, %s16_s18  }
   0x2   : > { %p183_p1 = scmp.lt.s32.totalorder %s601_s18, 9 }
   0x4   : > { %p184_p2 = pnand %p474_p0, %p183_p1 }
   0x5   : > { %p206_p3 = scmp.lt.s32.totalorder (!%p184_p2), %s645_s19, 7  ;;  %p477_p4 = scmp.ne.s32.totalorder (!%p184_p2), %s645_s19, 0 }
   0x6   : > { %187 = sbr.rel (%p184_p2) target bundleno = 475 (0x1db), region = 40 }
   0xb   : > { %s207_s20 = scalar_select %p206_p3, %s645_s19, 7 }
   0xc   : > { %215 = sbr.rel (%p477_p4) target bundleno = 19 (0x13), region = 44 }
   0xd   : > { %s496_s21 = sshll.u32 %s207_s20, 6 }
   0xe   : > { %s654_s24 = scalar_lea.vmem %s698_s1, %s496_s21 }
  0x11   : > { %vm216_vm0 = vcmask 254976   ;;  %v603_v0 = vmov 0.0  }
  0x12   : > { %217 = vst.msk [vmem:[#allocation2] sm:$0x3] %vm216_vm0, %v603_v0 }
  0x13 PF: > { %v557_v1 = vld [vmem:[%s654_s24 + $0x38] sm:$0xff]   ;;  %v604_v2 = vmov 0.0   ;;  %v558_v3 = vld [vmem:[%s654_s24 + $0x30] sm:$0xff]   ;;  %vm605_vm1 = vmmov 0   ;;  %v559_v4 = vld [vmem:[%s654_s24 + $0x28] sm:$0xff]   ;;  %s218_s27 = scalar_lea.vmem %s697_s0, %s645_s19  ;;  %vm245_vm2 = vcmask 1041409  }
  0x14   : > { %509 = vmatprep.subr.bf16.mxu0 %v604_v2  ;;  %525 = vmatprep.mubr.msk.bf16.mxu0 %vm605_vm1, %v604_v2  ;;  %v560_v5 = vld [vmem:[%s654_s24 + $0x20] sm:$0xff]   ;;  %v220_v6 = vld [vmem:[%s218_s27 + $0x8] sm:$0x1]  ;;  %v561_v7 = vld [vmem:[%s654_s24 + $0x18] sm:$0xff]   ;;  %vm338_vm3 = vcmask 254976   ;;  %p486_p5 = scmp.ne.s32.totalorder %s645_s19, 7 }
  0x15   : > { %510 = vmatpush3.bf16.msra.mxu0 %v557_v1  ;;  %v222_v8 = vpack.c.bf16 %v220_v6, %v220_v6  ;;  %v219_v9 = vld [vmem:[%s218_s27] sm:$0x1]  ;;  %v562_v10 = vld [vmem:[%s654_s24 + $0x10] sm:$0xff]   ;;  %v563_v13 = vld [vmem:[%s654_s24 + $0x8] sm:$0xff]  }
  0x16   : > { %511 = vmatprep.subr.bf16.mxu0 %v604_v2  ;;  %v221_v11 = vpack.c.bf16 %v219_v9, %v219_v9  ;;  %v564_v16 = vld [vmem:[%s654_s24] sm:$0xff]  }
  0x17   : > { %v243_v12 = vunpack.c.l.b16 %v222_v8 }
  0x18   : > { %v242_v14 = vunpack.c.l.b16 %v221_v11 }
  0x19   : > { %512 = vmatpush3.bf16.msra.mxu0 %v558_v3  ;;  %v244_v15 = vrot.slane %v243_v12, 7  ;;  %v223_v19 = vld [vmem:[#allocation2] sm:$0x3] }
  0x1a   : > { %513 = vmatprep.subr.bf16.mxu0 %v604_v2 }
  0x1b   : > { %v246_v17 = vsel %vm245_vm2, %v244_v15, %v242_v14 }
  0x1c   : > { %v247_v18 = vpack.c.b16 %v246_v17, %v246_v17 }
  0x1d   : > { %514 = vmatpush3.bf16.msra.mxu0 %v559_v4 }
  0x1e   : > { %515 = vmatprep.subr.bf16.mxu0 %v604_v2 }
  0x21   : > { %516 = vmatpush3.bf16.msra.mxu0 %v560_v5 }
  0x22   : > { %517 = vmatprep.subr.bf16.mxu0 %v604_v2 }
  0x25   : > { %518 = vmatpush3.bf16.msra.mxu0 %v561_v7 }
  0x26   : > { %519 = vmatprep.subr.bf16.mxu0 %v604_v2 }
  0x29   : > { %520 = vmatpush3.bf16.msra.mxu0 %v562_v10 }
  0x2a   : > { %521 = vmatprep.subr.bf16.mxu0 %v604_v2 }
  0x2d   : > { %522 = vmatpush3.bf16.msra.mxu0 %v563_v13 }
  0x2e   : > { %523 = vmatprep.subr.bf16.mxu0 %v604_v2 }
  0x31   : > { %524 = vmatpush3.bf16.msra.mxu0 %v564_v16 }
  0x34   : > { %526 = vmatmul.mubr.bf16.vlgmr.msra.gmra.mxu0 %v247_v18 }
  0xf4   : > { %v331_v20 = vpop.f32.mrf.mxu0 }
  0xf5   : > { %v337_v21 = vadd.f32 %v331_v20, %v223_v19 }
  0xf6   : > { %v527_v22 = vpop.f32.mrf.mxu0  ;;  %343 = sbr.rel (%p486_p5) target bundleno = 460 (0x1cc), region = 48 }
  0xf7   : > { %339 = vst.msk [vmem:[#allocation2] sm:$0x3] %vm338_vm3, %v337_v21 }
  0xf8   : > { %v334_v23 = vpop.f32.mrf.mxu0 }
  0xfa   : > { %v528_v24 = vpop.f32.mrf.mxu0 }
  0xfb   : > { %v565_v25 = vld [vmem:[%s700_s3 + $0x8] sm:$0xff]   ;;  %v606_v26 = vmov 0.0   ;;  %v566_v27 = vld [vmem:[%s700_s3] sm:$0xff]   ;;  %vm607_vm4 = vmmov 0   ;;  %vm378_vm5 = vcmask 261120   ;;  %vm422_vm6 = vcmask 25600  }
  0xfc   : > { %529 = vmatprep.subr.bf16.mxu0 %v606_v26  ;;  %533 = vmatprep.mubr.msk.bf16.mxu0 %vm607_vm4, %v606_v26  ;;  %v487_v29 = vld [vmem:[%s699_s2] ss:$0 sm:$0xff] }
  0xfd   : > { %530 = vmatpush3.bf16.msra.mxu0 %v565_v25  ;;  %v488_v33 = vld [vmem:[%s701_s4] ss:$0 sm:$0xff] }
  0xfe   : > { %v344_v28 = vld [vmem:[#allocation2] sm:$0x3]  ;;  %531 = vmatprep.subr.bf16.mxu0 %v606_v26 }
  0xff   : > { %v352_v30 = vadd.f32 %v487_v29, %v344_v28 }
 0x101   : > { %v353_v31 = vmax.f32 %v352_v30, 0.0  ;;  %532 = vmatpush3.bf16.msra.mxu0 %v566_v27 }
 0x103   : > { %v354_v32 = vpack.c.bf16 %v353_v31, %v353_v31 }
 0x105   : > { %534 = vmatmul.mubr.msk.bf16.vlgmr.msra.gmra.mxu0 %vm378_vm5, %v354_v32 }
 0x1c5   : > { %v416_v34 = vpop.f32.mrf.mxu0 }
 0x1c6   : > { %v417_v35 = vadd.f32 %v488_v33, %v416_v34 }
 0x1c7   : > { %v535_v36 = vpop.f32.mrf.mxu0 }
 0x1c8   : > { %423 = vst.msk [vmem:[#allocation3] sm:$0x3] %vm422_vm6, %v417_v35 }
 0x1c9   : > { %v419_v37 = vpop.f32.mrf.mxu0 }
 0x1cb   : > { %v536_v38 = vpop.f32.mrf.mxu0 }
 0x1cc PF: > { %p541_p6 = scmp.eq.s32.totalorder %s645_s19, 7  ;;  %s608_s11 = smov [#allocation3]  }
 0x1cd   : > { %s431_s12 = sshll.u32 %s608_s11, 4  ;;  %s432_s12 = int_to_ptr.vmem [resolvable:$true] %s431_s12 }
 0x1ce   : > { %s567_s13 = scalar_lea.vmem %s432_s12, 32  ;;  %p574_p10 = scmp.lt.s32.totalorder %s432_s12, %s432_s12 }
 0x1cf   : > { %p568_p7 = scmp.ne.s32.totalorder %s432_s12, %s567_s13  ;;  %p575_p11 = scmp.lt.s32.totalorder %s567_s13, %s567_s13 }
 0x1d1   : > { %p569_p8 = pnand %p568_p7, %p541_p6  ;;  %p576_p12 = por %p575_p11, %p574_p10 }
 0x1d3   : > { %p570_p9 = pneg %p569_p8 }
 0x1d5   : > { %p577_p13 = pnand %p576_p12, %p570_p9 }
 0x1d7   : > { %580 = shalt.err (!%p577_p13)
}
 0x1d8   : > { %538 = dma.vmem_to_hbm [thread:$0]  (%p541_p6), %s432_s12, 32, %s702_s5, [#allocation4]  }
 0x1d9   : > { %596 = dma.done.wait (%p541_p6), [#allocation4], 32  }
 0x1da   : > { %598 = vsyncadd (%p541_p6), [#allocation4], 4294967264 }
 0x1db PF: > { %s16_s18 = sadd.s32 1, %s601_s18  }
 0x1dc   : > { %p13_p0 = scmp.ge.s32.totalorder %s16_s18, 10  }
 0x1de   :  { %15 = sbr.rel (!%p13_p0) target bundleno = 1 (0x1), region = 76 }
 0x1e3   :  { %444 = vsyncpa [#allocation4], 1 }
 0x1e4   :  { %446 = vsyncpa [#allocation4 + $0x1], 1 }

// kernel: actor_ddpg_forward.2
= control target key start
LH: loop header
LB: loop body
LE: loop exit
PB: predicated region body
PF: predicated region fallthrough
CT: control target
= control target key end

     0   :  { %s10022_s24 = smov 0   ;;  %s16524_s0 = inlined_call_operand.vmem [shape: f32[2,16,16,4], index: 0, kind: input, shape index: {}]   ;;  %s16525_s1 = inlined_call_operand.vmem [shape: f32[36,8], index: 1, kind: input, shape index: {}]   ;;  %s16526_s2 = inlined_call_operand.vmem [shape: f32[1,8], index: 2, kind: input, shape index: {}]   ;;  %s16527_s3 = inlined_call_operand.vmem [shape: f32[72,8], index: 3, kind: input, shape index: {}]   ;;  %s16528_s4 = inlined_call_operand.vmem [shape: f32[1,8], index: 4, kind: input, shape index: {}]   ;;  %s16529_s5 = inlined_call_operand.vmem [shape: f32[8,72], index: 5, kind: input, shape index: {}]   ;;  %s16530_s6 = inlined_call_operand.vmem [shape: f32[8,1], index: 6, kind: input, shape index: {}]   ;;  %s16531_s7 = inlined_call_operand.vmem [shape: f32[2,8,128], index: 7, kind: output, shape index: {}]  }
   0x1 LB: > { %s9519_s25 = sadd.s32 4294967295, %s9964_s24   ;;  %p9523_p0 = scmp.ge.s32.totalorder %s9964_s24, 1  ;;  %s9964_s24 = sphi %s10022_s24, %s17_s24  }
   0x2   : > { %p237_p1 = scmp.lt.s32.totalorder %s9964_s24, 3 }
   0x4   : > { %p238_p2 = pnand %p9523_p0, %p237_p1 }
   0x6   : > { %241 = sbr.rel (%p238_p2) target bundleno = 1604 (0x644), region = 48 }
   0xb   : > { %p268_p3 = scmp.lt.s32.totalorder %s9519_s25, 1  ;;  %v341_v0 = vlaneseq  ;;  %v9966_v1 = vmov 1983009808   ;;  %vm813_vm0 = vcmask 1040384   ;;  %vm814_vm1 = vcmask 1042434   ;;  %s9967_s30 = smov 20  }
   0xc   : > { %v339_v2 = vunpack.c.l.s4 %v9966_v1  ;;  %vm816_vm2 = vcmask 1044484   ;;  %vm818_vm3 = vcmask 1046534   ;;  %vm10123_vm4 = vmor %vm813_vm0, %vm814_vm1  ;;  %s9968_s8 = smov 8   ;;  %s9969_s9 = smov 12   ;;  %vm4321_vm7 = vcmask 1043456  }
   0xd   : > { %s16949_s25 = smov (!%p268_p3, %s9519_s25), 1  ;;  %v342_v3 = vshrl.u32 %v341_v0, 7  ;;  %vm817_vm5 = vmor %vm10123_vm4, %vm816_vm2  ;;  %s9970_s10 = smov 24   ;;  %vm9976_vm8 = vmmov 0   ;;  %vm4025_vm9 = vcmask 31744   ;;  %vm4051_vm10 = vcmask 64512  }
   0xe   : > { %v340_v4 = vunpack.c.0.s8 %v339_v2  ;;  %s9657_s26 = sshll.u32 %s16949_s25, 8  ;;  %vm10175_vm6 = vmor %vm817_vm5, %vm818_vm3  ;;  %s9971_s11 = smov 4   ;;  %vm4077_vm11 = vcmask 97280   ;;  %vm4103_vm12 = vcmask 130048   ;;  %vm4129_vm13 = vcmask 162816  }
   0xf   : > { %s10036_s29 = scalar_lea.vmem %s16524_s0, %s9657_s26  ;;  %s9972_s12 = smov 32   ;;  %vm4155_vm14 = vcmask 195584   ;;  %vm4181_vm15 = vcmask 228352   ;;  %vm4207_vm0 = vcmask 261120   ;;  %vm4245_vm1 = vcmask 293888  }
  0x10   : > { %v10038_v5 = vsub.s32 %v340_v4, %v342_v3  ;;  %v280_v6 = vld [vmem:[%s10036_s29 + $0x18] sm:$0xff]  ;;  %v10042_v7 = vld [vmem:[%s10036_s29 + $0x20] sm:$0xff]  ;;  %v278_v8 = vld [vmem:[%s10036_s29 + $0x8] sm:$0xff]  ;;  %s9973_s13 = smov 16   ;;  %s9974_s14 = smov 28   ;;  %vm6894_vm2 = vcmask 326656  }
  0x11   : > { %v387_v9 = vcombine.high %v280_v6, %v280_v6  ;;  %v279_v12 = vld [vmem:[%s10036_s29 + $0x10] sm:$0xff]  ;;  %v354_v13 = vcombine.high %v278_v8, %v278_v8  ;;  %v277_v14 = vld [vmem:[%s10036_s29] sm:$0xff]  ;;  %v403_v55 = vcombine.high %v10042_v7, %v10042_v7  ;;  %s9980_s15 = smov 64   ;;  %vm6913_vm3 = vcmask 392192  }
  0x12   : > { %v10046_v10 = vrot.slane %v280_v6, %v10038_v5  ;;  %v10050_v11 = vrot.slane %v10042_v7, %v10038_v5  ;;  %v10055_v15 = vrot.slane %v278_v8, %v10038_v5  ;;  %v10058_v16 = vrot.slane %v279_v12, %v10038_v5 }
  0x13   : > { %v370_v17 = vcombine.high %v279_v12, %v279_v12  ;;  %v337_v18 = vcombine.high %v277_v14, %v277_v14  ;;  %v10061_v19 = vrot.slane %v387_v9, %v10038_v5  ;;  %v10072_v22 = vrot.slane %v354_v13, %v10038_v5  ;;  %v282_v12 = vld [vmem:[%s10036_s29 + $0x28] sm:$0xff] }
  0x14   : > { %v10065_v20 = vcombine.high %v10046_v10, %v10046_v10  ;;  %v10069_v21 = vcombine.high %v10050_v11, %v10050_v11  ;;  %v10076_v23 = vcombine.high %v10055_v15, %v10055_v15  ;;  %v10083_v25 = vcombine.high %v10058_v16, %v10058_v16 }
  0x15   : > { %v10079_v24 = vrot.slane %v370_v17, %v10038_v5  ;;  %v10086_v26 = vrot.slane %v277_v14, %v10038_v5  ;;  %v9550_v29 = vcombine.high %v10061_v19, %v10050_v11  ;;  %v9543_v30 = vcombine.high %v10072_v22, %v10058_v16 }
  0x16   : > { %v1295_v27 = vcombine.low %v10065_v20, %v10061_v19  ;;  %v1296_v28 = vcombine.low %v10050_v11, %v10069_v21  ;;  %v2193_v31 = vcombine.low %v10076_v23, %v10072_v22  ;;  %v2667_v33 = vcombine.low %v10058_v16, %v10083_v25 }
  0x17   : > { %v10100_v32 = vcombine.high %v10079_v24, %v10079_v24  ;;  %v2211_v34 = vcombine.low %v10046_v10, %v10065_v20  ;;  %v3400_v37 = vrot.slane %v9550_v29, %v10038_v5  ;;  %v2208_v38 = vrot.slane %v9543_v30, %v10038_v5 }
  0x18   : > { %v10107_v35 = vrot.slane %v1295_v27, %v10038_v5  ;;  %v10110_v36 = vrot.slane %v1296_v28, %v10038_v5  ;;  %v2201_v39 = vrot.slane %v2193_v31, %v10038_v5  ;;  %v2674_v41 = vrot.slane %v2667_v33, %v10038_v5 }
  0x19   : > { %v2210_v40 = vcombine.low %v10079_v24, %v10100_v32  ;;  %v10119_v42 = vrot.slane %v2211_v34, %v10038_v5  ;;  %v2676_v46 = vcombine.low %v10061_v19, %v10050_v11  ;;  %v1278_v47 = vcombine.low %v10083_v25, %v10079_v24 }
  0x1a   : > { %v3401_v44 = vcombine.low %v10107_v35, %v3400_v37  ;;  %v2209_v48 = vcombine.low %v2201_v39, %v2208_v38  ;;  %v1279_v50 = vcombine.low %v10100_v32, %v10046_v10  ;;  %v10140_v51 = vrot.slane %v337_v18, %v10038_v5 }
  0x1b   : > { %v10135_v49 = vrot.slane %v2210_v40, %v10038_v5  ;;  %v2683_v52 = vrot.slane %v2676_v46, %v10038_v5  ;;  %v1286_v53 = vrot.slane %v1278_v47, %v10038_v5  ;;  %v10147_v54 = vcombine.high %v10086_v26, %v10086_v26 }
  0x1c   : > { %3537 = vrot.lane.b32.xlu1 %v3401_v44, %s9967_s30  ;;  %2594 = vrot.lane.b32.xlu0 %v2209_v48, %s9968_s8  ;;  %v1293_v57 = vrot.slane %v1279_v50, %v10038_v5  ;;  %v10159_v58 = vcombine.high %v10140_v51, %v10140_v51  ;;  %v799_v59 = vcombine.high %v10072_v22, %v10072_v22  ;;  %v831_v63 = vrot.slane %v10055_v15, 7 }
  0x1d   : > { %v2675_v56 = vcombine.low %v2674_v41, %v10135_v49  ;;  %v2684_v60 = vcombine.low %v10119_v42, %v2683_v52  ;;  %v2176_v61 = vcombine.low %v10147_v54, %v10140_v51  ;;  %v10167_v62 = vrot.slane %v403_v55, %v10038_v5 }
  0x1e   : > { %v10170_v0 = vcombine.low %v1286_v53, %v1293_v57  ;;  %v2177_v1 = vcombine.low %v10159_v58, %v10055_v15  ;;  %v834_v3 = vrot.slane %v10076_v23, 7  ;;  %v837_v4 = vrot.slane %v10072_v22, 7 }
  0x1f   : > { %v2184_v6 = vrot.slane %v2176_v61, %v10038_v5  ;;  %v10185_v7 = vcombine.high %v10167_v62, %v10167_v62  ;;  %v833_v8 = vrot.slane %v831_v63, 2  ;;  %v840_v9 = vrot.slane %v799_v59, 7 }
  0x20   : > { %2827 = vrot.lane.b32.xlu1 %v2675_v56, %s9969_s9  ;;  %2829 = vrot.lane.b32.xlu0 %v2684_v60, %s9969_s9  ;;  %v2191_v13 = vrot.slane %v2177_v1, %v10038_v5  ;;  %v836_v14 = vrot.slane %v834_v3, 2  ;;  %v839_v17 = vrot.slane %v837_v4, 2  ;;  %v9528_v18 = vrot.slane %v10058_v16, 9 }
  0x21   : > { %v1312_v27 = vcombine.low %v10167_v62, %v10185_v7  ;;  %v835_v28 = vsel %vm10175_vm6, %v833_v8, %v834_v3  ;;  %v844_v29 = vrot.slane %v10083_v25, 7  ;;  %v420_v30 = vcombine.high %v282_v12, %v282_v12 }
  0x22   : > { %v2192_v31 = vcombine.low %v2184_v6, %v2191_v13  ;;  %v838_v33 = vsel %vm10175_vm6, %v836_v14, %v837_v4  ;;  %v841_v34 = vsel %vm10175_vm6, %v839_v17, %v840_v9  ;;  %v10203_v37 = vrot.slane %v282_v12, %v10038_v5 }
  0x23   : > { %v10208_v38 = vrot.slane %v1312_v27, %v10038_v5  ;;  %v845_v25 = vsel %vm10175_vm6, %v9528_v18, %v844_v29  ;;  %v1702_v39 = vcombine.low %v835_v28, %v838_v33  ;;  %v10213_v40 = vrot.slane %v420_v30, %v10038_v5 }
  0x24   : > { %3535 = vrot.lane.b32.xlu1 %v10170_v0, %s9967_s30  ;;  %2592 = vrot.lane.b32.xlu0 %v2192_v31, %s9968_s8  ;;  %v1703_v41 = vcombine.low %v841_v34, %v845_v25  ;;  %v2228_v43 = vcombine.low %v10069_v21, %v10167_v62  ;;  %v2244_v44 = vcombine.low %v10185_v7, %v10203_v37  ;;  %v853_v50 = vrot.slane %v10046_v10, 7 }
  0x25   : > { %v10222_v46 = vcombine.high %v10061_v19, %v10061_v19  ;;  %v3610_v47 = vcombine.low %v10110_v36, %v10208_v38  ;;  %v1710_v48 = vrot.slane %v1702_v39, %v10038_v5  ;;  %v856_v52 = vrot.slane %v10065_v20, 7 }
  0x26   : > { %v1717_v53 = vrot.slane %v1703_v41, %v10038_v5  ;;  %v10231_v55 = vrot.slane %v2228_v43, %v10038_v5  ;;  %v10234_v56 = vrot.slane %v2244_v44, %v10038_v5  ;;  %v859_v57 = vrot.slane %v10061_v19, 7 }
  0x27   : > { %v855_v59 = vrot.slane %v853_v50, 2  ;;  %v858_v60 = vrot.slane %v856_v52, 2  ;;  %v862_v61 = vrot.slane %v10222_v46, 7  ;;  %v9529_v10 = vrot.slane %v10050_v11, 9 }
  0x28   : > { %3674 = vrot.lane.b32.xlu1 %v3610_v47, %s9970_s10  ;;  %v1718_v20 = vcombine.low %v1710_v48, %v1717_v53  ;;  %v10242_v1 = vcombine.low %v10231_v55, %v10234_v56  ;;  %v861_v3 = vrot.slane %v859_v57, 2  ;;  %v866_v4 = vrot.slane %v10069_v21, 7 }
  0x29   : > { %v10247_v6 = vsel %vm10175_vm6, %v855_v59, %v856_v52  ;;  %v10251_v8 = vsel %vm10175_vm6, %v858_v60, %v859_v57  ;;  %v846_v9 = vrot.slane %v844_v29, 2  ;;  %v847_v12 = vrot.slane %v10079_v24, 7 }
  0x2a   : > { %2103 = vrot.lane.b32.xlu0 %v1718_v20, %s9971_s11  ;;  %v10257_v11 = vsel %vm10175_vm6, %v861_v3, %v862_v61  ;;  %v867_v21 = vsel %vm10175_vm6, %v9529_v10, %v866_v4  ;;  %v2919_v13 = vcombine.low %v10247_v6, %v10251_v8  ;;  %v850_v14 = vrot.slane %v10100_v32, 7 }
  0x2b   : > { %v2920_v24 = vcombine.low %v10257_v11, %v867_v21  ;;  %v848_v17 = vsel %vm10175_vm6, %v846_v9, %v847_v12  ;;  %v849_v18 = vrot.slane %v847_v12, 2  ;;  %v9527_v27 = vrot.slane %v10086_v26, 9  ;;  %v10297_v12 = vld [vmem:[%s10036_s29 + $0x30] sm:$0xff] }
  0x2c   : > { %3950 = vrot.lane.b32.xlu1 %v10242_v1, %s9972_s12  ;;  %v2927_v28 = vrot.slane %v2919_v13, %v10038_v5  ;;  %v852_v29 = vrot.slane %v850_v14, 2  ;;  %v2902_v30 = vcombine.low %v845_v25, %v848_v17  ;;  %v822_v31 = vrot.slane %v10147_v54, 7 }
  0x2d   : > { %v2934_v32 = vrot.slane %v2920_v24, %v10038_v5  ;;  %v851_v33 = vsel %vm10175_vm6, %v849_v18, %v850_v14  ;;  %v825_v34 = vrot.slane %v10140_v51, 7  ;;  %v828_v39 = vrot.slane %v10159_v58, 7 }
  0x2e   : > { %v854_v41 = vsel %vm10175_vm6, %v852_v29, %v853_v50  ;;  %v2910_v43 = vrot.slane %v2902_v30, %v10038_v5  ;;  %v823_v44 = vsel %vm10175_vm6, %v9527_v27, %v822_v31  ;;  %v824_v25 = vrot.slane %v822_v31, 2 }
  0x2f   : > { %v2935_v47 = vcombine.low %v2927_v28, %v2934_v32  ;;  %v2903_v48 = vcombine.low %v851_v33, %v854_v41  ;;  %v827_v52 = vrot.slane %v825_v34, 2  ;;  %v830_v53 = vrot.slane %v828_v39, 2 }
  0x30   : > { %v826_v57 = vsel %vm10175_vm6, %v824_v25, %v825_v34  ;;  %v868_v59 = vrot.slane %v866_v4, 2  ;;  %v869_v60 = vrot.slane %v10167_v62, 7  ;;  %v872_v61 = vrot.slane %v10185_v7, 7 }
  0x31   : > { %3320 = vrot.lane.b32.xlu0 %v2935_v47, %s9973_s13  ;;  %v2917_v50 = vrot.slane %v2903_v48, %v10038_v5  ;;  %v829_v10 = vsel %vm10175_vm6, %v827_v52, %v828_v39  ;;  %v832_v20 = vsel %vm10175_vm6, %v830_v53, %v831_v63  ;;  %v1685_v3 = vcombine.low %v823_v44, %v826_v57 }
  0x32   : > { %v1686_v9 = vcombine.low %v829_v10, %v832_v20  ;;  %v870_v62 = vsel %vm10175_vm6, %v868_v59, %v869_v60  ;;  %v871_v4 = vrot.slane %v869_v60, 2  ;;  %v874_v7 = vrot.slane %v872_v61, 2 }
  0x33   : > { %v2918_v13 = vcombine.low %v2910_v43, %v2917_v50  ;;  %v1693_v14 = vrot.slane %v1685_v3, %v10038_v5  ;;  %v875_v24 = vrot.slane %v10203_v37, 7  ;;  %v1737_v18 = vcombine.low %v867_v21, %v870_v62 }
  0x34   : > { %v1700_v27 = vrot.slane %v1686_v9, %v10038_v5  ;;  %v873_v63 = vsel %vm10175_vm6, %v871_v4, %v872_v61  ;;  %v1719_v28 = vcombine.low %v848_v17, %v851_v33  ;;  %v1720_v29 = vcombine.low %v854_v41, %v10247_v6 }
  0x35   : > { %3318 = vrot.lane.b32.xlu1 %v2918_v13, %s9973_s13  ;;  %v876_v30 = vsel %vm10175_vm6, %v874_v7, %v875_v24  ;;  %v10309_v31 = vrot.slane %v1737_v18, %v10038_v5  ;;  %v435_v32 = vcombine.high %v10203_v37, %v10203_v37  ;;  %v10315_v21 = vrot.slane %v10297_v12, %v10038_v5 }
  0x36   : > { %v1701_v34 = vcombine.low %v1693_v14, %v1700_v27  ;;  %v1753_v39 = vcombine.low %v873_v63, %v876_v30  ;;  %v1727_v17 = vrot.slane %v1719_v28, %v10038_v5  ;;  %v1734_v6 = vrot.slane %v1720_v29, %v10038_v5 }
  0x37   : > { %v1313_v33 = vcombine.low %v10203_v37, %v435_v32  ;;  %v1329_v41 = vcombine.low %v10213_v40, %v10315_v21  ;;  %v2226_v43 = vcombine.low %v10135_v49, %v10119_v42  ;;  %v10326_v44 = vcombine.high %v10315_v21, %v10315_v21 }
  0x38   : > { %2101 = vrot.lane.b32.xlu0 %v1701_v34, %s9971_s11  ;;  %v10330_v25 = vrot.slane %v1753_v39, %v10038_v5  ;;  %v1735_v47 = vcombine.low %v1727_v17, %v1734_v6  ;;  %v10334_v48 = vcombine.high %v10213_v40, %v10213_v40  ;;  %v877_v37 = vrot.slane %v875_v24, 2  ;;  %v284_v17 = vld [vmem:[%s10036_s29 + $0x38] sm:$0xff] }
  0x39   : > { %v1327_v52 = vrot.slane %v1313_v33, %v10038_v5  ;;  %v10338_v53 = vrot.slane %v1329_v41, %v10038_v5  ;;  %v878_v42 = vrot.slane %v435_v32, 7  ;;  %v881_v49 = vrot.slane %v10213_v40, 7 }
  0x3a   : > { %v3749_v57 = vcombine.low %v10309_v31, %v10330_v25  ;;  %v884_v59 = vrot.slane %v10334_v48, 7  ;;  %v9530_v60 = vrot.slane %v10315_v21, 9  ;;  %v888_v61 = vrot.slane %v10326_v44, 7 }
  0x3b   : > { %v3611_v50 = vcombine.low %v1327_v52, %v10338_v53  ;;  %v879_v10 = vsel %vm10175_vm6, %v877_v37, %v878_v42  ;;  %v880_v20 = vrot.slane %v878_v42, 2  ;;  %v883_v3 = vrot.slane %v881_v49, 2 }
  0x3c   : > { %3829 = vrot.lane.b32.xlu1 %v3749_v57, %s9974_s14  ;;  %2105 = vrot.lane.b32.xlu0 %v1735_v47, %s9971_s11  ;;  %v10353_v9 = vsel %vm10175_vm6, %v9530_v60, %v888_v61  ;;  %v2245_v4 = vcombine.low %v435_v32, %v10213_v40  ;;  %v9544_v7 = vcombine.high %v10213_v40, %v10315_v21  ;;  %v890_v47 = vrot.slane %v888_v61, 2 }
  0x3d   : > { %v10360_v13 = vsel %vm10175_vm6, %v880_v20, %v881_v49  ;;  %v10364_v14 = vsel %vm10175_vm6, %v883_v3, %v884_v59  ;;  %v2936_v24 = vcombine.low %v870_v62, %v873_v63  ;;  %v2937_v18 = vcombine.low %v876_v30, %v879_v10 }
  0x3e   : > { %v1754_v27 = vcombine.low %v879_v10, %v10360_v13  ;;  %v1770_v28 = vcombine.low %v10364_v14, %v10353_v9  ;;  %v10370_v29 = vrot.slane %v2245_v4, %v10038_v5  ;;  %v10373_v32 = vrot.slane %v9544_v7, %v10038_v5 }
  0x3f   : > { %v2944_v34 = vrot.slane %v2936_v24, %v10038_v5  ;;  %v2951_v39 = vrot.slane %v2937_v18, %v10038_v5  ;;  %v1736_v30 = vcombine.low %v10251_v8, %v10257_v11  ;;  %v436_v6 = vcombine.high %v10297_v12, %v10297_v12 }
  0x40   : > { %3676 = vrot.lane.b32.xlu1 %v3611_v50, %s9970_s10  ;;  %2596 = vrot.lane.b32.xlu0 %v2226_v43, %s9968_s8  ;;  %v10381_v62 = vrot.slane %v1754_v27, %v10038_v5  ;;  %v10384_v63 = vrot.slane %v1770_v28, %v10038_v5  ;;  %v460_v41 = vrot.slane %v284_v17, %v10038_v5  ;;  %vm6932_vm4 = vcmask 457728  }
  0x41   : > { %v3904_v43 = vcombine.low %v10370_v29, %v10373_v32  ;;  %v2952_v37 = vcombine.low %v2944_v34, %v2951_v39  ;;  %v450_v42 = vrot.slane %v436_v6, %v10038_v5  ;;  %v2227_v49 = vcombine.low %v10061_v19, %v10222_v46 }
  0x42   : > { %v3750_v33 = vcombine.low %v10381_v62, %v10384_v63  ;;  %v1744_v8 = vrot.slane %v1736_v30, %v10038_v5  ;;  %v453_v11 = vcombine.high %v284_v17, %v284_v17  ;;  %v10402_v12 = vcombine.high %v460_v41, %v460_v41 }
  0x43   : > { %v897_v57 = vrot.slane %v460_v41, 7  ;;  %v452_v59 = vcombine.high %v450_v42, %v450_v42  ;;  %v1330_v60 = vcombine.low %v10326_v44, %v450_v42  ;;  %v891_v61 = vrot.slane %v450_v42, 7 }
  0x44   : > { %3831 = vrot.lane.b32.xlu1 %v3750_v33, %s9974_s14  ;;  %2831 = vrot.lane.b32.xlu0 %v10242_v1, %s9969_s9  ;;  %v2686_v50 = vcombine.low %v10315_v21, %v10326_v44  ;;  %v900_v19 = vrot.slane %v10402_v12, 7  ;;  %v10409_v46 = vcombine.low %v10208_v38, %v1327_v52  ;;  %v2235_v20 = vrot.slane %v2227_v49, %v10038_v5  ;;  %v285_v33 = vld [vmem:[%s10036_s29 + $0x40] sm:$0xff] }
  0x45   : > { %v899_v10 = vrot.slane %v897_v57, 2  ;;  %v1346_v1 = vcombine.low %v452_v59, %v460_v41  ;;  %v893_v3 = vrot.slane %v891_v61, 2  ;;  %v1752_v4 = vcombine.low %v1744_v8, %v10309_v31 }
  0x46   : > { %v10416_v7 = vrot.slane %v1330_v60, %v10038_v5  ;;  %v892_v21 = vsel %vm10175_vm6, %v890_v47, %v891_v61  ;;  %v894_v44 = vrot.slane %v452_v59, 7  ;;  %v10421_v38 = vrot.slane %v453_v11, %v10038_v5 }
  0x47   : > { %v10424_v52 = vrot.slane %v1346_v1, %v10038_v5  ;;  %v2693_v24 = vrot.slane %v2686_v50, %v10038_v5  ;;  %v2953_v18 = vcombine.low %v10360_v13, %v10364_v14  ;;  %v10435_v28 = vsel %vm10175_vm6, %v899_v10, %v900_v19 }
  0x48   : > { %3952 = vrot.lane.b32.xlu1 %v3904_v43, %s9972_s12  ;;  %3322 = vrot.lane.b32.xlu0 %v2952_v37, %s9973_s13  ;;  %v10431_v31 = vsel %vm10175_vm6, %v893_v3, %v894_v44  ;;  %v896_v27 = vrot.slane %v894_v44, 2  ;;  %v2262_v34 = vcombine.low %v450_v42, %v452_v59  ;;  %v2243_v39 = vcombine.low %v2235_v20, %v10231_v55 }
  0x49   : > { %v1771_v17 = vcombine.low %v892_v21, %v10431_v31  ;;  %v2278_v30 = vcombine.low %v460_v41, %v10402_v12  ;;  %v2954_v6 = vcombine.low %v10353_v9, %v892_v21  ;;  %v3612_v13 = vcombine.low %v10416_v7, %v10424_v52 }
  0x4a   : > { %v10449_v14 = vsel %vm10175_vm6, %v896_v27, %v897_v57  ;;  %v469_v55 = vcombine.high %v285_v33, %v285_v33  ;;  %v2961_v41 = vrot.slane %v2953_v18, %v10038_v5  ;;  %v10458_v43 = vrot.slane %v2262_v34, %v10038_v5 }
  0x4b   : > { %v10452_v47 = vrot.slane %v1771_v17, %v10038_v5  ;;  %v1787_v9 = vcombine.low %v10449_v14, %v10435_v28  ;;  %v3402_v37 = vcombine.low %v10213_v40, %v10334_v48  ;;  %v10463_v42 = vrot.slane %v285_v33, %v10038_v5 }
  0x4c   : > { %3539 = vrot.lane.b32.xlu1 %v10409_v46, %s9967_s30  ;;  %2107 = vrot.lane.b32.xlu0 %v1752_v4, %s9971_s11  ;;  %v10466_v49 = vrot.slane %v469_v55, %v10038_v5  ;;  %v10472_v11 = vrot.slane %v2278_v30, %v10038_v5  ;;  %v802_v57 = vcombine.high %v10421_v38, %v10421_v38  ;;  %v903_v59 = vrot.slane %v10421_v38, 7 }
  0x4d   : > { %v10469_v8 = vrot.slane %v1787_v9, %v10038_v5  ;;  %v2694_v40 = vcombine.low %v10370_v29, %v2693_v24  ;;  %v2968_v48 = vrot.slane %v2954_v6, %v10038_v5  ;;  %v484_v60 = vcombine.high %v10463_v42, %v10463_v42 }
  0x4e   : > { %v902_v61 = vrot.slane %v900_v19, 2  ;;  %v905_v10 = vrot.slane %v903_v59, 2  ;;  %v906_v1 = vrot.slane %v802_v57, 7  ;;  %v9531_v20 = vrot.slane %v10463_v42, 9 }
  0x4f   : > { %v3751_v50 = vcombine.low %v10452_v47, %v10469_v8  ;;  %v910_v3 = vrot.slane %v484_v60, 7  ;;  %v913_v4 = vrot.slane %v10466_v49, 7  ;;  %v2695_v21 = vcombine.low %v10458_v43, %v10472_v11 }
  0x50   : > { %3678 = vrot.lane.b32.xlu1 %v3612_v13, %s9970_s10  ;;  %2598 = vrot.lane.b32.xlu0 %v2243_v39, %s9968_s8  ;;  %v3409_v44 = vrot.slane %v3402_v37, %v10038_v5  ;;  %v1347_v24 = vcombine.low %v10402_v12, %v10421_v38  ;;  %v1363_v19 = vcombine.low %v10463_v42, %v484_v60  ;;  %v286_v12 = vld [vmem:[%s10036_s29 + $0x48] sm:$0xff]  ;;  %vm6951_vm5 = vcmask 523264  }
  0x51   : > { %v2969_v18 = vcombine.low %v2961_v41, %v2968_v48  ;;  %v904_v27 = vsel %vm10175_vm6, %v902_v61, %v903_v59  ;;  %v10499_v34 = vsel %vm10175_vm6, %v905_v10, %v906_v1  ;;  %v912_v39 = vrot.slane %v910_v3, 2 }
  0x52   : > { %v10503_v17 = vsel %vm10175_vm6, %v9531_v20, %v910_v3  ;;  %v1769_v30 = vcombine.low %v10330_v25, %v10381_v62  ;;  %v3410_v33 = vcombine.low %v3409_v44, %v10416_v7  ;;  %v1361_v13 = vrot.slane %v1347_v24, %v10038_v5 }
  0x53   : > { %v10510_v6 = vsel %vm10175_vm6, %v912_v39, %v913_v4  ;;  %v10515_v55 = vrot.slane %v1363_v19, %v10038_v5  ;;  %v1788_v9 = vcombine.low %v904_v27, %v10499_v34  ;;  %v10524_v62 = vcombine.high %v10466_v49, %v10466_v49 }
  0x54   : > { %3833 = vrot.lane.b32.xlu1 %v3751_v50, %s9974_s14  ;;  %2833 = vrot.lane.b32.xlu0 %v2694_v40, %s9969_s9  ;;  %v1804_v25 = vcombine.low %v10503_v17, %v10510_v6  ;;  %v10527_v41 = vrot.slane %v286_v12, %v10038_v5  ;;  %v486_v37 = vcombine.high %v286_v12, %v286_v12  ;;  %v915_v19 = vrot.slane %v913_v4, 2 }
  0x55   : > { %16663 = vst [vmem:[#allocation2_spill] sm:$0xff] %v10515_v55  ;;  %v2260_v59 = vcombine.low %v10234_v56, %v10370_v29  ;;  %v2279_v48 = vcombine.low %v10421_v38, %v802_v57  ;;  %v2295_v61 = vcombine.low %v484_v60, %v10466_v49  ;;  %v2970_v50 = vcombine.low %v10431_v31, %v10449_v14 }
  0x56   : > { %v10533_v40 = vcombine.high %v10527_v41, %v10527_v41  ;;  %v2971_v10 = vcombine.low %v10435_v28, %v904_v27  ;;  %v3613_v1 = vcombine.low %v1361_v13, %v10515_v55  ;;  %v10544_v56 = vrot.slane %v1788_v9, %v10038_v5 }
  0x57   : > { %v10547_v29 = vrot.slane %v1804_v25, %v10038_v5  ;;  %v916_v57 = vrot.slane %v10524_v62, 7  ;;  %v10551_v60 = vrot.slane %v486_v37, %v10038_v5  ;;  %v919_v31 = vrot.slane %v10527_v41, 7 }
  0x58   : > { %3954 = vrot.lane.b32.xlu1 %v2695_v21, %s9972_s12  ;;  %3324 = vrot.lane.b32.xlu0 %v2969_v18, %s9973_s13  ;;  %v922_v28 = vrot.slane %v10533_v40, 7  ;;  %v10556_v14 = vrot.slane %v2279_v48, %v10038_v5  ;;  %v10559_v20 = vrot.slane %v2295_v61, %v10038_v5  ;;  %v2978_v3 = vrot.slane %v2970_v50, %v10038_v5 }
  0x59   : > { %v3752_v44 = vcombine.low %v10544_v56, %v10547_v29  ;;  %v2985_v24 = vrot.slane %v2971_v10, %v10038_v5  ;;  %v918_v18 = vrot.slane %v916_v57, 2  ;;  %v921_v27 = vrot.slane %v919_v31, 2 }
  0x5a   : > { %v924_v39 = vrot.slane %v922_v28, 2  ;;  %v925_v12 = vrot.slane %v10551_v60, 7  ;;  %v1364_v9 = vcombine.low %v10466_v49, %v10524_v62  ;;  %v1380_v25 = vcombine.low %v10527_v41, %v10533_v40 }
  0x5b   : > { %v2986_v4 = vcombine.low %v2978_v3, %v2985_v24  ;;  %v917_v37 = vsel %vm10175_vm6, %v915_v19, %v916_v57  ;;  %v10585_v48 = vsel %vm10175_vm6, %v921_v27, %v922_v28  ;;  %v10597_v10 = vcombine.low %v10424_v52, %v1361_v13 }
  0x5c   : > { %3541 = vrot.lane.b32.xlu1 %v3410_v33, %s9967_s30  ;;  %2109 = vrot.lane.b32.xlu0 %v1769_v30, %s9971_s11  ;;  %v287_v30 = vld [vmem:[%s10036_s29 + $0x50] sm:$0xff]  ;;  %v3905_v33 = vcombine.low %v10556_v14, %v10559_v20  ;;  %v10589_v49 = vsel %vm10175_vm6, %v924_v39, %v925_v12  ;;  %v10603_v57 = vrot.slane %v1380_v25, %v10038_v5 }
  0x5d   : > { %v502_v61 = vcombine.high %v287_v30, %v287_v30  ;;  %v10592_v50 = vrot.slane %v287_v30, %v10038_v5  ;;  %16664 = vst [vmem:[#allocation3_spill] sm:$0xff] %v10597_v10  ;;  %v1821_v3 = vcombine.low %v10585_v48, %v10589_v49  ;;  %v2312_v19 = vcombine.low %v10533_v40, %v10551_v60 }
  0x5e   : > { %16666 = vst [vmem:[#allocation5_spill] sm:$0xff] %v10603_v57  ;;  %v2988_v27 = vcombine.low %v10510_v6, %v917_v37 }
  0x5f   : > { %v10613_v52 = vrot.slane %v502_v61, %v10038_v5  ;;  %v10617_v13 = vcombine.high %v10592_v50, %v10592_v50  ;;  %v10655_v39 = vrot.slane %v2312_v19, %v10038_v5  ;;  %v9532_v61 = vrot.slane %v10592_v50, 9 }
  0x60   : > { %3680 = vrot.lane.b32.xlu1 %v3613_v1, %s9970_s10  ;;  %2600 = vrot.lane.b32.xlu0 %v2260_v59, %s9968_s8  ;;  %v10581_v59 = vsel %vm10175_vm6, %v918_v18, %v919_v31  ;;  %v10600_v1 = vrot.slane %v1364_v9, %v10038_v5  ;;  %v1786_v31 = vcombine.low %v10384_v63, %v10452_v47 }
  0x61   : > { %v1805_v28 = vcombine.low %v917_v37, %v10581_v59  ;;  %v2296_v63 = vcombine.low %v10524_v62, %v10527_v41  ;;  %v2987_v18 = vcombine.low %v10499_v34, %v10503_v17  ;;  %v10642_v62 = vcombine.high %v10551_v60, %v10551_v60 }
  0x62   : > { %16665 = vst [vmem:[#allocation4_spill] sm:$0xff] %v10600_v1  ;;  %v3614_v47 = vcombine.low %v10600_v1, %v10603_v57  ;;  %v10646_v34 = vcombine.high %v10613_v52, %v10613_v52  ;;  %v932_v17 = vrot.slane %v10617_v13, 7  ;;  %v935_v6 = vrot.slane %v10613_v52, 7 }
  0x63   : > { %v10652_v40 = vrot.slane %v2296_v63, %v10038_v5  ;;  %v2995_v30 = vrot.slane %v2987_v18, %v10038_v5  ;;  %v9551_v9 = vcombine.high %v10421_v38, %v10463_v42  ;;  %v928_v37 = vrot.slane %v10642_v62, 7 }
  0x64   : > { %3835 = vrot.lane.b32.xlu1 %v3752_v44, %s9974_s14  ;;  %2835 = vrot.lane.b32.xlu0 %v2695_v21, %s9969_s9  ;;  %v2696_v21 = vcombine.low %v10421_v38, %v10463_v42  ;;  %v2277_v44 = vcombine.low %v10373_v32, %v10458_v43  ;;  %v10635_v32 = vrot.slane %v1805_v28, %v10038_v5  ;;  %v938_v28 = vrot.slane %v10646_v34, 7 }
  0x65   : > { %v10638_v43 = vrot.slane %v1821_v3, %v10038_v5  ;;  %v288_v3 = vld [vmem:[%s10036_s29 + $0x58] sm:$0xff]  ;;  %v2705_v38 = vcombine.low %v10652_v40, %v10655_v39 }
  0x66   : > { %v2703_v24 = vrot.slane %v2696_v21, %v10038_v5  ;;  %v934_v21 = vrot.slane %v932_v17, 2 }
  0x67   : > { %v3753_v25 = vcombine.low %v10635_v32, %v10638_v43 }
  0x68   : > { %3956 = vrot.lane.b32.xlu1 %v3905_v33, %s9972_s12  ;;  %3326 = vrot.lane.b32.xlu0 %v2986_v4, %s9973_s13  ;;  %v2704_v41 = vcombine.low %v2703_v24, %v10559_v20  ;;  %v3002_v33 = vrot.slane %v2988_v27, %v10038_v5  ;;  %v927_v4 = vrot.slane %v925_v12, 2  ;;  %v3418_v24 = vrot.slane %v9551_v9, %v10038_v5 }
  0x69   : > { %v1397_v12 = vcombine.low %v10617_v13, %v10613_v52  ;;  %v10686_v19 = vsel %vm10175_vm6, %v934_v21, %v935_v6  ;;  %v519_v27 = vcombine.high %v288_v3, %v288_v3  ;;  %v3004_v21 = vcombine.low %v10581_v59, %v10585_v48 }
  0x6a   : > { %v3003_v42 = vcombine.low %v2995_v30, %v3002_v33  ;;  %v929_v63 = vsel %vm10175_vm6, %v927_v4, %v928_v37  ;;  %v3419_v30 = vcombine.low %v3418_v24, %v10600_v1  ;;  %v1803_v33 = vcombine.low %v10469_v8, %v10544_v56  ;;  %v289_v24 = vld [vmem:[%s10036_s29 + $0x60] sm:$0xff] }
  0x6b   : > { %v10710_v4 = vrot.slane %v519_v27, %v10038_v5  ;;  %v2294_v56 = vcombine.low %v10472_v11, %v10556_v14  ;;  %v9545_v37 = vcombine.high %v10551_v60, %v10592_v50 }
  0x6c   : > { %3543 = vrot.lane.b32.xlu1 %v10597_v10, %s9967_s30  ;;  %2111 = vrot.lane.b32.xlu0 %v1786_v31, %s9971_s11  ;;  %v937_v31 = vrot.slane %v935_v6, 2  ;;  %v10704_v6 = vrot.slane %v1397_v12, %v10038_v5 }
  0x6d   : > { %v10738_v59 = vcombine.high %v10710_v4, %v10710_v4 }
  0x6e   : > { %v10690_v18 = vsel %vm10175_vm6, %v937_v31, %v938_v28  ;;  %v3005_v31 = vcombine.low %v10589_v49, %v929_v63  ;;  %v947_v49 = vrot.slane %v10710_v4, 7 }
  0x70   : > { %3682 = vrot.lane.b32.xlu1 %v3614_v47, %s9970_s10  ;;  %2602 = vrot.lane.b32.xlu0 %v2277_v44, %s9968_s8  ;;  %v1381_v44 = vcombine.low %v10551_v60, %v10592_v50  ;;  %v10682_v47 = vsel %vm10175_vm6, %v9532_v61, %v932_v17  ;;  %v2329_v61 = vcombine.low %v10613_v52, %v10646_v34 }
  0x71   : > { %v1822_v9 = vcombine.low %v929_v63, %v10682_v47  ;;  %v3012_v63 = vrot.slane %v3004_v21, %v10038_v5  ;;  %v3019_v27 = vrot.slane %v3005_v31, %v10038_v5 }
  0x72   : > { %v10699_v17 = vrot.slane %v1381_v44, %v10038_v5  ;;  %v10746_v44 = vrot.slane %v9545_v37, %v10038_v5  ;;  %v10749_v12 = vrot.slane %v2329_v61, %v10038_v5  ;;  %v535_v37 = vcombine.high %v289_v24, %v289_v24 }
  0x73   : > { %v10730_v11 = vrot.slane %v1822_v9, %v10038_v5  ;;  %v949_v9 = vrot.slane %v947_v49, 2  ;;  %v3020_v31 = vcombine.low %v3012_v63, %v3019_v27 }
  0x74   : > { %3837 = vrot.lane.b32.xlu1 %v3753_v25, %s9974_s14  ;;  %2837 = vrot.lane.b32.xlu0 %v2704_v41, %s9969_s9  ;;  %v10693_v41 = vrot.slane %v288_v3, %v10038_v5  ;;  %16667 = vst [vmem:[#allocation6_spill] sm:$0xff] %v10699_v17  ;;  %v1838_v25 = vcombine.low %v10686_v19, %v10690_v18 }
  0x75   : > { %v3615_v3 = vcombine.low %v10699_v17, %v10704_v6  ;;  %v3906_v21 = vcombine.low %v10746_v44, %v10749_v12 }
  0x76   : > { %v10714_v8 = vcombine.high %v10693_v41, %v10693_v41  ;;  %v10733_v14 = vrot.slane %v1838_v25, %v10038_v5  ;;  %v941_v52 = vrot.slane %v10693_v41, 7  ;;  %v950_v25 = vrot.slane %v10738_v59, 7 }
  0x78   : > { %3958 = vrot.lane.b32.xlu1 %v2705_v38, %s9972_s12  ;;  %3328 = vrot.lane.b32.xlu0 %v3003_v42, %s9973_s13  ;;  %v944_v48 = vrot.slane %v10714_v8, 7  ;;  %v3420_v42 = vcombine.low %v10551_v60, %v10642_v62  ;;  %v943_v60 = vrot.slane %v941_v52, 2  ;;  %v10784_v27 = vsel %vm10175_vm6, %v949_v9, %v950_v25 }
  0x79   : > { %v2311_v25 = vcombine.low %v10559_v20, %v10652_v40  ;;  %v4234_v40 = vld [vmem:[%s16525_s1 + $0x8] sm:$0xff] }
  0x7a   : > { %v946_v62 = vrot.slane %v944_v48, 2  ;;  %v3427_v61 = vrot.slane %v3420_v42, %v10038_v5  ;;  %v10776_v63 = vsel %vm10175_vm6, %v943_v60, %v944_v48  ;;  %v2706_v48 = vcombine.low %v10592_v50, %v10617_v13 }
  0x7c   : > { %3545 = vrot.lane.b32.xlu1 %v3419_v30, %s9967_s30  ;;  %2113 = vrot.lane.b32.xlu0 %v1803_v33, %s9971_s11  ;;  %v3754_v30 = vcombine.low %v10730_v11, %v10733_v14  ;;  %v940_v33 = vrot.slane %v938_v28, 2  ;;  %v4237_v28 = vld [vmem:[%s16525_s1 + $0x20] sm:$0xf] }
  0x7e   : > { %v10772_v42 = vsel %vm10175_vm6, %v940_v33, %v941_v52  ;;  %v16533_v52 = vmov 0.0   ;;  %v3428_v33 = vcombine.low %v10603_v57, %v3427_v61  ;;  %v3021_v61 = vcombine.low %v10682_v47, %v10686_v19 }
  0x7f   : > { %9729 = vmatprep.subr.mxu0 %v16533_v52  ;;  %9888 = vmatprep.subr.mxu1 %v16533_v52  ;;  %v1839_v13 = vcombine.low %v10772_v42, %v10776_v63  ;;  %v3022_v20 = vcombine.low %v10690_v18, %v10772_v42 }
  0x80   : > { %3684 = vrot.lane.b32.xlu1 %v3615_v3, %s9970_s10  ;;  %2604 = vrot.lane.b32.xlu0 %v2294_v56, %s9968_s8  ;;  %v1398_v3 = vcombine.low %v10646_v34, %v10693_v41  ;;  %v1414_v56 = vcombine.low %v10714_v8, %v10710_v4  ;;  %v10780_v34 = vsel %vm10175_vm6, %v946_v62, %v947_v49  ;;  %v4236_v49 = vld [vmem:[%s16525_s1 + $0x18] sm:$0xff] }
  0x81   : > { %9730 = vmatpush3.msk.msra.mxu0 %vm4321_vm7, %v4237_v28  ;;  %9893 = vmatpush3.msk.msra.mxu1 %vm4321_vm7, %v4237_v28  ;;  %v10852_v19 = vrot.slane %v1839_v13, %v10038_v5  ;;  %vm6986_vm7 = vcmask 588800  }
  0x82   : > { %v10803_v60 = vrot.slane %v1398_v3, %v10038_v5  ;;  %9731 = vmatprep.subr.mxu0 %v16533_v52  ;;  %v10809_v50 = vrot.slane %v1414_v56, %v10038_v5  ;;  %9889 = vmatprep.subr.mxu1 %v16533_v52  ;;  %v2346_v3 = vcombine.low %v10710_v4, %v10738_v59 }
  0x83   : > { %9732 = vmatpush3.msra.mxu0 %v4236_v49  ;;  %9739 = vmatprep.mubr.msk.f32.mxu0 %vm9976_vm8, %v16533_v52 }
  0x84   : > { %3839 = vrot.lane.b32.xlu1 %v3754_v30, %s9974_s14  ;;  %2839 = vrot.lane.b32.xlu0 %v2705_v38, %s9969_s9  ;;  %v10787_v30 = vrot.slane %v289_v24, %v10038_v5  ;;  %v10790_v38 = vrot.slane %v535_v37, %v10038_v5  ;;  %v1820_v24 = vcombine.low %v10547_v29, %v10635_v32  ;;  %v4235_v32 = vld [vmem:[%s16525_s1 + $0x10] sm:$0xff] }
  0x85   : > { %v1855_v29 = vcombine.low %v10780_v34, %v10784_v27  ;;  %v2713_v37 = vrot.slane %v2706_v48, %v10038_v5  ;;  %9733 = vmatprep.subr.mxu0 %v16533_v52  ;;  %9894 = vmatpush3.msra.mxu1 %v4236_v49  ;;  %v3616_v47 = vcombine.low %v10803_v60, %v10809_v50  ;;  %v4233_v48 = vld [vmem:[%s16525_s1] sm:$0xff] }
  0x86   : > { %v10820_v62 = vcombine.high %v10787_v30, %v10787_v30  ;;  %v10824_v9 = vcombine.high %v10790_v38, %v10790_v38  ;;  %9734 = vmatpush3.msra.mxu0 %v4235_v32  ;;  %v957_v56 = vrot.slane %v10790_v38, 7  ;;  %9890 = vmatprep.subr.mxu1 %v16533_v52 }
  0x87   : > { %9735 = vmatprep.subr.mxu0 %v16533_v52  ;;  %9895 = vmatpush3.msra.mxu1 %v4235_v32  ;;  %v2714_v49 = vcombine.low %v2713_v37, %v10749_v12  ;;  %v3036_v32 = vrot.slane %v3022_v20, %v10038_v5  ;;  %v9533_v37 = vrot.slane %v10787_v30, 9 }
  0x88   : > { %3960 = vrot.lane.b32.xlu1 %v3906_v21, %s9972_s12  ;;  %3330 = vrot.lane.b32.xlu0 %v3020_v31, %s9973_s13  ;;  %v10833_v21 = vld [vmem:[%s10036_s29 + $0x68] sm:$0xff]  ;;  %v2330_v31 = vcombine.low %v10693_v41, %v10714_v8  ;;  %v10855_v41 = vrot.slane %v1855_v29, %v10038_v5  ;;  %v954_v59 = vrot.slane %v10820_v62, 7  ;;  %v960_v28 = vrot.slane %v10824_v9, 7 }
  0x89   : > { %v10861_v8 = vrot.slane %v10833_v21, %v10038_v5  ;;  %9736 = vmatpush3.msra.mxu0 %v4234_v40  ;;  %v3029_v29 = vrot.slane %v3021_v61, %v10038_v5  ;;  %v1415_v61 = vcombine.low %v10787_v30, %v10820_v62  ;;  %v1431_v20 = vcombine.low %v10790_v38, %v10824_v9 }
  0x8a   : > { %9737 = vmatprep.subr.mxu0 %v16533_v52  ;;  %v3755_v13 = vcombine.low %v10852_v19, %v10855_v41  ;;  %v956_v45 = vrot.slane %v954_v59, 2  ;;  %v962_v57 = vrot.slane %v960_v28, 2  ;;  %v552_v55 = vcombine.high %v10833_v21, %v10833_v21 }
  0x8b   : > { %9738 = vmatpush3.msra.mxu0 %v4233_v48  ;;  %v3037_v17 = vcombine.low %v3029_v29, %v3036_v32  ;;  %v955_v1 = vsel %vm10175_vm6, %v9533_v37, %v954_v59  ;;  %v2715_v59 = vcombine.low %v10710_v4, %v10787_v30  ;;  %v10926_v29 = vld [vmem:[%s10036_s29 + $0x70] sm:$0xff]  ;;  %v2363_v37 = vcombine.low %v10824_v9, %v10861_v8 }
  0x8c   : > { %3547 = vrot.lane.b32.xlu1 %v3428_v33, %s9967_s30  ;;  %2115 = vrot.lane.b32.xlu0 %v1820_v24, %s9971_s11  ;;  %v10875_v33 = vrot.slane %v2330_v31, %v10038_v5  ;;  %v10878_v24 = vrot.slane %v2346_v3, %v10038_v5  ;;  %v959_v3 = vrot.slane %v957_v56, 2  ;;  %v10908_v10 = vsel %vm10175_vm6, %v956_v45, %v957_v56 }
  0x8d   : > { %v10932_v45 = vcombine.low %v10704_v6, %v10803_v60  ;;  %v10937_v56 = vrot.slane %v1415_v61, %v10038_v5  ;;  %v1856_v32 = vcombine.low %v955_v1, %v10908_v10  ;;  %v10958_v60 = vrot.slane %v10926_v29, %v10038_v5 }
  0x8e   : > { %v10857_v18 = vpop.permute.xlu1 %3537  ;;  %v10868_v42 = vpop.permute.xlu0 %2594  ;;  %v3907_v52 = vcombine.low %v10875_v33, %v10878_v24  ;;  %v2328_v61 = vcombine.low %v10655_v39, %v10746_v44 }
  0x8f   : > { %16670 = vst [vmem:[#allocation7_spill] sm:$0xff] %v10932_v45  ;;  %16671 = vst [vmem:[#allocation8_spill] sm:$0xff] %v10937_v56 }
  0x90   : > { %3686 = vrot.lane.b32.xlu1 %v3616_v47, %s9970_s10  ;;  %2606 = vrot.lane.b32.xlu0 %v2311_v25, %s9968_s8  ;;  %v16668_v25 = vmov 0.0  }
  0x91   : > { %9891 = vmatprep.subr.mxu1 %v16668_v25  ;;  %9799 = vmatprep.mubr.msk.f32.mxu1 %vm9976_vm8, %v16668_v25 }
  0x92   : > { %v10888_v31 = vpop.permute.xlu1 %2827  ;;  %v10891_v47 = vpop.permute.xlu0 %2829  ;;  %9896 = vmatpush3.msra.mxu1 %v4234_v40  ;;  %v10912_v40 = vsel %vm10175_vm6, %v959_v3, %v960_v28  ;;  %v10940_v28 = vrot.slane %v1431_v20, %v10038_v5  ;;  %v3038_v3 = vcombine.low %v10776_v63, %v10780_v34  ;;  %v3039_v20 = vcombine.low %v10784_v27, %v955_v1 }
  0x93   : > { %9892 = vmatprep.subr.mxu1 %v16668_v25  ;;  %v10980_v63 = vrot.slane %v1856_v32, %v10038_v5  ;;  %v10990_v1 = vcombine.high %v10958_v60, %v10958_v60  ;;  %v1245_v32 = vcombine.low %v10140_v51, %v10159_v58  ;;  %v568_v58 = vcombine.high %v10926_v29, %v10926_v29 }
  0x94   : > { %3841 = vrot.lane.b32.xlu1 %v3755_v13, %s9974_s14  ;;  %2841 = vrot.lane.b32.xlu0 %v2714_v49, %s9969_s9  ;;  %v16669_v49 = vrot.slane %v10861_v8, 7 }
  0x95   : > { %9897 = vmatpush3.msra.mxu1 %v4233_v48  ;;  %v1259_v29 = vrot.slane %v1245_v32, %v10038_v5  ;;  %v11061_v32 = vrot.slane %v568_v58, %v10038_v5 }
  0x96   : > { %v10918_v13 = vsel %vm10175_vm6, %v962_v57, %v16669_v49  ;;  %v10921_v21 = vpop.permute.xlu1 %3535  ;;  %v1837_v57 = vcombine.low %v10638_v43, %v10730_v11  ;;  %v10944_v48 = vpop.permute.xlu0 %2592  ;;  %v10951_v43 = vcombine.high %v10861_v8, %v10861_v8  ;;  %v10954_v11 = vrot.slane %v552_v55, %v10038_v5 }
  0x97   : > { %v1872_v6 = vcombine.low %v10912_v40, %v10918_v13  ;;  %v1261_v55 = vcombine.low %v10055_v15, %v10076_v23  ;;  %v1262_v23 = vcombine.low %v10072_v22, %v10058_v16  ;;  %v3046_v16 = vrot.slane %v3038_v3, %v10038_v5 }
  0x98   : > { %3962 = vrot.lane.b32.xlu1 %v3907_v52, %s9972_s12  ;;  %3332 = vrot.lane.b32.xlu0 %v3037_v17, %s9973_s13  ;;  %v2722_v17 = vrot.slane %v2715_v59, %v10038_v5  ;;  %v2347_v52 = vcombine.low %v10820_v62, %v10790_v38  ;;  %v3617_v38 = vcombine.low %v10937_v56, %v10940_v28  ;;  %v966_v15 = vrot.slane %v10951_v43, 7 }
  0x99   : > { %v10983_v39 = vrot.slane %v1872_v6, %v10038_v5  ;;  %v10994_v44 = vcombine.high %v10954_v11, %v10954_v11  ;;  %v969_v34 = vrot.slane %v10954_v11, 7  ;;  %v11004_v59 = vrot.slane %v2363_v37, %v10038_v5 }
  0x9a   : > { %v10977_v62 = vpop.permute.xlu1 %3674  ;;  %v2723_v9 = vcombine.low %v10875_v33, %v2722_v17  ;;  %v11001_v49 = vrot.slane %v2347_v52, %v10038_v5  ;;  %v3053_v22 = vrot.slane %v3039_v20, %v10038_v5  ;;  %v9552_v6 = vcombine.high %v10710_v4, %v10787_v30 }
  0x9b   : > { %v3756_v17 = vcombine.low %v10980_v63, %v10983_v39  ;;  %v16672_v52 = vrot.slane %v10861_v8, 7  ;;  %v968_v3 = vrot.slane %v966_v15, 2  ;;  %v9534_v20 = vrot.slane %v10958_v60, 9 }
  0x9c   : > { %3549 = vrot.lane.b32.xlu1 %v10932_v45, %s9967_s30  ;;  %2117 = vrot.lane.b32.xlu0 %v1837_v57, %s9971_s11  ;;  %v10997_v27 = vpop.permute.xlu0 %2103  ;;  %v1244_v57 = vcombine.low %v10086_v26, %v10147_v54  ;;  %v971_v26 = vrot.slane %v969_v34, 2  ;;  %v972_v54 = vrot.slane %v10994_v44, 7  ;;  %v1269_v4 = vrot.slane %v1261_v55, %v10038_v5 }
  0x9d   : > { %v965_v37 = vrot.slane %v16672_v52, 2  ;;  %v1276_v30 = vrot.slane %v1262_v23, %v10038_v5  ;;  %v1448_v52 = vcombine.low %v10954_v11, %v10958_v60  ;;  %v11035_v56 = vcombine.low %v11001_v49, %v11004_v59 }
  0x9e   : > { %v3054_v51 = vcombine.low %v3046_v16, %v3053_v22  ;;  %v1252_v45 = vrot.slane %v1244_v57, %v10038_v5  ;;  %v11048_v16 = vsel %vm10175_vm6, %v968_v3, %v969_v34  ;;  %v11052_v22 = vsel %vm10175_vm6, %v971_v26, %v972_v54 }
  0x9f   : > { %v967_v23 = vsel %vm10175_vm6, %v965_v37, %v966_v15  ;;  %v16673_v57 = vrot.slane %v10990_v1, 7  ;;  %v11067_v34 = vrot.slane %v1448_v52, %v10038_v5  ;;  %v1854_v3 = vcombine.low %v10733_v14, %v10852_v19 }
  0xa0   : > { %3688 = vrot.lane.b32.xlu1 %v3617_v38, %s9970_s10  ;;  %2608 = vrot.lane.b32.xlu0 %v2328_v61, %s9968_s8  ;;  %v11027_v61 = vpop.permute.xlu1 %3950  ;;  %v1432_v38 = vcombine.low %v10861_v8, %v10951_v43  ;;  %v3436_v8 = vrot.slane %v9552_v6, %v10038_v5  ;;  %v1277_v6 = vcombine.low %v1269_v4, %v1276_v30 }
  0xa1   : > { %v1260_v37 = vcombine.low %v1252_v45, %v1259_v29  ;;  %v2345_v45 = vcombine.low %v10749_v12, %v10875_v33  ;;  %v11085_v14 = vcombine.high %v11061_v32, %v11061_v32  ;;  %v2364_v30 = vcombine.low %v10951_v43, %v10954_v11 }
  0xa2   : > { %v11064_v15 = vrot.slane %v1432_v38, %v10038_v5  ;;  %v3437_v54 = vcombine.low %v10809_v50, %v3436_v8  ;;  %v9546_v38 = vcombine.high %v10954_v11, %v10958_v60  ;;  %v3055_v52 = vcombine.low %v10908_v10, %v10912_v40 }
  0xa3   : > { %v11041_v55 = vpop.permute.xlu0 %3320  ;;  %v3056_v29 = vcombine.low %v10918_v13, %v967_v23  ;;  %v4027_v8 = vsel %vm4025_vm9, %v1277_v6, %v10997_v27  ;;  %v982_v13 = vrot.slane %v11085_v14, 7 }
  0xa4   : > { %3843 = vrot.lane.b32.xlu1 %v3756_v17, %s9974_s14  ;;  %2843 = vrot.lane.b32.xlu0 %v2723_v9, %s9969_s9  ;;  %v11058_v9 = vsel %vm10175_vm6, %v9534_v20, %v16673_v57  ;;  %v11070_v17 = vld [vmem:[%s10036_s29 + $0x78] sm:$0xff]  ;;  %v1873_v20 = vcombine.low %v967_v23, %v11048_v16  ;;  %v3618_v4 = vcombine.low %v11064_v15, %v11067_v34 }
  0xa5   : > { %v1889_v58 = vcombine.low %v11052_v22, %v11058_v9  ;;  %v11089_v19 = vrot.slane %v11070_v17, %v10038_v5 }
  0xa6   : > { %v11099_v33 = vrot.slane %v1873_v20, %v10038_v5  ;;  %v11129_v20 = vrot.slane %v9546_v38, %v10038_v5 }
  0xa7   : > { %v3319_v26 = vpop.permute.xlu1 %3318  ;;  %v11111_v43 = vrot.slane %v1889_v58, %v10038_v5  ;;  %v11118_v40 = vcombine.high %v11089_v19, %v11089_v19  ;;  %v3063_v58 = vrot.slane %v3055_v52, %v10038_v5  ;;  %v984_v52 = vrot.slane %v982_v13, 2 }
  0xa8   : > { %3964 = vrot.lane.b32.xlu1 %v11035_v56, %s9972_s12  ;;  %3334 = vrot.lane.b32.xlu0 %v3054_v51, %s9973_s13 }
  0xaa   : > { %v2102_v51 = vpop.permute.xlu0 %2101 }
  0xab   : > { %v4026_v12 = vsel %vm4025_vm9, %v1260_v37, %v2102_v51  ;;  %v979_v37 = vrot.slane %v11061_v32, 7  ;;  %v16674_v51 = vrot.slane %v10990_v1, 7 }
  0xac   : > { %v4052_v57 = vsel %vm4051_vm10, %v4026_v12, %v10944_v48  ;;  %3551 = vrot.lane.b32.xlu1 %v3437_v54, %s9967_s30  ;;  %2119 = vrot.lane.b32.xlu0 %v1854_v3, %s9971_s11  ;;  %v985_v48 = vrot.slane %v11089_v19, 7  ;;  %v11126_v3 = vrot.slane %v2364_v30, %v10038_v5  ;;  %v3757_v30 = vcombine.low %v11099_v33, %v11111_v43 }
  0xad   : > { %v4078_v10 = vsel %vm4077_vm11, %v4052_v57, %v10888_v31  ;;  %v4053_v31 = vsel %vm4051_vm10, %v4027_v8, %v10868_v42  ;;  %v3070_v42 = vrot.slane %v3056_v29, %v10038_v5  ;;  %v981_v38 = vrot.slane %v979_v37, 2 }
  0xae   : > { %v3830_v27 = vpop.permute.xlu1 %3829  ;;  %v4104_v23 = vsel %vm4103_vm12, %v4078_v10, %v3319_v26  ;;  %v11123_v6 = vpop.permute.xlu0 %2105  ;;  %v978_v26 = vrot.slane %v16674_v51, 2  ;;  %v987_v8 = vrot.slane %v985_v48, 2  ;;  %v988_v57 = vrot.slane %v11118_v40, 7 }
  0xaf   : > { %v4130_v54 = vsel %vm4129_vm13, %v4104_v23, %v10921_v21  ;;  %v4079_v10 = vsel %vm4077_vm11, %v4053_v31, %v10891_v47  ;;  %v3908_v29 = vcombine.low %v11126_v3, %v11129_v20  ;;  %v1465_v47 = vcombine.low %v11085_v14, %v11089_v19 }
  0xb0   : > { %v4156_v12 = vsel %vm4155_vm14, %v4130_v54, %v10977_v62  ;;  %3690 = vrot.lane.b32.xlu1 %v3618_v4, %s9970_s10  ;;  %2610 = vrot.lane.b32.xlu0 %v2345_v45, %s9968_s8  ;;  %v293_v4 = vld [vmem:[%s10036_s29 + $0x80] sm:$0xff]  ;;  %v1449_v54 = vcombine.low %v10990_v1, %v11061_v32  ;;  %v980_v31 = vsel %vm10175_vm6, %v978_v26, %v979_v37 }
  0xb1   : > { %v4182_v21 = vsel %vm4181_vm15, %v4156_v12, %v3830_v27  ;;  %v585_v27 = vcombine.high %v11070_v17, %v11070_v17  ;;  %v11170_v51 = vsel %vm10175_vm6, %v981_v38, %v982_v13  ;;  %v4105_v17 = vsel %vm4103_vm12, %v4079_v10, %v11041_v55 }
  0xb2   : > { %v3677_v62 = vpop.permute.xlu1 %3676  ;;  %v11149_v23 = vpop.permute.xlu0 %2596  ;;  %v4208_v45 = vsel %vm4207_vm0, %v4182_v21, %v11027_v61  ;;  %v3071_v61 = vcombine.low %v3063_v58, %v3070_v42  ;;  %v11178_v12 = vsel %vm10175_vm6, %v984_v52, %v985_v48  ;;  %v11187_v37 = vrot.slane %v293_v4, %v10038_v5 }
  0xb3   : > { %9740 = vmatmul.mubr.msk.f32.vlgmr.msra.gmra.mxu0 %vm4245_vm1, %v4208_v45  ;;  %v11193_v55 = vcombine.low %v10940_v28, %v11064_v15  ;;  %v2725_v48 = vcombine.low %v10958_v60, %v10990_v1  ;;  %v1871_v26 = vcombine.low %v10855_v41, %v10980_v63  ;;  %v11203_v42 = vrot.slane %v1449_v54, %v10038_v5 }
  0xb4   : > { %3845 = vrot.lane.b32.xlu1 %v3757_v30, %s9974_s14  ;;  %2845 = vrot.lane.b32.xlu0 %v11035_v56, %s9969_s9  ;;  %v11184_v56 = vsel %vm10175_vm6, %v987_v8, %v988_v57  ;;  %v11200_v30 = vrot.slane %v585_v27, %v10038_v5  ;;  %v11206_v38 = vrot.slane %v1465_v47, %v10038_v5 }
  0xb5   : > { %9742 = vmatprep.mubr.msk.f32.mxu0 %vm9976_vm8, %v16668_v25  ;;  %v4131_v21 = vsel %vm4129_vm13, %v4105_v17, %v10857_v18  ;;  %v1890_v28 = vcombine.low %v980_v31, %v11170_v51  ;;  %v1906_v41 = vcombine.low %v11178_v12, %v11184_v56  ;;  %v2362_v63 = vcombine.low %v10878_v24, %v11001_v49 }
  0xb6   : > { %v3832_v13 = vpop.permute.xlu1 %3831  ;;  %v11189_v58 = vpop.permute.xlu0 %2831  ;;  %v4157_v60 = vsel %vm4155_vm14, %v4131_v21, %v3677_v62  ;;  %v601_v1 = vcombine.high %v293_v4, %v293_v4  ;;  %v11220_v15 = vcombine.high %v11187_v37, %v11187_v37  ;;  %v2732_v10 = vrot.slane %v2725_v48, %v10038_v5 }
  0xb7   : > { %v4183_v18 = vsel %vm4181_vm15, %v4157_v60, %v3832_v13  ;;  %v2381_v45 = vcombine.low %v11061_v32, %v11085_v14  ;;  %v3072_v62 = vcombine.low %v11048_v16, %v11052_v22  ;;  %v3619_v24 = vcombine.low %v11203_v42, %v11206_v38 }
  0xb8   : > { %3966 = vrot.lane.b32.xlu1 %v3908_v29, %s9972_s12  ;;  %3336 = vrot.lane.b32.xlu0 %v3071_v61, %s9973_s13  ;;  %v2397_v49 = vcombine.low %v11089_v19, %v11118_v40  ;;  %v3073_v4 = vcombine.low %v11058_v9, %v980_v31  ;;  %v11238_v32 = vrot.slane %v1890_v28, %v10038_v5  ;;  %v991_v14 = vrot.slane %v11200_v30, 7 }
  0xb9   : > { %v11241_v16 = vrot.slane %v1906_v41, %v10038_v5  ;;  %v11245_v22 = vcombine.high %v11200_v30, %v11200_v30  ;;  %v11250_v9 = vrot.slane %v601_v1, %v10038_v5  ;;  %v998_v19 = vrot.slane %v11220_v15, 7 }
  0xba   : > { %v3953_v52 = vpop.permute.xlu1 %3952  ;;  %v3323_v8 = vpop.permute.xlu0 %3322  ;;  %v2733_v47 = vcombine.low %v11126_v3, %v2732_v10  ;;  %v3438_v61 = vcombine.low %v10954_v11, %v10994_v44  ;;  %v11261_v31 = vrot.slane %v2381_v45, %v10038_v5  ;;  %v11264_v17 = vrot.slane %v2397_v49, %v10038_v5 }
  0xbb   : > { %v4209_v29 = vsel %vm4207_vm0, %v4183_v18, %v3953_v52  ;;  %v3080_v13 = vrot.slane %v3072_v62, %v10038_v5  ;;  %v3087_v48 = vrot.slane %v3073_v4, %v10038_v5  ;;  %v990_v11 = vrot.slane %v988_v57, 2 }
  0xbc   : > { %3553 = vrot.lane.b32.xlu1 %v11193_v55, %s9967_s30  ;;  %2121 = vrot.lane.b32.xlu0 %v1871_v26, %s9971_s11  ;;  %v3758_v26 = vcombine.low %v11238_v32, %v11241_v16  ;;  %v993_v44 = vrot.slane %v991_v14, 2  ;;  %v994_v21 = vrot.slane %v11245_v22, 7  ;;  %v9535_v28 = vrot.slane %v11187_v37, 9 }
  0xbd   : > { %9743 = vmatmul.mubr.msk.f32.gmra.mxu0 %vm4245_vm1, %v4209_v29  ;;  %v1000_v41 = vrot.slane %v998_v19, 2  ;;  %v1001_v60 = vrot.slane %v11250_v9, 7  ;;  %v3445_v52 = vrot.slane %v3438_v61, %v10038_v5  ;;  %v11283_v10 = vcombine.low %v11261_v31, %v11264_v17 }
  0xbe   : > { %v3540_v27 = vpop.permute.xlu1 %3539  ;;  %v11253_v54 = vpop.permute.xlu0 %2107  ;;  %9745 = vmatprep.mubr.msk.f32.mxu0 %vm9976_vm8, %v16668_v25  ;;  %v3088_v45 = vcombine.low %v3080_v13, %v3087_v48  ;;  %v1466_v57 = vcombine.low %v11118_v40, %v11200_v30  ;;  %v1482_v62 = vcombine.low %v11187_v37, %v11220_v15  ;;  %v4028_v29 = vsel %vm4025_vm9, %v10170_v0, %v11123_v6 }
  0xbf   : > { %v11298_v49 = vsel %vm10175_vm6, %v993_v44, %v994_v21  ;;  %v4054_v40 = vsel %vm4051_vm10, %v4028_v29, %v11149_v23  ;;  %v11304_v4 = vsel %vm10175_vm6, %v9535_v28, %v998_v19  ;;  %v11308_v0 = vsel %vm10175_vm6, %v1000_v41, %v1001_v60 }
  0xc0   : > { %3692 = vrot.lane.b32.xlu1 %v3619_v24, %s9970_s10  ;;  %2612 = vrot.lane.b32.xlu0 %v2362_v63, %s9968_s8  ;;  %v294_v63 = vld [vmem:[%s10036_s29 + $0x88] sm:$0xff]  ;;  %v992_v24 = vsel %vm10175_vm6, %v990_v11, %v991_v14  ;;  %v4080_v14 = vsel %vm4077_vm11, %v4054_v40, %v11189_v58  ;;  %v3446_v13 = vcombine.low %v3445_v52, %v11203_v42 }
  0xc1   : > { %v11311_v6 = vrot.slane %v294_v63, %v10038_v5  ;;  %v1888_v23 = vcombine.low %v10983_v39, %v11099_v33  ;;  %v4106_v19 = vsel %vm4103_vm12, %v4080_v14, %v3323_v8  ;;  %v11322_v48 = vrot.slane %v1466_v57, %v10038_v5 }
  0xc2   : > { %v3679_v1 = vpop.permute.xlu1 %3678  ;;  %v11277_v18 = vpop.permute.xlu0 %2598  ;;  %v1907_v11 = vcombine.low %v992_v24, %v11298_v49  ;;  %v4132_v58 = vsel %vm4129_vm13, %v4106_v19, %v3540_v27  ;;  %v1923_v39 = vcombine.low %v11304_v4, %v11308_v0  ;;  %v11336_v33 = vcombine.high %v11250_v9, %v11250_v9 }
  0xc3   : > { %v4158_v8 = vsel %vm4155_vm14, %v4132_v58, %v3679_v1  ;;  %v618_v44 = vcombine.high %v294_v63, %v294_v63  ;;  %v11341_v21 = vcombine.high %v11311_v6, %v11311_v6  ;;  %v2379_v52 = vcombine.low %v11004_v59, %v11126_v3 }
  0xc4   : > { %3847 = vrot.lane.b32.xlu1 %v3758_v26, %s9974_s14  ;;  %2847 = vrot.lane.b32.xlu0 %v2733_v47, %s9969_s9  ;;  %v11325_v26 = vrot.slane %v1482_v62, %v10038_v5  ;;  %v2414_v57 = vcombine.low %v11220_v15, %v11250_v9  ;;  %v11352_v63 = vrot.slane %v1907_v11, %v10038_v5  ;;  %v1004_v15 = vrot.slane %v11336_v33, 7 }
  0xc5   : > { %v3089_v62 = vcombine.low %v11170_v51, %v11178_v12  ;;  %v3090_v29 = vcombine.low %v11184_v56, %v992_v24  ;;  %v11362_v3 = vrot.slane %v1923_v39, %v10038_v5  ;;  %v11368_v51 = vrot.slane %v618_v44, %v10038_v5 }
  0xc6   : > { %v3834_v47 = vpop.permute.xlu1 %3833  ;;  %v11315_v61 = vpop.permute.xlu0 %2833  ;;  %v3620_v59 = vcombine.low %v11322_v48, %v11325_v26  ;;  %v1010_v12 = vrot.slane %v11341_v21, 7  ;;  %v11377_v14 = vrot.slane %v2414_v57, %v10038_v5  ;;  %v1006_v11 = vrot.slane %v1004_v15, 2 }
  0xc7   : > { %v4184_v27 = vsel %vm4181_vm15, %v4158_v8, %v3834_v47  ;;  %v3097_v47 = vrot.slane %v3089_v62, %v10038_v5  ;;  %v3759_v19 = vcombine.low %v11352_v63, %v11362_v3  ;;  %v1013_v8 = vrot.slane %v11368_v51, 7 }
  0xc8   : > { %3968 = vrot.lane.b32.xlu1 %v11283_v10, %s9972_s12  ;;  %3338 = vrot.lane.b32.xlu0 %v3088_v45, %s9973_s13  ;;  %v2398_v45 = vcombine.low %v11200_v30, %v11245_v22  ;;  %v1007_v22 = vrot.slane %v11311_v6, 7  ;;  %v1012_v39 = vrot.slane %v1010_v12, 2  ;;  %v1483_v57 = vcombine.low %v11250_v9, %v11336_v33 }
  0xc9   : > { %v16675_v62 = vcombine.low %v10107_v35, %v10110_v36 }
  0xca   : > { %v3955_v28 = vpop.permute.xlu1 %3954  ;;  %v3325_v41 = vpop.permute.xlu0 %3324  ;;  %v11374_v40 = vrot.slane %v2398_v45, %v10038_v5  ;;  %v1009_v58 = vrot.slane %v1007_v22, 2  ;;  %v295_v45 = vld [vmem:[%s10036_s29 + $0x90] sm:$0xff]  ;;  %v11409_v9 = vsel %vm10175_vm6, %v1006_v11, %v1007_v22  ;;  %v11419_v35 = vsel %vm10175_vm6, %v1012_v39, %v1013_v8 }
  0xcb   : > { %v4210_v1 = vsel %vm4207_vm0, %v4184_v27, %v3955_v28  ;;  %v634_v36 = vcombine.high %v295_v45, %v295_v45 }
  0xcc   : > { %3555 = vrot.lane.b32.xlu1 %v3446_v13, %s9967_s30  ;;  %2123 = vrot.lane.b32.xlu0 %v1888_v23, %s9971_s11  ;;  %v3104_v13 = vrot.slane %v3090_v29, %v10038_v5  ;;  %v1003_v23 = vrot.slane %v1001_v60, 2  ;;  %v3909_v28 = vcombine.low %v11374_v40, %v11377_v14  ;;  %v4029_v29 = vsel %vm4025_vm9, %v16675_v62, %v11253_v54 }
  0xcd   : > { %9746 = vmatmul.mubr.msk.f32.gmra.mxu0 %vm4245_vm1, %v4210_v1  ;;  %v11422_v54 = vrot.slane %v295_v45, %v10038_v5  ;;  %v2396_v45 = vcombine.low %v11129_v20, %v11261_v31 }
  0xce   : > { %v3542_v56 = vpop.permute.xlu1 %3541  ;;  %v11371_v24 = vpop.permute.xlu0 %2109  ;;  %9748 = vmatprep.mubr.msk.f32.mxu0 %vm9976_vm8, %v16668_v25  ;;  %v3105_v60 = vcombine.low %v3097_v47, %v3104_v13  ;;  %v1005_v1 = vsel %vm10175_vm6, %v1003_v23, %v1004_v15  ;;  %v4055_v15 = vsel %vm4051_vm10, %v4029_v29, %v11277_v18  ;;  %v1905_v18 = vcombine.low %v11111_v43, %v11238_v32 }
  0xcf   : > { %v11436_v23 = vrot.slane %v1483_v57, %v10038_v5  ;;  %v2735_v43 = vcombine.low %v11200_v30, %v11187_v37  ;;  %v2415_v57 = vcombine.low %v11336_v33, %v11311_v6  ;;  %v1015_v29 = vrot.slane %v1013_v8, 2 }
  0xd0   : > { %3694 = vrot.lane.b32.xlu1 %v3620_v59, %s9970_s10  ;;  %2614 = vrot.lane.b32.xlu0 %v2379_v52, %s9968_s8  ;;  %v1499_v52 = vcombine.low %v11311_v6, %v11341_v21  ;;  %v11413_v59 = vsel %vm10175_vm6, %v1009_v58, %v1010_v12  ;;  %v11430_v12 = vcombine.low %v11206_v38, %v11322_v48 }
  0xd1   : > { %v1940_v38 = vcombine.low %v11413_v59, %v11419_v35  ;;  %v3106_v48 = vcombine.low %v11298_v49, %v11304_v4  ;;  %v3107_v49 = vcombine.low %v11308_v0, %v1005_v1  ;;  %v2742_v0 = vrot.slane %v2735_v43, %v10038_v5  ;;  %v296_v43 = vld [vmem:[%s10036_s29 + $0x98] sm:$0xff] }
  0xd2   : > { %v3681_v44 = vpop.permute.xlu1 %3680  ;;  %v11388_v27 = vpop.permute.xlu0 %2600 }
  0xd3   : > { %v11481_v31 = vrot.slane %v1940_v38, %v10038_v5 }
  0xd4   : > { %3849 = vrot.lane.b32.xlu1 %v3759_v19, %s9974_s14  ;;  %2849 = vrot.lane.b32.xlu0 %v11283_v10, %s9969_s9  ;;  %v4081_v10 = vsel %vm4077_vm11, %v4055_v15, %v11315_v61  ;;  %v11439_v19 = vrot.slane %v1499_v52, %v10038_v5  ;;  %v1924_v61 = vcombine.low %v1005_v1, %v11409_v9 }
  0xd5   : > { %v4107_v13 = vsel %vm4103_vm12, %v4081_v10, %v3325_v41  ;;  %v11453_v41 = vrot.slane %v634_v36, %v10038_v5  ;;  %v2431_v52 = vcombine.low %v11341_v21, %v11368_v51  ;;  %v9553_v36 = vcombine.high %v11200_v30, %v11187_v37 }
  0xd6   : > { %v3836_v22 = vpop.permute.xlu1 %3835  ;;  %v11426_v47 = vpop.permute.xlu0 %2835  ;;  %16676 = vst [vmem:[#allocation9_spill] sm:$0xff] %v11439_v19  ;;  %v4133_v11 = vsel %vm4129_vm13, %v4107_v13, %v3542_v56  ;;  %v11457_v56 = vcombine.high %v11422_v54, %v11422_v54  ;;  %v11478_v20 = vrot.slane %v1924_v61, %v10038_v5  ;;  %v11499_v10 = vrot.slane %v2415_v57, %v10038_v5 }
  0xd7   : > { %v4159_v32 = vsel %vm4155_vm14, %v4133_v11, %v3681_v44  ;;  %v11464_v44 = vcombine.high %v11368_v51, %v11368_v51  ;;  %v11487_v6 = vcombine.high %v11453_v41, %v11453_v41  ;;  %v1023_v21 = vrot.slane %v11453_v41, 7 }
  0xd8   : > { %3970 = vrot.lane.b32.xlu1 %v3909_v28, %s9972_s12  ;;  %3340 = vrot.lane.b32.xlu0 %v3105_v60, %s9973_s13  ;;  %v4185_v58 = vsel %vm4181_vm15, %v4159_v32, %v3836_v22  ;;  %v3621_v60 = vcombine.low %v11436_v23, %v11439_v19  ;;  %v1020_v33 = vrot.slane %v11457_v56, 7  ;;  %v11502_v22 = vrot.slane %v2431_v52, %v10038_v5 }
  0xd9   : > { %v1016_v15 = vrot.slane %v11464_v44, 7  ;;  %v3121_v13 = vrot.slane %v3107_v49, %v10038_v5  ;;  %v3760_v8 = vcombine.low %v11478_v20, %v11481_v31  ;;  %v2743_v61 = vcombine.low %v2742_v0, %v11377_v14 }
  0xda   : > { %v3957_v39 = vpop.permute.xlu1 %3956  ;;  %v3327_v28 = vpop.permute.xlu0 %3326  ;;  %v9536_v37 = vrot.slane %v11422_v54, 9  ;;  %v1022_v30 = vrot.slane %v1020_v33, 2  ;;  %v1025_v11 = vrot.slane %v1023_v21, 2  ;;  %v1026_v38 = vrot.slane %v11487_v6, 7 }
  0xdb   : > { %v4211_v4 = vsel %vm4207_vm0, %v4185_v58, %v3957_v39  ;;  %v1017_v58 = vsel %vm10175_vm6, %v1015_v29, %v1016_v15  ;;  %v3454_v39 = vrot.slane %v9553_v36, %v10038_v5  ;;  %v4030_v57 = vsel %vm4025_vm9, %v10409_v46, %v11371_v24 }
  0xdc   : > { %3557 = vrot.lane.b32.xlu1 %v11430_v12, %s9967_s30  ;;  %2125 = vrot.lane.b32.xlu0 %v1905_v18, %s9971_s11  ;;  %v3114_v18 = vrot.slane %v3106_v48, %v10038_v5  ;;  %v11534_v52 = vsel %vm10175_vm6, %v9536_v37, %v1020_v33  ;;  %v11537_v0 = vrot.slane %v296_v43, %v10038_v5 }
  0xdd   : > { %9749 = vmatmul.mubr.msk.f32.gmra.mxu0 %vm4245_vm1, %v4211_v4  ;;  %v1500_v4 = vcombine.low %v11368_v51, %v11422_v54  ;;  %v4056_v29 = vsel %vm4051_vm10, %v4030_v57, %v11388_v27  ;;  %v11543_v15 = vsel %vm10175_vm6, %v1022_v30, %v1023_v21  ;;  %v11549_v46 = vsel %vm10175_vm6, %v1025_v11, %v1026_v38 }
  0xde   : > { %v3544_v1 = vpop.permute.xlu1 %3543  ;;  %v11491_v62 = vpop.permute.xlu0 %2111  ;;  %9751 = vmatprep.mubr.msk.f32.mxu0 %vm9976_vm8, %v16668_v25  ;;  %v3122_v49 = vcombine.low %v3114_v18, %v3121_v13  ;;  %v651_v24 = vcombine.high %v296_v43, %v296_v43  ;;  %v4082_v33 = vsel %vm4077_vm11, %v4056_v29, %v11426_v47  ;;  %v3455_v13 = vcombine.low %v3454_v39, %v11436_v23 }
  0xdf   : > { %v1922_v27 = vcombine.low %v11241_v16, %v11352_v63  ;;  %v4108_v21 = vsel %vm4103_vm12, %v4082_v33, %v3327_v28  ;;  %v1941_v37 = vcombine.low %v1017_v58, %v11534_v52  ;;  %v1957_v16 = vcombine.low %v11543_v15, %v11549_v46 }
  0xe0   : > { %3696 = vrot.lane.b32.xlu1 %v3621_v60, %s9970_s10  ;;  %2616 = vrot.lane.b32.xlu0 %v2396_v45, %s9968_s8  ;;  %v11521_v45 = vcombine.low %v11499_v10, %v11502_v22  ;;  %v1516_v60 = vcombine.low %v11457_v56, %v11453_v41  ;;  %v4134_v47 = vsel %vm4129_vm13, %v4108_v21, %v3544_v1 }
  0xe1   : > { %v11574_v63 = vcombine.high %v11537_v0, %v11537_v0  ;;  %v11578_v30 = vrot.slane %v651_v24, %v10038_v5  ;;  %v3123_v1 = vcombine.low %v11409_v9, %v11413_v59  ;;  %v3124_v11 = vcombine.low %v11419_v35, %v1017_v58 }
  0xe2   : > { %v3683_v32 = vpop.permute.xlu1 %3682  ;;  %v11514_v48 = vpop.permute.xlu0 %2602  ;;  %v9547_v57 = vcombine.high %v11368_v51, %v11422_v54  ;;  %v2448_v9 = vcombine.low %v11453_v41, %v11487_v6  ;;  %v11596_v59 = vrot.slane %v1941_v37, %v10038_v5 }
  0xe3   : > { %v4160_v28 = vsel %vm4155_vm14, %v4134_v47, %v3683_v32  ;;  %v1032_v35 = vrot.slane %v11574_v63, 7  ;;  %v11606_v41 = vcombine.high %v11578_v30, %v11578_v30  ;;  %v1035_v58 = vrot.slane %v11578_v30, 7 }
  0xe4   : > { %3851 = vrot.lane.b32.xlu1 %v3760_v8, %s9974_s14  ;;  %2851 = vrot.lane.b32.xlu0 %v2743_v61, %s9969_s9  ;;  %v11560_v8 = vrot.slane %v1500_v4, %v10038_v5  ;;  %v11563_v61 = vrot.slane %v1516_v60, %v10038_v5  ;;  %v2413_v4 = vcombine.low %v11264_v17, %v11374_v40  ;;  %v1029_v40 = vrot.slane %v11537_v0, 7 }
  0xe5   : > { %v11599_v17 = vrot.slane %v1957_v16, %v10038_v5  ;;  %v3131_v33 = vrot.slane %v3123_v1, %v10038_v5  ;;  %v11619_v21 = vrot.slane %v9547_v57, %v10038_v5  ;;  %v11622_v37 = vrot.slane %v2448_v9, %v10038_v5 }
  0xe6   : > { %v3838_v36 = vpop.permute.xlu1 %3837  ;;  %v11553_v18 = vpop.permute.xlu0 %2837  ;;  %16677 = vst [vmem:[#allocation10_spill] sm:$0xff] %v11560_v8  ;;  %v3622_v32 = vcombine.low %v11560_v8, %v11563_v61  ;;  %v1028_v47 = vrot.slane %v1026_v38, 2  ;;  %v1345_v16 = vcombine.low %v10338_v53, %v10416_v7  ;;  %v1037_v1 = vrot.slane %v1035_v58, 2 }
  0xe7   : > { %v4186_v43 = vsel %vm4181_vm15, %v4160_v28, %v3838_v36  ;;  %v3138_v36 = vrot.slane %v3124_v11, %v10038_v5  ;;  %v1034_v28 = vrot.slane %v1032_v35, 2  ;;  %v1038_v11 = vrot.slane %v11606_v41, 7 }
  0xe8   : > { %3972 = vrot.lane.b32.xlu1 %v11521_v45, %s9972_s12  ;;  %3342 = vrot.lane.b32.xlu0 %v3122_v49, %s9973_s13  ;;  %v3910_v53 = vcombine.low %v11619_v21, %v11622_v37  ;;  %v1517_v7 = vcombine.low %v11487_v6, %v11537_v0  ;;  %v4031_v9 = vsel %vm4025_vm9, %v1345_v16, %v11491_v62 }
  0xe9   : > { %v3139_v38 = vcombine.low %v3131_v33, %v3138_v36  ;;  %v11655_v6 = vsel %vm10175_vm6, %v1034_v28, %v1035_v58  ;;  %v4057_v36 = vsel %vm4051_vm10, %v4031_v9, %v11514_v48  ;;  %v2745_v48 = vcombine.low %v11422_v54, %v11457_v56 }
  0xea   : > { %v3959_v39 = vpop.permute.xlu1 %3958  ;;  %v3329_v49 = vpop.permute.xlu0 %3328 }
  0xeb   : > { %v4212_v60 = vsel %vm4207_vm0, %v4186_v43, %v3959_v39 }
  0xec   : > { %3559 = vrot.lane.b32.xlu1 %v3455_v13, %s9967_s30  ;;  %2127 = vrot.lane.b32.xlu0 %v1922_v27, %s9971_s11  ;;  %v3456_v13 = vcombine.low %v11368_v51, %v11464_v44  ;;  %v297_v27 = vld [vmem:[%s10036_s29 + $0xa0] sm:$0xff]  ;;  %v3761_v51 = vcombine.low %v11596_v59, %v11599_v17  ;;  %v1031_v44 = vrot.slane %v1029_v40, 2 }
  0xed   : > { %9752 = vmatmul.mubr.msk.f32.gmra.mxu0 %vm4245_vm1, %v4212_v60  ;;  %v667_v43 = vcombine.high %v297_v27, %v297_v27  ;;  %v11664_v62 = vrot.slane %v297_v27, %v10038_v5  ;;  %v1939_v27 = vcombine.low %v11362_v3, %v11478_v20 }
  0xee   : > { %v3546_v29 = vpop.permute.xlu1 %3545  ;;  %v11609_v24 = vpop.permute.xlu0 %2113  ;;  %9754 = vmatprep.mubr.msk.f32.mxu0 %vm9976_vm8, %v16668_v25  ;;  %v3463_v57 = vrot.slane %v3456_v13, %v10038_v5  ;;  %v11651_v33 = vsel %vm10175_vm6, %v1031_v44, %v1032_v35  ;;  %v4083_v35 = vsel %vm4077_vm11, %v4057_v36, %v11553_v18 }
  0xef   : > { %v4109_v16 = vsel %vm4103_vm12, %v4083_v35, %v3329_v49  ;;  %v11694_v20 = vcombine.high %v11664_v62, %v11664_v62 }
  0xf0   : > { %3698 = vrot.lane.b32.xlu1 %v3622_v32, %s9970_s10  ;;  %2618 = vrot.lane.b32.xlu0 %v2413_v4, %s9968_s8  ;;  %v1533_v4 = vcombine.low %v11574_v63, %v11578_v30  ;;  %v1030_v32 = vsel %vm10175_vm6, %v1028_v47, %v1029_v40  ;;  %v11661_v40 = vsel %vm10175_vm6, %v1037_v1, %v1038_v11 }
  0xf1   : > { %v3464_v58 = vcombine.low %v11439_v19, %v3463_v57  ;;  %v4135_v18 = vsel %vm4129_vm13, %v4109_v16, %v3546_v29  ;;  %v1958_v54 = vcombine.low %v1030_v32, %v11651_v33  ;;  %v1974_v56 = vcombine.low %v11655_v6, %v11661_v40 }
  0xf2   : > { %v3685_v39 = vpop.permute.xlu1 %3684  ;;  %v11633_v60 = vpop.permute.xlu0 %2604  ;;  %v11683_v44 = vrot.slane %v1533_v4, %v10038_v5  ;;  %v2430_v11 = vcombine.low %v11377_v14, %v11499_v10  ;;  %v2465_v4 = vcombine.low %v11578_v30, %v11606_v41  ;;  %v9537_v16 = vrot.slane %v11664_v62, 9 }
  0xf3   : > { %v4161_v3 = vsel %vm4155_vm14, %v4135_v18, %v3685_v39  ;;  %v3140_v39 = vcombine.low %v11534_v52, %v11543_v15  ;;  %v11717_v14 = vrot.slane %v1958_v54, %v10038_v5  ;;  %v11720_v10 = vrot.slane %v1974_v56, %v10038_v5 }
  0xf4   : > { %3853 = vrot.lane.b32.xlu1 %v3761_v51, %s9974_s14  ;;  %2853 = vrot.lane.b32.xlu0 %v11521_v45, %s9969_s9  ;;  %v11667_v45 = vrot.slane %v667_v43, %v10038_v5  ;;  %v11680_v51 = vrot.slane %v1517_v7, %v10038_v5  ;;  %16678 = vst [vmem:[#allocation11_spill] sm:$0xff] %v11683_v44 }
  0xf5   : > { %v2752_v43 = vrot.slane %v2745_v48, %v10038_v5  ;;  %v2449_v7 = vcombine.low %v11537_v0, %v11574_v63  ;;  %v3141_v52 = vcombine.low %v11549_v46, %v1030_v32  ;;  %v1042_v0 = vrot.slane %v11694_v20, 7 }
  0xf6   : > { %v3840_v13 = vpop.permute.xlu1 %3839  ;;  %v11671_v47 = vpop.permute.xlu0 %2839  ;;  %v11698_v49 = vcombine.high %v11667_v45, %v11667_v45  ;;  %v1045_v63 = vrot.slane %v11667_v45, 7  ;;  %v11739_v32 = vrot.slane %v2465_v4, %v10038_v5 }
  0xf7   : > { %v4187_v29 = vsel %vm4181_vm15, %v4161_v3, %v3840_v13  ;;  %v2753_v35 = vcombine.low %v2752_v43, %v11622_v37  ;;  %v11736_v46 = vrot.slane %v2449_v7, %v10038_v5  ;;  %v3762_v13 = vcombine.low %v11717_v14, %v11720_v10 }
  0xf8   : > { %3974 = vrot.lane.b32.xlu1 %v3910_v53, %s9972_s12  ;;  %3344 = vrot.lane.b32.xlu0 %v3139_v38, %s9973_s13  ;;  %v298_v38 = vld [vmem:[%s10036_s29 + $0xa8] sm:$0xff]  ;;  %v3623_v53 = vcombine.low %v11680_v51, %v11683_v44  ;;  %v1048_v41 = vrot.slane %v11698_v49, 7  ;;  %v3155_v48 = vrot.slane %v3141_v52, %v10038_v5  ;;  %v1047_v18 = vrot.slane %v1045_v63, 2 }
  0xf9   : > { %v11725_v15 = vrot.slane %v298_v38, %v10038_v5  ;;  %v3911_v43 = vcombine.low %v11736_v46, %v11739_v32  ;;  %v1043_v4 = vsel %vm10175_vm6, %v9537_v16, %v1042_v0 }
  0xfa   : > { %v3961_v28 = vpop.permute.xlu1 %3960  ;;  %v3331_v1 = vpop.permute.xlu0 %3330  ;;  %v1050_v54 = vrot.slane %v1048_v41, 2 }
  0xfb   : > { %v4213_v57 = vsel %vm4207_vm0, %v4187_v29, %v3961_v28  ;;  %v1534_v28 = vcombine.low %v11664_v62, %v11694_v20 }
  0xfc   : > { %3561 = vrot.lane.b32.xlu1 %v3464_v58, %s9967_s30  ;;  %2129 = vrot.lane.b32.xlu0 %v1939_v27, %s9971_s11  ;;  %v3148_v58 = vrot.slane %v3140_v39, %v10038_v5  ;;  %v1044_v27 = vrot.slane %v1042_v0, 2  ;;  %v684_v39 = vcombine.high %v298_v38, %v298_v38  ;;  %v11772_v38 = vsel %vm10175_vm6, %v1047_v18, %v1048_v41 }
  0xfd   : > { %9755 = vmatmul.mubr.msk.f32.gmra.mxu0 %vm4245_vm1, %v4213_v57  ;;  %v16679_v57 = vld [vmem:[#allocation3_spill] sm:$0xff] }
  0xfe   : > { %v3548_v9 = vpop.permute.xlu1 %3547  ;;  %v11730_v36 = vpop.permute.xlu0 %2115  ;;  %9757 = vmatprep.mubr.msk.f32.mxu0 %vm9976_vm8, %v16668_v25  ;;  %v3156_v7 = vcombine.low %v3148_v58, %v3155_v48  ;;  %v11768_v56 = vsel %vm10175_vm6, %v1044_v27, %v1045_v63  ;;  %v11789_v63 = vrot.slane %v1534_v28, %v10038_v5  ;;  %v11795_v48 = vld [vmem:[%s10036_s29 + $0xb0] sm:$0xff]  ;;  %v11801_v27 = vrot.slane %v684_v39, %v10038_v5 }
  0xff   : > { %v1975_v18 = vcombine.low %v1043_v4, %v11768_v56 }
 0x100   : > { %3700 = vrot.lane.b32.xlu1 %v3623_v53, %s9970_s10  ;;  %2620 = vrot.lane.b32.xlu0 %v2430_v11, %s9968_s8  ;;  %v1550_v11 = vcombine.low %v11667_v45, %v11698_v49  ;;  %v4032_v53 = vsel %vm4025_vm9, %v16679_v57, %v11609_v24  ;;  %v16680_v24 = vrot.slane %v11725_v15, 7  ;;  %16682 = vst [vmem:[#allocation12_spill] sm:$0xff] %v11789_v63 }
 0x101   : > { %v4058_v52 = vsel %vm4051_vm10, %v4032_v53, %v11633_v60  ;;  %v11786_v60 = vcombine.low %v11563_v61, %v11680_v51  ;;  %v2754_v61 = vcombine.low %v11578_v30, %v11664_v62  ;;  %v3157_v53 = vcombine.low %v11651_v33, %v11655_v6 }
 0x102   : > { %v3687_v3 = vpop.permute.xlu1 %3686  ;;  %v11749_v29 = vpop.permute.xlu0 %2606  ;;  %v4084_v0 = vsel %vm4077_vm11, %v4058_v52, %v11671_v47  ;;  %v11792_v41 = vrot.slane %v1550_v11, %v10038_v5  ;;  %v1956_v47 = vcombine.low %v11481_v31, %v11596_v59  ;;  %v2447_v31 = vcombine.low %v11502_v22, %v11619_v21 }
 0x103   : > { %16681 = vst [vmem:[#allocation3_spill] sm:$0xff] %v11786_v60  ;;  %v4110_v16 = vsel %vm4103_vm12, %v4084_v0, %v3331_v1  ;;  %v11816_v59 = vcombine.high %v11725_v15, %v11725_v15  ;;  %v2482_v22 = vcombine.low %v11698_v49, %v11725_v15  ;;  %v2761_v57 = vrot.slane %v2754_v61, %v10038_v5 }
 0x104   : > { %3855 = vrot.lane.b32.xlu1 %v3762_v13, %s9974_s14  ;;  %2855 = vrot.lane.b32.xlu0 %v2753_v35, %s9969_s9  ;;  %v11778_v35 = vsel %vm10175_vm6, %v1050_v54, %v16680_v24  ;;  %v4136_v51 = vsel %vm4129_vm13, %v4110_v16, %v3548_v9  ;;  %v11820_v9 = vrot.slane %v11795_v48, %v10038_v5  ;;  %v1057_v49 = vrot.slane %v11801_v27, 7 }
 0x105   : > { %v1991_v1 = vcombine.low %v11772_v38, %v11778_v35  ;;  %v4162_v54 = vsel %vm4155_vm14, %v4136_v51, %v3687_v3  ;;  %v3624_v39 = vcombine.low %v11789_v63, %v11792_v41  ;;  %v2466_v3 = vcombine.low %v11694_v20, %v11667_v45 }
 0x106   : > { %v3842_v13 = vpop.permute.xlu1 %3841  ;;  %v11782_v58 = vpop.permute.xlu0 %2841  ;;  %v11838_v52 = vrot.slane %v1975_v18, %v10038_v5  ;;  %v11845_v20 = vcombine.high %v11801_v27, %v11801_v27  ;;  %v11851_v33 = vcombine.high %v11820_v9, %v11820_v9  ;;  %v1054_v6 = vrot.slane %v11816_v59, 7 }
 0x107   : > { %v4188_v28 = vsel %vm4181_vm15, %v4162_v54, %v3842_v13  ;;  %v11841_v45 = vrot.slane %v1991_v1, %v10038_v5  ;;  %v11859_v16 = vrot.slane %v2466_v3, %v10038_v5  ;;  %v3165_v61 = vrot.slane %v3157_v53, %v10038_v5 }
 0x108   : > { %3976 = vrot.lane.b32.xlu1 %v3911_v43, %s9972_s12  ;;  %3346 = vrot.lane.b32.xlu0 %v3156_v7, %s9973_s13  ;;  %v3158_v7 = vcombine.low %v11661_v40, %v1043_v4  ;;  %v16683_v40 = vld [vmem:[#allocation4_spill] sm:$0xff]  ;;  %v16684_v4 = vld [vmem:[#allocation2_spill] sm:$0xff]  ;;  %v9554_v18 = vcombine.high %v11578_v30, %v11664_v62  ;;  %v16685_v1 = vrot.slane %v11725_v15, 7  ;;  %v1059_v3 = vrot.slane %v1057_v49, 2 }
 0x109   : > { %v1379_v24 = vcombine.low %v16684_v4, %v16683_v40  ;;  %v9538_v53 = vrot.slane %v11820_v9, 9  ;;  %v700_v62 = vcombine.high %v11795_v48, %v11795_v48  ;;  %v1551_v4 = vcombine.low %v11725_v15, %v11816_v59 }
 0x10a   : > { %v3963_v11 = vpop.permute.xlu1 %3962  ;;  %v3333_v43 = vpop.permute.xlu0 %3332  ;;  %v3172_v51 = vrot.slane %v3158_v7, %v10038_v5  ;;  %v1053_v54 = vrot.slane %v16685_v1, 2  ;;  %v1567_v1 = vcombine.low %v11801_v27, %v11820_v9 }
 0x10b   : > { %v4214_v21 = vsel %vm4207_vm0, %v4188_v28, %v3963_v11  ;;  %v3763_v28 = vcombine.low %v11838_v52, %v11841_v45  ;;  %v2762_v11 = vcombine.low %v11736_v46, %v2761_v57  ;;  %v3472_v57 = vrot.slane %v9554_v18, %v10038_v5 }
 0x10c   : > { %3563 = vrot.lane.b32.xlu1 %v11786_v60, %s9967_s30  ;;  %2131 = vrot.lane.b32.xlu0 %v1956_v47, %s9971_s11  ;;  %v11862_v47 = vrot.slane %v2482_v22, %v10038_v5  ;;  %v1060_v22 = vrot.slane %v11845_v20, 7  ;;  %v3173_v40 = vcombine.low %v3165_v61, %v3172_v51  ;;  %v4033_v48 = vsel %vm4025_vm9, %v1379_v24, %v11730_v36 }
 0x10d   : > { %9758 = vmatmul.mubr.msk.f32.gmra.mxu0 %vm4245_vm1, %v4214_v21  ;;  %v1056_v21 = vrot.slane %v1054_v6, 2  ;;  %v1055_v30 = vsel %vm10175_vm6, %v1053_v54, %v1054_v6  ;;  %v4059_v15 = vsel %vm4051_vm10, %v4033_v48, %v11749_v29  ;;  %v16686_v36 = vrot.slane %v11851_v33, 7 }
 0x10e   : > { %v3550_v0 = vpop.permute.xlu1 %3549  ;;  %v11856_v13 = vpop.permute.xlu0 %2117  ;;  %9760 = vmatprep.mubr.msk.f32.mxu0 %vm9976_vm8, %v16668_v25  ;;  %v11901_v61 = vsel %vm10175_vm6, %v1059_v3, %v1060_v22  ;;  %v11916_v18 = vrot.slane %v700_v62, %v10038_v5  ;;  %v4085_v6 = vsel %vm4077_vm11, %v4059_v15, %v11782_v58  ;;  %v1973_v29 = vcombine.low %v11599_v17, %v11717_v14 }
 0x10f   : > { %v11907_v51 = vsel %vm10175_vm6, %v1056_v21, %v1057_v49  ;;  %v11913_v24 = vsel %vm10175_vm6, %v9538_v53, %v16686_v36  ;;  %v300_v49 = vld [vmem:[%s10036_s29 + $0xb8] sm:$0xff]  ;;  %v3473_v3 = vcombine.low %v11683_v44, %v3472_v57  ;;  %v1565_v22 = vrot.slane %v1551_v4, %v10038_v5 }
 0x110   : > { %3702 = vrot.lane.b32.xlu1 %v3624_v39, %s9970_s10  ;;  %2622 = vrot.lane.b32.xlu0 %v2447_v31, %s9968_s8  ;;  %v11886_v31 = vcombine.low %v11859_v16, %v11862_v47  ;;  %v11929_v21 = vrot.slane %v1567_v1, %v10038_v5  ;;  %v1992_v58 = vcombine.low %v1055_v30, %v11907_v51 }
 0x111   : > { %v2008_v17 = vcombine.low %v11901_v61, %v11913_v24  ;;  %v11944_v62 = vrot.slane %v300_v49, %v10038_v5  ;;  %v2483_v1 = vcombine.low %v11816_v59, %v11801_v27  ;;  %v3174_v15 = vcombine.low %v11768_v56, %v11772_v38 }
 0x112   : > { %v3689_v7 = vpop.permute.xlu1 %3688  ;;  %v11882_v39 = vpop.permute.xlu0 %2608  ;;  %16687 = vst [vmem:[#allocation4_spill] sm:$0xff] %v11929_v21  ;;  %v3175_v36 = vcombine.low %v11778_v35, %v1055_v30  ;;  %v12025_v8 = vcombine.low %v11792_v41, %v1565_v22 }
 0x113   : > { %v11964_v59 = vrot.slane %v2008_v17, %v10038_v5  ;;  %v11970_v56 = vcombine.high %v11944_v62, %v11944_v62  ;;  %v1073_v35 = vrot.slane %v11944_v62, 7  ;;  %v16688_v17 = vld [vmem:[#allocation6_spill] sm:$0xff] }
 0x114   : > { %3857 = vrot.lane.b32.xlu1 %v3763_v28, %s9974_s14  ;;  %2857 = vrot.lane.b32.xlu0 %v2762_v11, %s9969_s9  ;;  %v4111_v11 = vsel %vm4103_vm12, %v4085_v6, %v3333_v43  ;;  %v11941_v43 = vcombine.high %v11916_v18, %v11916_v18  ;;  %v717_v6 = vcombine.high %v300_v49, %v300_v49 }
 0x115   : > { %v4137_v53 = vsel %vm4129_vm13, %v4111_v11, %v3550_v0  ;;  %v11977_v49 = vrot.slane %v2483_v1, %v10038_v5  ;;  %v16690_v1 = vrot.slane %v11851_v33, 7  ;;  %16691 = vst [vmem:[#allocation2_spill] sm:$0xff] %v12025_v8 }
 0x116   : > { %v3844_v54 = vpop.permute.xlu1 %3843  ;;  %v11920_v28 = vpop.permute.xlu0 %2843  ;;  %v4163_v14 = vsel %vm4155_vm14, %v4137_v53, %v3689_v7  ;;  %v9548_v7 = vcombine.high %v11801_v27, %v11820_v9  ;;  %v1070_v38 = vrot.slane %v11941_v43, 7  ;;  %v3189_v53 = vrot.slane %v3175_v36, %v10038_v5 }
 0x117   : > { %v4189_v0 = vsel %vm4181_vm15, %v4163_v14, %v3844_v54  ;;  %v1067_v54 = vrot.slane %v11916_v18, 7  ;;  %v16689_v14 = vld [vmem:[#allocation5_spill] sm:$0xff]  ;;  %v1076_v36 = vrot.slane %v11970_v56, 7 }
 0x118   : > { %3978 = vrot.lane.b32.xlu1 %v11886_v31, %s9972_s12  ;;  %3348 = vrot.lane.b32.xlu0 %v3173_v40, %s9973_s13  ;;  %v2464_v40 = vcombine.low %v11622_v37, %v11736_v46  ;;  %v3625_v37 = vcombine.low %v1565_v22, %v11929_v21  ;;  %v11961_v46 = vrot.slane %v1992_v58, %v10038_v5  ;;  %v1075_v21 = vrot.slane %v1073_v35, 2 }
 0x119   : > { %v11982_v11 = vrot.slane %v9548_v7, %v10038_v5  ;;  %v11987_v58 = vrot.slane %v717_v6, %v10038_v5  ;;  %v1066_v7 = vrot.slane %v16690_v1, 2 }
 0x11a   : > { %v3965_v57 = vpop.permute.xlu1 %3964  ;;  %v3335_v4 = vpop.permute.xlu0 %3334 }
 0x11b   : > { %v4215_v48 = vsel %vm4207_vm0, %v4189_v0, %v3965_v57  ;;  %v1396_v0 = vcombine.low %v16689_v14, %v16688_v17  ;;  %v3764_v57 = vcombine.low %v11961_v46, %v11964_v59  ;;  %v1568_v17 = vcombine.low %v11851_v33, %v11916_v18 }
 0x11c   : > { %3565 = vrot.lane.b32.xlu1 %v3473_v3, %s9967_s30  ;;  %2133 = vrot.lane.b32.xlu0 %v1973_v29, %s9971_s11  ;;  %v3182_v3 = vrot.slane %v3174_v15, %v10038_v5  ;;  %v1072_v15 = vrot.slane %v1070_v38, 2  ;;  %v1584_v14 = vcombine.low %v11941_v43, %v11944_v62  ;;  %v12008_v1 = vcombine.high %v11987_v58, %v11987_v58 }
 0x11d   : > { %9761 = vmatmul.mubr.msk.f32.gmra.mxu0 %vm4245_vm1, %v4215_v48  ;;  %v1069_v48 = vrot.slane %v1067_v54, 2  ;;  %v4034_v63 = vsel %vm4025_vm9, %v1396_v0, %v11856_v13  ;;  %v1068_v60 = vsel %vm10175_vm6, %v1066_v7, %v1067_v54  ;;  %v12042_v41 = vrot.slane %v1568_v17, %v10038_v5 }
 0x11e   : > { %v3552_v30 = vpop.permute.xlu1 %3551  ;;  %v11974_v29 = vpop.permute.xlu0 %2119  ;;  %9763 = vmatprep.mubr.msk.f32.mxu0 %vm9976_vm8, %v16668_v25  ;;  %v4060_v19 = vsel %vm4051_vm10, %v4034_v63, %v11882_v39  ;;  %v12029_v13 = vsel %vm10175_vm6, %v1072_v15, %v1073_v35  ;;  %v1990_v63 = vcombine.low %v11720_v10, %v11838_v52  ;;  %v2764_v39 = vcombine.low %v11820_v9, %v11851_v33 }
 0x11f   : > { %v4086_v54 = vsel %vm4077_vm11, %v4060_v19, %v11920_v28  ;;  %16692 = vst [vmem:[#allocation6_spill] sm:$0xff] %v12042_v41  ;;  %v1078_v19 = vrot.slane %v1076_v36, 2  ;;  %v1082_v9 = vrot.slane %v12008_v1, 7  ;;  %v2516_v17 = vcombine.low %v11944_v62, %v11970_v56 }
 0x120   : > { %3704 = vrot.lane.b32.xlu1 %v3625_v37, %s9970_s10  ;;  %2624 = vrot.lane.b32.xlu0 %v2464_v40, %s9968_s8  ;;  %v3912_v40 = vcombine.low %v11977_v49, %v11982_v11  ;;  %v3190_v37 = vcombine.low %v3182_v3, %v3189_v53  ;;  %v12019_v3 = vsel %vm10175_vm6, %v1069_v48, %v1070_v38  ;;  %v1079_v53 = vrot.slane %v11987_v58, 7 }
 0x121   : > { %v4112_v22 = vsel %vm4103_vm12, %v4086_v54, %v3335_v4  ;;  %v2009_v35 = vcombine.low %v1068_v60, %v12019_v3  ;;  %v2481_v4 = vcombine.low %v11739_v32, %v11859_v16  ;;  %v2771_v15 = vrot.slane %v2764_v39, %v10038_v5  ;;  %v302_v39 = vld [vmem:[%s10036_s29 + $0xc8] sm:$0xff] }
 0x122   : > { %v3691_v6 = vpop.permute.xlu1 %3690  ;;  %v11998_v44 = vpop.permute.xlu0 %2610  ;;  %v4138_v28 = vsel %vm4129_vm13, %v4112_v22, %v3552_v30  ;;  %v1081_v52 = vrot.slane %v1079_v53, 2 }
 0x123   : > { %v4164_v33 = vsel %vm4155_vm14, %v4138_v28, %v3691_v6  ;;  %v12073_v16 = vrot.slane %v2009_v35, %v10038_v5  ;;  %v2772_v35 = vcombine.low %v11977_v49, %v2771_v15 }
 0x124   : > { %3859 = vrot.lane.b32.xlu1 %v3764_v57, %s9974_s14  ;;  %2859 = vrot.lane.b32.xlu0 %v11886_v31, %s9969_s9  ;;  %v12033_v31 = vsel %vm10175_vm6, %v1075_v21, %v1076_v36  ;;  %v12048_v21 = vrot.slane %v1584_v14, %v10038_v5  ;;  %v3191_v57 = vcombine.low %v11907_v51, %v11901_v61 }
 0x125   : > { %v2025_v10 = vcombine.low %v12029_v13, %v12033_v31  ;;  %v2500_v36 = vcombine.low %v11916_v18, %v11941_v43  ;;  %v3192_v61 = vcombine.low %v11913_v24, %v1068_v60  ;;  %v12084_v18 = vsel %vm10175_vm6, %v1078_v19, %v1079_v53 }
 0x126   : > { %v3846_v38 = vpop.permute.xlu1 %3845  ;;  %v12037_v0 = vpop.permute.xlu0 %2845  ;;  %v3626_v32 = vcombine.low %v12042_v41, %v12048_v21  ;;  %v12088_v43 = vsel %vm10175_vm6, %v1081_v52, %v1082_v9  ;;  %v12100_v14 = vrot.slane %v2516_v17, %v10038_v5  ;;  %v3199_v54 = vrot.slane %v3191_v57, %v10038_v5 }
 0x127   : > { %v4190_v30 = vsel %vm4181_vm15, %v4164_v33, %v3846_v38  ;;  %v12080_v51 = vrot.slane %v2025_v10, %v10038_v5  ;;  %v3206_v38 = vrot.slane %v3192_v61, %v10038_v5  ;;  %v3474_v19 = vcombine.low %v11801_v27, %v11845_v20 }
 0x128   : > { %3980 = vrot.lane.b32.xlu1 %v3912_v40, %s9972_s12  ;;  %3350 = vrot.lane.b32.xlu0 %v3190_v37, %s9973_s13  ;;  %v301_v40 = vld [vmem:[%s10036_s29 + $0xc0] sm:$0xff]  ;;  %v12097_v37 = vrot.slane %v2500_v36, %v10038_v5  ;;  %v2007_v27 = vcombine.low %v11841_v45, %v11961_v46  ;;  %v12135_v20 = vrot.slane %v302_v39, %v10038_v5 }
 0x129   : > { %v12092_v60 = vrot.slane %v301_v40, %v10038_v5  ;;  %v733_v53 = vcombine.high %v301_v40, %v301_v40  ;;  %v3765_v22 = vcombine.low %v12073_v16, %v12080_v51  ;;  %v3207_v57 = vcombine.low %v3199_v54, %v3206_v38 }
 0x12a   : > { %v3967_v7 = vpop.permute.xlu1 %3966  ;;  %v3337_v48 = vpop.permute.xlu0 %3336  ;;  %v12124_v9 = vcombine.low %v12097_v37, %v12100_v14  ;;  %v2498_v36 = vcombine.low %v11862_v47, %v11977_v49  ;;  %v1585_v17 = vcombine.low %v11970_v56, %v11987_v58  ;;  %v3481_v46 = vrot.slane %v3474_v19, %v10038_v5 }
 0x12b   : > { %v4216_v6 = vsel %vm4207_vm0, %v4190_v30, %v3967_v7  ;;  %v12118_v28 = vcombine.high %v12092_v60, %v12092_v60  ;;  %v12127_v33 = vrot.slane %v733_v53, %v10038_v5  ;;  %v16693_v7 = vld [vmem:[#allocation7_spill] sm:$0xff]  ;;  %v9539_v61 = vrot.slane %v12092_v60, 9 }
 0x12c   : > { %3567 = vrot.lane.b32.xlu1 %v12025_v8, %s9967_s30  ;;  %2135 = vrot.lane.b32.xlu0 %v1990_v63, %s9971_s11  ;;  %v2026_v63 = vcombine.low %v12084_v18, %v12088_v43  ;;  %v4035_v15 = vsel %vm4025_vm9, %v16693_v7, %v11974_v29 }
 0x12d   : > { %9764 = vmatmul.mubr.msk.f32.gmra.mxu0 %vm4245_vm1, %v4216_v6  ;;  %v1086_v40 = vrot.slane %v12118_v28, 7  ;;  %v4061_v45 = vsel %vm4051_vm10, %v4035_v15, %v11998_v44  ;;  %v1601_v29 = vcombine.low %v12092_v60, %v12118_v28  ;;  %v2517_v6 = vcombine.low %v11987_v58, %v12008_v1 }
 0x12e   : > { %v3554_v24 = vpop.permute.xlu1 %3553  ;;  %v12094_v62 = vpop.permute.xlu0 %2121  ;;  %9766 = vmatprep.mubr.msk.f32.mxu0 %vm9976_vm8, %v16668_v25  ;;  %v12130_v30 = vrot.slane %v2026_v63, %v10038_v5  ;;  %v12160_v56 = vcombine.high %v12127_v33, %v12127_v33  ;;  %v1089_v54 = vrot.slane %v12127_v33, 7  ;;  %v12190_v15 = vrot.slane %v1585_v17, %v10038_v5 }
 0x12f   : > { %v1088_v63 = vrot.slane %v1086_v40, 2  ;;  %v12207_v17 = vsel %vm10175_vm6, %v9539_v61, %v1086_v40  ;;  %v3208_v40 = vcombine.low %v12019_v3, %v12029_v13  ;;  %v3209_v61 = vcombine.low %v12033_v31, %v12084_v18 }
 0x130   : > { %3706 = vrot.lane.b32.xlu1 %v3626_v32, %s9970_s10  ;;  %2626 = vrot.lane.b32.xlu0 %v2481_v4, %s9968_s8  ;;  %v750_v4 = vcombine.high %v302_v39, %v302_v39  ;;  %v4087_v32 = vsel %vm4077_vm11, %v4061_v45, %v12037_v0  ;;  %v2041_v1 = vcombine.low %v12080_v51, %v12130_v30  ;;  %v1092_v39 = vrot.slane %v12160_v56, 7 }
 0x131   : > { %v4113_v53 = vsel %vm4103_vm12, %v4087_v32, %v3337_v48  ;;  %v12171_v0 = vcombine.high %v12135_v20, %v12135_v20  ;;  %v1095_v48 = vrot.slane %v12135_v20, 7  ;;  %v12193_v45 = vrot.slane %v2517_v6, %v10038_v5 }
 0x132   : > { %v3693_v10 = vpop.permute.xlu1 %3692  ;;  %v12120_v52 = vpop.permute.xlu0 %2612  ;;  %v12163_v44 = vrot.slane %v750_v4, %v10038_v5  ;;  %v4139_v38 = vsel %vm4129_vm13, %v4113_v53, %v3554_v24  ;;  %v12197_v32 = vrot.slane %v1601_v29, %v10038_v5  ;;  %v2534_v53 = vcombine.low %v12160_v56, %v12135_v20 }
 0x133   : > { %v4165_v51 = vsel %vm4155_vm14, %v4139_v38, %v3693_v10  ;;  %v1094_v29 = vrot.slane %v1092_v39, 2  ;;  %v1097_v6 = vrot.slane %v1095_v48, 2  ;;  %v1091_v18 = vrot.slane %v1089_v54, 2 }
 0x134   : > { %3861 = vrot.lane.b32.xlu1 %v3765_v22, %s9974_s14  ;;  %2861 = vrot.lane.b32.xlu0 %v2772_v35, %s9969_s9  ;;  %v12183_v22 = vcombine.high %v12163_v44, %v12163_v44  ;;  %v1098_v35 = vrot.slane %v12171_v0, 7  ;;  %v1101_v24 = vrot.slane %v12163_v44, 7  ;;  %16694 = vst [vmem:[#allocation5_spill] sm:$0xff] %v12197_v32  ;;  %v3627_v3 = vcombine.low %v12190_v15, %v12197_v32 }
 0x135   : > { %v1096_v13 = vsel %vm10175_vm6, %v1094_v29, %v1095_v48  ;;  %v3223_v48 = vrot.slane %v3209_v61, %v10038_v5  ;;  %v303_v29 = vld [vmem:[%s10036_s29 + $0xd0] sm:$0xff] }
 0x136   : > { %v3848_v47 = vpop.permute.xlu1 %3847  ;;  %v12156_v49 = vpop.permute.xlu0 %2847  ;;  %v1100_v38 = vrot.slane %v1098_v35, 2  ;;  %v12243_v31 = vsel %vm10175_vm6, %v1097_v6, %v1098_v35 }
 0x137   : > { %v4191_v19 = vsel %vm4181_vm15, %v4165_v51, %v3848_v47  ;;  %v2550_v47 = vcombine.low %v12171_v0, %v12163_v44  ;;  %v1103_v51 = vrot.slane %v1101_v24, 2  ;;  %v3242_v6 = vcombine.low %v1096_v13, %v12243_v31 }
 0x138   : > { %3982 = vrot.lane.b32.xlu1 %v12124_v9, %s9972_s12  ;;  %3352 = vrot.lane.b32.xlu0 %v3207_v57, %s9973_s13  ;;  %v3482_v57 = vcombine.low %v3481_v46, %v12042_v41  ;;  %v12211_v46 = vsel %vm10175_vm6, %v1088_v63, %v1089_v54  ;;  %v2532_v63 = vcombine.low %v12100_v14, %v12193_v45 }
 0x139   : > { %v12247_v14 = vsel %vm10175_vm6, %v1100_v38, %v1101_v24  ;;  %v2533_v24 = vcombine.low %v12118_v28, %v12127_v33 }
 0x13a   : > { %v3969_v4 = vpop.permute.xlu1 %3968  ;;  %v3339_v7 = vpop.permute.xlu0 %3338 }
 0x13b   : > { %v4217_v10 = vsel %vm4207_vm0, %v4191_v19, %v3969_v4  ;;  %v1104_v19 = vrot.slane %v12183_v22, 7  ;;  %v16695_v4 = vld [vmem:[#allocation8_spill] sm:$0xff]  ;;  %v12288_v32 = vrot.slane %v2533_v24, %v10038_v5 }
 0x13c   : > { %2141 = vrot.lane.b32.xlu1 %v2041_v1, %s9971_s11  ;;  %2137 = vrot.lane.b32.xlu0 %v2007_v27, %s9971_s11  ;;  %v1430_v1 = vcombine.low %v10809_v50, %v16695_v4  ;;  %v12231_v50 = vrot.slane %v2550_v47, %v10038_v5  ;;  %v2042_v4 = vcombine.low %v12207_v17, %v12211_v46 }
 0x13d   : > { %9767 = vmatmul.mubr.msk.f32.gmra.mxu0 %vm4245_vm1, %v4217_v10  ;;  %v12228_v10 = vrot.slane %v2534_v53, %v10038_v5  ;;  %v3216_v47 = vrot.slane %v3208_v40, %v10038_v5  ;;  %v766_v40 = vcombine.high %v303_v29, %v303_v29 }
 0x13e   : > { %v3556_v27 = vpop.permute.xlu1 %3555  ;;  %v12217_v41 = vpop.permute.xlu0 %2123  ;;  %9769 = vmatprep.mubr.msk.f32.mxu0 %vm9976_vm8, %v16668_v25  ;;  %v12263_v54 = vrot.slane %v2042_v4, %v10038_v5  ;;  %v4036_v38 = vsel %vm4025_vm9, %v1430_v1, %v12094_v62 }
 0x13f   : > { %v12260_v35 = vcombine.low %v12228_v10, %v12231_v50  ;;  %v4062_v28 = vsel %vm4051_vm10, %v4036_v38, %v12120_v52  ;;  %v3224_v1 = vcombine.low %v3216_v47, %v3223_v48  ;;  %v1618_v47 = vcombine.low %v12135_v20, %v12171_v0 }
 0x140   : > { %2628 = vrot.lane.b32.xlu1 %v2498_v36, %s9968_s8  ;;  %3569 = vrot.lane.b32.xlu0 %v3482_v57, %s9967_s30  ;;  %v12251_v36 = vsel %vm10175_vm6, %v1103_v51, %v1104_v19  ;;  %v12276_v19 = vsel %vm10175_vm6, %v1091_v18, %v1092_v39  ;;  %v4088_v61 = vsel %vm4077_vm11, %v4062_v28, %v12156_v49  ;;  %v304_v18 = vld [vmem:[%s10036_s29 + $0xd8] sm:$0xff] }
 0x141   : > { %v3243_v51 = vcombine.low %v12247_v14, %v12251_v36  ;;  %v2043_v39 = vcombine.low %v12276_v19, %v1096_v13  ;;  %v3250_v49 = vrot.slane %v3242_v6, %v10038_v5  ;;  %v12303_v13 = vrot.slane %v766_v40, %v10038_v5 }
 0x142   : > { %v3695_v57 = vpop.permute.xlu1 %3694  ;;  %v12253_v53 = vpop.permute.xlu0 %2614  ;;  %v3492_v38 = vcombine.low %v12163_v44, %v12183_v22  ;;  %v12309_v6 = vrot.slane %v304_v18, %v10038_v5  ;;  %v3913_v20 = vcombine.low %v12193_v45, %v12288_v32  ;;  %v12321_v22 = vrot.slane %v1618_v47, %v10038_v5 }
 0x143   : > { %v12325_v28 = vcombine.high %v12303_v13, %v12303_v13 }
 0x144   : > { %3708 = vrot.lane.b32.xlu1 %v3627_v3, %s9970_s10  ;;  %2632 = vrot.lane.b32.xlu0 %v2532_v63, %s9968_s8  ;;  %v4114_v63 = vsel %vm4103_vm12, %v4088_v61, %v3339_v7  ;;  %v3766_v3 = vcombine.low %v12130_v30, %v12263_v54  ;;  %v3257_v7 = vrot.slane %v3243_v51, %v10038_v5 }
 0x145   : > { %v4140_v52 = vsel %vm4129_vm13, %v4114_v63, %v3556_v27  ;;  %v12340_v63 = vrot.slane %v303_v29, %v10038_v5  ;;  %v2567_v8 = vcombine.low %v12303_v13, %v12325_v28 }
 0x146   : > { %v3850_v4 = vpop.permute.xlu1 %3849  ;;  %v12282_v62 = vpop.permute.xlu0 %2849  ;;  %v4166_v30 = vsel %vm4155_vm14, %v4140_v52, %v3695_v57  ;;  %v3258_v0 = vcombine.low %v3250_v49, %v3257_v7  ;;  %v12317_v57 = vrot.slane %v2043_v39, %v10038_v5  ;;  %v16549_v39 = vrot.slane %v12325_v28, 7 }
 0x147   : > { %v4192_v27 = vsel %vm4181_vm15, %v4166_v30, %v3850_v4  ;;  %v3499_v4 = vrot.slane %v3492_v38, %v10038_v5  ;;  %v1602_v30 = vcombine.low %v12127_v33, %v12160_v56  ;;  %v1636_v38 = vcombine.low %v12325_v28, %v12309_v6 }
 0x148   : > { %2867 = vrot.lane.b32.xlu1 %v12260_v35, %s9969_s9  ;;  %2863 = vrot.lane.b32.xlu0 %v12124_v9, %s9969_s9  ;;  %v783_v9 = vcombine.high %v304_v18, %v304_v18  ;;  %v1117_v18 = vrot.slane %v12309_v6, 7  ;;  %v2058_v52 = vcombine.low %v12263_v54, %v12317_v57  ;;  %v2774_v33 = vcombine.low %v11987_v58, %v12092_v60 }
 0x149   : > { %v1116_v56 = vrot.slane %v16549_v39, 2  ;;  %v1111_v39 = vrot.slane %v12303_v13, 7 }
 0x14a   : > { %v3971_v48 = vpop.permute.xlu1 %3970  ;;  %v3341_v24 = vpop.permute.xlu0 %3340  ;;  %v12333_v45 = vrot.slane %v783_v9, %v10038_v5 }
 0x14b   : > { %v4218_v51 = vsel %vm4207_vm0, %v4192_v27, %v3971_v48  ;;  %v3500_v27 = vcombine.low %v12321_v22, %v3499_v4  ;;  %v2515_v48 = vcombine.low %v11982_v11, %v12097_v37  ;;  %v4037_v11 = vsel %vm4025_vm9, %v11193_v55, %v12217_v41 }
 0x14c   : > { %3354 = vrot.lane.b32.xlu1 %v3224_v1, %s9973_s13  ;;  %3863 = vrot.lane.b32.xlu0 %v3766_v3, %s9974_s14  ;;  %v12337_v1 = vcombine.high %v12309_v6, %v12309_v6  ;;  %v2024_v3 = vcombine.low %v11964_v59, %v12073_v16  ;;  %v12352_v49 = vcombine.high %v12333_v45, %v12333_v45  ;;  %v1123_v7 = vrot.slane %v12333_v45, 7 }
 0x14d   : > { %9770 = vmatmul.mubr.msk.f32.gmra.mxu0 %vm4245_vm1, %v4218_v51  ;;  %v12358_v59 = vcombine.low %v12048_v21, %v12190_v15  ;;  %v2549_v16 = vcombine.low %v12288_v32, %v12228_v10  ;;  %v12373_v21 = vcombine.high %v12340_v63, %v12340_v63  ;;  %v1119_v10 = vrot.slane %v1117_v18, 2 }
 0x14e   : > { %v3558_v40 = vpop.permute.xlu1 %3557  ;;  %v12327_v61 = vpop.permute.xlu0 %2125  ;;  %9772 = vmatprep.mubr.msk.f32.mxu0 %vm9976_vm8, %v16668_v25  ;;  %v1120_v29 = vrot.slane %v12337_v1, 7  ;;  %v1652_v15 = vcombine.low %v12337_v1, %v12333_v45  ;;  %v1125_v9 = vrot.slane %v1123_v7, 2  ;;  %v1126_v51 = vrot.slane %v12352_v49, 7 }
 0x14f   : > { %v1108_v4 = vrot.slane %v12373_v21, 7 }
 0x150   : > { %3984 = vrot.lane.b32.xlu1 %v3913_v20, %s9972_s12  ;;  %3358 = vrot.lane.b32.xlu0 %v3258_v0, %s9973_s13  ;;  %v1122_v37 = vrot.slane %v1120_v29, 2  ;;  %v4063_v20 = vsel %vm4051_vm10, %v4037_v11, %v12253_v53  ;;  %v12390_v0 = vrot.slane %v1602_v30, %v10038_v5  ;;  %v2784_v53 = vcombine.low %v12340_v63, %v12373_v21 }
 0x151   : > { %v4089_v55 = vsel %vm4077_vm11, %v4063_v20, %v12282_v62  ;;  %v12407_v11 = vrot.slane %v1652_v15, %v10038_v5  ;;  %v1118_v62 = vsel %vm10175_vm6, %v1116_v56, %v1117_v18  ;;  %v12413_v20 = vsel %vm10175_vm6, %v1119_v10, %v1120_v29 }
 0x152   : > { %v3697_v47 = vpop.permute.xlu1 %3696  ;;  %v12364_v54 = vpop.permute.xlu0 %2616  ;;  %v4115_v30 = vsel %vm4103_vm12, %v4089_v55, %v3341_v24  ;;  %v12421_v24 = vsel %vm10175_vm6, %v1122_v37, %v1123_v7  ;;  %v12425_v15 = vsel %vm10175_vm6, %v1125_v9, %v1126_v51  ;;  %v9540_v29 = vrot.slane %v12340_v63, 9 }
 0x153   : > { %v1110_v56 = vrot.slane %v1108_v4, 2  ;;  %v1113_v10 = vrot.slane %v1111_v39, 2  ;;  %v2059_v7 = vcombine.low %v12243_v31, %v12247_v14  ;;  %v2781_v9 = vrot.slane %v2774_v33, %v10038_v5 }
 0x154   : > { %2143 = vrot.lane.b32.xlu1 %v2058_v52, %s9971_s11  ;;  %2139 = vrot.lane.b32.xlu0 %v2024_v3, %s9971_s11  ;;  %v12399_v3 = vrot.slane %v1636_v38, %v10038_v5  ;;  %v4141_v38 = vsel %vm4129_vm13, %v4115_v30, %v3558_v40  ;;  %v3628_v30 = vcombine.low %v12390_v0, %v12321_v22 }
 0x155   : > { %v4167_v18 = vsel %vm4155_vm14, %v4141_v38, %v3697_v47  ;;  %v2077_v47 = vcombine.low %v1118_v62, %v12413_v20  ;;  %v2093_v51 = vcombine.low %v12421_v24, %v12425_v15  ;;  %v12444_v38 = vrot.slane %v2567_v8, %v10038_v5 }
 0x156   : > { %v3852_v41 = vpop.permute.xlu1 %3851  ;;  %v12396_v52 = vpop.permute.xlu0 %2851  ;;  %v2791_v31 = vrot.slane %v2784_v53, %v10038_v5  ;;  %v12450_v14 = vsel %vm10175_vm6, %v9540_v29, %v1108_v4  ;;  %v12454_v33 = vsel %vm10175_vm6, %v1110_v56, %v1111_v39  ;;  %v1464_v8 = vcombine.low %v11067_v34, %v11203_v42 }
 0x157   : > { %v4193_v40 = vsel %vm4181_vm15, %v4167_v18, %v3852_v41  ;;  %v3630_v41 = vcombine.low %v12399_v3, %v12407_v11  ;;  %v3225_v4 = vcombine.low %v12088_v43, %v12207_v17  ;;  %v3226_v39 = vcombine.low %v12211_v46, %v12276_v19 }
 0x158   : > { %3575 = vrot.lane.b32.xlu1 %v3500_v27, %s9967_s30  ;;  %3571 = vrot.lane.b32.xlu0 %v12358_v59, %s9967_s30  ;;  %v2782_v29 = vcombine.low %v2781_v9, %v12288_v32  ;;  %v12475_v56 = vrot.slane %v2077_v47, %v10038_v5  ;;  %v12478_v34 = vrot.slane %v2093_v51, %v10038_v5 }
 0x159   : > { %v12481_v42 = vrot.slane %v2059_v7, %v10038_v5  ;;  %v2792_v43 = vcombine.low %v2791_v31, %v12444_v38  ;;  %v3259_v17 = vcombine.low %v12450_v14, %v12454_v33  ;;  %v2568_v46 = vcombine.low %v12309_v6, %v12337_v1 }
 0x15a   : > { %v3973_v27 = vpop.permute.xlu1 %3972  ;;  %v3343_v55 = vpop.permute.xlu0 %3342  ;;  %v3240_v7 = vrot.slane %v3226_v39, %v10038_v5  ;;  %v4038_v9 = vsel %vm4025_vm9, %v1464_v8, %v12327_v61 }
 0x15b   : > { %v4219_v37 = vsel %vm4207_vm0, %v4193_v40, %v3973_v27  ;;  %v3233_v27 = vrot.slane %v3225_v4, %v10038_v5  ;;  %v3767_v6 = vcombine.low %v12317_v57, %v12481_v42  ;;  %v12515_v47 = vrot.slane %v2568_v46, %v10038_v5 }
 0x15c   : > { %2634 = vrot.lane.b32.xlu1 %v2549_v16, %s9968_s8  ;;  %2630 = vrot.lane.b32.xlu0 %v2515_v48, %s9968_s8  ;;  %v16696_v16 = vrot.slane %v12325_v28, 7  ;;  %v305_v28 = vld [vmem:[%s10036_s29 + $0xe0] sm:$0xff]  ;;  %v2060_v4 = vcombine.low %v12251_v36, %v12450_v14  ;;  %v1635_v36 = vcombine.low %v12373_v21, %v12303_v13 }
 0x15d   : > { %9773 = vmatmul.mubr.msk.f32.gmra.mxu0 %vm4245_vm1, %v4219_v37  ;;  %v1130_v19 = vcombine.high %v305_v28, %v305_v28  ;;  %v9555_v37 = vcombine.high %v11987_v58, %v12092_v60  ;;  %v12504_v1 = vrot.slane %v305_v28, %v10038_v5  ;;  %v4064_v60 = vsel %vm4051_vm10, %v4038_v9, %v12364_v54 }
 0x15e   : > { %v12460_v48 = vsel %vm10175_vm6, %v1113_v10, %v16696_v16  ;;  %v3560_v53 = vpop.permute.xlu1 %3559  ;;  %v12464_v18 = vpop.permute.xlu0 %2127  ;;  %9775 = vmatprep.mubr.msk.f32.mxu0 %vm9976_vm8, %v16668_v25  ;;  %v4090_v61 = vsel %vm4077_vm11, %v4064_v60, %v12396_v52  ;;  %v3241_v31 = vcombine.low %v3233_v27, %v3240_v7 }
 0x15f   : > { %v3260_v32 = vcombine.low %v12460_v48, %v1118_v62  ;;  %v3769_v62 = vcombine.low %v12475_v56, %v12478_v34  ;;  %v12518_v57 = vrot.slane %v1130_v19, %v10038_v5  ;;  %v12528_v8 = vrot.slane %v9555_v37, %v10038_v5 }
 0x160   : > { %3714 = vrot.lane.b32.xlu1 %v3630_v41, %s9970_s10  ;;  %3710 = vrot.lane.b32.xlu0 %v3628_v30, %s9970_s10  ;;  %v2584_v30 = vcombine.low %v12333_v45, %v12352_v49  ;;  %v3267_v49 = vrot.slane %v3259_v17, %v10038_v5  ;;  %v4116_v54 = vsel %vm4103_vm12, %v4090_v61, %v3343_v55  ;;  %v9541_v52 = vrot.slane %v12504_v1, 9 }
 0x161   : > { %v3274_v58 = vrot.slane %v3260_v32, %v10038_v5  ;;  %v12535_v39 = vcombine.high %v12504_v1, %v12504_v1  ;;  %v4142_v28 = vsel %vm4129_vm13, %v4116_v54, %v3560_v53  ;;  %v12548_v14 = vcombine.high %v12518_v57, %v12518_v57  ;;  %v12552_v53 = vld [vmem:[%s10036_s29 + $0xe8] sm:$0xff] }
 0x162   : > { %v3699_v10 = vpop.permute.xlu1 %3698  ;;  %v12491_v40 = vpop.permute.xlu0 %2618  ;;  %v12525_v16 = vrot.slane %v2584_v30, %v10038_v5  ;;  %v2076_v13 = vcombine.low %v12454_v33, %v12460_v48  ;;  %v2793_v7 = vcombine.low %v12333_v45, %v12504_v1  ;;  %v1169_v37 = vrot.slane %v12518_v57, 7 }
 0x163   : > { %v4168_v55 = vsel %vm4155_vm14, %v4142_v28, %v3699_v10  ;;  %v1166_v17 = vrot.slane %v12535_v39, 7  ;;  %v1619_v10 = vcombine.low %v12163_v44, %v12340_v63  ;;  %v12581_v33 = vrot.slane %v12552_v53, %v10038_v5 }
 0x164   : > { %2869 = vrot.lane.b32.xlu1 %v2792_v43, %s9969_s9  ;;  %2865 = vrot.lane.b32.xlu0 %v2782_v29, %s9969_s9  ;;  %v3275_v29 = vcombine.low %v3267_v49, %v3274_v58  ;;  %v9549_v43 = vcombine.high %v12163_v44, %v12340_v63  ;;  %v3915_v27 = vcombine.low %v12515_v47, %v12525_v16  ;;  %v1172_v48 = vrot.slane %v12548_v14, 7 }
 0x165   : > { %v12568_v30 = vsel %vm10175_vm6, %v9541_v52, %v1166_v17  ;;  %v12574_v44 = vrot.slane %v2060_v4, %v10038_v5  ;;  %v3510_v9 = vcombine.low %v12518_v57, %v12548_v14  ;;  %v3631_v49 = vcombine.low %v12504_v1, %v12535_v39 }
 0x166   : > { %v3854_v51 = vpop.permute.xlu1 %3853  ;;  %v12522_v41 = vpop.permute.xlu0 %2853  ;;  %v12577_v63 = vrot.slane %v9549_v43, %v10038_v5  ;;  %v12599_v61 = vrot.slane %v1619_v10, %v10038_v5  ;;  %v3277_v54 = vcombine.low %v12425_v15, %v12568_v30  ;;  %v3491_v4 = vcombine.low %v12528_v8, %v12390_v0  ;;  %v12624_v8 = vld [vmem:[%s16526_s2] ss:$0 sm:$0xff] }
 0x167   : > { %v4194_v32 = vsel %vm4181_vm15, %v4168_v55, %v3854_v51  ;;  %v12602_v51 = vrot.slane %v2076_v13, %v10038_v5  ;;  %v12611_v52 = vrot.slane %v2793_v7, %v10038_v5  ;;  %v1168_v28 = vrot.slane %v1166_v17, 2 }
 0x168   : > { %3869 = vrot.lane.b32.xlu1 %v3769_v62, %s9974_s14  ;;  %3865 = vrot.lane.b32.xlu0 %v3767_v6, %s9974_s14  ;;  %v12588_v6 = vrot.slane %v1635_v36, %v10038_v5  ;;  %v2075_v43 = vcombine.low %v12481_v42, %v12574_v44  ;;  %v1175_v15 = vrot.slane %v12581_v33, 7  ;;  %v3638_v42 = vrot.slane %v3631_v49, %v10038_v5 }
 0x169   : > { %v12660_v7 = vcombine.high %v12581_v33, %v12581_v33 }
 0x16a   : > { %v3975_v46 = vpop.permute.xlu1 %3974  ;;  %v12555_v19 = vpop.permute.xlu0 %3344  ;;  %v12628_v55 = vcombine.low %v12588_v6, %v12399_v3 }
 0x16b   : > { %v4220_v21 = vsel %vm4207_vm0, %v4194_v32, %v3975_v46  ;;  %v3629_v32 = vcombine.low %v12599_v61, %v12588_v6  ;;  %v4039_v6 = vsel %vm4025_vm9, %v11430_v12, %v12464_v18  ;;  %v2802_v12 = vcombine.low %v12535_v39, %v12518_v57 }
 0x16c   : > { %3360 = vrot.lane.b32.xlu1 %v3275_v29, %s9973_s13  ;;  %3356 = vrot.lane.b32.xlu0 %v3241_v31, %s9973_s13  ;;  %v3276_v31 = vcombine.low %v12413_v20, %v12421_v24  ;;  %v1171_v29 = vrot.slane %v1169_v37, 2  ;;  %v2566_v20 = vcombine.low %v12231_v50, %v12577_v63  ;;  %v1174_v24 = vrot.slane %v1172_v48, 2 }
 0x16d   : > { %9776 = vmatmul.mubr.msk.f32.gmra.mxu0 %vm4245_vm1, %v4220_v21  ;;  %v1147_v50 = vcombine.high %v12552_v53, %v12552_v53  ;;  %v12652_v53 = vsel %vm10175_vm6, %v1168_v28, %v1169_v37  ;;  %v1178_v39 = vrot.slane %v12660_v7, 7 }
 0x16e   : > { %v3562_v58 = vpop.permute.xlu1 %3561  ;;  %v12594_v60 = vpop.permute.xlu0 %2129  ;;  %9778 = vmatprep.mubr.msk.f32.mxu0 %vm9976_vm8, %v16668_v25  ;;  %v12643_v3 = vrot.slane %v3276_v31, %v10038_v5  ;;  %v12656_v21 = vsel %vm10175_vm6, %v1171_v29, %v1172_v48  ;;  %v12670_v37 = vsel %vm10175_vm6, %v1174_v24, %v1175_v15  ;;  %v4065_v48 = vsel %vm4051_vm10, %v4039_v6, %v12491_v40  ;;  %v12689_v24 = vld [vmem:[%s10036_s29 + $0xf0] sm:$0xff] }
 0x16f   : > { %v4091_v18 = vsel %vm4077_vm11, %v4065_v48, %v12522_v41  ;;  %v3770_v40 = vcombine.low %v12568_v30, %v12652_v53  ;;  %v3771_v57 = vcombine.low %v12656_v21, %v12670_v37  ;;  %v2803_v41 = vcombine.low %v12548_v14, %v12581_v33 }
 0x170   : > { %3990 = vrot.lane.b32.xlu1 %v3915_v27, %s9972_s12  ;;  %3986 = vrot.lane.b32.xlu0 %v12260_v35, %s9972_s12  ;;  %v12631_v35 = vrot.slane %v3510_v9, %v10038_v5  ;;  %v12646_v27 = vrot.slane %v3277_v54, %v10038_v5  ;;  %v12676_v54 = vrot.slane %v1147_v50, %v10038_v5 }
 0x171   : > { %v9556_v30 = vcombine.high %v12333_v45, %v12504_v1  ;;  %v12710_v14 = vrot.slane %v12689_v24, %v10038_v5  ;;  %v3785_v1 = vrot.slane %v3771_v57, %v10038_v5  ;;  %v2810_v57 = vrot.slane %v2802_v12, %v10038_v5 }
 0x172   : > { %v3701_v36 = vpop.permute.xlu1 %3700  ;;  %v12636_v17 = vpop.permute.xlu0 %2620  ;;  %v3639_v31 = vcombine.low %v3638_v42, %v12631_v35  ;;  %v4117_v42 = vsel %vm4103_vm12, %v4091_v18, %v12555_v19  ;;  %v3511_v12 = vcombine.low %v12581_v33, %v12660_v7  ;;  %v16697_v33 = vcombine.low %v12574_v44, %v12602_v51 }
 0x173   : > { %v4391_v10 = vpop.f32.mrf.mxu0  ;;  %v4143_v50 = vsel %vm4129_vm13, %v4117_v42, %v3562_v58  ;;  %v9542_v44 = vrot.slane %v12710_v14, 9 }
 0x174   : > { %v4392_v9 = vadd.f32 %v12624_v8, %v4391_v10  ;;  %3573 = vrot.lane.b32.xlu1 %v3491_v4, %s9967_s30  ;;  %2145 = vrot.lane.b32.xlu0 %v2075_v43, %s9971_s11  ;;  %v4169_v19 = vsel %vm4155_vm14, %v4143_v50, %v3701_v36  ;;  %v3778_v36 = vrot.slane %v3770_v40, %v10038_v5 }
 0x175   : > { %v9741_v49 = vpop.f32.mrf.mxu0 }
 0x176   : > { %v4515_v4 = vmax.f32 %v4392_v9, 0.0  ;;  %v3856_v28 = vpop.permute.xlu1 %3855  ;;  %v12682_v29 = vpop.permute.xlu0 %2855  ;;  %v1177_v9 = vrot.slane %v1175_v15, 2  ;;  %v1181_v15 = vrot.slane %v12676_v54, 7  ;;  %v3786_v43 = vcombine.low %v3778_v36, %v3785_v1 }
 0x178   : > { %v4565_v10 = vcombine.high %v4515_v4, %v4515_v4  ;;  %v12700_v6 = vrot.slane %v4515_v4, %v10038_v5  ;;  %2636 = vrot.lane.b32.xlu1 %v2566_v20, %s9968_s8  ;;  %3577 = vrot.lane.b32.xlu0 %v12628_v55, %s9967_s30  ;;  %v4195_v20 = vsel %vm4181_vm15, %v4169_v19, %v3856_v28  ;;  %v1180_v4 = vrot.slane %v1178_v39, 2 }
 0x179   : > { %v12736_v28 = vcombine.high %v12676_v54, %v12676_v54  ;;  %v3914_v19 = vcombine.low %v12577_v63, %v12444_v38  ;;  %v3640_v63 = vcombine.low %v12676_v54, %v12710_v14  ;;  %v1183_v13 = vrot.slane %v1181_v15, 2 }
 0x17a   : > { %v12713_v58 = vrot.slane %v4565_v10, %v10038_v5  ;;  %v12717_v48 = vcombine.high %v12700_v6, %v12700_v6  ;;  %v3977_v49 = vpop.permute.xlu1 %3976  ;;  %v12720_v18 = vpop.permute.xlu0 %3346  ;;  %v2817_v10 = vrot.slane %v2803_v41, %v10038_v5  ;;  %v12765_v62 = vsel %vm10175_vm6, %v1180_v4, %v1181_v15 }
 0x17b   : > { %v4221_v45 = vsel %vm4207_vm0, %v4195_v20, %v3977_v49  ;;  %v12745_v20 = vcombine.high %v12710_v14, %v12710_v14  ;;  %v2092_v4 = vcombine.low %v12602_v51, %v12475_v56 }
 0x17c   : > { %v12728_v42 = vcombine.high %v12713_v58, %v12713_v58  ;;  %v5247_v50 = vcombine.low %v12700_v6, %v12717_v48  ;;  %3716 = vrot.lane.b32.xlu1 %v3639_v31, %s9970_s10  ;;  %3712 = vrot.lane.b32.xlu0 %v3629_v32, %s9970_s10  ;;  %v12782_v1 = vcombine.low %v2810_v57, %v2817_v10  ;;  %v308_v10 = vld [vmem:[%s10036_s29 + $0xf8] sm:$0xff]  ;;  %s9977_s29 = smov 40  }
 0x17d   : > { %v4396_v40 = vpop.f32.mrf.mxu0  ;;  %9779 = vmatmul.mubr.msk.f32.gmra.mxu0 %vm4245_vm1, %v4221_v45  ;;  %v12753_v45 = vrot.slane %v9556_v30, %v10038_v5  ;;  %v16698_v30 = vcombine.low %v12515_v47, %v12611_v52  ;;  %v1224_v15 = vrot.slane %v12745_v20, 7  ;;  %v12798_v57 = vrot.slane %v3640_v63, %v10038_v5 }
 0x17e   : > { %v4397_v32 = vadd.f32 %v12624_v8, %v4396_v40  ;;  %v3564_v31 = vpop.permute.xlu1 %3563  ;;  %v12748_v49 = vpop.permute.xlu0 %2131  ;;  %9781 = vmatprep.mubr.msk.f32.mxu0 %vm9976_vm8, %v16668_v25  ;;  %v12761_v40 = vsel %vm10175_vm6, %v1177_v9, %v1178_v39  ;;  %v1184_v39 = vrot.slane %v12736_v28, 7  ;;  %v1188_v9 = vcombine.high %v12689_v24, %v12689_v24 }
 0x17f   : > { %v9744_v41 = vpop.f32.mrf.mxu0  ;;  %v5248_v36 = vcombine.low %v12713_v58, %v12728_v42  ;;  %v12795_v24 = vrot.slane %v3511_v12, %v10038_v5  ;;  %v3509_v51 = vcombine.low %v12407_v11, %v12753_v45  ;;  %v16701_v12 = vcombine.low %v11325_v26, %v11436_v23 }
 0x180   : > { %v12767_v46 = vmax.f32 %v4397_v32, 0.0  ;;  %3867 = vrot.lane.b32.xlu1 %v16697_v33, %s9974_s14  ;;  %2871 = vrot.lane.b32.xlu0 %v16698_v30, %s9969_s9  ;;  %v3787_v33 = vcombine.low %v12761_v40, %v12765_v62  ;;  %v12810_v30 = vrot.slane %v5247_v50, %v10038_v5  ;;  %v12824_v45 = vsel %vm10175_vm6, %v1183_v13, %v1184_v39 }
 0x181   : > { %v12801_v56 = vrot.slane %v5248_v36, %v10038_v5  ;;  %v4040_v63 = vsel %vm4025_vm9, %v16701_v12, %v12594_v60  ;;  %v16702_v36 = vcombine.low %v12643_v3, %v12646_v27  ;;  %v12828_v50 = vrot.slane %v1188_v9, %v10038_v5 }
 0x182   : > { %v12790_v52 = vrot.slane %v12767_v46, %v10038_v5  ;;  %v3703_v32 = vpop.permute.xlu1 %3702  ;;  %v12792_v41 = vpop.permute.xlu0 %2622  ;;  %16700 = vst [vmem:[#allocation8_spill] sm:$0xff] %v12810_v30  ;;  %v4066_v26 = vsel %vm4051_vm10, %v4040_v63, %v12636_v17  ;;  %v1225_v60 = vsel %vm10175_vm6, %v9542_v44, %v1224_v15  ;;  %v3648_v39 = vcombine.low %v12795_v24, %v12798_v57 }
 0x183   : > { %16699 = vst [vmem:[#allocation7_spill] sm:$0xff] %v12801_v56  ;;  %v4092_v27 = vsel %vm4077_vm11, %v4066_v26, %v12682_v29  ;;  %v2819_v17 = vcombine.low %v12660_v7, %v12676_v54  ;;  %v9557_v9 = vcombine.high %v12676_v54, %v12710_v14  ;;  %v3293_v12 = vcombine.low %v12652_v53, %v12656_v21 }
 0x184   : > { %3362 = vrot.lane.b32.xlu1 %v16702_v36, %s9973_s13  ;;  %3871 = vrot.lane.b32.xlu0 %v3786_v43, %s9974_s14  ;;  %v12834_v23 = vcombine.high %v12790_v52, %v12790_v52  ;;  %v4118_v44 = vsel %vm4103_vm12, %v4092_v27, %v12720_v18  ;;  %v3294_v29 = vcombine.low %v12670_v37, %v12761_v40 }
 0x185   : > { %v12857_v63 = vrot.slane %v308_v10, %v10038_v5  ;;  %v4144_v57 = vsel %vm4129_vm13, %v4118_v44, %v3564_v31  ;;  %v3788_v7 = vcombine.low %v12824_v45, %v1225_v60  ;;  %v12866_v14 = vcombine.high %v12828_v50, %v12828_v50  ;;  %v16703_v44 = vld [vmem:[#allocation10_spill] sm:$0xff] }
 0x186   : > { %v3858_v13 = vpop.permute.xlu1 %3857  ;;  %v12842_v43 = vpop.permute.xlu0 %2857  ;;  %v4170_v53 = vsel %vm4155_vm14, %v4144_v57, %v3703_v32  ;;  %v3795_v21 = vrot.slane %v3787_v33, %v10038_v5  ;;  %v1205_v37 = vcombine.high %v308_v10, %v308_v10  ;;  %v4582_v31 = vcombine.high %v12767_v46, %v12767_v46  ;;  %v16704_v57 = vld [vmem:[#allocation9_spill] sm:$0xff] }
 0x187   : > { %v4196_v40 = vsel %vm4181_vm15, %v4170_v53, %v3858_v13  ;;  %v12878_v26 = vrot.slane %v2819_v17, %v10038_v5  ;;  %v12881_v60 = vrot.slane %v9557_v9, %v10038_v5  ;;  %v12886_v10 = vcombine.high %v12857_v63, %v12857_v63 }
 0x188   : > { %3992 = vrot.lane.b32.xlu1 %v12782_v1, %s9972_s12  ;;  %3988 = vrot.lane.b32.xlu0 %v3914_v19, %s9972_s12  ;;  %v1227_v33 = vrot.slane %v12828_v50, 7  ;;  %v1233_v46 = vrot.slane %v12857_v63, 7  ;;  %v3802_v27 = vrot.slane %v3788_v7, %v10038_v5  ;;  %v3301_v13 = vrot.slane %v3293_v12, %v10038_v5 }
 0x189   : > { %v3308_v17 = vrot.slane %v3294_v29, %v10038_v5  ;;  %v1230_v9 = vrot.slane %v12866_v14, 7  ;;  %v1515_v53 = vcombine.low %v16704_v57, %v16703_v44  ;;  %v12900_v3 = vrot.slane %v1205_v37, %v10038_v5 }
 0x18a   : > { %v3979_v19 = vpop.permute.xlu1 %3978  ;;  %v12875_v36 = vpop.permute.xlu0 %3348  ;;  %v3924_v29 = vcombine.low %v12878_v26, %v12881_v60  ;;  %v1229_v37 = vrot.slane %v1227_v33, 2  ;;  %v1235_v44 = vrot.slane %v1233_v46, 2  ;;  %v3310_v57 = vcombine.low %v12765_v62, %v12824_v45 }
 0x18b   : > { %v4222_v32 = vsel %vm4207_vm0, %v4196_v40, %v3979_v19  ;;  %v1226_v19 = vrot.slane %v1224_v15, 2  ;;  %v16705_v60 = vcombine.low %v12444_v38, %v12515_v47  ;;  %v3803_v18 = vcombine.low %v3795_v21, %v3802_v27 }
 0x18c   : > { %3579 = vrot.lane.b32.xlu1 %v3509_v51, %s9967_s30  ;;  %2147 = vrot.lane.b32.xlu0 %v2092_v4, %s9971_s11  ;;  %v12903_v4 = vrot.slane %v4582_v31, %v10038_v5  ;;  %v1236_v31 = vrot.slane %v12886_v10, 7  ;;  %v3309_v56 = vcombine.low %v3301_v13, %v3308_v17  ;;  %v1232_v15 = vrot.slane %v1230_v9, 2 }
 0x18d   : > { %v4401_v40 = vpop.f32.mrf.mxu0  ;;  %9782 = vmatmul.mubr.msk.f32.gmra.mxu0 %vm4245_vm1, %v4222_v32  ;;  %v3527_v30 = vcombine.low %v12676_v54, %v12736_v28  ;;  %v12930_v62 = vcombine.high %v12900_v3, %v12900_v3  ;;  %v1239_v45 = vrot.slane %v12900_v3, 7  ;;  %v3650_v54 = vcombine.low %v12866_v14, %v12857_v63 }
 0x18e   : > { %v4402_v51 = vadd.f32 %v12624_v8, %v4401_v40  ;;  %v3566_v12 = vpop.permute.xlu1 %3565  ;;  %v12906_v7 = vpop.permute.xlu0 %2133  ;;  %9784 = vmatprep.mubr.msk.f32.mxu0 %vm9976_vm8, %v16668_v25  ;;  %v3926_v28 = vcombine.low %v12857_v63, %v12886_v10  ;;  %v1231_v27 = vsel %vm10175_vm6, %v1229_v37, %v1230_v9  ;;  %v1237_v13 = vsel %vm10175_vm6, %v1235_v44, %v1236_v31 }
 0x18f   : > { %v9747_v32 = vpop.f32.mrf.mxu0  ;;  %v3925_v17 = vcombine.low %v12828_v50, %v12866_v14  ;;  %v1234_v63 = vsel %vm10175_vm6, %v1232_v15, %v1233_v46  ;;  %v1242_v9 = vrot.slane %v12930_v62, 7  ;;  %v1241_v14 = vrot.slane %v1239_v45, 2 }
 0x190   : > { %v12917_v40 = vmax.f32 %v4402_v51, 0.0  ;;  %3718 = vrot.lane.b32.xlu1 %v3648_v39, %s9970_s10  ;;  %2638 = vrot.lane.b32.xlu0 %v16705_v60, %s9968_s8  ;;  %v3649_v32 = vcombine.low %v12745_v20, %v12828_v50  ;;  %v12935_v39 = vcombine.high %v12903_v4, %v12903_v4  ;;  %v1228_v20 = vsel %vm10175_vm6, %v1226_v19, %v1227_v33 }
 0x191   : > { %v4041_v51 = vsel %vm4025_vm9, %v1515_v53, %v12748_v49  ;;  %v1238_v50 = vrot.slane %v1236_v31, 2  ;;  %v12974_v37 = vrot.slane %v3926_v28, %v10038_v5  ;;  %v3804_v46 = vcombine.low %v1228_v20, %v1231_v27 }
 0x192   : > { %v12939_v38 = vrot.slane %v12917_v40, %v10038_v5  ;;  %v3705_v47 = vpop.permute.xlu1 %3704  ;;  %v12941_v21 = vpop.permute.xlu0 %2624  ;;  %v4067_v33 = vsel %vm4051_vm10, %v4041_v51, %v12792_v41  ;;  %v3805_v15 = vcombine.low %v1234_v63, %v1237_v13  ;;  %v12979_v44 = vrot.slane %v3925_v17, %v10038_v5 }
 0x193   : > { %v4093_v49 = vsel %vm4077_vm11, %v4067_v33, %v12842_v43  ;;  %v3666_v28 = vcombine.low %v12886_v10, %v12900_v3  ;;  %v4599_v20 = vcombine.high %v12917_v40, %v12917_v40  ;;  %v16707_v40 = vcombine.low %v12631_v35, %v12795_v24 }
 0x194   : > { %v5265_v60 = vcombine.low %v12935_v39, %v12939_v38  ;;  %3873 = vrot.lane.b32.xlu1 %v3803_v18, %s9974_s14  ;;  %2873 = vrot.lane.b32.xlu0 %v12782_v1, %s9969_s9  ;;  %v3657_v18 = vrot.slane %v3649_v32, %v10038_v5  ;;  %v3664_v1 = vrot.slane %v3650_v54, %v10038_v5 }
 0x195   : > { %v4119_v41 = vsel %vm4103_vm12, %v4093_v49, %v12875_v36  ;;  %v16706_v32 = vcombine.low %v12790_v52, %v12834_v23  ;;  %v3819_v51 = vrot.slane %v3805_v15, %v10038_v5  ;;  %v3317_v33 = vrot.slane %v3310_v57, %v10038_v5 }
 0x196   : > { %v3860_v53 = vpop.permute.xlu1 %3859  ;;  %v12969_v19 = vpop.permute.xlu0 %2859  ;;  %v4145_v43 = vsel %vm4129_vm13, %v4119_v41, %v3566_v12  ;;  %v12985_v31 = vrot.slane %v5265_v60, %v10038_v5  ;;  %v1240_v12 = vsel %vm10175_vm6, %v1238_v50, %v1239_v45  ;;  %v3812_v45 = vrot.slane %v3804_v46, %v10038_v5 }
 0x197   : > { %v12991_v54 = vrot.slane %v16706_v32, %v10038_v5  ;;  %v4171_v36 = vsel %vm4155_vm14, %v4145_v43, %v3705_v47  ;;  %v4986_v60 = vrot.slane %v12713_v58, 7  ;;  %v3665_v63 = vcombine.low %v3657_v18, %v3664_v1 }
 0x198   : > { %3994 = vrot.lane.b32.xlu1 %v3924_v29, %s9972_s12  ;;  %3364 = vrot.lane.b32.xlu0 %v3309_v56, %s9973_s13  ;;  %v1243_v56 = vsel %vm10175_vm6, %v1241_v14, %v1242_v9  ;;  %v4983_v29 = vrot.slane %v12717_v48, 7  ;;  %v4197_v27 = vsel %vm4181_vm15, %v4171_v36, %v3860_v53  ;;  %v3941_v50 = vcombine.low %v12979_v44, %v12974_v37 }
 0x199   : > { %v5280_v47 = vcombine.low %v12991_v54, %v12985_v31  ;;  %v13023_v14 = vrot.slane %v3527_v30, %v10038_v5  ;;  %v3942_v49 = vcombine.low %v12900_v3, %v12930_v62  ;;  %v3821_v35 = vcombine.low %v1240_v12, %v1243_v56 }
 0x19a   : > { %v3981_v13 = vpop.permute.xlu1 %3980  ;;  %v13004_v17 = vpop.permute.xlu0 %3350  ;;  %v4985_v24 = vrot.slane %v4983_v29, 2  ;;  %v13028_v53 = vrot.slane %v4599_v20, %v10038_v5  ;;  %v13036_v1 = vrot.slane %v3666_v28, %v10038_v5  ;;  %v13040_v30 = vcombine.high %v12939_v38, %v12939_v38 }
 0x19b   : > { %v4223_v10 = vsel %vm4207_vm0, %v4197_v27, %v3981_v13  ;;  %v5002_v3 = vrot.slane %v12939_v38, 7  ;;  %v3820_v37 = vcombine.low %v3812_v45, %v3819_v51  ;;  %v4989_v41 = vrot.slane %v12728_v42, 7 }
 0x19c   : > { %3581 = vrot.lane.b32.xlu1 %v16707_v40, %s9967_s30  ;;  %2149 = vrot.lane.b32.xlu0 %v12478_v34, %s9971_s11  ;;  %v9585_v46 = vrot.slane %v12700_v6, 9  ;;  %v4988_v15 = vrot.slane %v4986_v60, 2  ;;  %v4995_v44 = vrot.slane %v12834_v23, 7  ;;  %v4992_v32 = vrot.slane %v12790_v52, 7  ;;  %v16708_v40 = vld [vmem:[#allocation3_spill] sm:$0xff]  ;;  %s9978_s11 = smov 48  }
 0x19d   : > { %v4406_v9 = vpop.f32.mrf.mxu0  ;;  %9785 = vmatmul.mubr.msk.f32.gmra.mxu0 %vm4245_vm1, %v4223_v10  ;;  %v13051_v36 = vrot.slane %v3942_v49, %v10038_v5  ;;  %v13054_v28 = vrot.slane %v3821_v35, %v10038_v5  ;;  %v5931_v6 = vcombine.low %v12717_v48, %v12713_v58  ;;  %v13064_v56 = vcombine.high %v13028_v53, %v13028_v53 }
 0x19e   : > { %v4407_v34 = vadd.f32 %v12624_v8, %v4406_v9  ;;  %v3568_v57 = vpop.permute.xlu1 %3567  ;;  %v13031_v18 = vpop.permute.xlu0 %2135  ;;  %9787 = vmatprep.mubr.msk.f32.mxu0 %vm9976_vm8, %v16668_v25  ;;  %v13060_v12 = vsel %vm10175_vm6, %v9585_v46, %v4983_v29  ;;  %v13073_v13 = vsel %vm10175_vm6, %v4985_v24, %v4986_v60  ;;  %v5004_v10 = vrot.slane %v5002_v3, 2 }
 0x19f   : > { %v9750_v62 = vpop.f32.mrf.mxu0  ;;  %v5005_v45 = vrot.slane %v13040_v30, 7  ;;  %v4991_v51 = vrot.slane %v4989_v41, 2  ;;  %v5281_v29 = vcombine.low %v13040_v30, %v13028_v53  ;;  %v4997_v60 = vrot.slane %v4995_v44, 2 }
 0x1a0   : > { %v4518_v43 = vmax.f32 %v4407_v34, 0.0  ;;  %3720 = vrot.lane.b32.xlu1 %v3665_v63, %s9970_s10  ;;  %2640 = vrot.lane.b32.xlu0 %v12525_v16, %s9968_s8  ;;  %v4042_v63 = vsel %vm4025_vm9, %v16708_v40, %v12906_v7  ;;  %v4990_v49 = vsel %vm10175_vm6, %v4988_v15, %v4989_v41  ;;  %v5571_v7 = vcombine.low %v13060_v12, %v13073_v13 }
 0x1a1   : > { %v4068_v35 = vsel %vm4051_vm10, %v4042_v63, %v12941_v21  ;;  %v4993_v34 = vsel %vm10175_vm6, %v4991_v51, %v4992_v32  ;;  %v4994_v62 = vrot.slane %v4992_v32, 2  ;;  %v9586_v46 = vrot.slane %v12935_v39, 9 }
 0x1a2   : > { %v13067_v16 = vrot.slane %v4518_v43, %v10038_v5  ;;  %v3707_v20 = vpop.permute.xlu1 %3706  ;;  %v13069_v27 = vpop.permute.xlu0 %2626  ;;  %v4616_v24 = vcombine.high %v4518_v43, %v4518_v43  ;;  %v5006_v15 = vsel %vm10175_vm6, %v5004_v10, %v5005_v45  ;;  %v13108_v32 = vrot.slane %v5281_v29, %v10038_v5 }
 0x1a3   : > { %v5008_v39 = vrot.slane %v13028_v53, 7  ;;  %v5003_v51 = vsel %vm10175_vm6, %v9586_v46, %v5002_v3 }
 0x1a4   : > { %v5282_v9 = vcombine.low %v13064_v56, %v13067_v16  ;;  %3875 = vrot.lane.b32.xlu1 %v3820_v37, %s9974_s14  ;;  %2875 = vrot.lane.b32.xlu0 %v12878_v26, %s9969_s9  ;;  %v4998_v37 = vrot.slane %v12903_v4, 7  ;;  %v4094_v26 = vsel %vm4077_vm11, %v4068_v35, %v12969_v19  ;;  %v13117_v13 = vrot.slane %v4616_v24, %v10038_v5 }
 0x1a5   : > { %v4120_v21 = vsel %vm4103_vm12, %v4094_v26, %v13004_v17  ;;  %v5572_v17 = vcombine.low %v4990_v49, %v4993_v34  ;;  %v5014_v3 = vrot.slane %v13067_v16, 7  ;;  %v5010_v35 = vrot.slane %v5008_v39, 2 }
 0x1a6   : > { %v3862_v40 = vpop.permute.xlu1 %3861  ;;  %v13098_v41 = vpop.permute.xlu0 %2861  ;;  %v13105_v43 = vrot.slane %v5282_v9, %v10038_v5  ;;  %v4146_v12 = vsel %vm4129_vm13, %v4120_v21, %v3568_v57  ;;  %v4999_v19 = vsel %vm10175_vm6, %v4997_v60, %v4998_v37  ;;  %v5589_v60 = vcombine.low %v5003_v51, %v5006_v15 }
 0x1a7   : > { %v4172_v10 = vsel %vm4155_vm14, %v4146_v12, %v3707_v20  ;;  %v13133_v20 = vcombine.high %v13067_v16, %v13067_v16  ;;  %v13148_v24 = vcombine.high %v13117_v13, %v13117_v13  ;;  %v5939_v37 = vrot.slane %v5931_v6, %v10038_v5 }
 0x1a8   : > { %3996 = vrot.lane.b32.xlu1 %v3941_v50, %s9972_s12  ;;  %3366 = vrot.lane.b32.xlu0 %v3317_v33, %s9973_s13  ;;  %v5932_v50 = vcombine.low %v12728_v42, %v12790_v52  ;;  %v5948_v33 = vcombine.low %v12834_v23, %v12903_v4  ;;  %v4198_v57 = vsel %vm4181_vm15, %v4172_v10, %v3862_v40 }
 0x1a9   : > { %v4996_v42 = vsel %vm10175_vm6, %v4994_v62, %v4995_v44  ;;  %v5949_v52 = vcombine.low %v12939_v38, %v13040_v30  ;;  %v5586_v4 = vrot.slane %v5572_v17, %v10038_v5  ;;  %v5007_v44 = vrot.slane %v5005_v45, 2 }
 0x1aa   : > { %v3983_v63 = vpop.permute.xlu1 %3982  ;;  %v13129_v9 = vpop.permute.xlu0 %3352  ;;  %v5588_v23 = vcombine.low %v4996_v42, %v4999_v19  ;;  %v5011_v38 = vrot.slane %v13064_v56, 7  ;;  %v5016_v45 = vrot.slane %v5014_v3, 2  ;;  %v5017_v46 = vrot.slane %v13133_v20, 7 }
 0x1ab   : > { %v4224_v49 = vsel %vm4207_vm0, %v4198_v57, %v3983_v63  ;;  %v5579_v40 = vrot.slane %v5571_v7, %v10038_v5  ;;  %v5956_v21 = vrot.slane %v5948_v33, %v10038_v5  ;;  %v13175_v48 = vrot.slane %v5949_v52, %v10038_v5 }
 0x1ac   : > { %3722 = vrot.lane.b32.xlu1 %v13036_v1, %s9970_s10  ;;  %3583 = vrot.lane.b32.xlu0 %v13023_v14, %s9967_s30  ;;  %v13158_v14 = vrot.slane %v5589_v60, %v10038_v5  ;;  %v5596_v58 = vrot.slane %v5588_v23, %v10038_v5  ;;  %v5946_v6 = vrot.slane %v5932_v50, %v10038_v5  ;;  %v5021_v12 = vrot.slane %v13148_v24, 7 }
 0x1ad   : > { %v4411_v34 = vpop.f32.mrf.mxu0  ;;  %9788 = vmatmul.mubr.msk.f32.gmra.mxu0 %vm4245_vm1, %v4224_v49  ;;  %v5587_v19 = vcombine.low %v5579_v40, %v5586_v4  ;;  %v5009_v7 = vsel %vm10175_vm6, %v5007_v44, %v5008_v39  ;;  %v5012_v17 = vsel %vm10175_vm6, %v5010_v35, %v5011_v38  ;;  %v5013_v57 = vrot.slane %v5011_v38, 2  ;;  %v16709_v40 = vld [vmem:[#allocation12_spill] sm:$0xff] }
 0x1ae   : > { %v4412_v30 = vadd.f32 %v12624_v8, %v4411_v34  ;;  %v13153_v1 = vpop.permute.xlu1 %2141  ;;  %v13155_v62 = vpop.permute.xlu0 %2137  ;;  %9790 = vmatprep.mubr.msk.f32.mxu0 %vm9976_vm8, %v16668_v25  ;;  %v5604_v50 = vcombine.low %v5596_v58, %v13158_v14  ;;  %v5018_v63 = vsel %vm10175_vm6, %v5016_v45, %v5017_v46  ;;  %v5964_v49 = vcombine.low %v5956_v21, %v13175_v48 }
 0x1af   : > { %v9753_v26 = vpop.f32.mrf.mxu0  ;;  %v5947_v42 = vcombine.low %v5939_v37, %v5946_v6  ;;  %v5023_v52 = vrot.slane %v5021_v12, 2  ;;  %v5015_v4 = vsel %vm10175_vm6, %v5013_v57, %v5014_v3  ;;  %v5605_v35 = vcombine.low %v5009_v7, %v5012_v17  ;;  %v16710_v3 = vld [vmem:[#allocation11_spill] sm:$0xff] }
 0x1b0   : > { %v4519_v15 = vmax.f32 %v4412_v30, 0.0  ;;  %3998 = vrot.lane.b32.xlu1 %v13051_v36, %s9972_s12  ;;  %3877 = vrot.lane.b32.xlu0 %v13054_v28, %s9974_s14  ;;  %v5298_v36 = vcombine.low %v13117_v13, %v13148_v24  ;;  %v9587_v34 = vrot.slane %v13117_v13, 9  ;;  %v5606_v46 = vcombine.low %v5015_v4, %v5018_v63  ;;  %s9979_s14 = smov 56  }
 0x1b1   : > { %v5965_v37 = vcombine.low %v13028_v53, %v13064_v56  ;;  %v1549_v21 = vcombine.low %v16710_v3, %v16709_v40  ;;  %v5966_v57 = vcombine.low %v13067_v16, %v13133_v20 }
 0x1b2   : > { %v4633_v28 = vcombine.high %v4519_v15, %v4519_v15  ;;  %v13186_v10 = vrot.slane %v4519_v15, %v10038_v5  ;;  %v13188_v51 = vpop.permute.xlu1 %2628  ;;  %v3570_v33 = vpop.permute.xlu0 %3569  ;;  %v13211_v45 = vrot.slane %v5298_v36, %v10038_v5  ;;  %v5022_v13 = vsel %vm10175_vm6, %v9587_v34, %v5021_v12 }
 0x1b3   : > { %v6291_v36 = vcombine.low %v12985_v31, %v13108_v32  ;;  %v5973_v12 = vrot.slane %v5965_v37, %v10038_v5  ;;  %v4043_v63 = vsel %vm4025_vm9, %v1549_v21, %v13031_v18 }
 0x1b4   : > { %v13195_v39 = vcombine.high %v13186_v10, %v13186_v10  ;;  %v5024_v60 = vrot.slane %v13186_v10, 7  ;;  %5879 = vrot.lane.b32.xlu1 %v5604_v50, %s9968_s8  ;;  %5877 = vrot.lane.b32.xlu0 %v5587_v19, %s9968_s8  ;;  %v13202_v23 = vrot.slane %v4633_v28, %v10038_v5  ;;  %v5613_v19 = vrot.slane %v5605_v35, %v10038_v5 }
 0x1b5   : > { %v6292_v17 = vcombine.low %v13105_v43, %v13211_v45  ;;  %v5620_v28 = vrot.slane %v5606_v46, %v10038_v5 }
 0x1b6   : > { %v5027_v44 = vrot.slane %v13195_v39, 7  ;;  %v3709_v38 = vpop.permute.xlu1 %3708  ;;  %v13208_v30 = vpop.permute.xlu0 %2632  ;;  %v5025_v26 = vsel %vm10175_vm6, %v5023_v52, %v5024_v60  ;;  %v5026_v58 = vrot.slane %v5024_v60, 2  ;;  %v5030_v6 = vrot.slane %v13202_v23, 7 }
 0x1b7   : > { %v5622_v53 = vcombine.low %v5022_v13, %v5025_v26  ;;  %v4069_v60 = vsel %vm4051_vm10, %v4043_v63, %v13069_v27  ;;  %v5621_v34 = vcombine.low %v5613_v19, %v5620_v28  ;;  %v5299_v3 = vcombine.low %v13186_v10, %v13195_v39 }
 0x1b8   : > { %6239 = vrot.lane.b32.xlu1 %v5964_v49, %s9973_s13  ;;  %6237 = vrot.lane.b32.xlu0 %v5947_v42, %s9973_s13  ;;  %v5029_v15 = vrot.slane %v5027_v44, 2  ;;  %v6387_v42 = vcombine.low %v13158_v14, %v5613_v19  ;;  %v5028_v4 = vsel %vm10175_vm6, %v5026_v58, %v5027_v44  ;;  %v4095_v16 = vsel %vm4077_vm11, %v4069_v60, %v13098_v41 }
 0x1b9   : > { %v5630_v52 = vrot.slane %v5622_v53, %v10038_v5  ;;  %v4121_v27 = vsel %vm4103_vm12, %v4095_v16, %v13129_v9  ;;  %v6483_v14 = vcombine.low %v13175_v48, %v5973_v12  ;;  %v13260_v44 = vcombine.high %v13202_v23, %v13202_v23 }
 0x1ba   : > { %v13225_v56 = vpop.permute.xlu1 %2867  ;;  %v13227_v7 = vpop.permute.xlu0 %2863  ;;  %v5031_v50 = vsel %vm10175_vm6, %v5029_v15, %v5030_v6  ;;  %v4147_v26 = vsel %vm4129_vm13, %v4121_v27, %v3570_v33  ;;  %v5980_v41 = vrot.slane %v5966_v57, %v10038_v5  ;;  %v5982_v9 = vcombine.low %v13148_v24, %v13186_v10 }
 0x1bb   : > { %v5623_v46 = vcombine.low %v5028_v4, %v5031_v50  ;;  %v4173_v48 = vsel %vm4155_vm14, %v4147_v26, %v3709_v38  ;;  %v6388_v33 = vcombine.low %v5620_v28, %v5630_v52  ;;  %v5313_v10 = vrot.slane %v5299_v3, %v10038_v5 }
 0x1bc   : > { %6335 = vrot.lane.b32.xlu1 %v6292_v17, %s9970_s10  ;;  %6333 = vrot.lane.b32.xlu0 %v6291_v36, %s9970_s10  ;;  %v5033_v36 = vrot.slane %v13260_v44, 7  ;;  %v5981_v24 = vcombine.low %v5973_v12, %v5980_v41  ;;  %v5990_v38 = vrot.slane %v5982_v9, %v10038_v5  ;;  %v5315_v28 = vcombine.low %v13202_v23, %v13260_v44 }
 0x1bd   : > { %v4416_v49 = vpop.f32.mrf.mxu0  ;;  %v13277_v53 = vrot.slane %v5623_v46, %v10038_v5  ;;  %v5983_v50 = vcombine.low %v13195_v39, %v13202_v23  ;;  %v5032_v4 = vrot.slane %v5030_v6, 2  ;;  %v13308_v39 = vld [vmem:[%s16527_s3 + $0x40] sm:$0xff]  ;;  %v13311_v23 = vcombine.low %v13211_v45, %v5313_v10 }
 0x1be   : > { %v4417_v18 = vadd.f32 %v12624_v8, %v4416_v49  ;;  %v13252_v20 = vpop.permute.xlu1 %3354  ;;  %v3864_v35 = vpop.permute.xlu0 %3863  ;;  %v5035_v16 = vrot.slane %v5033_v36, 2  ;;  %9814 = vmatprep.subr.mxu1 %v13308_v39 }
 0x1bf   : > { %v9756_v37 = vpop.f32.mrf.mxu0  ;;  %v4199_v15 = vsel %vm4181_vm15, %v4173_v48, %v3864_v35  ;;  %v13315_v35 = vrot.slane %v5983_v50, %v10038_v5 }
 0x1c0   : > { %v4520_v40 = vmax.f32 %v4417_v18, 0.0  ;;  %5881 = vrot.lane.b32.xlu1 %v5621_v34, %s9968_s8  ;;  %6429 = vrot.lane.b32.xlu0 %v6387_v42, %s9972_s12  ;;  %v5638_v42 = vcombine.low %v5630_v52, %v13277_v53  ;;  %v6484_v18 = vcombine.low %v5980_v41, %v5990_v38  ;;  %v5323_v52 = vrot.slane %v5315_v28, %v10038_v5 }
 0x1c1   : > { %v5998_v41 = vcombine.low %v5990_v38, %v13315_v35 }
 0x1c2   : > { %v4650_v21 = vcombine.high %v4520_v40, %v4520_v40  ;;  %v13271_v13 = vrot.slane %v4520_v40, %v10038_v5  ;;  %v3985_v58 = vpop.permute.xlu1 %3984  ;;  %v13274_v19 = vpop.permute.xlu0 %3358  ;;  %v6293_v40 = vcombine.low %v5313_v10, %v5323_v52 }
 0x1c3   : > { %v4225_v17 = vsel %vm4207_vm0, %v4199_v15, %v3985_v58 }
 0x1c4   : > { %6525 = vrot.lane.b32.xlu1 %v6483_v14, %s9977_s29  ;;  %6431 = vrot.lane.b32.xlu0 %v6388_v33, %s9972_s12  ;;  %v13291_v57 = vrot.slane %v4650_v21, %v10038_v5  ;;  %v4665_v63 = vcombine.high %v13271_v13, %v13271_v13  ;;  %v5036_v12 = vrot.slane %v13271_v13, 7  ;;  %v5034_v14 = vsel %vm10175_vm6, %v5032_v4, %v5033_v36 }
 0x1c5   : > { %9791 = vmatmul.mubr.msk.f32.gmra.mxu0 %vm4245_vm1, %v4225_v17 }
 0x1c6   : > { %v13296_v60 = vpop.permute.xlu1 %2143  ;;  %v13298_v49 = vpop.permute.xlu0 %2139  ;;  %9793 = vmatprep.mubr.msk.f32.mxu0 %vm9976_vm8, %v16668_v25  ;;  %v13320_v6 = vcombine.high %v13291_v57, %v13291_v57  ;;  %v5037_v34 = vsel %vm10175_vm6, %v5035_v16, %v5036_v12  ;;  %v5040_v46 = vrot.slane %v13291_v57, 7  ;;  %v5316_v45 = vcombine.low %v4665_v63, %v13291_v57 }
 0x1c7   : > { %v5639_v3 = vcombine.low %v5034_v14, %v5037_v34  ;;  %v9588_v17 = vrot.slane %v4665_v63, 9 }
 0x1c8   : > { %6241 = vrot.lane.b32.xlu1 %v5981_v24, %s9973_s13  ;;  %5883 = vrot.lane.b32.xlu0 %v5638_v42, %s9968_s8  ;;  %v5042_v9 = vrot.slane %v5040_v46, 2  ;;  %v5330_v15 = vrot.slane %v5316_v45, %v10038_v5  ;;  %v5043_v58 = vrot.slane %v13320_v6, 7 }
 0x1c9   : > { %v5647_v36 = vrot.slane %v5639_v3, %v10038_v5  ;;  %v5041_v4 = vsel %vm10175_vm6, %v9588_v17, %v5040_v46 }
 0x1ca   : > { %v13326_v27 = vpop.permute.xlu1 %3575  ;;  %v13328_v37 = vpop.permute.xlu0 %3571  ;;  %v13353_v12 = vcombine.low %v5323_v52, %v5330_v15  ;;  %v5044_v63 = vsel %vm10175_vm6, %v5042_v9, %v5043_v58  ;;  %v5045_v14 = vrot.slane %v5043_v58, 2 }
 0x1cb   : > { %v6389_v52 = vcombine.low %v13277_v53, %v5647_v36  ;;  %v5640_v46 = vcombine.low %v5041_v4, %v5044_v63  ;;  %v4046_v53 = vsel %vm4025_vm9, %v12358_v59, %v13153_v1 }
 0x1cc   : > { %6606 = vrot.lane.b32.xlu1 %v13311_v23, %s9978_s11  ;;  %6527 = vrot.lane.b32.xlu0 %v6484_v18, %s9977_s29 }
 0x1cd   : > { %v4421_v26 = vpop.f32.mrf.mxu0  ;;  %v5654_v4 = vrot.slane %v5640_v46, %v10038_v5 }
 0x1ce   : > { %v4422_v48 = vadd.f32 %v12624_v8, %v4421_v26  ;;  %v13337_v33 = vpop.permute.xlu1 %2634  ;;  %v13339_v21 = vpop.permute.xlu0 %2630 }
 0x1cf   : > { %v9759_v24 = vpop.f32.mrf.mxu0 }
 0x1d0   : > { %v4521_v28 = vmax.f32 %v4422_v48, 0.0  ;;  %6337 = vrot.lane.b32.xlu1 %v6293_v40, %s9970_s10  ;;  %6243 = vrot.lane.b32.xlu0 %v5998_v41, %s9973_s13 }
 0x1d2   : > { %v4667_v10 = vcombine.high %v4521_v28, %v4521_v28  ;;  %v13347_v8 = vrot.slane %v4521_v28, %v10038_v5  ;;  %v13349_v38 = vpop.permute.xlu1 %3714  ;;  %v13351_v50 = vpop.permute.xlu0 %3710  ;;  %v6000_v28 = vcombine.low %v13291_v57, %v13320_v6 }
 0x1d4   : > { %v13360_v16 = vrot.slane %v4667_v10, %v10038_v5  ;;  %v13364_v18 = vcombine.high %v13347_v8, %v13347_v8  ;;  %v5046_v34 = vrot.slane %v13347_v8, 7  ;;  %v5332_v45 = vcombine.low %v13320_v6, %v13347_v8  ;;  %6687 = vrot.lane.b32.xlu1 %v5638_v42, %s9979_s14  ;;  %6608 = vrot.lane.b32.xlu0 %v13353_v12, %s9978_s11 }
 0x1d5   : > { %v5999_v10 = vcombine.low %v13260_v44, %v13271_v13  ;;  %v4072_v13 = vsel %vm4051_vm10, %v4046_v53, %v13208_v30  ;;  %v13414_v6 = vrot.slane %v6000_v28, %v10038_v5 }
 0x1d6   : > { %v13375_v26 = vcombine.high %v13360_v16, %v13360_v16  ;;  %v5048_v40 = vrot.slane %v5046_v34, 2  ;;  %v5049_v3 = vrot.slane %v13364_v18, 7  ;;  %v5052_v9 = vrot.slane %v13360_v16, 7  ;;  %v13379_v48 = vpop.permute.xlu1 %2869  ;;  %v13381_v17 = vpop.permute.xlu0 %2865 }
 0x1d7   : > { %v13384_v42 = vrot.slane %v5332_v45, %v10038_v5  ;;  %v5047_v58 = vsel %vm10175_vm6, %v5045_v14, %v5046_v34  ;;  %v16711_v14 = vld [vmem:[#allocation2_spill] sm:$0xff] }
 0x1d8   : > { %6433 = vrot.lane.b32.xlu1 %v6389_v52, %s9972_s12  ;;  %v5050_v24 = vsel %vm10175_vm6, %v5048_v40, %v5049_v3  ;;  %v5054_v59 = vrot.slane %v5052_v9, 2  ;;  %v5055_v1 = vrot.slane %v13375_v26, 7  ;;  %v5051_v34 = vrot.slane %v5049_v3, 2 }
 0x1d9   : > { %v6294_v63 = vcombine.low %v5330_v15, %v13384_v42  ;;  %v5656_v45 = vcombine.low %v5047_v58, %v5050_v24  ;;  %v4044_v40 = vsel %vm4025_vm9, %v16711_v14, %v13155_v62  ;;  %v4098_v62 = vsel %vm4077_vm11, %v4072_v13, %v13225_v56 }
 0x1da   : > { %v3870_v52 = vpop.permute.xlu1 %3869  ;;  %v3866_v29 = vpop.permute.xlu0 %3865  ;;  %v4070_v44 = vsel %vm4051_vm10, %v4044_v40, %v13188_v51  ;;  %v5655_v3 = vcombine.low %v5647_v36, %v5654_v4  ;;  %v6007_v58 = vrot.slane %v5999_v10, %v10038_v5  ;;  %v13424_v51 = vld [vmem:[%s16526_s2] ss:$0 sm:$0xff]  ;;  %v5056_v36 = vsel %vm10175_vm6, %v5054_v59, %v5055_v1 }
 0x1db   : > { %6339 = vrot.lane.b32.xlu0 %v6294_v63, %s9970_s10  ;;  %v13406_v57 = vrot.slane %v5656_v45, %v10038_v5  ;;  %v4096_v15 = vsel %vm4077_vm11, %v4070_v44, %v13227_v7  ;;  %v5053_v7 = vsel %vm10175_vm6, %v5051_v34, %v5052_v9  ;;  %v4124_v28 = vsel %vm4103_vm12, %v4098_v62, %v13274_v19 }
 0x1dc   : > { %6768 = vrot.lane.b32.xlu1 %v5998_v41, %s9980_s15  ;;  %v4122_v24 = vsel %vm4103_vm12, %v4096_v15, %v13252_v20  ;;  %v4150_v63 = vsel %vm4129_vm13, %v4124_v28, %v13326_v27  ;;  %v6015_v9 = vcombine.low %v6007_v58, %v13414_v6  ;;  %v5657_v59 = vcombine.low %v5053_v7, %v5056_v36 }
 0x1dd   : > { %v4426_v46 = vpop.f32.mrf.mxu0  ;;  %v6390_v56 = vcombine.low %v5654_v4, %v13406_v57  ;;  %v4148_v4 = vsel %vm4129_vm13, %v4122_v24, %v13328_v37  ;;  %v4176_v20 = vsel %vm4155_vm14, %v4150_v63, %v13349_v38  ;;  %v5333_v1 = vcombine.low %v13364_v18, %v13360_v16  ;;  %v16712_v63 = vld [vmem:[#allocation5_spill] sm:$0xff] }
 0x1de   : > { %v4427_v30 = vadd.f32 %v13424_v51, %v4426_v46  ;;  %v13427_v41 = vpop.permute.xlu1 %3360  ;;  %v13429_v53 = vpop.permute.xlu0 %3356  ;;  %v4174_v19 = vsel %vm4155_vm14, %v4148_v4, %v13351_v50  ;;  %v4202_v27 = vsel %vm4181_vm15, %v4176_v20, %v3870_v52  ;;  %v6016_v50 = vcombine.low %v13347_v8, %v13364_v18 }
 0x1df   : > { %6689 = vrot.lane.b32.xlu0 %v5655_v3, %s9979_s14  ;;  %v9762_v10 = vpop.f32.mrf.mxu0  ;;  %v4200_v34 = vsel %vm4181_vm15, %v4174_v19, %v3866_v29  ;;  %v6977_v29 = vld [vmem:[%s16527_s3 + $0x38] sm:$0xff]  ;;  %v6485_v15 = vcombine.low %v13315_v35, %v6007_v58  ;;  %v13474_v46 = vrot.slane %v5657_v59, %v10038_v5  ;;  %v6976_v35 = vld [vmem:[%s16527_s3 + $0x30] sm:$0xff]  ;;  %v6017_v28 = vcombine.low %v13360_v16, %v13375_v26  ;;  %v16713_v26 = vld [vmem:[#allocation6_spill] sm:$0xff] }
 0x1e0   : > { %v4522_v45 = vmax.f32 %v4427_v30, 0.0  ;;  %6435 = vrot.lane.b32.xlu1 %v6390_v56, %s9972_s12  ;;  %v5347_v56 = vrot.slane %v5333_v1, %v10038_v5  ;;  %v6024_v7 = vrot.slane %v6016_v50, %v10038_v5  ;;  %v6975_v10 = vld [vmem:[%s16527_s3 + $0x28] sm:$0xff]  ;;  %v1617_v4 = vcombine.low %v16712_v63, %v12390_v0  ;;  %v6974_v0 = vld [vmem:[%s16527_s3 + $0x20] sm:$0xff]  ;;  %v16714_v59 = vld [vmem:[#allocation4_spill] sm:$0xff] }
 0x1e1   : > { %v1583_v1 = vcombine.low %v16714_v59, %v16713_v26  ;;  %v6970_v26 = vld [vmem:[%s16527_s3] sm:$0xff] }
 0x1e2   : > { %v4684_v37 = vcombine.high %v4522_v45, %v4522_v45  ;;  %v4691_v14 = vrot.slane %v4522_v45, %v10038_v5  ;;  %v3991_v40 = vpop.permute.xlu1 %3990  ;;  %v3987_v44 = vpop.permute.xlu0 %3986  ;;  %v13513_v20 = vcombine.low %v13384_v42, %v5347_v56 }
 0x1e3   : > { %5885 = vrot.lane.b32.xlu0 %v5655_v3, %s9968_s8  ;;  %v4228_v38 = vsel %vm4207_vm0, %v4202_v27, %v3991_v40  ;;  %v4226_v13 = vsel %vm4207_vm0, %v4200_v34, %v3987_v44  ;;  %v6486_v34 = vcombine.low %v13414_v6, %v6024_v7  ;;  %v6973_v40 = vld [vmem:[%s16527_s3 + $0x18] sm:$0xff]  ;;  %v4047_v44 = vsel %vm4025_vm9, %v1617_v4, %v13296_v60 }
 0x1e4   : > { %v13461_v62 = vcombine.high %v4691_v14, %v4691_v14  ;;  %6770 = vrot.lane.b32.xlu1 %v6015_v9, %s9980_s15  ;;  %9794 = vmatmul.mubr.msk.f32.gmra.mxu0 %vm4245_vm1, %v4226_v13  ;;  %v13469_v52 = vrot.slane %v4684_v37, %v10038_v5  ;;  %v9589_v19 = vrot.slane %v4691_v14, 9  ;;  %v13530_v37 = vrot.slane %v6017_v28, %v10038_v5  ;;  %v6971_v28 = vld [vmem:[%s16527_s3 + $0x8] sm:$0xff] }
 0x1e5   : > { %9800 = vmatmul.mubr.msk.f32.vlgmr.msra.gmra.mxu1 %vm4245_vm1, %v4228_v38  ;;  %9796 = vmatprep.mubr.msk.f32.mxu0 %vm9976_vm8, %v16668_v25  ;;  %v4045_v60 = vsel %vm4025_vm9, %v1583_v1, %v13298_v49 }
 0x1e6   : > { %v5059_v8 = vrot.slane %v13461_v62, 7  ;;  %v5349_v18 = vcombine.low %v4691_v14, %v13461_v62  ;;  %v13480_v3 = vpop.permute.xlu1 %3573  ;;  %v13482_v30 = vpop.permute.xlu0 %2145  ;;  %9802 = vmatprep.mubr.msk.f32.mxu1 %vm9976_vm8, %v16668_v25  ;;  %9815 = vmatpush3.msra.mxu1 %v13308_v39  ;;  %v13496_v36 = vcombine.high %v13469_v52, %v13469_v52  ;;  %v5062_v24 = vrot.slane %v13469_v52, 7 }
 0x1e7   : > { %6529 = vrot.lane.b32.xlu0 %v6485_v15, %s9977_s29  ;;  %9816 = vmatprep.subr.mxu1 %v6977_v29  ;;  %v5672_v39 = vcombine.low %v13406_v57, %v13474_v46 }
 0x1e8   : > { %v5061_v58 = vrot.slane %v5059_v8, 2  ;;  %6245 = vrot.lane.b32.xlu1 %v6015_v9, %s9973_s13  ;;  %9817 = vmatpush3.msra.mxu1 %v6977_v29  ;;  %v5357_v57 = vrot.slane %v5349_v18, %v10038_v5  ;;  %v5060_v42 = vsel %vm10175_vm6, %v9589_v19, %v5059_v8  ;;  %v5350_v14 = vcombine.low %v13469_v52, %v13496_v36  ;;  %v6972_v8 = vld [vmem:[%s16527_s3 + $0x10] sm:$0xff] }
 0x1e9   : > { %9818 = vmatprep.subr.mxu1 %v6976_v35 }
 0x1ea   : > { %v13508_v45 = vpop.permute.xlu1 %2636  ;;  %v13510_v9 = vpop.permute.xlu0 %3577  ;;  %9819 = vmatpush3.msra.mxu1 %v6976_v35  ;;  %v5063_v16 = vsel %vm10175_vm6, %v5061_v58, %v5062_v24  ;;  %v6295_v29 = vcombine.low %v5347_v56, %v5357_v57  ;;  %v4073_v56 = vsel %vm4051_vm10, %v4047_v44, %v13337_v33  ;;  %v6032_v35 = vcombine.low %v6024_v7, %v13530_v37 }
 0x1eb   : > { %5887 = vrot.lane.b32.xlu0 %v5672_v39, %s9968_s8  ;;  %9820 = vmatprep.subr.mxu1 %v6975_v10  ;;  %v5673_v6 = vcombine.low %v5060_v42, %v5063_v16  ;;  %v13551_v58 = vrot.slane %v5350_v14, %v10038_v5  ;;  %v5065_v33 = vrot.slane %v13496_v36, 7  ;;  %v4071_v7 = vsel %vm4051_vm10, %v4045_v60, %v13339_v21 }
 0x1ec   : > { %6610 = vrot.lane.b32.xlu1 %v13513_v20, %s9978_s11  ;;  %9821 = vmatpush3.msra.mxu1 %v6975_v10  ;;  %v4099_v16 = vsel %vm4077_vm11, %v4073_v56, %v13379_v48  ;;  %v4097_v59 = vsel %vm4077_vm11, %v4071_v7, %v13381_v17 }
 0x1ed   : > { %v4431_v27 = vpop.f32.mrf.mxu0  ;;  %9822 = vmatprep.subr.mxu1 %v6974_v0  ;;  %v13562_v49 = vrot.slane %v5673_v6, %v10038_v5  ;;  %v4123_v42 = vsel %vm4103_vm12, %v4097_v59, %v13429_v53  ;;  %v13589_v17 = vcombine.low %v5357_v57, %v13551_v58  ;;  %v5067_v44 = vrot.slane %v5065_v33, 2 }
 0x1ee   : > { %v4432_v38 = vadd.f32 %v13424_v51, %v4431_v27  ;;  %v3717_v13 = vpop.permute.xlu1 %3716  ;;  %v3713_v50 = vpop.permute.xlu0 %3712  ;;  %9823 = vmatpush3.msra.mxu1 %v6974_v0  ;;  %v5064_v0 = vrot.slane %v5062_v24, 2  ;;  %v4125_v24 = vsel %vm4103_vm12, %v4099_v16, %v13427_v41  ;;  %v4149_v41 = vsel %vm4129_vm13, %v4123_v42, %v13480_v3 }
 0x1ef   : > { %6531 = vrot.lane.b32.xlu0 %v6486_v34, %s9977_s29  ;;  %v9765_v15 = vpop.f32.mrf.mxu0  ;;  %9824 = vmatprep.subr.mxu1 %v6973_v40  ;;  %v4151_v53 = vsel %vm4129_vm13, %v4125_v24, %v13510_v9 }
 0x1f0   : > { %v4523_v18 = vmax.f32 %v4432_v38, 0.0  ;;  %6341 = vrot.lane.b32.xlu1 %v6295_v29, %s9970_s10  ;;  %9825 = vmatpush3.msra.mxu1 %v6973_v40  ;;  %v5066_v38 = vsel %vm10175_vm6, %v5064_v0, %v5065_v33  ;;  %v4177_v9 = vsel %vm4155_vm14, %v4151_v53, %v3717_v13 }
 0x1f1   : > { %9826 = vmatprep.subr.mxu1 %v6972_v8 }
 0x1f2   : > { %v4701_v10 = vcombine.high %v4523_v18, %v4523_v18  ;;  %v13557_v63 = vrot.slane %v4523_v18, %v10038_v5  ;;  %v3868_v4 = vpop.permute.xlu1 %3867  ;;  %v13559_v19 = vpop.permute.xlu0 %2871  ;;  %9827 = vmatpush3.msra.mxu1 %v6972_v8 }
 0x1f3   : > { %6247 = vrot.lane.b32.xlu0 %v6032_v35, %s9973_s13  ;;  %9828 = vmatprep.subr.mxu1 %v6971_v28 }
 0x1f4   : > { %v13576_v1 = vrot.slane %v4701_v10, %v10038_v5  ;;  %v13580_v21 = vcombine.high %v13557_v63, %v13557_v63  ;;  %v5068_v48 = vrot.slane %v13557_v63, 7  ;;  %6691 = vrot.lane.b32.xlu1 %v5672_v39, %s9979_s14  ;;  %9829 = vmatpush3.msra.mxu1 %v6971_v28  ;;  %v6391_v39 = vcombine.low %v13474_v46, %v13562_v49 }
 0x1f5   : > { %9830 = vmatprep.subr.mxu1 %v6970_v26  ;;  %v4175_v46 = vsel %vm4155_vm14, %v4149_v41, %v3713_v50  ;;  %v6034_v50 = vcombine.low %v13496_v36, %v13557_v63 }
 0x1f6   : > { %v5070_v27 = vrot.slane %v5068_v48, 2  ;;  %v5071_v34 = vrot.slane %v13580_v21, 7  ;;  %v13592_v14 = vpop.permute.xlu1 %3362  ;;  %v3872_v40 = vpop.permute.xlu0 %3871  ;;  %v5366_v57 = vcombine.low %v13557_v63, %v13580_v21  ;;  %v5074_v29 = vrot.slane %v13576_v1, 7  ;;  %9831 = vmatpush3.msra.mxu1 %v6970_v26 }
 0x1f7   : > { %6612 = vrot.lane.b32.xlu0 %v13589_v17, %s9978_s11  ;;  %v5069_v3 = vsel %vm10175_vm6, %v5067_v44, %v5068_v48  ;;  %v4201_v15 = vsel %vm4181_vm15, %v4175_v46, %v3868_v4  ;;  %9859 = vmatprep.subr.mxu1 %v16668_v25  ;;  %v4203_v60 = vsel %vm4181_vm15, %v4177_v9, %v3872_v40 }
 0x1f8   : > { %6437 = vrot.lane.b32.xlu1 %v6391_v39, %s9972_s12  ;;  %v5073_v6 = vrot.slane %v5071_v34, 2  ;;  %v13614_v8 = vrot.slane %v5366_v57, %v10038_v5  ;;  %v5674_v18 = vcombine.low %v5066_v38, %v5069_v3  ;;  %v5072_v10 = vsel %vm10175_vm6, %v5070_v27, %v5071_v34 }
 0x1f9   : > { %v1634_v63 = vcombine.low %v12321_v22, %v12599_v61  ;;  %v6033_v26 = vcombine.low %v13461_v62, %v13469_v52  ;;  %v13643_v61 = vrot.slane %v6034_v50, %v10038_v5  ;;  %v4717_v52 = vcombine.high %v13576_v1, %v13576_v1 }
 0x1fa   : > { %v3993_v56 = vpop.permute.xlu1 %3992  ;;  %v3989_v28 = vpop.permute.xlu0 %3988  ;;  %v5075_v13 = vsel %vm10175_vm6, %v5073_v6, %v5074_v29  ;;  %v6296_v7 = vcombine.low %v13551_v58, %v13614_v8  ;;  %v5688_v16 = vrot.slane %v5674_v18, %v10038_v5 }
 0x1fb   : > { %v4229_v4 = vsel %vm4207_vm0, %v4203_v60, %v3993_v56  ;;  %v4227_v33 = vsel %vm4207_vm0, %v4201_v15, %v3989_v28  ;;  %v5690_v36 = vcombine.low %v5072_v10, %v5075_v13  ;;  %v4048_v62 = vsel %vm4025_vm9, %v1634_v63, %v13482_v30 }
 0x1fc   : > { %6772 = vrot.lane.b32.xlu1 %v6032_v35, %s9980_s15  ;;  %9797 = vmatmul.mubr.msk.f32.gmra.mxu0 %vm4245_vm1, %v4227_v33  ;;  %v5689_v22 = vcombine.low %v13562_v49, %v5688_v16  ;;  %v6041_v34 = vrot.slane %v6033_v26, %v10038_v5  ;;  %v4074_v40 = vsel %vm4051_vm10, %v4048_v62, %v13508_v45  ;;  %v9590_v46 = vrot.slane %v4717_v52, 9 }
 0x1fd   : > { %6343 = vrot.lane.b32.xlu0 %v6296_v7, %s9970_s10  ;;  %v4436_v0 = vpop.f32.mrf.mxu0  ;;  %9803 = vmatmul.mubr.msk.f32.gmra.mxu1 %vm4245_vm1, %v4229_v4  ;;  %v5698_v35 = vrot.slane %v5690_v36, %v10038_v5  ;;  %v4100_v30 = vsel %vm4077_vm11, %v4074_v40, %v13559_v19  ;;  %v6050_v33 = vcombine.low %v13580_v21, %v13576_v1 }
 0x1fe   : > { %v4437_v58 = vadd.f32 %v13424_v51, %v4436_v0  ;;  %v3580_v59 = vpop.permute.xlu1 %3579  ;;  %v2148_v48 = vpop.permute.xlu0 %2147  ;;  %9805 = vmatprep.mubr.msk.f32.mxu1 %vm9976_vm8, %v16668_v25  ;;  %v6049_v53 = vcombine.low %v6041_v34, %v13643_v61  ;;  %v4126_v3 = vsel %vm4103_vm12, %v4100_v30, %v13592_v14  ;;  %v6487_v56 = vcombine.low %v13530_v37, %v6041_v34 }
 0x1ff   : > { %v9768_v24 = vpop.f32.mrf.mxu0  ;;  %v6392_v27 = vcombine.low %v5688_v16, %v5698_v35  ;;  %v4152_v60 = vsel %vm4129_vm13, %v4126_v3, %v3580_v59  ;;  %v4049_v36 = vsel %vm4025_vm9, %v12628_v55, %v2148_v48 }
 0x200   : > { %v4524_v42 = vmax.f32 %v4437_v58, 0.0 }
 0x201   : > { %6693 = vrot.lane.b32.xlu0 %v5689_v22, %s9979_s14  ;;  %6439 = vrot.lane.b32.xlu1 %v6392_v27, %s9972_s12 }
 0x202   : > { %v4718_v39 = vcombine.high %v4524_v42, %v4524_v42  ;;  %v13654_v49 = vrot.slane %v4524_v42, %v10038_v5  ;;  %v3719_v44 = vpop.permute.xlu1 %3718  ;;  %v2639_v41 = vpop.permute.xlu0 %2638 }
 0x203   : > { %v4178_v7 = vsel %vm4155_vm14, %v4152_v60, %v3719_v44  ;;  %v4075_v42 = vsel %vm4051_vm10, %v4049_v36, %v2639_v41 }
 0x204   : > { %v13661_v57 = vrot.slane %v4718_v39, %v10038_v5  ;;  %v4733_v38 = vcombine.high %v13654_v49, %v13654_v49  ;;  %v5078_v45 = vrot.slane %v13654_v49, 7  ;;  %v5367_v29 = vcombine.low %v4717_v52, %v13654_v49 }
 0x205   : > { %5889 = vrot.lane.b32.xlu0 %v5689_v22, %s9968_s8  ;;  %6774 = vrot.lane.b32.xlu1 %v6049_v53, %s9980_s15  ;;  %v6058_v52 = vrot.slane %v6050_v33, %v10038_v5 }
 0x206   : > { %v13672_v19 = vcombine.high %v13661_v57, %v13661_v57  ;;  %v5080_v6 = vrot.slane %v5078_v45, 2  ;;  %v5081_v9 = vrot.slane %v4733_v38, 7  ;;  %v5084_v15 = vrot.slane %v13661_v57, 7  ;;  %v3874_v18 = vpop.permute.xlu1 %3873  ;;  %v2874_v50 = vpop.permute.xlu0 %2873 }
 0x207   : > { %v5381_v14 = vrot.slane %v5367_v29, %v10038_v5  ;;  %v5079_v10 = vsel %vm10175_vm6, %v9590_v46, %v5078_v45  ;;  %v5383_v4 = vcombine.low %v4733_v38, %v13661_v57  ;;  %v4204_v63 = vsel %vm4181_vm15, %v4178_v7, %v3874_v18 }
 0x208   : > { %v5086_v28 = vrot.slane %v5084_v15, 2  ;;  %v5082_v13 = vsel %vm10175_vm6, %v5080_v6, %v5081_v9  ;;  %v5083_v37 = vrot.slane %v5081_v9, 2  ;;  %v5087_v58 = vrot.slane %v13672_v19, 7 }
 0x209   : > { %6533 = vrot.lane.b32.xlu0 %v6487_v56, %s9977_s29  ;;  %v5691_v16 = vcombine.low %v5079_v10, %v5082_v13  ;;  %6249 = vrot.lane.b32.xlu1 %v6049_v53, %s9973_s13  ;;  %v13696_v21 = vcombine.low %v13614_v8, %v5381_v14  ;;  %v5391_v24 = vrot.slane %v5383_v4, %v10038_v5 }
 0x20a   : > { %v3995_v0 = vpop.permute.xlu1 %3994  ;;  %v3365_v26 = vpop.permute.xlu0 %3364  ;;  %v5085_v55 = vsel %vm10175_vm6, %v5083_v37, %v5084_v15  ;;  %v5088_v48 = vsel %vm10175_vm6, %v5086_v28, %v5087_v58  ;;  %v6051_v22 = vcombine.low %v13654_v49, %v4733_v38  ;;  %v4101_v44 = vsel %vm4077_vm11, %v4075_v42, %v2874_v50 }
 0x20b   : > { %v4230_v59 = vsel %vm4207_vm0, %v4204_v63, %v3995_v0  ;;  %v5705_v1 = vrot.slane %v5691_v16, %v10038_v5  ;;  %v5707_v49 = vcombine.low %v5085_v55, %v5088_v48  ;;  %v6488_v30 = vcombine.low %v13643_v61, %v6058_v52 }
 0x20c   : > { %9806 = vmatmul.mubr.msk.f32.gmra.mxu1 %vm4245_vm1, %v4230_v59  ;;  %v13716_v53 = vrot.slane %v6051_v22, %v10038_v5  ;;  %v4127_v3 = vsel %vm4103_vm12, %v4101_v44, %v3365_v26  ;;  %v5089_v56 = vrot.slane %v5087_v58, 2 }
 0x20d   : > { %v4441_v27 = vpop.f32.mrf.mxu0  ;;  %v5706_v62 = vcombine.low %v5698_v35, %v5705_v1  ;;  %9808 = vmatprep.mubr.msk.f32.mxu1 %vm9976_vm8, %v16668_v25  ;;  %6614 = vrot.lane.b32.xlu1 %v13696_v21, %s9978_s11  ;;  %v6297_v35 = vcombine.low %v5381_v14, %v5391_v24  ;;  %v5715_v61 = vrot.slane %v5707_v49, %v10038_v5 }
 0x20e   : > { %v4442_v8 = vadd.f32 %v13424_v51, %v4441_v27  ;;  %v3582_v34 = vpop.permute.xlu1 %3581  ;;  %v2150_v40 = vpop.permute.xlu0 %2149  ;;  %v6066_v60 = vcombine.low %v6058_v52, %v13716_v53 }
 0x20f   : > { %v9771_v39 = vpop.f32.mrf.mxu0  ;;  %5891 = vrot.lane.b32.xlu0 %v5706_v62, %s9968_s8  ;;  %v4050_v6 = vsel %vm4025_vm9, %v12407_v11, %v2150_v40  ;;  %v4153_v33 = vsel %vm4129_vm13, %v4127_v3, %v3582_v34  ;;  %v6393_v37 = vcombine.low %v5705_v1, %v5715_v61 }
 0x210   : > { %v4525_v41 = vmax.f32 %v4442_v8, 0.0 }
 0x211   : > { %6345 = vrot.lane.b32.xlu1 %v6297_v35, %s9970_s10 }
 0x212   : > { %v4735_v38 = vcombine.high %v4525_v41, %v4525_v41  ;;  %v13719_v45 = vrot.slane %v4525_v41, %v10038_v5  ;;  %v3721_v29 = vpop.permute.xlu1 %3720  ;;  %v2641_v46 = vpop.permute.xlu0 %2640 }
 0x213   : > { %6535 = vrot.lane.b32.xlu0 %v6488_v30, %s9977_s29  ;;  %v4076_v10 = vsel %vm4051_vm10, %v4050_v6, %v2641_v46  ;;  %v4179_v0 = vsel %vm4155_vm14, %v4153_v33, %v3721_v29 }
 0x214   : > { %v13728_v9 = vrot.slane %v4735_v38, %v10038_v5  ;;  %v13732_v15 = vcombine.high %v13719_v45, %v13719_v45  ;;  %v5090_v18 = vrot.slane %v13719_v45, 7  ;;  %v5384_v50 = vcombine.low %v13672_v19, %v13719_v45 }
 0x215   : > { %6695 = vrot.lane.b32.xlu1 %v5706_v62, %s9979_s14  ;;  %v6067_v38 = vcombine.low %v13661_v57, %v13672_v19 }
 0x216   : > { %v13740_v11 = vcombine.high %v13728_v9, %v13728_v9  ;;  %v5092_v14 = vrot.slane %v5090_v18, 2  ;;  %v5093_v28 = vrot.slane %v13732_v15, 7  ;;  %v3876_v13 = vpop.permute.xlu1 %3875  ;;  %v2876_v4 = vpop.permute.xlu0 %2875  ;;  %v5398_v7 = vrot.slane %v5384_v50, %v10038_v5 }
 0x217   : > { %6251 = vrot.lane.b32.xlu0 %v6066_v60, %s9973_s13  ;;  %v5091_v36 = vsel %vm10175_vm6, %v5089_v56, %v5090_v18  ;;  %v4102_v26 = vsel %vm4077_vm11, %v4076_v10, %v2876_v4  ;;  %v4205_v55 = vsel %vm4181_vm15, %v4179_v0, %v3876_v13  ;;  %v6075_v57 = vrot.slane %v6067_v38, %v10038_v5 }
 0x218   : > { %v5400_v16 = vcombine.low %v13728_v9, %v13740_v11  ;;  %v5094_v63 = vsel %vm10175_vm6, %v5092_v14, %v5093_v28  ;;  %v13756_v58 = vcombine.low %v5391_v24, %v5398_v7  ;;  %v5097_v35 = vrot.slane %v13740_v11, 7 }
 0x219   : > { %v5708_v59 = vcombine.low %v5091_v36, %v5094_v63  ;;  %6441 = vrot.lane.b32.xlu1 %v6393_v37, %s9972_s12  ;;  %v9591_v14 = vrot.slane %v13728_v9, 9  ;;  %v6489_v63 = vcombine.low %v13716_v53, %v6075_v57 }
 0x21a   : > { %v3997_v48 = vpop.permute.xlu1 %3996  ;;  %v3367_v22 = vpop.permute.xlu0 %3366  ;;  %v13761_v1 = vrot.slane %v5400_v16, %v10038_v5 }
 0x21b   : > { %v4231_v42 = vsel %vm4207_vm0, %v4205_v55, %v3997_v48  ;;  %6616 = vrot.lane.b32.xlu0 %v13756_v58, %s9978_s11  ;;  %v4128_v27 = vsel %vm4103_vm12, %v4102_v26, %v3367_v22  ;;  %v5722_v52 = vrot.slane %v5708_v59, %v10038_v5  ;;  %v5098_v33 = vsel %vm10175_vm6, %v9591_v14, %v5097_v35 }
 0x21c   : > { %9809 = vmatmul.mubr.msk.f32.gmra.mxu1 %vm4245_vm1, %v4231_v42  ;;  %v6298_v24 = vcombine.low %v5398_v7, %v13761_v1  ;;  %v6068_v7 = vcombine.low %v13719_v45, %v13732_v15 }
 0x21d   : > { %v4446_v62 = vpop.f32.mrf.mxu0  ;;  %9811 = vmatprep.mubr.msk.f32.mxu1 %vm9976_vm8, %v16668_v25  ;;  %6776 = vrot.lane.b32.xlu1 %v6066_v60, %s9980_s15  ;;  %v5723_v30 = vcombine.low %v5715_v61, %v5722_v52  ;;  %v5099_v61 = vrot.slane %v5097_v35, 2 }
 0x21e   : > { %v4447_v8 = vadd.f32 %v13424_v51, %v4446_v62  ;;  %v3723_v34 = vpop.permute.xlu1 %3722  ;;  %v3584_v40 = vpop.permute.xlu0 %3583  ;;  %v6082_v53 = vrot.slane %v6068_v7, %v10038_v5 }
 0x21f   : > { %v9774_v39 = vpop.f32.mrf.mxu0  ;;  %6347 = vrot.lane.b32.xlu0 %v6298_v24, %s9970_s10  ;;  %v4154_v49 = vsel %vm4129_vm13, %v4128_v27, %v3584_v40 }
 0x220   : > { %v4526_v44 = vmax.f32 %v4447_v8, 0.0  ;;  %v4180_v41 = vsel %vm4155_vm14, %v4154_v49, %v3723_v34 }
 0x222   : > { %v4752_v29 = vcombine.high %v4526_v44, %v4526_v44  ;;  %v4759_v46 = vrot.slane %v4526_v44, %v10038_v5  ;;  %v3999_v3 = vpop.permute.xlu1 %3998  ;;  %v3878_v6 = vpop.permute.xlu0 %3877 }
 0x223   : > { %6697 = vrot.lane.b32.xlu0 %v5723_v30, %s9979_s14  ;;  %v4206_v18 = vsel %vm4181_vm15, %v4180_v41, %v3878_v6  ;;  %v6083_v41 = vcombine.low %v6075_v57, %v6082_v53 }
 0x224   : > { %v13784_v50 = vrot.slane %v4752_v29, %v10038_v5  ;;  %v4767_v60 = vcombine.high %v4759_v46, %v4759_v46  ;;  %v5100_v56 = vrot.slane %v4759_v46, 7  ;;  %v4232_v28 = vsel %vm4207_vm0, %v4206_v18, %v3999_v3 }
 0x225   : > { %9812 = vmatmul.mubr.msk.f32.gmra.mxu1 %vm4245_vm1, %v4232_v28  ;;  %v6084_v45 = vcombine.low %v13740_v11, %v4759_v46 }
 0x226   : > { %v5102_v19 = vrot.slane %v5100_v56, 2  ;;  %v5103_v10 = vrot.slane %v4767_v60, 7  ;;  %v13790_v13 = vpop.permute.xlu1 %5879  ;;  %v13792_v4 = vpop.permute.xlu0 %5877  ;;  %v5101_v9 = vsel %vm10175_vm6, %v5099_v61, %v5100_v56  ;;  %v5106_v16 = vrot.slane %v13784_v50, 7 }
 0x227   : > { %5893 = vrot.lane.b32.xlu0 %v5723_v30, %s9968_s8  ;;  %v5724_v37 = vcombine.low %v5098_v33, %v5101_v9  ;;  %v13822_v62 = vcombine.high %v13784_v50, %v13784_v50  ;;  %v5401_v34 = vcombine.low %v4759_v46, %v4767_v60  ;;  %v6092_v39 = vrot.slane %v6084_v45, %v10038_v5 }
 0x228   : > { %v5105_v36 = vrot.slane %v5103_v10, 2  ;;  %v5104_v55 = vsel %vm10175_vm6, %v5102_v19, %v5103_v10  ;;  %v6085_v49 = vcombine.low %v4767_v60, %v13784_v50  ;;  %v5108_v28 = vrot.slane %v5106_v16, 2 }
 0x229   : > { %v5732_v59 = vrot.slane %v5724_v37, %v10038_v5  ;;  %v5109_v38 = vrot.slane %v13822_v62, 7  ;;  %v6490_v3 = vcombine.low %v6082_v53, %v6092_v39  ;;  %v5415_v6 = vrot.slane %v5401_v34, %v10038_v5 }
 0x22a   : > { %v13803_v0 = vpop.permute.xlu1 %6239  ;;  %v13805_v26 = vpop.permute.xlu0 %6237  ;;  %v5107_v48 = vsel %vm10175_vm6, %v5105_v36, %v5106_v16  ;;  %v13843_v18 = vrot.slane %v6085_v49, %v10038_v5  ;;  %v5417_v61 = vcombine.low %v13784_v50, %v13822_v62 }
 0x22b   : > { %6537 = vrot.lane.b32.xlu0 %v6489_v63, %s9977_s29  ;;  %v5725_v15 = vcombine.low %v5104_v55, %v5107_v48  ;;  %v6394_v22 = vcombine.low %v5722_v52, %v5732_v59  ;;  %v5111_v57 = vrot.slane %v5109_v38, 2  ;;  %v13864_v37 = vcombine.low %v13761_v1, %v5415_v6 }
 0x22c   : > { %v6100_v9 = vcombine.low %v6092_v39, %v13843_v18  ;;  %v5425_v50 = vrot.slane %v5417_v61, %v10038_v5  ;;  %v5110_v55 = vsel %vm10175_vm6, %v5108_v28, %v5109_v38 }
 0x22d   : > { %v4451_v42 = vpop.f32.mrf.mxu0  ;;  %v13816_v27 = vrot.slane %v5725_v15, %v10038_v5  ;;  %6443 = vrot.lane.b32.xlu1 %v6394_v22, %s9972_s12 }
 0x22e   : > { %v4452_v24 = vadd.f32 %v13424_v51, %v4451_v42  ;;  %v13824_v8 = vpop.permute.xlu1 %6335  ;;  %v13826_v11 = vpop.permute.xlu0 %6333  ;;  %v6299_v15 = vcombine.low %v5415_v6, %v5425_v50 }
 0x22f   : > { %v9777_v52 = vpop.f32.mrf.mxu0  ;;  %v5740_v40 = vcombine.low %v5732_v59, %v13816_v27 }
 0x230   : > { %v4527_v44 = vmax.f32 %v4452_v24, 0.0 }
 0x231   : > { %5895 = vrot.lane.b32.xlu0 %v5740_v40, %s9968_s8  ;;  %6778 = vrot.lane.b32.xlu1 %v6083_v41, %s9980_s15 }
 0x232   : > { %v4769_v35 = vcombine.high %v4527_v44, %v4527_v44  ;;  %v13833_v30 = vrot.slane %v4527_v44, %v10038_v5  ;;  %v13837_v29 = vpop.permute.xlu1 %5881  ;;  %v13839_v46 = vpop.permute.xlu0 %6429 }
 0x234   : > { %v13846_v60 = vrot.slane %v4769_v35, %v10038_v5  ;;  %v4784_v56 = vcombine.high %v13833_v30, %v13833_v30  ;;  %v5112_v14 = vrot.slane %v13833_v30, 7 }
 0x235   : > { %6539 = vrot.lane.b32.xlu0 %v6490_v3, %s9977_s29  ;;  %6253 = vrot.lane.b32.xlu1 %v6083_v41, %s9973_s13 }
 0x236   : > { %v13855_v19 = vpop.permute.xlu1 %6525  ;;  %v13857_v10 = vpop.permute.xlu0 %6431  ;;  %v5418_v33 = vcombine.low %v4784_v56, %v13846_v60  ;;  %v5113_v7 = vsel %vm10175_vm6, %v5111_v57, %v5112_v14  ;;  %v13873_v36 = vcombine.high %v13846_v60, %v13846_v60  ;;  %v5116_v63 = vrot.slane %v13846_v60, 7 }
 0x237   : > { %v5741_v45 = vcombine.low %v5110_v55, %v5113_v7  ;;  %v9592_v39 = vrot.slane %v4784_v56, 9 }
 0x238   : > { %v13869_v16 = vrot.slane %v5418_v33, %v10038_v5  ;;  %v5118_v53 = vrot.slane %v5116_v63, 2  ;;  %v5119_v52 = vrot.slane %v13873_v36, 7 }
 0x239   : > { %6255 = vrot.lane.b32.xlu0 %v6100_v9, %s9973_s13  ;;  %6618 = vrot.lane.b32.xlu1 %v13864_v37, %s9978_s11  ;;  %v5749_v44 = vrot.slane %v5741_v45, %v10038_v5  ;;  %v5117_v56 = vsel %vm10175_vm6, %v9592_v39, %v5116_v63 }
 0x23a   : > { %v13878_v59 = vpop.permute.xlu1 %6241  ;;  %v13880_v1 = vpop.permute.xlu0 %5883  ;;  %v13885_v48 = vcombine.low %v5425_v50, %v13869_v16  ;;  %v5120_v14 = vsel %vm10175_vm6, %v5118_v53, %v5119_v52  ;;  %v5121_v50 = vrot.slane %v5119_v52, 2  ;;  %v16716_v53 = vld [vmem:[#allocation7_spill] sm:$0xff] }
 0x23b   : > { %v6395_v61 = vcombine.low %v13816_v27, %v5749_v44  ;;  %v5742_v7 = vcombine.low %v5117_v56, %v5120_v14 }
 0x23d   : > { %v4456_v22 = vpop.f32.mrf.mxu0  ;;  %6620 = vrot.lane.b32.xlu0 %v13885_v48, %s9978_s11  ;;  %6349 = vrot.lane.b32.xlu1 %v6299_v15, %s9970_s10 }
 0x23e   : > { %v4457_v42 = vadd.f32 %v13424_v51, %v4456_v22  ;;  %v6607_v24 = vpop.permute.xlu1 %6606  ;;  %v13891_v34 = vpop.permute.xlu0 %6527  ;;  %v16715_v22 = vld [vmem:[#allocation8_spill] sm:$0xff] }
 0x23f   : > { %v9780_v49 = vpop.f32.mrf.mxu0 }
 0x240   : > { %v4528_v41 = vmax.f32 %v4457_v42, 0.0  ;;  %v16717_v42 = vcombine.low %v16715_v22, %v16716_v53 }
 0x241   : > { %6699 = vrot.lane.b32.xlu1 %v5740_v40, %s9979_s14 }
 0x242   : > { %v4786_v35 = vcombine.high %v4528_v41, %v4528_v41  ;;  %v13896_v38 = vrot.slane %v4528_v41, %v10038_v5  ;;  %v13899_v3 = vpop.permute.xlu1 %6337  ;;  %v13901_v6 = vpop.permute.xlu0 %6243  ;;  %v6822_v39 = vsel %vm4051_vm10, %v16717_v42, %v13792_v4  ;;  %v5756_v4 = vrot.slane %v5742_v7, %v10038_v5 }
 0x243   : > { %v6840_v41 = vsel %vm4103_vm12, %v6822_v39, %v13805_v26 }
 0x244   : > { %v13909_v28 = vrot.slane %v4786_v35, %v10038_v5  ;;  %v13913_v57 = vcombine.high %v13896_v38, %v13896_v38  ;;  %v5122_v40 = vrot.slane %v13896_v38, 7  ;;  %v5434_v33 = vcombine.low %v13873_v36, %v13896_v38 }
 0x245   : > { %6445 = vrot.lane.b32.xlu1 %v6395_v61, %s9972_s12  ;;  %v6858_v22 = vsel %vm4155_vm14, %v6840_v41, %v13826_v11 }
 0x246   : > { %v13920_v27 = vcombine.high %v13909_v28, %v13909_v28  ;;  %v5124_v55 = vrot.slane %v5122_v40, 2  ;;  %v5125_v63 = vrot.slane %v13913_v57, 7  ;;  %v5128_v45 = vrot.slane %v13909_v28, 7  ;;  %v6688_v15 = vpop.permute.xlu1 %6687  ;;  %v6609_v52 = vpop.permute.xlu0 %6608 }
 0x247   : > { %v13931_v49 = vrot.slane %v5434_v33, %v10038_v5  ;;  %v5123_v35 = vsel %vm10175_vm6, %v5121_v50, %v5122_v40  ;;  %v6102_v33 = vcombine.low %v13846_v60, %v13873_v36  ;;  %v6876_v7 = vsel %vm4207_vm0, %v6858_v22, %v13839_v46 }
 0x248   : > { %v5126_v14 = vsel %vm10175_vm6, %v5124_v55, %v5125_v63  ;;  %v5130_v26 = vrot.slane %v5128_v45, 2  ;;  %v5131_v53 = vrot.slane %v13920_v27, 7  ;;  %v5127_v50 = vrot.slane %v5125_v63, 2 }
 0x249   : > { %v6300_v61 = vcombine.low %v13869_v16, %v13931_v49  ;;  %v5758_v56 = vcombine.low %v5123_v35, %v5126_v14  ;;  %6780 = vrot.lane.b32.xlu1 %v6100_v9, %s9980_s15  ;;  %v6101_v16 = vcombine.low %v13822_v62, %v13833_v30  ;;  %v6895_v11 = vsel %vm6894_vm2, %v6876_v7, %v13855_v19 }
 0x24a   : > { %v13948_v40 = vpop.permute.xlu1 %6433  ;;  %v6914_v9 = vsel %vm6913_vm3, %v6895_v11, %v6607_v24  ;;  %v5757_v63 = vcombine.low %v5749_v44, %v5756_v4  ;;  %v13962_v30 = vrot.slane %v6102_v33, %v10038_v5  ;;  %v5129_v19 = vsel %vm10175_vm6, %v5127_v50, %v5128_v45 }
 0x24b   : > { %6351 = vrot.lane.b32.xlu0 %v6300_v61, %s9970_s10  ;;  %v5766_v60 = vrot.slane %v5758_v56, %v10038_v5  ;;  %v6933_v46 = vsel %vm6932_vm4, %v6914_v9, %v6688_v15  ;;  %v5132_v41 = vsel %vm10175_vm6, %v5130_v26, %v5131_v53  ;;  %v6109_v35 = vrot.slane %v6101_v16, %v10038_v5 }
 0x24c   : > { %v5435_v45 = vcombine.low %v13913_v57, %v13909_v28  ;;  %v5759_v56 = vcombine.low %v5129_v19, %v5132_v41 }
 0x24d   : > { %v13959_v36 = vpop.permute.xlu0 %6339  ;;  %v4461_v55 = vpop.f32.mrf.mxu0  ;;  %v6396_v62 = vcombine.low %v5756_v4, %v5766_v60  ;;  %v6117_v4 = vcombine.low %v6109_v35, %v13962_v30  ;;  %v6491_v16 = vcombine.low %v13843_v18, %v6109_v35 }
 0x24e   : > { %v4462_v42 = vadd.f32 %v13424_v51, %v4461_v55  ;;  %v6769_v39 = vpop.permute.xlu1 %6768  ;;  %v6823_v51 = vsel %vm4051_vm10, %v5280_v47, %v13790_v13  ;;  %v6118_v13 = vcombine.low %v13896_v38, %v13913_v57  ;;  %v14009_v7 = vrot.slane %v5759_v56, %v10038_v5 }
 0x24f   : > { %6701 = vrot.lane.b32.xlu0 %v5757_v63, %s9979_s14  ;;  %v6952_v24 = vsel %vm6951_vm5, %v6933_v46, %v6769_v39  ;;  %6447 = vrot.lane.b32.xlu1 %v6396_v62, %s9972_s12  ;;  %v9783_v44 = vpop.f32.mrf.mxu0  ;;  %v6841_v14 = vsel %vm4103_vm12, %v6823_v51, %v13803_v0 }
 0x250   : > { %v4529_v15 = vmax.f32 %v4462_v42, 0.0  ;;  %9832 = vmatprep.mubr.msk.f32.mxu1 %vm6986_vm7, %v6952_v24  ;;  %v6859_v33 = vsel %vm4155_vm14, %v6841_v14, %v13824_v8  ;;  %v5449_v8 = vrot.slane %v5435_v45, %v10038_v5  ;;  %v6126_v55 = vrot.slane %v6118_v13, %v10038_v5  ;;  %v14053_v45 = vld [vmem:[%s16526_s2] ss:$0 sm:$0xff] }
 0x251   : > { %v6690_v61 = vpop.permute.xlu0 %6689  ;;  %v6877_v47 = vsel %vm4207_vm0, %v6859_v33, %v13857_v10  ;;  %v5774_v39 = vcombine.low %v5766_v60, %v14009_v7 }
 0x252   : > { %v4803_v22 = vcombine.high %v4529_v15, %v4529_v15  ;;  %v4810_v31 = vrot.slane %v4529_v15, %v10038_v5  ;;  %v13988_v54 = vpop.permute.xlu1 %6435  ;;  %v6896_v0 = vsel %vm6894_vm2, %v6877_v47, %v13891_v34  ;;  %v14019_v18 = vcombine.low %v13931_v49, %v5449_v8 }
 0x253   : > { %5897 = vrot.lane.b32.xlu0 %v5757_v63, %s9968_s8  ;;  %6782 = vrot.lane.b32.xlu1 %v6117_v4, %s9980_s15  ;;  %v6915_v53 = vsel %vm6913_vm3, %v6896_v0, %v6609_v52  ;;  %v6119_v63 = vcombine.low %v13909_v28, %v13920_v27  ;;  %v6492_v27 = vcombine.low %v13962_v30, %v6126_v55 }
 0x254   : > { %v13998_v26 = vcombine.high %v4810_v31, %v4810_v31  ;;  %v14003_v50 = vrot.slane %v4803_v22, %v10038_v5  ;;  %v6934_v57 = vsel %vm6932_vm4, %v6915_v53, %v6690_v61  ;;  %v9593_v49 = vrot.slane %v4810_v31, 9 }
 0x255   : > { %v14005_v10 = vpop.permute.xlu0 %5885  ;;  %v14046_v51 = vrot.slane %v6119_v63, %v10038_v5 }
 0x256   : > { %v5135_v38 = vrot.slane %v13998_v26, 7  ;;  %v5451_v34 = vcombine.low %v4810_v31, %v13998_v26  ;;  %v6771_v11 = vpop.permute.xlu1 %6770  ;;  %v14026_v62 = vcombine.high %v14003_v50, %v14003_v50  ;;  %v5138_v46 = vrot.slane %v14003_v50, 7 }
 0x257   : > { %6541 = vrot.lane.b32.xlu0 %v6491_v16, %s9977_s29  ;;  %v6953_v52 = vsel %vm6951_vm5, %v6934_v57, %v6771_v11  ;;  %6257 = vrot.lane.b32.xlu1 %v6117_v4, %s9973_s13  ;;  %v6134_v22 = vcombine.low %v6126_v55, %v14046_v51  ;;  %v16718_v11 = vcombine.low %v13108_v32, %v13105_v43 }
 0x258   : > { %v5137_v9 = vrot.slane %v5135_v38, 2  ;;  %9833 = vmatmul.mubr.msk.f32.vlgmr.msra.gmra.mxu1 %vm6986_vm7, %v6953_v52  ;;  %v5459_v19 = vrot.slane %v5451_v34, %v10038_v5  ;;  %v5136_v24 = vsel %vm10175_vm6, %v9593_v49, %v5135_v38  ;;  %v5452_v15 = vcombine.low %v14003_v50, %v14026_v62 }
 0x259   : > { %v14029_v42 = vpop.permute.xlu0 %6529  ;;  %v5141_v53 = vrot.slane %v14026_v62, 7  ;;  %v5140_v16 = vrot.slane %v5138_v46, 2  ;;  %v6824_v52 = vsel %vm4051_vm10, %v16718_v11, %v13837_v29 }
 0x25a   : > { %v14033_v41 = vpop.permute.xlu1 %6245  ;;  %v5139_v28 = vsel %vm10175_vm6, %v5137_v9, %v5138_v46  ;;  %v6301_v35 = vcombine.low %v5449_v8, %v5459_v19  ;;  %v5466_v31 = vrot.slane %v5452_v15, %v10038_v5 }
 0x25b   : > { %5899 = vrot.lane.b32.xlu0 %v5774_v39, %s9968_s8  ;;  %6622 = vrot.lane.b32.xlu1 %v14019_v18, %s9978_s11  ;;  %v5775_v61 = vcombine.low %v5136_v24, %v5139_v28  ;;  %v5143_v28 = vrot.slane %v5141_v53, 2  ;;  %v5142_v32 = vsel %vm10175_vm6, %v5140_v16, %v5141_v53 }
 0x25c   : > { %v14081_v55 = vcombine.low %v5459_v19, %v5466_v31 }
 0x25d   : > { %v14043_v44 = vpop.permute.xlu0 %5887  ;;  %v4466_v60 = vpop.f32.mrf.mxu0  ;;  %v5783_v8 = vrot.slane %v5775_v61, %v10038_v5 }
 0x25e   : > { %v4467_v30 = vadd.f32 %v14053_v45, %v4466_v60  ;;  %v6611_v14 = vpop.permute.xlu1 %6610 }
 0x25f   : > { %6543 = vrot.lane.b32.xlu0 %v6492_v27, %s9977_s29  ;;  %6353 = vrot.lane.b32.xlu1 %v6301_v35, %s9970_s10  ;;  %v9786_v4 = vpop.f32.mrf.mxu0  ;;  %v6397_v49 = vcombine.low %v14009_v7, %v5783_v8  ;;  %v6842_v27 = vsel %vm4103_vm12, %v6824_v52, %v13878_v59 }
 0x260   : > { %v4530_v56 = vmax.f32 %v4467_v30, 0.0  ;;  %v6860_v19 = vsel %vm4155_vm14, %v6842_v27, %v13899_v3 }
 0x261   : > { %v14058_v33 = vpop.permute.xlu0 %6531  ;;  %v6878_v35 = vsel %vm4207_vm0, %v6860_v19, %v13948_v40 }
 0x262   : > { %v4820_v47 = vcombine.high %v4530_v56, %v4530_v56  ;;  %v4827_v13 = vrot.slane %v4530_v56, %v10038_v5  ;;  %v14063_v0 = vpop.permute.xlu1 %6341  ;;  %v6897_v16 = vsel %vm6894_vm2, %v6878_v35, %v14029_v42 }
 0x263   : > { %6259 = vrot.lane.b32.xlu0 %v6134_v22, %s9973_s13  ;;  %6703 = vrot.lane.b32.xlu1 %v5774_v39, %s9979_s14  ;;  %v6916_v40 = vsel %vm6913_vm3, %v6897_v16, %v6611_v14 }
 0x264   : > { %v14070_v38 = vrot.slane %v4820_v47, %v10038_v5  ;;  %v14072_v34 = vcombine.high %v4827_v13, %v4827_v13  ;;  %v5144_v57 = vrot.slane %v4827_v13, 7  ;;  %v6136_v4 = vcombine.low %v14026_v62, %v4827_v13 }
 0x265   : > { %v14079_v9 = vpop.permute.xlu0 %6247  ;;  %v6135_v62 = vcombine.low %v13998_v26, %v14003_v50 }
 0x266   : > { %v5146_v63 = vrot.slane %v5144_v57, 2  ;;  %v5147_v39 = vrot.slane %v14072_v34, 7  ;;  %v6692_v46 = vpop.permute.xlu1 %6691  ;;  %v5468_v24 = vcombine.low %v4827_v13, %v14072_v34  ;;  %v5150_v43 = vrot.slane %v14070_v38, 7 }
 0x267   : > { %6624 = vrot.lane.b32.xlu0 %v14081_v55, %s9978_s11  ;;  %6449 = vrot.lane.b32.xlu1 %v6397_v49, %s9972_s12  ;;  %v5145_v29 = vsel %vm10175_vm6, %v5143_v28, %v5144_v57  ;;  %v6935_v13 = vsel %vm6932_vm4, %v6916_v40, %v6692_v46  ;;  %v14132_v28 = vrot.slane %v6136_v4, %v10038_v5 }
 0x268   : > { %v5149_v7 = vrot.slane %v5147_v39, 2  ;;  %v14099_v59 = vrot.slane %v5468_v24, %v10038_v5  ;;  %v5776_v60 = vcombine.low %v5142_v32, %v5145_v29  ;;  %v5148_v30 = vsel %vm10175_vm6, %v5146_v63, %v5147_v39 }
 0x269   : > { %v6613_v56 = vpop.permute.xlu0 %6612  ;;  %v4836_v50 = vcombine.high %v14070_v38, %v14070_v38 }
 0x26a   : > { %v14103_v15 = vpop.permute.xlu1 %6437  ;;  %v5151_v61 = vsel %vm10175_vm6, %v5149_v7, %v5150_v43  ;;  %v6302_v3 = vcombine.low %v5466_v31, %v14099_v59  ;;  %v5790_v47 = vrot.slane %v5776_v60, %v10038_v5  ;;  %v6825_v31 = vsel %vm4051_vm10, %v13311_v23, %v13880_v1 }
 0x26b   : > { %v5792_v53 = vcombine.low %v5148_v30, %v5151_v61  ;;  %6784 = vrot.lane.b32.xlu1 %v6134_v22, %s9980_s15  ;;  %v6843_v26 = vsel %vm4103_vm12, %v6825_v31, %v13901_v6  ;;  %v9594_v35 = vrot.slane %v4836_v50, 9 }
 0x26c   : > { %6355 = vrot.lane.b32.xlu0 %v6302_v3, %s9970_s10  ;;  %v5791_v39 = vcombine.low %v5783_v8, %v5790_v47  ;;  %v6861_v1 = vsel %vm4155_vm14, %v6843_v26, %v13959_v36  ;;  %v6143_v8 = vrot.slane %v6135_v62, %v10038_v5 }
 0x26d   : > { %v4471_v57 = vpop.f32.mrf.mxu0  ;;  %v14118_v11 = vrot.slane %v5792_v53, %v10038_v5  ;;  %v6879_v46 = vsel %vm4207_vm0, %v6861_v1, %v13988_v54 }
 0x26e   : > { %v4472_v42 = vadd.f32 %v14053_v45, %v4471_v57  ;;  %v6773_v22 = vpop.permute.xlu1 %6772  ;;  %v6898_v24 = vsel %vm6894_vm2, %v6879_v46, %v14058_v33  ;;  %v6151_v36 = vcombine.low %v6143_v8, %v14132_v28  ;;  %v6493_v53 = vcombine.low %v14046_v51, %v6143_v8 }
 0x26f   : > { %v14127_v52 = vpop.permute.xlu0 %6343  ;;  %v6954_v14 = vsel %vm6951_vm5, %v6935_v13, %v6773_v22  ;;  %v9789_v63 = vpop.f32.mrf.mxu0  ;;  %v6398_v49 = vcombine.low %v5790_v47, %v14118_v11  ;;  %v6917_v54 = vsel %vm6913_vm3, %v6898_v24, %v6613_v56 }
 0x270   : > { %v4531_v23 = vmax.f32 %v4472_v42, 0.0  ;;  %9835 = vmatprep.mubr.msk.f32.mxu1 %vm6986_vm7, %v6954_v14  ;;  %6705 = vrot.lane.b32.xlu0 %v5791_v39, %s9979_s14  ;;  %v6152_v42 = vcombine.low %v14072_v34, %v14070_v38 }
 0x271   : > { %6451 = vrot.lane.b32.xlu1 %v6398_v49, %s9972_s12 }
 0x272   : > { %v4837_v27 = vcombine.high %v4531_v23, %v4531_v23  ;;  %v4844_v6 = vrot.slane %v4531_v23, %v10038_v5 }
 0x273   : > { %v6694_v43 = vpop.permute.xlu0 %6693  ;;  %v14153_v60 = vpop.permute.xlu1 %6439 }
 0x274   : > { %v14151_v32 = vrot.slane %v4837_v27, %v10038_v5  ;;  %v4852_v29 = vcombine.high %v4844_v6, %v4844_v6  ;;  %v5154_v7 = vrot.slane %v4844_v6, 7  ;;  %v5469_v19 = vcombine.low %v4836_v50, %v4844_v6  ;;  %5901 = vrot.lane.b32.xlu0 %v5791_v39, %s9968_s8 }
 0x275   : > { %6786 = vrot.lane.b32.xlu1 %v6151_v36, %s9980_s15  ;;  %v6936_v3 = vsel %vm6932_vm4, %v6917_v54, %v6694_v43  ;;  %v6160_v50 = vrot.slane %v6152_v42, %v10038_v5 }
 0x276   : > { %v14160_v33 = vcombine.high %v14151_v32, %v14151_v32  ;;  %v5156_v30 = vrot.slane %v5154_v7, 2  ;;  %v5157_v61 = vrot.slane %v4852_v29, 7  ;;  %v5160_v4 = vrot.slane %v14151_v32, 7 }
 0x277   : > { %v14164_v47 = vpop.permute.xlu0 %5889  ;;  %v5483_v56 = vrot.slane %v5469_v19, %v10038_v5  ;;  %v5485_v16 = vcombine.low %v4852_v29, %v14151_v32  ;;  %v6775_v57 = vpop.permute.xlu1 %6774  ;;  %v5155_v62 = vsel %vm10175_vm6, %v9594_v35, %v5154_v7  ;;  %v6153_v23 = vcombine.low %v4844_v6, %v4852_v29 }
 0x278   : > { %v5162_v40 = vrot.slane %v5160_v4, 2  ;;  %v5158_v31 = vsel %vm10175_vm6, %v5156_v30, %v5157_v61  ;;  %v5159_v13 = vrot.slane %v5157_v61, 2  ;;  %v6955_v22 = vsel %vm6951_vm5, %v6936_v3, %v6775_v57  ;;  %6545 = vrot.lane.b32.xlu0 %v6493_v53, %s9977_s29 }
 0x279   : > { %6261 = vrot.lane.b32.xlu1 %v6151_v36, %s9973_s13  ;;  %v5793_v51 = vcombine.low %v5155_v62, %v5158_v31  ;;  %v5163_v14 = vrot.slane %v14160_v33, 7  ;;  %9836 = vmatmul.mubr.msk.f32.gmra.mxu1 %vm6986_vm7, %v6955_v22  ;;  %v14181_v63 = vcombine.low %v14099_v59, %v5483_v56  ;;  %v5493_v49 = vrot.slane %v5485_v16, %v10038_v5 }
 0x27a   : > { %v5161_v38 = vsel %vm10175_vm6, %v5159_v13, %v5160_v4  ;;  %v6494_v43 = vcombine.low %v14132_v28, %v6160_v50  ;;  %v14201_v6 = vrot.slane %v6153_v23, %v10038_v5  ;;  %v6826_v4 = vsel %vm4051_vm10, %v13353_v12, %v14005_v10 }
 0x27b   : > { %v5807_v39 = vrot.slane %v5793_v51, %v10038_v5  ;;  %v14185_v26 = vpop.permute.xlu1 %6249  ;;  %v5164_v34 = vsel %vm10175_vm6, %v5162_v40, %v5163_v14  ;;  %v6534_v1 = vpop.permute.xlu0 %6533  ;;  %v6303_v8 = vcombine.low %v5483_v56, %v5493_v49  ;;  %v6844_v53 = vsel %vm4103_vm12, %v6826_v4, %v14033_v41 }
 0x27c   : > { %v5809_v46 = vcombine.low %v5161_v38, %v5164_v34  ;;  %v6168_v19 = vcombine.low %v6160_v50, %v14201_v6  ;;  %v6862_v40 = vsel %vm4155_vm14, %v6844_v53, %v14063_v0  ;;  %v5165_v13 = vrot.slane %v5163_v14, 2 }
 0x27d   : > { %6626 = vrot.lane.b32.xlu1 %v14181_v63, %s9978_s11  ;;  %v5808_v59 = vcombine.low %v14118_v11, %v5807_v39  ;;  %v6880_v31 = vsel %vm4207_vm0, %v6862_v40, %v14103_v15 }
 0x27e   : > { %v5817_v11 = vrot.slane %v5809_v46, %v10038_v5  ;;  %v6899_v42 = vsel %vm6894_vm2, %v6880_v31, %v6534_v1 }
 0x27f   : > { %5903 = vrot.lane.b32.xlu0 %v5808_v59, %s9968_s8  ;;  %v6615_v27 = vpop.permute.xlu1 %6614 }
 0x280   : > { %v6399_v28 = vcombine.low %v5807_v39, %v5817_v11  ;;  %v6918_v38 = vsel %vm6913_vm3, %v6899_v42, %v6615_v27 }
 0x281   : > { %6357 = vrot.lane.b32.xlu1 %v6303_v8, %s9970_s10  ;;  %v14197_v24 = vpop.permute.xlu0 %5891 }
 0x283   : > { %6547 = vrot.lane.b32.xlu0 %v6494_v43, %s9977_s29  ;;  %v14205_v36 = vpop.permute.xlu1 %6345 }
 0x285   : > { %6707 = vrot.lane.b32.xlu1 %v5808_v59, %s9979_s14  ;;  %v4476_v29 = vpop.f32.mrf.mxu0  ;;  %v6536_v7 = vpop.permute.xlu0 %6535 }
 0x286   : > { %v4477_v35 = vadd.f32 %v14053_v45, %v4476_v29 }
 0x287   : > { %v9792_v54 = vpop.f32.mrf.mxu0  ;;  %6263 = vrot.lane.b32.xlu0 %v6168_v19, %s9973_s13  ;;  %v6696_v61 = vpop.permute.xlu1 %6695 }
 0x288   : > { %v4532_v30 = vmax.f32 %v4477_v35, 0.0  ;;  %v6937_v23 = vsel %vm6932_vm4, %v6918_v38, %v6696_v61  ;;  %v6827_v61 = vsel %vm4051_vm10, %v13513_v20, %v14043_v44 }
 0x289   : > { %6453 = vrot.lane.b32.xlu1 %v6399_v28, %s9972_s12  ;;  %v14215_v3 = vpop.permute.xlu0 %6251  ;;  %v6845_v4 = vsel %vm4103_vm12, %v6827_v61, %v14079_v9 }
 0x28a   : > { %v4854_v56 = vcombine.high %v4532_v30, %v4532_v30  ;;  %v14220_v16 = vrot.slane %v4532_v30, %v10038_v5 }
 0x28b   : > { %v14234_v41 = vpop.permute.xlu1 %6441 }
 0x28c   : > { %v14225_v57 = vrot.slane %v4854_v56, %v10038_v5  ;;  %v14229_v12 = vcombine.high %v14220_v16, %v14220_v16  ;;  %v5166_v10 = vrot.slane %v14220_v16, 7  ;;  %v5486_v62 = vcombine.low %v14160_v33, %v14220_v16 }
 0x28d   : > { %6788 = vrot.lane.b32.xlu1 %v6168_v19, %s9980_s15  ;;  %v6617_v0 = vpop.permute.xlu0 %6616 }
 0x28e   : > { %v14242_v22 = vcombine.high %v14225_v57, %v14225_v57  ;;  %v5168_v51 = vrot.slane %v5166_v10, 2  ;;  %v5169_v39 = vrot.slane %v14229_v12, 7  ;;  %v5500_v34 = vrot.slane %v5486_v62, %v10038_v5 }
 0x28f   : > { %v6777_v59 = vpop.permute.xlu1 %6776  ;;  %v5167_v14 = vsel %vm10175_vm6, %v5165_v13, %v5166_v10 }
 0x290   : > { %v5502_v15 = vcombine.low %v14225_v57, %v14242_v22  ;;  %v5170_v1 = vsel %vm10175_vm6, %v5168_v51, %v5169_v39  ;;  %v6956_v50 = vsel %vm6951_vm5, %v6937_v23, %v6777_v59  ;;  %v14257_v46 = vcombine.low %v5493_v49, %v5500_v34 }
 0x291   : > { %v14255_v8 = vpop.permute.xlu0 %6347  ;;  %v5810_v27 = vcombine.low %v5167_v14, %v5170_v1  ;;  %9838 = vmatprep.mubr.msk.f32.mxu1 %vm6986_vm7, %v6956_v50  ;;  %v6169_v49 = vcombine.low %v14151_v32, %v14160_v33  ;;  %v5173_v42 = vrot.slane %v14242_v22, 7  ;;  %v9595_v23 = vrot.slane %v14225_v57, 9 }
 0x292   : > { %v14261_v43 = vrot.slane %v5502_v15, %v10038_v5  ;;  %6628 = vrot.lane.b32.xlu0 %v14257_v46, %s9978_s11 }
 0x293   : > { %v5824_v19 = vrot.slane %v5810_v27, %v10038_v5  ;;  %v6177_v30 = vrot.slane %v6169_v49, %v10038_v5  ;;  %v5175_v59 = vrot.slane %v5173_v42, 2  ;;  %v6170_v27 = vcombine.low %v14220_v16, %v14229_v12 }
 0x294   : > { %v6304_v29 = vcombine.low %v5500_v34, %v14261_v43 }
 0x295   : > { %v6698_v35 = vpop.permute.xlu0 %6697  ;;  %v5825_v54 = vcombine.low %v5817_v11, %v5824_v19  ;;  %v6863_v11 = vsel %vm4155_vm14, %v6845_v4, %v14127_v52  ;;  %v6495_v33 = vcombine.low %v14201_v6, %v6177_v30 }
 0x296   : > { %6359 = vrot.lane.b32.xlu0 %v6304_v29, %s9970_s10  ;;  %v6881_v32 = vsel %vm4207_vm0, %v6863_v11, %v14153_v60 }
 0x297   : > { %v6900_v56 = vsel %vm6894_vm2, %v6881_v32, %v6536_v7 }
 0x298   : > { %v6919_v40 = vsel %vm6913_vm3, %v6900_v56, %v6617_v0 }
 0x299   : > { %v14271_v28 = vpop.permute.xlu0 %5893  ;;  %v6938_v44 = vsel %vm6932_vm4, %v6919_v40, %v6698_v35  ;;  %v5174_v35 = vsel %vm10175_vm6, %v9595_v23, %v5173_v42 }
 0x29a   : > { %6709 = vrot.lane.b32.xlu0 %v5825_v54, %s9979_s14 }
 0x29d   : > { %v6538_v20 = vpop.permute.xlu0 %6537 }
 0x29e   : > { %5905 = vrot.lane.b32.xlu0 %v5825_v54, %s9968_s8 }
 0x29f   : > { %v14282_v53 = vpop.permute.xlu1 %6443 }
 0x2a2   : > { %6549 = vrot.lane.b32.xlu0 %v6495_v33, %s9977_s29  ;;  %v6184_v33 = vrot.slane %v6170_v27, %v10038_v5 }
 0x2a3   : > { %v6779_v9 = vpop.permute.xlu1 %6778  ;;  %v14294_v6 = vpop.permute.xlu0 %5895 }
 0x2a4   : > { %v4481_v10 = vpop.f32.mrf.mxu0  ;;  %v6957_v52 = vsel %vm6951_vm5, %v6938_v44, %v6779_v9 }
 0x2a5   : > { %v4482_v62 = vadd.f32 %v14053_v45, %v4481_v10  ;;  %v4491_v31 = vpop.f32.mrf.mxu1  ;;  %9839 = vmatmul.mubr.msk.f32.gmra.mxu1 %vm6986_vm7, %v6957_v52  ;;  %v6828_v10 = vsel %vm4051_vm10, %v13589_v17, %v14164_v47 }
 0x2a6   : > { %v9795_v60 = vpop.f32.mrf.mxu0  ;;  %v6846_v52 = vsel %vm4103_vm12, %v6828_v10, %v14185_v26 }
 0x2a7   : > { %v4533_v7 = vmax.f32 %v4482_v62, 0.0  ;;  %v9801_v13 = vpop.f32.mrf.mxu1  ;;  %v14296_v0 = vpop.permute.xlu1 %6253  ;;  %v6864_v60 = vsel %vm4155_vm14, %v6846_v52, %v14205_v36 }
 0x2a8   : > { %v14304_v50 = vpop.permute.xlu0 %6539  ;;  %v6882_v26 = vsel %vm4207_vm0, %v6864_v60, %v14234_v41 }
 0x2a9   : > { %v4871_v51 = vcombine.high %v4533_v7, %v4533_v7  ;;  %v4878_v39 = vrot.slane %v4533_v7, %v10038_v5  ;;  %v6185_v7 = vcombine.low %v6177_v30, %v6184_v33  ;;  %v6901_v30 = vsel %vm6894_vm2, %v6882_v26, %v6538_v20 }
 0x2ab   : > { %v4886_v38 = vcombine.high %v4878_v39, %v4878_v39  ;;  %v5176_v34 = vrot.slane %v4878_v39, 7  ;;  %v6619_v15 = vpop.permute.xlu1 %6618  ;;  %v14302_v14 = vrot.slane %v4871_v51, %v10038_v5  ;;  %v6186_v56 = vcombine.low %v14242_v22, %v4878_v39 }
 0x2ac   : > { %v14316_v32 = vpop.permute.xlu0 %6255  ;;  %v4492_v22 = vadd.f32 %v14053_v45, %v4491_v31 }
 0x2ad   : > { %v5179_v1 = vrot.slane %v4886_v38, 7  ;;  %v5178_v29 = vrot.slane %v5176_v34, 2  ;;  %v5177_v54 = vsel %vm10175_vm6, %v5175_v59, %v5176_v34  ;;  %v5182_v61 = vrot.slane %v14302_v14, 7 }
 0x2ae   : > { %v5826_v57 = vcombine.low %v5174_v35, %v5177_v54  ;;  %v14345_v17 = vcombine.high %v14302_v14, %v14302_v14  ;;  %v6194_v47 = vrot.slane %v6186_v56, %v10038_v5  ;;  %v6187_v36 = vcombine.low %v4886_v38, %v14302_v14 }
 0x2af   : > { %v14312_v49 = vpop.permute.xlu1 %6349  ;;  %v5181_v4 = vrot.slane %v5179_v1, 2  ;;  %v5180_v16 = vsel %vm10175_vm6, %v5178_v29, %v5179_v1  ;;  %v14355_v31 = vmax.f32 %v4492_v22, 0.0 }
 0x2b0   : > { %v5834_v11 = vrot.slane %v5826_v57, %v10038_v5  ;;  %v6621_v51 = vpop.permute.xlu0 %6620  ;;  %v6496_v1 = vcombine.low %v6184_v33, %v6194_v47  ;;  %v14367_v54 = vrot.slane %v6187_v36, %v10038_v5 }
 0x2b1   : > { %v5183_v12 = vsel %vm10175_vm6, %v5181_v4, %v5182_v61 }
 0x2b2   : > { %v6400_v44 = vcombine.low %v5824_v19, %v5834_v11  ;;  %v5827_v9 = vcombine.low %v5180_v16, %v5183_v12  ;;  %v5503_v19 = vcombine.low %v4878_v39, %v4886_v38  ;;  %v6920_v39 = vsel %vm6913_vm3, %v6901_v30, %v6619_v15 }
 0x2b3   : > { %v6700_v40 = vpop.permute.xlu1 %6699  ;;  %v5519_v38 = vcombine.low %v14302_v14, %v14345_v17  ;;  %v6829_v15 = vsel %vm4051_vm10, %v13696_v21, %v14197_v24  ;;  %v5185_v21 = vrot.slane %v14345_v17, 7  ;;  %v14396_v52 = vcombine.low %v6194_v47, %v14367_v54 }
 0x2b4   : > { %6455 = vrot.lane.b32.xlu1 %v6400_v44, %s9972_s12  ;;  %v14333_v62 = vrot.slane %v5827_v9, %v10038_v5  ;;  %v6939_v34 = vsel %vm6932_vm4, %v6920_v39, %v6700_v40  ;;  %v5517_v41 = vrot.slane %v5503_v19, %v10038_v5  ;;  %v6847_v4 = vsel %vm4103_vm12, %v6829_v15, %v14215_v3 }
 0x2b5   : > { %v6865_v12 = vsel %vm4155_vm14, %v6847_v4, %v14255_v8  ;;  %v5527_v56 = vrot.slane %v5519_v38, %v10038_v5  ;;  %v5187_v19 = vrot.slane %v5185_v21, 2 }
 0x2b6   : > { %v14341_v42 = vcombine.low %v5834_v11, %v14333_v62  ;;  %v14378_v11 = vrot.slane %v14355_v31, %v10038_v5  ;;  %v14385_v24 = vcombine.low %v14261_v43, %v5517_v41  ;;  %v6883_v3 = vsel %vm4207_vm0, %v6865_v12, %v14282_v53 }
 0x2b7   : > { %v14338_v13 = vpop.permute.xlu1 %6445  ;;  %v6902_v8 = vsel %vm6894_vm2, %v6883_v3, %v14304_v50  ;;  %v5184_v50 = vrot.slane %v5182_v61, 2  ;;  %v6305_v47 = vcombine.low %v5517_v41, %v5527_v56 }
 0x2b8   : > { %6790 = vrot.lane.b32.xlu1 %v6185_v7, %s9980_s15  ;;  %5907 = vrot.lane.b32.xlu0 %v14341_v42, %s9968_s8  ;;  %v14404_v43 = vcombine.high %v14378_v11, %v14378_v11  ;;  %v6921_v26 = vsel %vm6913_vm3, %v6902_v8, %v6621_v51  ;;  %v4905_v51 = vcombine.high %v14355_v31, %v14355_v31 }
 0x2b9   : > { %v5186_v15 = vsel %vm10175_vm6, %v5184_v50, %v5185_v21 }
 0x2bb   : > { %v6781_v23 = vpop.permute.xlu1 %6780 }
 0x2bc   : > { %v4486_v59 = vpop.f32.mrf.mxu0  ;;  %v6958_v20 = vsel %vm6951_vm5, %v6939_v34, %v6781_v23  ;;  %6265 = vrot.lane.b32.xlu1 %v6185_v7, %s9973_s13  ;;  %6551 = vrot.lane.b32.xlu0 %v6496_v1, %s9977_s29  ;;  %v5198_v7 = vrot.slane %v14378_v11, 7 }
 0x2bd   : > { %v14363_v27 = vpop.permute.xlu0 %6351  ;;  %v4487_v29 = vadd.f32 %v14053_v45, %v4486_v59  ;;  %v4496_v35 = vpop.f32.mrf.mxu1  ;;  %9841 = vmatprep.mubr.msk.f32.mxu1 %vm6986_vm7, %v6958_v20  ;;  %v5201_v20 = vrot.slane %v14404_v43, 7 }
 0x2be   : > { %v9798_v57 = vpop.f32.mrf.mxu0  ;;  %v5200_v38 = vrot.slane %v5198_v7, 2 }
 0x2bf   : > { %v4534_v33 = vmax.f32 %v4487_v29, 0.0  ;;  %v9804_v16 = vpop.f32.mrf.mxu1  ;;  %v4497_v57 = vadd.f32 %v14053_v45, %v4496_v35 }
 0x2c0   : > { %6630 = vrot.lane.b32.xlu1 %v14385_v24, %s9978_s11  ;;  %6267 = vrot.lane.b32.xlu0 %v14396_v52, %s9973_s13 }
 0x2c1   : > { %v4888_v40 = vcombine.high %v4534_v33, %v4534_v33  ;;  %v14391_v44 = vrot.slane %v4534_v33, %v10038_v5  ;;  %v6702_v9 = vpop.permute.xlu0 %6701  ;;  %v14393_v10 = vpop.permute.xlu1 %6447 }
 0x2c2   : > { %v6940_v59 = vsel %vm6932_vm4, %v6921_v26, %v6702_v9 }
 0x2c3   : > { %v14407_v53 = vrot.slane %v4888_v40, %v10038_v5  ;;  %v4903_v60 = vcombine.high %v14391_v44, %v14391_v44  ;;  %v5188_v22 = vrot.slane %v14391_v44, 7  ;;  %v6203_v50 = vcombine.low %v14345_v17, %v14391_v44 }
 0x2c4   : > { %6361 = vrot.lane.b32.xlu1 %v6305_v47, %s9970_s10 }
 0x2c5   : > { %v14420_v36 = vcombine.high %v14407_v53, %v14407_v53  ;;  %v5192_v30 = vrot.slane %v14407_v53, 7  ;;  %v14423_v39 = vpop.permute.xlu0 %5897  ;;  %v6783_v34 = vpop.permute.xlu1 %6782  ;;  %v5189_v23 = vsel %vm10175_vm6, %v5187_v19, %v5188_v22  ;;  %v9596_v14 = vrot.slane %v4903_v60, 9 }
 0x2c6   : > { %v5520_v61 = vcombine.low %v4903_v60, %v14407_v53  ;;  %v6959_v41 = vsel %vm6951_vm5, %v6940_v59, %v6783_v34  ;;  %v5843_v31 = vcombine.low %v5186_v15, %v5189_v23  ;;  %v14459_v60 = vrot.slane %v4905_v51, %v10038_v5 }
 0x2c7   : > { %v5194_v1 = vrot.slane %v5192_v30, 2  ;;  %9842 = vmatmul.mubr.msk.f32.gmra.mxu1 %vm6986_vm7, %v6959_v41  ;;  %v5536_v16 = vcombine.low %v14420_v36, %v14378_v11  ;;  %v5195_v12 = vrot.slane %v14420_v36, 7  ;;  %v5193_v21 = vsel %vm10175_vm6, %v9596_v14, %v5192_v30 }
 0x2c8   : > { %v5534_v29 = vrot.slane %v5520_v61, %v10038_v5  ;;  %6711 = vrot.lane.b32.xlu1 %v14341_v42, %s9979_s14  ;;  %v5851_v35 = vrot.slane %v5843_v31, %v10038_v5  ;;  %v5202_v22 = vsel %vm10175_vm6, %v5200_v38, %v5201_v20  ;;  %v4536_v19 = vmax.f32 %v4497_v57, 0.0 }
 0x2c9   : > { %v14439_v4 = vpop.permute.xlu0 %6541  ;;  %v14441_v33 = vpop.permute.xlu1 %6257  ;;  %v14454_v40 = vrot.slane %v5536_v16, %v10038_v5  ;;  %v5196_v9 = vsel %vm10175_vm6, %v5194_v1, %v5195_v12  ;;  %v5197_v8 = vrot.slane %v5195_v12, 2  ;;  %v5204_v51 = vrot.slane %v14459_v60, 7 }
 0x2ca   : > { %v14448_v3 = vcombine.low %v5527_v56, %v5534_v29  ;;  %v5844_v56 = vcombine.low %v5193_v21, %v5196_v9  ;;  %v6401_v30 = vcombine.low %v14333_v62, %v5851_v35  ;;  %v14479_v17 = vcombine.high %v14459_v60, %v14459_v60 }
 0x2cb   : > { %v5199_v34 = vsel %vm10175_vm6, %v5197_v8, %v5198_v7  ;;  %v6306_v14 = vcombine.low %v5534_v29, %v14454_v40  ;;  %v4922_v62 = vcombine.high %v4536_v19, %v4536_v19  ;;  %v6211_v1 = vrot.slane %v6203_v50, %v10038_v5 }
 0x2cc   : > { %6632 = vrot.lane.b32.xlu0 %v14448_v3, %s9978_s11  ;;  %v4501_v42 = vpop.f32.mrf.mxu1  ;;  %v5858_v61 = vrot.slane %v5844_v56, %v10038_v5  ;;  %v5860_v59 = vcombine.low %v5199_v34, %v5202_v22  ;;  %6457 = vrot.lane.b32.xlu1 %v6401_v30, %s9972_s12  ;;  %v6204_v15 = vcombine.low %v14407_v53, %v14420_v36  ;;  %v5206_v57 = vrot.slane %v5204_v51, 2 }
 0x2cd   : > { %v14467_v47 = vpop.permute.xlu0 %5899  ;;  %v6623_v26 = vpop.permute.xlu1 %6622  ;;  %v4502_v41 = vadd.f32 %v14053_v45, %v4501_v42  ;;  %v14495_v31 = vrot.slane %v4536_v19, %v10038_v5  ;;  %v5207_v16 = vrot.slane %v14479_v17, 7  ;;  %v14500_v12 = vrot.slane %v4922_v62, %v10038_v5 }
 0x2ce   : > { %v9807_v23 = vpop.f32.mrf.mxu1  ;;  %v5859_v38 = vcombine.low %v5851_v35, %v5858_v61  ;;  %v14488_v29 = vrot.slane %v5860_v59, %v10038_v5  ;;  %v6497_v9 = vcombine.low %v14367_v54, %v6211_v1  ;;  %v5203_v53 = vrot.slane %v5201_v20, 2 }
 0x2cf   : > { %v14505_v36 = vmax.f32 %v4502_v41, 0.0  ;;  %v6218_v8 = vrot.slane %v6204_v15, %v10038_v5  ;;  %v6220_v42 = vcombine.low %v14378_v11, %v14404_v43  ;;  %v5537_v56 = vcombine.low %v14404_v43, %v14459_v60 }
 0x2d0   : > { %6363 = vrot.lane.b32.xlu0 %v6306_v14, %s9970_s10  ;;  %6792 = vrot.lane.b32.xlu1 %v14396_v52, %s9980_s15  ;;  %v6402_v52 = vcombine.low %v5858_v61, %v14488_v29  ;;  %v6830_v22 = vsel %vm4051_vm10, %v13756_v58, %v14271_v28  ;;  %v14519_v54 = vcombine.high %v14495_v31, %v14495_v31  ;;  %v5214_v61 = vrot.slane %v14500_v12, 7 }
 0x2d1   : > { %v14481_v44 = vpop.permute.xlu0 %6543  ;;  %v14483_v7 = vpop.permute.xlu1 %6353  ;;  %v6848_v20 = vsel %vm4103_vm12, %v6830_v22, %v14296_v0  ;;  %v14526_v11 = vcombine.high %v14500_v12, %v14500_v12  ;;  %v5205_v43 = vsel %vm10175_vm6, %v5203_v53, %v5204_v51  ;;  %v5208_v50 = vsel %vm10175_vm6, %v5206_v57, %v5207_v16 }
 0x2d2   : > { %v6866_v58 = vsel %vm4155_vm14, %v6848_v20, %v14312_v49  ;;  %v14536_v28 = vrot.slane %v14505_v36, %v10038_v5  ;;  %v6219_v0 = vcombine.low %v6211_v1, %v6218_v8  ;;  %v14544_v23 = vrot.slane %v5537_v56, %v10038_v5 }
 0x2d3   : > { %v6884_v30 = vsel %vm4207_vm0, %v6866_v58, %v14338_v13  ;;  %v14547_v14 = vrot.slane %v6220_v42, %v10038_v5  ;;  %v5211_v49 = vrot.slane %v14519_v54, 7  ;;  %v5861_v13 = vcombine.low %v5205_v43, %v5208_v50 }
 0x2d4   : > { %6713 = vrot.lane.b32.xlu0 %v5859_v38, %s9979_s14  ;;  %6553 = vrot.lane.b32.xlu1 %v6497_v9, %s9977_s29  ;;  %v6903_v59 = vsel %vm6894_vm2, %v6884_v30, %v14439_v4  ;;  %v14557_v1 = vcombine.low %v14454_v40, %v14544_v23  ;;  %v6316_v41 = vcombine.low %v14500_v12, %v14526_v11  ;;  %v5220_v53 = vrot.slane %v14536_v28, 7 }
 0x2d5   : > { %v14502_v21 = vpop.permute.xlu0 %6259  ;;  %v6704_v35 = vpop.permute.xlu1 %6703  ;;  %v6922_v62 = vsel %vm6913_vm3, %v6903_v59, %v6623_v26  ;;  %v14564_v15 = vcombine.high %v14536_v28, %v14536_v28  ;;  %v6498_v26 = vcombine.low %v6218_v8, %v14547_v14  ;;  %v6307_v40 = vcombine.low %v14495_v31, %v14519_v54 }
 0x2d6   : > { %v6941_v4 = vsel %vm6932_vm4, %v6922_v62, %v6704_v35  ;;  %v5213_v56 = vrot.slane %v5211_v49, 2  ;;  %v4939_v35 = vcombine.high %v14505_v36, %v14505_v36  ;;  %v14582_v8 = vrot.slane %v5861_v13, %v10038_v5 }
 0x2d7   : > { %v6221_v22 = vcombine.low %v14459_v60, %v14479_v17  ;;  %v6831_v20 = vsel %vm4051_vm10, %v13864_v37, %v14294_v6  ;;  %v5216_v43 = vrot.slane %v5214_v61, 2  ;;  %v14590_v50 = vrot.slane %v6316_v41, %v10038_v5 }
 0x2d8   : > { %6459 = vrot.lane.b32.xlu0 %v6402_v52, %s9972_s12  ;;  %5909 = vrot.lane.b32.xlu1 %v5859_v38, %s9968_s8  ;;  %v5217_v38 = vrot.slane %v14526_v11, 7  ;;  %v6849_v36 = vsel %vm4103_vm12, %v6831_v20, %v14316_v32  ;;  %v5223_v30 = vrot.slane %v14564_v15, 7  ;;  %v9597_v17 = vrot.slane %v14495_v31, 9 }
 0x2d9   : > { %v14538_v19 = vpop.permute.xlu1 %6449  ;;  %v6625_v34 = vpop.permute.xlu0 %6624  ;;  %v6867_v60 = vsel %vm4155_vm14, %v6849_v36, %v14363_v27  ;;  %v6314_v6 = vrot.slane %v6307_v40, %v10038_v5  ;;  %v14609_v62 = vrot.slane %v4939_v35, %v10038_v5  ;;  %v14613_v27 = vrot.slane %v6221_v22, %v10038_v5 }
 0x2da   : > { %v5219_v58 = vrot.slane %v5217_v38, 2  ;;  %v6885_v13 = vsel %vm4207_vm0, %v6867_v60, %v14393_v10  ;;  %v5215_v31 = vsel %vm10175_vm6, %v5213_v56, %v5214_v61  ;;  %v5225_v40 = vrot.slane %v5223_v30, 2 }
 0x2db   : > { %v6904_v41 = vsel %vm6894_vm2, %v6885_v13, %v14481_v44  ;;  %v6579_v10 = vcombine.low %v6314_v6, %v14590_v50  ;;  %v5222_v44 = vrot.slane %v5220_v53, 2  ;;  %v5226_v35 = vrot.slane %v14609_v62, 7 }
 0x2dc   : > { %6794 = vrot.lane.b32.xlu0 %v6219_v0, %s9980_s15  ;;  %v4506_v51 = vpop.f32.mrf.mxu1  ;;  %6634 = vrot.lane.b32.xlu1 %v14557_v1, %s9978_s11  ;;  %v5221_v32 = vsel %vm10175_vm6, %v5219_v58, %v5220_v53  ;;  %v6317_v20 = vcombine.low %v14536_v28, %v14564_v15  ;;  %v6315_v58 = vcombine.low %v14544_v23, %v6314_v6 }
 0x2dd   : > { %v6785_v57 = vpop.permute.xlu1 %6784  ;;  %v4507_v16 = vadd.f32 %v14053_v45, %v4506_v51  ;;  %v5876_v51 = vcombine.low %v14488_v29, %v14582_v8  ;;  %v6236_v53 = vcombine.low %v14547_v14, %v14613_v27  ;;  %v6508_v6 = vcombine.low %v14526_v11, %v14536_v28 }
 0x2de   : > { %v9810_v9 = vpop.f32.mrf.mxu1  ;;  %v6960_v52 = vsel %vm6951_vm5, %v6941_v4, %v6785_v57  ;;  %v14575_v42 = vpop.permute.xlu0 %6355  ;;  %v5218_v4 = vsel %vm10175_vm6, %v5216_v43, %v5217_v38  ;;  %v6923_v57 = vsel %vm6913_vm3, %v6904_v41, %v6625_v34 }
 0x2df   : > { %9844 = vmatprep.mubr.msk.f32.mxu1 %vm6986_vm7, %v6960_v52  ;;  %v4538_v59 = vmax.f32 %v4507_v16, 0.0 }
 0x2e0   : > { %6555 = vrot.lane.b32.xlu0 %v6498_v26, %s9977_s29  ;;  %6269 = vrot.lane.b32.xlu1 %v6219_v0, %s9973_s13  ;;  %v5212_v0 = vsel %vm10175_vm6, %v9597_v17, %v5211_v49  ;;  %v6412_v26 = vcombine.low %v5218_v4, %v5221_v32  ;;  %v5224_v17 = vsel %vm10175_vm6, %v5222_v44, %v5223_v30 }
 0x2e1   : > { %v4956_v16 = vcombine.high %v4538_v59, %v4538_v59  ;;  %v6403_v56 = vcombine.low %v5212_v0, %v5215_v31  ;;  %v14630_v22 = vrot.slane %v4538_v59, %v10038_v5  ;;  %v5227_v59 = vsel %vm10175_vm6, %v5225_v40, %v5226_v35 }
 0x2e2   : > { %v6706_v29 = vpop.permute.xlu0 %6705  ;;  %v6420_v36 = vrot.slane %v6412_v26, %v10038_v5  ;;  %v14663_v32 = vrot.slane %v6317_v20, %v10038_v5  ;;  %v6413_v13 = vcombine.low %v5224_v17, %v5227_v59  ;;  %v6499_v4 = vcombine.low %v14519_v54, %v14500_v12 }
 0x2e3   : > { %v14601_v37 = vpop.permute.xlu1 %6451  ;;  %v6942_v52 = vsel %vm6932_vm4, %v6923_v57, %v6706_v29  ;;  %v14654_v23 = vcombine.high %v14630_v22, %v14630_v22  ;;  %v6410_v14 = vrot.slane %v6403_v56, %v10038_v5  ;;  %v5230_v30 = vrot.slane %v14630_v22, 7 }
 0x2e4   : > { %5911 = vrot.lane.b32.xlu0 %v5876_v51, %s9968_s8  ;;  %6715 = vrot.lane.b32.xlu1 %v5876_v51, %s9979_s14  ;;  %v6509_v57 = vcombine.low %v14564_v15, %v14609_v62  ;;  %v6516_v26 = vrot.slane %v6508_v6, %v10038_v5  ;;  %v4955_v12 = vcombine.high %v14609_v62, %v14609_v62 }
 0x2e5   : > { %v4511_v9 = vpop.f32.mrf.mxu1  ;;  %v6660_v41 = vcombine.low %v6410_v14, %v6420_v36  ;;  %v5233_v28 = vrot.slane %v14654_v23, 7  ;;  %v5232_v54 = vrot.slane %v5230_v30, 2  ;;  %v6506_v44 = vrot.slane %v6499_v4, %v10038_v5 }
 0x2e6   : > { %v4512_v49 = vadd.f32 %v14053_v45, %v4511_v9  ;;  %v14639_v45 = vrot.slane %v4956_v16, %v10038_v5  ;;  %v6411_v16 = vcombine.low %v14582_v8, %v6410_v14  ;;  %v14685_v9 = vrot.slane %v6413_v13, %v10038_v5  ;;  %v14697_v56 = vpop.permute.xlu0 %5901 }
 0x2e7   : > { %v6787_v61 = vpop.permute.xlu1 %6786  ;;  %v9813_v38 = vpop.f32.mrf.mxu1  ;;  %v5235_v35 = vrot.slane %v5233_v28, 2  ;;  %v6523_v62 = vrot.slane %v6509_v57, %v10038_v5  ;;  %v6741_v20 = vcombine.low %v6506_v44, %v6516_v26  ;;  %v5234_v17 = vsel %vm10175_vm6, %v5232_v54, %v5233_v28 }
 0x2e8   : > { %v6961_v34 = vsel %vm6951_vm5, %v6942_v52, %v6787_v61  ;;  %6636 = vrot.lane.b32.xlu0 %v6579_v10, %s9978_s11  ;;  %v4539_v43 = vmax.f32 %v4512_v49, 0.0  ;;  %6365 = vrot.lane.b32.xlu1 %v6315_v58, %s9970_s10  ;;  %v14667_v29 = vcombine.high %v14639_v45, %v14639_v45  ;;  %v5236_v10 = vrot.slane %v14639_v45, 7 }
 0x2e9   : > { %9845 = vmatmul.mubr.msk.f32.gmra.mxu1 %vm6986_vm7, %v6961_v34  ;;  %v6332_v49 = vcombine.low %v14590_v50, %v14663_v32  ;;  %v6428_v34 = vcombine.low %v6420_v36, %v14685_v9  ;;  %v6580_v38 = vcombine.low %v4955_v12, %v14630_v22  ;;  %v6589_v14 = vcombine.low %v14654_v23, %v14639_v45 }
 0x2ea   : > { %v14647_v51 = vrot.slane %v4539_v43, %v10038_v5  ;;  %v5239_v61 = vrot.slane %v14667_v29, 7  ;;  %v5238_v8 = vrot.slane %v5236_v10, 2  ;;  %v6832_v36 = vsel %vm4051_vm10, %v13885_v48, %v14423_v39  ;;  %v6546_v39 = vpop.permute.xlu0 %6545 }
 0x2eb   : > { %v14650_v60 = vpop.permute.xlu1 %6261  ;;  %v5237_v6 = vsel %vm10175_vm6, %v5235_v35, %v5236_v10  ;;  %v6524_v4 = vcombine.low %v6516_v26, %v6523_v62  ;;  %v6850_v48 = vsel %vm4103_vm12, %v6832_v36, %v14441_v33  ;;  %v6587_v10 = vrot.slane %v6580_v38, %v10038_v5 }
 0x2ec   : > { %6271 = vrot.lane.b32.xlu0 %v6236_v53, %s9973_s13  ;;  %v14671_v31 = vcombine.high %v14647_v51, %v14647_v51  ;;  %v5242_v0 = vrot.slane %v14647_v51, 7  ;;  %6796 = vrot.lane.b32.xlu1 %v6236_v53, %s9980_s15  ;;  %v6590_v50 = vcombine.low %v14667_v29, %v14647_v51  ;;  %v5241_v43 = vrot.slane %v5239_v61, 2 }
 0x2ed   : > { %v9598_v53 = vrot.slane %v4955_v12, 9  ;;  %v5240_v13 = vsel %vm10175_vm6, %v5238_v8, %v5239_v61  ;;  %v6597_v26 = vrot.slane %v6589_v14, %v10038_v5  ;;  %v6742_v54 = vcombine.low %v14630_v22, %v14654_v23 }
 0x2ee   : > { %v5244_v40 = vrot.slane %v5242_v0, 2  ;;  %v5245_v52 = vrot.slane %v14671_v31, 7  ;;  %v6604_v57 = vrot.slane %v6590_v50, %v10038_v5  ;;  %v6670_v61 = vcombine.low %v5237_v6, %v5240_v13 }
 0x2ef   : > { %v6627_v11 = vpop.permute.xlu1 %6626  ;;  %v5231_v28 = vsel %vm10175_vm6, %v9598_v53, %v5230_v30  ;;  %v6752_v33 = vcombine.low %v14647_v51, %v14671_v31  ;;  %v6751_v31 = vcombine.low %v14639_v45, %v14667_v29  ;;  %v6749_v38 = vrot.slane %v6742_v54, %v10038_v5 }
 0x2f0   : > { %6717 = vrot.lane.b32.xlu0 %v6660_v41, %s9979_s14  ;;  %6461 = vrot.lane.b32.xlu1 %v6411_v16, %s9972_s12  ;;  %v5246_v58 = vsel %vm10175_vm6, %v5244_v40, %v5245_v52  ;;  %v5243_v41 = vsel %vm10175_vm6, %v5241_v43, %v5242_v0  ;;  %v6507_v40 = vcombine.low %v14613_v27, %v6506_v44 }
 0x2f1   : > { %v6671_v16 = vcombine.low %v5243_v41, %v5246_v58  ;;  %v6661_v52 = vcombine.low %v5231_v28, %v5234_v17  ;;  %v6605_v12 = vcombine.low %v6597_v26, %v6604_v57  ;;  %v6588_v44 = vcombine.low %v14663_v32, %v6587_v10  ;;  %v14757_v32 = vpop.permute.xlu0 %5903 }
 0x2f2   : > { %v6678_v51 = vrot.slane %v6670_v61, %v10038_v5  ;;  %v6766_v23 = vrot.slane %v6752_v33, %v10038_v5  ;;  %v6750_v29 = vcombine.low %v6523_v62, %v6749_v38 }
 0x2f3   : > { %v14695_v15 = vpop.permute.xlu1 %6357  ;;  %v6668_v35 = vrot.slane %v6661_v52, %v10038_v5 }
 0x2f4   : > { %6367 = vrot.lane.b32.xlu0 %v6332_v49, %s9970_s10  ;;  %6463 = vrot.lane.b32.xlu1 %v6428_v34, %s9972_s12  ;;  %v6868_v49 = vsel %vm4155_vm14, %v6850_v48, %v14483_v7  ;;  %v6685_v7 = vrot.slane %v6671_v16, %v10038_v5 }
 0x2f5   : > { %v6886_v30 = vsel %vm4207_vm0, %v6868_v49, %v14538_v19  ;;  %v6548_v43 = vpop.permute.xlu0 %6547 }
 0x2f6   : > { %v6905_v27 = vsel %vm6894_vm2, %v6886_v30, %v6546_v39  ;;  %v6686_v22 = vcombine.low %v6678_v51, %v6685_v7  ;;  %v6833_v39 = vsel %vm4051_vm10, %v14019_v18, %v14467_v47 }
 0x2f7   : > { %v6708_v59 = vpop.permute.xlu1 %6707  ;;  %v6924_v8 = vsel %vm6913_vm3, %v6905_v27, %v6627_v11  ;;  %v6669_v11 = vcombine.low %v14685_v9, %v6668_v35  ;;  %v14771_v9 = vld [vmem:[%s16528_s4] ss:$0 sm:$0xff]  ;;  %v6851_v27 = vsel %vm4103_vm12, %v6833_v39, %v14502_v21 }
 0x2f8   : > { %6798 = vrot.lane.b32.xlu0 %v6741_v20, %s9980_s15  ;;  %6559 = vrot.lane.b32.xlu1 %v6524_v4, %s9977_s29  ;;  %v6943_v19 = vsel %vm6932_vm4, %v6924_v8, %v6708_v59  ;;  %v6759_v20 = vrot.slane %v6751_v31, %v10038_v5  ;;  %v6869_v18 = vsel %vm4155_vm14, %v6851_v27, %v14575_v42 }
 0x2f9   : > { %v14766_v58 = vpop.permute.xlu0 %6263 }
 0x2fa   : > { %v6767_v45 = vcombine.low %v6759_v20, %v6766_v23 }
 0x2fb   : > { %v14733_v0 = vpop.permute.xlu1 %6453 }
 0x2fc   : > { %6557 = vrot.lane.b32.xlu0 %v6507_v40, %s9977_s29  ;;  %6640 = vrot.lane.b32.xlu1 %v6605_v12, %s9978_s11 }
 0x2ff   : > { %v6789_v50 = vpop.permute.xlu1 %6788 }
 0x300   : > { %v6962_v34 = vsel %vm6951_vm5, %v6943_v19, %v6789_v50  ;;  %6638 = vrot.lane.b32.xlu0 %v6588_v44, %s9978_s11  ;;  %6721 = vrot.lane.b32.xlu1 %v6686_v22, %s9979_s14  ;;  %v6887_v44 = vsel %vm4207_vm0, %v6869_v18, %v14601_v37 }
 0x301   : > { %9847 = vmatprep.mubr.msk.f32.mxu1 %vm6986_vm7, %v6962_v34  ;;  %v6906_v37 = vsel %vm6894_vm2, %v6887_v44, %v6548_v43 }
 0x304   : > { %6719 = vrot.lane.b32.xlu0 %v6669_v11, %s9979_s14  ;;  %6802 = vrot.lane.b32.xlu1 %v6767_v45, %s9980_s15  ;;  %v6629_v53 = vpop.permute.xlu0 %6628 }
 0x305   : > { %v6925_v38 = vsel %vm6913_vm3, %v6906_v37, %v6629_v53 }
 0x308   : > { %6800 = vrot.lane.b32.xlu0 %v6750_v29, %s9980_s15  ;;  %v14773_v59 = vpop.permute.xlu0 %6359 }
 0x30c   : > { %v6710_v41 = vpop.permute.xlu0 %6709 }
 0x310   : > { %v14785_v49 = vpop.permute.xlu0 %5905 }
 0x314   : > { %v6550_v20 = vpop.permute.xlu0 %6549 }
 0x318   : > { %v9834_v14 = vpop.f32.mrf.mxu1 }
 0x319   : > { %v7113_v17 = vadd.f32 %v9834_v14, %v14771_v9 }
 0x31a   : > { %v7107_v36 = vpop.f32.mrf.mxu1 }
 0x31b   : > { %v7108_v62 = vadd.f32 %v14771_v9, %v7107_v36  ;;  %v7197_v6 = vmax.f32 %v7113_v17, 0.0  ;;  %v6944_v17 = vsel %vm6932_vm4, %v6925_v38, %v6710_v41 }
 0x31d   : > { %v7196_v13 = vmax.f32 %v7108_v62, 0.0  ;;  %v7233_v57 = vcombine.high %v7197_v6, %v7197_v6  ;;  %v14783_v40 = vrot.slane %v7197_v6, %v10038_v5 }
 0x31f   : > { %v7232_v4 = vcombine.high %v7196_v13, %v7196_v13  ;;  %v7256_v16 = vrot.slane %v7196_v13, %v10038_v5  ;;  %v14788_v26 = vrot.slane %v7233_v57, %v10038_v5  ;;  %v7501_v35 = vrot.slane %v14783_v40, 7 }
 0x321   : > { %v7264_v28 = vrot.slane %v7232_v4, %v10038_v5  ;;  %v7257_v48 = vcombine.high %v7256_v16, %v7256_v16  ;;  %v9618_v12 = vrot.slane %v7256_v16, 9  ;;  %v7747_v34 = vcombine.low %v14783_v40, %v14788_v26 }
 0x322   : > { %v9619_v27 = vrot.slane %v14788_v26, 9 }
 0x323   : > { %v7265_v10 = vcombine.high %v7264_v28, %v7264_v28  ;;  %v7495_v52 = vrot.slane %v7264_v28, 7  ;;  %v7492_v61 = vrot.slane %v7257_v48, 7  ;;  %v7730_v30 = vcombine.low %v7256_v16, %v7257_v48 }
 0x324   : > { %v8206_v33 = vcombine.low %v7257_v48, %v7264_v28 }
 0x325   : > { %v7497_v7 = vrot.slane %v7495_v52, 2  ;;  %v7498_v54 = vrot.slane %v7265_v10, 7  ;;  %v7494_v47 = vrot.slane %v7492_v61, 2  ;;  %v8207_v8 = vcombine.low %v7265_v10, %v14783_v40 }
 0x326   : > { %v7493_v19 = vsel %vm10175_vm6, %v9618_v12, %v7492_v61  ;;  %v6456_v51 = vpop.permute.xlu1 %6455  ;;  %v14803_v31 = vrot.slane %v8206_v33, %v10038_v5  ;;  %v7731_v14 = vcombine.low %v7264_v28, %v7265_v10  ;;  %v14826_v6 = vrot.slane %v7730_v30, %v10038_v5 }
 0x327   : > { %v7500_v50 = vrot.slane %v7498_v54, 2  ;;  %v7496_v21 = vsel %vm10175_vm6, %v7494_v47, %v7495_v52  ;;  %v14806_v42 = vrot.slane %v8207_v8, %v10038_v5  ;;  %v7499_v22 = vsel %vm10175_vm6, %v7497_v7, %v7498_v54 }
 0x328   : > { %16719 = vst [vmem:[#allocation10_spill] sm:$0xff] %v14803_v31  ;;  %v7955_v11 = vcombine.low %v7493_v19, %v7496_v21  ;;  %16723 = vst [vmem:[#allocation11_spill] sm:$0xff] %v14826_v6  ;;  %v14829_v53 = vrot.slane %v7731_v14, %v10038_v5  ;;  %v14843_v28 = vcombine.high %v14788_v26, %v14788_v26  ;;  %v7503_v33 = vrot.slane %v7501_v35, 2 }
 0x329   : > { %16720 = vst [vmem:[#allocation9_spill] sm:$0xff] %v14806_v42  ;;  %v7502_v23 = vsel %vm10175_vm6, %v7500_v50, %v7501_v35  ;;  %v7480_v10 = vcombine.high %v14783_v40, %v14783_v40  ;;  %v6834_v54 = vsel %vm4051_vm10, %v14081_v55, %v14697_v56  ;;  %v9630_v19 = vcombine.high %v14783_v40, %v14788_v26 }
 0x32a   : > { %v7956_v45 = vcombine.low %v7499_v22, %v7502_v23  ;;  %v6791_v36 = vpop.permute.xlu1 %6790  ;;  %v14820_v43 = vrot.slane %v7955_v11, %v10038_v5  ;;  %16724 = vst [vmem:[#allocation2_spill] sm:$0xff] %v14829_v53  ;;  %v14832_v4 = vpop.permute.xlu0 %5907  ;;  %v7508_v52 = vrot.slane %v14843_v28, 7  ;;  %v6852_v8 = vsel %vm4103_vm12, %v6834_v54, %v14650_v60 }
 0x32b   : > { %v6963_v13 = vsel %vm6951_vm5, %v6944_v17, %v6791_v36  ;;  %v7504_v30 = vrot.slane %v7480_v10, 7  ;;  %v6835_v50 = vsel %vm4051_vm10, %v14181_v63, %v14757_v32  ;;  %v6870_v37 = vsel %vm4155_vm14, %v6852_v8, %v14695_v15 }
 0x32c   : > { %16721 = vst [vmem:[#allocation3_spill] sm:$0xff] %v14820_v43  ;;  %v14823_v62 = vrot.slane %v7956_v45, %v10038_v5  ;;  %9848 = vmatmul.mubr.msk.f32.gmra.mxu1 %vm6986_vm7, %v6963_v13  ;;  %v14859_v47 = vsel %vm10175_vm6, %v9619_v27, %v7508_v52  ;;  %v6853_v60 = vsel %vm4103_vm12, %v6835_v50, %v14766_v58  ;;  %v7510_v14 = vrot.slane %v7508_v52, 2 }
 0x32d   : > { %v7505_v56 = vsel %vm10175_vm6, %v7503_v33, %v7504_v30  ;;  %v6888_v11 = vsel %vm4207_vm0, %v6870_v37, %v14733_v0  ;;  %v6871_v45 = vsel %vm4155_vm14, %v6853_v60, %v14773_v59  ;;  %v14887_v58 = vrot.slane %v9630_v19, %v10038_v5 }
 0x32e   : > { %16722 = vst [vmem:[#allocation12_spill] sm:$0xff] %v14823_v62  ;;  %v14839_v16 = vpop.permute.xlu1 %6265  ;;  %v6552_v48 = vpop.permute.xlu0 %6551  ;;  %v14876_v23 = vcombine.low %v7505_v56, %v14859_v47  ;;  %v6907_v15 = vsel %vm6894_vm2, %v6888_v11, %v6550_v20  ;;  %v6889_v17 = vsel %vm4207_vm0, %v6871_v45, %v6456_v51  ;;  %v8457_v30 = vcombine.low %v14788_v26, %v14843_v28 }
 0x32f   : > { %16725 = vst [vmem:[#allocation5_spill] sm:$0xff] %v14887_v58  ;;  %v6908_v59 = vsel %vm6894_vm2, %v6889_v17, %v6552_v48 }
 0x330   : > { %v7980_v51 = vrot.slane %v14876_v23, %v10038_v5 }
 0x332   : > { %v6631_v39 = vpop.permute.xlu1 %6630  ;;  %v14851_v12 = vpop.permute.xlu0 %6267 }
 0x333   : > { %v6926_v33 = vsel %vm6913_vm3, %v6907_v15, %v6631_v39 }
 0x336   : > { %v14848_v61 = vpop.permute.xlu1 %6361 }
 0x339   : > { %v9837_v7 = vpop.f32.mrf.mxu1 }
 0x33a   : > { %v7123_v18 = vadd.f32 %v9837_v7, %v14771_v9  ;;  %v6712_v44 = vpop.permute.xlu1 %6711 }
 0x33b   : > { %v7117_v35 = vpop.f32.mrf.mxu1  ;;  %v6945_v54 = vsel %vm6932_vm4, %v6926_v33, %v6712_v44 }
 0x33c   : > { %v7199_v21 = vmax.f32 %v7123_v18, 0.0  ;;  %v7118_v55 = vadd.f32 %v14771_v9, %v7117_v35 }
 0x33e   : > { %v6633_v22 = vpop.permute.xlu0 %6632  ;;  %v7235_v63 = vcombine.high %v7199_v21, %v7199_v21  ;;  %v14881_v32 = vrot.slane %v7199_v21, %v10038_v5  ;;  %v7198_v38 = vmax.f32 %v7118_v55, 0.0  ;;  %v14897_v10 = vpop.permute.xlu1 %6457 }
 0x33f   : > { %v6927_v11 = vsel %vm6913_vm3, %v6908_v59, %v6633_v22 }
 0x340   : > { %v14892_v36 = vcombine.high %v14881_v32, %v14881_v32  ;;  %v14895_v0 = vrot.slane %v7235_v63, %v10038_v5  ;;  %v7234_v13 = vcombine.high %v7198_v38, %v7198_v38  ;;  %v14901_v20 = vrot.slane %v7198_v38, %v10038_v5 }
 0x341   : > { %v14941_v38 = vrot.slane %v8457_v30, %v10038_v5  ;;  %v9620_v33 = vrot.slane %v14881_v32, 9 }
 0x342   : > { %v14903_v52 = vpop.permute.xlu0 %6363  ;;  %v14912_v27 = vcombine.high %v14895_v0, %v14895_v0  ;;  %v7527_v7 = vrot.slane %v14895_v0, 7  ;;  %v14916_v48 = vrot.slane %v7234_v13, %v10038_v5  ;;  %v14921_v18 = vcombine.high %v14901_v20, %v14901_v20  ;;  %v6793_v21 = vpop.permute.xlu1 %6792 }
 0x343   : > { %v7511_v8 = vrot.slane %v14901_v20, 7  ;;  %v7748_v39 = vcombine.low %v14843_v28, %v14901_v20  ;;  %v8241_v50 = vcombine.low %v14892_v36, %v14895_v0  ;;  %v6964_v37 = vsel %vm6951_vm5, %v6945_v54, %v6793_v21  ;;  %16726 = vst [vmem:[#allocation6_spill] sm:$0xff] %v14941_v38 }
 0x344   : > { %v7529_v35 = vrot.slane %v7527_v7, 2  ;;  %v7481_v44 = vcombine.high %v14916_v48, %v14916_v48  ;;  %v7514_v56 = vrot.slane %v14921_v18, 7  ;;  %v16553_v23 = vrot.slane %v14912_v27, 7  ;;  %9850 = vmatprep.mubr.msk.f32.mxu1 %vm6986_vm7, %v6964_v37 }
 0x345   : > { %v7513_v55 = vrot.slane %v7511_v8, 2  ;;  %v8224_v28 = vcombine.low %v14901_v20, %v14921_v18  ;;  %v7517_v63 = vrot.slane %v14916_v48, 7  ;;  %v7524_v17 = vrot.slane %v14892_v36, 7 }
 0x346   : > { %v6714_v60 = vpop.permute.xlu0 %6713  ;;  %v7516_v45 = vrot.slane %v7514_v56, 2  ;;  %v7520_v15 = vrot.slane %v7481_v44, 7  ;;  %v8240_v13 = vcombine.low %v14916_v48, %v7481_v44  ;;  %v14946_v54 = vpop.permute.xlu1 %6553  ;;  %v7512_v22 = vsel %vm10175_vm6, %v7510_v14, %v7511_v8 }
 0x347   : > { %v7519_v20 = vrot.slane %v7517_v63, 2  ;;  %v7515_v59 = vsel %vm10175_vm6, %v7513_v55, %v7514_v56  ;;  %v14958_v30 = vsel %vm10175_vm6, %v7529_v35, %v16553_v23  ;;  %v7526_v37 = vrot.slane %v7524_v17, 2 }
 0x348   : > { %v7518_v44 = vsel %vm10175_vm6, %v7516_v45, %v7517_v63  ;;  %v14963_v57 = vrot.slane %v8241_v50, %v10038_v5  ;;  %v7525_v8 = vsel %vm10175_vm6, %v9620_v33, %v7524_v17  ;;  %v14970_v55 = vrot.slane %v8240_v13, %v10038_v5 }
 0x349   : > { %v7521_v14 = vsel %vm10175_vm6, %v7519_v20, %v7520_v15  ;;  %v7973_v56 = vcombine.low %v7512_v22, %v7515_v59  ;;  %v7528_v35 = vsel %vm10175_vm6, %v7526_v37, %v7527_v7  ;;  %v14975_v63 = vrot.slane %v8224_v28, %v10038_v5 }
 0x34a   : > { %v14952_v21 = vpop.permute.xlu0 %6459  ;;  %16727 = vst [vmem:[#allocation4_spill] sm:$0xff] %v14963_v57  ;;  %16728 = vst [vmem:[#allocation8_spill] sm:$0xff] %v14970_v55  ;;  %v7989_v29 = vcombine.low %v7518_v44, %v7521_v14  ;;  %v8466_v50 = vcombine.low %v14916_v48, %v14881_v32  ;;  %v14979_v45 = vpop.permute.xlu1 %5909  ;;  %v7990_v15 = vcombine.low %v7525_v8, %v7528_v35 }
 0x34b   : > { %16729 = vst [vmem:[#allocation7_spill] sm:$0xff] %v14975_v63  ;;  %v7987_v13 = vrot.slane %v7973_v56, %v10038_v5  ;;  %v8619_v33 = vcombine.low %v7521_v14, %v7525_v8  ;;  %v6946_v20 = vsel %vm6932_vm4, %v6927_v11, %v6714_v60  ;;  %v8620_v14 = vcombine.low %v7528_v35, %v14958_v30 }
 0x34c   : > { %v14986_v7 = vrot.slane %v7989_v29, %v10038_v5  ;;  %v14991_v37 = vrot.slane %v8466_v50, %v10038_v5  ;;  %v14995_v19 = vrot.slane %v7990_v15, %v10038_v5  ;;  %v8603_v35 = vcombine.low %v7515_v59, %v7518_v44 }
 0x34d   : > { %v14997_v17 = vcombine.low %v7980_v51, %v7987_v13  ;;  %v15004_v60 = vrot.slane %v8619_v33, %v10038_v5  ;;  %v15012_v56 = vrot.slane %v8620_v14, %v10038_v5  ;;  %v7764_v13 = vcombine.low %v14921_v18, %v14916_v48 }
 0x34e   : > { %v6795_v41 = vpop.permute.xlu0 %6794  ;;  %16730 = vst [vmem:[#allocation13_spill] sm:$0xff] %v14986_v7  ;;  %16731 = vst [vmem:[#allocation14_spill] sm:$0xff] %v14991_v37  ;;  %v6635_v8 = vpop.permute.xlu1 %6634  ;;  %v15031_v59 = vrot.slane %v8603_v35, %v10038_v5  ;;  %v9635_v18 = vcombine.high %v14916_v48, %v14881_v32  ;;  %v7765_v40 = vcombine.low %v14881_v32, %v14892_v36 }
 0x34f   : > { %v6965_v23 = vsel %vm6951_vm5, %v6946_v20, %v6795_v41  ;;  %16732 = vst [vmem:[#allocation15_spill] sm:$0xff] %v14995_v19  ;;  %16733 = vst [vmem:[#allocation16_spill] sm:$0xff] %v14997_v17  ;;  %v8602_v41 = vcombine.low %v14859_v47, %v7512_v22  ;;  %v15026_v47 = vrot.slane %v7747_v34, %v10038_v5 }
 0x350   : > { %9851 = vmatmul.mubr.msk.f32.gmra.mxu1 %vm6986_vm7, %v6965_v23  ;;  %16734 = vst [vmem:[#allocation17_spill] sm:$0xff] %v15004_v60  ;;  %16735 = vst [vmem:[#allocation18_spill] sm:$0xff] %v15012_v56  ;;  %v15015_v23 = vrot.slane %v7748_v39, %v10038_v5  ;;  %v16740_v39 = vcombine.low %v14895_v0, %v14912_v27  ;;  %v15042_v33 = vrot.slane %v7764_v13, %v10038_v5 }
 0x351   : > { %v15018_v15 = vrot.slane %v8602_v41, %v10038_v5  ;;  %16738 = vst [vmem:[#allocation21_spill] sm:$0xff] %v15026_v47  ;;  %16739 = vst [vmem:[#allocation22_spill] sm:$0xff] %v15031_v59  ;;  %v15051_v0 = vrot.slane %v9635_v18, %v10038_v5  ;;  %v15056_v41 = vrot.slane %v7765_v40, %v10038_v5 }
 0x352   : > { %16736 = vst [vmem:[#allocation19_spill] sm:$0xff] %v15015_v23  ;;  %v6556_v50 = vpop.permute.xlu0 %6555  ;;  %v15037_v44 = vrot.slane %v16740_v39, %v10038_v5  ;;  %16742 = vst [vmem:[#allocation24_spill] sm:$0xff] %v15042_v33  ;;  %v6270_v34 = vpop.permute.xlu1 %6269  ;;  %v6836_v18 = vsel %vm4051_vm10, %v14257_v46, %v14785_v49 }
 0x353   : > { %16737 = vst [vmem:[#allocation20_spill] sm:$0xff] %v15018_v15  ;;  %16743 = vst [vmem:[#allocation25_spill] sm:$0xff] %v15051_v0  ;;  %v6854_v26 = vsel %vm4103_vm12, %v6836_v18, %v14839_v16  ;;  %v6837_v16 = vsel %vm4051_vm10, %v14385_v24, %v14832_v4 }
 0x354   : > { %16741 = vst [vmem:[#allocation23_spill] sm:$0xff] %v15037_v44  ;;  %16744 = vst [vmem:[#allocation26_spill] sm:$0xff] %v15056_v41  ;;  %v6872_v40 = vsel %vm4155_vm14, %v6854_v26, %v14848_v61  ;;  %v6855_v61 = vsel %vm4103_vm12, %v6837_v16, %v14851_v12 }
 0x355   : > { %v6890_v32 = vsel %vm4207_vm0, %v6872_v40, %v14897_v10 }
 0x356   : > { %v5912_v14 = vpop.permute.xlu0 %5911  ;;  %v6716_v13 = vpop.permute.xlu1 %6715  ;;  %v6909_v35 = vsel %vm6894_vm2, %v6890_v32, %v14946_v54  ;;  %v6873_v54 = vsel %vm4155_vm14, %v6855_v61, %v14903_v52 }
 0x357   : > { %v6928_v20 = vsel %vm6913_vm3, %v6909_v35, %v6635_v8 }
 0x358   : > { %v6947_v11 = vsel %vm6932_vm4, %v6928_v20, %v6716_v13  ;;  %v6891_v20 = vsel %vm4207_vm0, %v6873_v54, %v14952_v21  ;;  %v6839_v13 = vsel %vm4051_vm10, %v14557_v1, %v5912_v14 }
 0x35a   : > { %v6637_v39 = vpop.permute.xlu0 %6636  ;;  %v6366_v48 = vpop.permute.xlu1 %6365 }
 0x35e   : > { %v6272_v36 = vpop.permute.xlu0 %6271  ;;  %v6797_v22 = vpop.permute.xlu1 %6796 }
 0x35f   : > { %v6966_v46 = vsel %vm6951_vm5, %v6947_v11, %v6797_v22  ;;  %v6910_v22 = vsel %vm6894_vm2, %v6891_v20, %v6556_v50  ;;  %v6857_v16 = vsel %vm4103_vm12, %v6839_v13, %v6272_v36 }
 0x360   : > { %9853 = vmatprep.mubr.msk.f32.mxu1 %vm6986_vm7, %v6966_v46  ;;  %v6929_v35 = vsel %vm6913_vm3, %v6910_v22, %v6637_v39  ;;  %v6838_v39 = vsel %vm4051_vm10, %v14448_v3, %v14979_v45 }
 0x362   : > { %v6718_v49 = vpop.permute.xlu0 %6717  ;;  %v6462_v10 = vpop.permute.xlu1 %6461 }
 0x363   : > { %v6948_v52 = vsel %vm6932_vm4, %v6929_v35, %v6718_v49 }
 0x365   : > { %v9840_v8 = vpop.f32.mrf.mxu1 }
 0x366   : > { %v6368_v26 = vpop.permute.xlu0 %6367  ;;  %v7133_v11 = vadd.f32 %v9840_v8, %v14771_v9  ;;  %v6464_v4 = vpop.permute.xlu1 %6463  ;;  %v6856_v8 = vsel %vm4103_vm12, %v6838_v39, %v6270_v34 }
 0x367   : > { %v7127_v32 = vpop.f32.mrf.mxu1  ;;  %v6875_v20 = vsel %vm4155_vm14, %v6857_v16, %v6368_v26  ;;  %v6874_v36 = vsel %vm4155_vm14, %v6856_v8, %v6366_v48 }
 0x368   : > { %v7201_v24 = vmax.f32 %v7133_v11, 0.0  ;;  %v7128_v12 = vadd.f32 %v14771_v9, %v7127_v32  ;;  %v16745_v32 = vrot.slane %v14912_v27, 7  ;;  %v6892_v48 = vsel %vm4207_vm0, %v6874_v36, %v6462_v10 }
 0x369   : > { %v6893_v13 = vsel %vm4207_vm0, %v6875_v20, %v6464_v4 }
 0x36a   : > { %v6799_v18 = vpop.permute.xlu0 %6798  ;;  %v7237_v40 = vcombine.high %v7201_v24, %v7201_v24  ;;  %v15096_v21 = vrot.slane %v7201_v24, %v10038_v5  ;;  %v7200_v46 = vmax.f32 %v7128_v12, 0.0  ;;  %v6560_v54 = vpop.permute.xlu1 %6559  ;;  %v7532_v35 = vrot.slane %v16745_v32, 2 }
 0x36b   : > { %v6967_v50 = vsel %vm6951_vm5, %v6948_v52, %v6799_v18 }
 0x36c   : > { %9854 = vmatmul.mubr.msk.f32.gmra.mxu1 %vm6986_vm7, %v6967_v50  ;;  %v15106_v1 = vcombine.high %v15096_v21, %v15096_v21  ;;  %v15109_v14 = vrot.slane %v7237_v40, %v10038_v5  ;;  %v7543_v49 = vrot.slane %v15096_v21, 7  ;;  %v7236_v61 = vcombine.high %v7200_v46, %v7200_v46 }
 0x36d   : > { %v15115_v3 = vrot.slane %v7200_v46, %v10038_v5  ;;  %v6912_v50 = vsel %vm6894_vm2, %v6893_v13, %v6560_v54 }
 0x36e   : > { %v6558_v45 = vpop.permute.xlu0 %6557  ;;  %v7546_v11 = vrot.slane %v15106_v1, 7  ;;  %v15120_v22 = vrot.slane %v7236_v61, %v10038_v5  ;;  %v7545_v24 = vrot.slane %v7543_v49, 2  ;;  %v15126_v34 = vcombine.high %v15109_v14, %v15109_v14  ;;  %v6641_v18 = vpop.permute.xlu1 %6640 }
 0x36f   : > { %v7549_v26 = vrot.slane %v15109_v14, 7  ;;  %v15131_v12 = vcombine.high %v15115_v3, %v15115_v3  ;;  %v8274_v46 = vcombine.low %v15096_v21, %v15106_v1  ;;  %v6911_v8 = vsel %vm6894_vm2, %v6892_v48, %v6558_v45 }
 0x370   : > { %v15137_v52 = vcombine.high %v15120_v22, %v15120_v22  ;;  %v7548_v40 = vrot.slane %v7546_v11, 2  ;;  %v7552_v61 = vrot.slane %v15126_v34, 7  ;;  %v7533_v20 = vrot.slane %v15115_v3, 7 }
 0x371   : > { %v7551_v16 = vrot.slane %v7549_v26, 2  ;;  %v15152_v36 = vsel %vm10175_vm6, %v7545_v24, %v7546_v11  ;;  %v7536_v32 = vrot.slane %v15131_v12, 7  ;;  %v9621_v45 = vrot.slane %v15120_v22, 9 }
 0x372   : > { %v6639_v39 = vpop.permute.xlu0 %6638  ;;  %v7540_v10 = vrot.slane %v15137_v52, 7  ;;  %v15147_v4 = vsel %vm10175_vm6, %v7548_v40, %v7549_v26  ;;  %v6722_v48 = vpop.permute.xlu1 %6721  ;;  %v7534_v40 = vsel %vm10175_vm6, %v7532_v35, %v7533_v20  ;;  %v7535_v29 = vrot.slane %v7533_v20, 2 }
 0x373   : > { %v15156_v54 = vsel %vm10175_vm6, %v7551_v16, %v7552_v61  ;;  %v6931_v11 = vsel %vm6913_vm3, %v6912_v50, %v6641_v18  ;;  %v15166_v28 = vrot.slane %v8274_v46, %v10038_v5  ;;  %v8006_v61 = vcombine.low %v14958_v30, %v7534_v40 }
 0x374   : > { %v7542_v13 = vrot.slane %v7540_v10, 2  ;;  %v8024_v26 = vcombine.low %v15147_v4, %v15156_v54  ;;  %v7541_v16 = vsel %vm10175_vm6, %v9621_v45, %v7540_v10  ;;  %v6930_v51 = vsel %vm6913_vm3, %v6911_v8, %v6639_v39 }
 0x375   : > { %16746 = vst [vmem:[#allocation27_spill] sm:$0xff] %v15166_v28  ;;  %v6950_v53 = vsel %vm6932_vm4, %v6931_v11, %v6722_v48  ;;  %v7537_v35 = vsel %vm10175_vm6, %v7535_v29, %v7536_v32  ;;  %v8257_v10 = vcombine.low %v14912_v27, %v15115_v3  ;;  %v9631_v39 = vcombine.high %v15115_v3, %v15120_v22 }
 0x376   : > { %v6720_v24 = vpop.permute.xlu0 %6719  ;;  %v7544_v6 = vsel %vm10175_vm6, %v7542_v13, %v7543_v49  ;;  %v8007_v50 = vcombine.low %v7537_v35, %v7541_v16  ;;  %v6803_v20 = vpop.permute.xlu1 %6802  ;;  %v15182_v30 = vrot.slane %v8024_v26, %v10038_v5  ;;  %v8475_v49 = vcombine.low %v15120_v22, %v15137_v52 }
 0x377   : > { %v6949_v18 = vsel %vm6932_vm4, %v6930_v51, %v6720_v24  ;;  %v8023_v46 = vcombine.low %v7544_v6, %v15152_v36  ;;  %v8636_v8 = vcombine.low %v7534_v40, %v7537_v35  ;;  %v6969_v29 = vsel %vm6951_vm5, %v6950_v53, %v6803_v20 }
 0x378   : > { %16747 = vst [vmem:[#allocation28_spill] sm:$0xff] %v15182_v30  ;;  %v15193_v45 = vrot.slane %v8006_v61, %v10038_v5  ;;  %v15196_v27 = vrot.slane %v8007_v50, %v10038_v5  ;;  %v15200_v13 = vrot.slane %v8257_v10, %v10038_v5  ;;  %v15203_v26 = vrot.slane %v9631_v39, %v10038_v5 }
 0x379   : > { %v15190_v32 = vrot.slane %v8023_v46, %v10038_v5  ;;  %v15206_v53 = vrot.slane %v8475_v49, %v10038_v5  ;;  %v8637_v24 = vcombine.low %v7541_v16, %v7544_v6  ;;  %v15214_v61 = vrot.slane %v8636_v8, %v10038_v5 }
 0x37a   : > { %v6801_v51 = vpop.permute.xlu0 %6800  ;;  %16749 = vst [vmem:[#allocation30_spill] sm:$0xff] %v15193_v45  ;;  %16750 = vst [vmem:[#allocation31_spill] sm:$0xff] %v15196_v27  ;;  %v7799_v46 = vcombine.low %v15106_v1, %v15109_v14  ;;  %v7798_v50 = vcombine.low %v15137_v52, %v15096_v21  ;;  %v8863_v6 = vcombine.low %v15115_v3, %v15131_v12 }
 0x37b   : > { %16748 = vst [vmem:[#allocation29_spill] sm:$0xff] %v15190_v32  ;;  %v6968_v48 = vsel %vm6951_vm5, %v6949_v18, %v6801_v51  ;;  %16751 = vst [vmem:[#allocation32_spill] sm:$0xff] %v15200_v13  ;;  %v15226_v10 = vrot.slane %v8637_v24, %v10038_v5  ;;  %v7782_v20 = vcombine.low %v15115_v3, %v15120_v22 }
 0x37c   : > { %16752 = vst [vmem:[#allocation33_spill] sm:$0xff] %v15203_v26  ;;  %16753 = vst [vmem:[#allocation34_spill] sm:$0xff] %v15206_v53  ;;  %9856 = vmatprep.mubr.msk.f32.mxu1 %vm6986_vm7, %v6968_v48  ;;  %v15237_v1 = vrot.slane %v7799_v46, %v10038_v5  ;;  %v15240_v21 = vrot.slane %v7798_v50, %v10038_v5  ;;  %v15249_v3 = vrot.slane %v8863_v6, %v10038_v5 }
 0x37d   : > { %16754 = vst [vmem:[#allocation35_spill] sm:$0xff] %v15214_v61  ;;  %9857 = vmatmul.mubr.msk.f32.gmra.mxu1 %vm6986_vm7, %v6969_v29  ;;  %16755 = vst [vmem:[#allocation36_spill] sm:$0xff] %v15226_v10  ;;  %v15252_v22 = vrot.slane %v7782_v20, %v10038_v5 }
 0x37e   : > { %9885 = vmatprep.mubr.msk.f32.mxu1 %vm9976_vm8, %v16668_v25  ;;  %16756 = vst [vmem:[#allocation37_spill] sm:$0xff] %v15237_v1  ;;  %16757 = vst [vmem:[#allocation38_spill] sm:$0xff] %v15240_v21 }
 0x37f   : > { %16758 = vst [vmem:[#allocation39_spill] sm:$0xff] %v15249_v3  ;;  %16759 = vst [vmem:[#allocation40_spill] sm:$0xff] %v15252_v22 }
 0x387   : > { %v9843_v24 = vpop.f32.mrf.mxu1 }
 0x388   : > { %v7143_v46 = vadd.f32 %v9843_v24, %v14771_v9 }
 0x389   : > { %v7137_v50 = vpop.f32.mrf.mxu1 }
 0x38a   : > { %v7203_v6 = vmax.f32 %v7143_v46, 0.0  ;;  %v7138_v20 = vadd.f32 %v14771_v9, %v7137_v50  ;;  %v8275_v46 = vcombine.low %v15109_v14, %v15126_v34  ;;  %v8653_v50 = vcombine.low %v15152_v36, %v15147_v4 }
 0x38c   : > { %v7239_v49 = vcombine.high %v7203_v6, %v7203_v6  ;;  %v15267_v12 = vrot.slane %v7203_v6, %v10038_v5  ;;  %v7202_v8 = vmax.f32 %v7138_v20, 0.0  ;;  %v15298_v47 = vrot.slane %v8653_v50, %v10038_v5 }
 0x38e   : > { %v15270_v52 = vrot.slane %v7239_v49, %v10038_v5  ;;  %v7238_v16 = vcombine.high %v7202_v8, %v7202_v8  ;;  %v15273_v51 = vrot.slane %v7202_v8, %v10038_v5  ;;  %v7484_v48 = vcombine.high %v15267_v12, %v15267_v12  ;;  %16761 = vst [vmem:[#allocation42_spill] sm:$0xff] %v15298_v47 }
 0x38f   : > { %v7565_v24 = vrot.slane %v15267_v12, 7 }
 0x390   : > { %v7349_v6 = vcombine.high %v15273_v51, %v15273_v51  ;;  %v7356_v49 = vrot.slane %v7238_v16, %v10038_v5  ;;  %v15287_v8 = vcombine.high %v15270_v52, %v15270_v52  ;;  %v7568_v29 = vrot.slane %v7484_v48, 7 }
 0x391   : > { %v7567_v20 = vrot.slane %v7565_v24, 2  ;;  %v9623_v39 = vrot.slane %v15270_v52, 9  ;;  %v9632_v18 = vcombine.high %v15267_v12, %v15270_v52  ;;  %v9622_v11 = vrot.slane %v15273_v51, 9 }
 0x392   : > { %v7357_v34 = vcombine.high %v7356_v49, %v7356_v49  ;;  %v7559_v35 = vrot.slane %v7356_v49, 7  ;;  %v16569_v4 = vrot.slane %v15287_v8, 7  ;;  %v7556_v36 = vrot.slane %v7349_v6, 7 }
 0x393   : > { %v8291_v40 = vcombine.low %v7349_v6, %v7356_v49  ;;  %v15295_v16 = vrot.slane %v8275_v46, %v10038_v5  ;;  %v7569_v44 = vsel %vm10175_vm6, %v7567_v20, %v7568_v29  ;;  %v15310_v33 = vrot.slane %v9632_v18, %v10038_v5 }
 0x394   : > { %v7561_v41 = vrot.slane %v7559_v35, 2  ;;  %v7816_v22 = vcombine.low %v7356_v49, %v7357_v34  ;;  %v15306_v0 = vsel %vm10175_vm6, %v9623_v39, %v16569_v4  ;;  %v7558_v46 = vrot.slane %v7556_v36, 2 }
 0x395   : > { %16760 = vst [vmem:[#allocation41_spill] sm:$0xff] %v15295_v16  ;;  %v8057_v25 = vcombine.low %v7569_v44, %v15306_v0  ;;  %v7562_v23 = vrot.slane %v7357_v34, 7  ;;  %v7557_v50 = vsel %vm10175_vm6, %v9622_v11, %v7556_v36  ;;  %v8292_v49 = vcombine.low %v7357_v34, %v15267_v12 }
 0x396   : > { %v15316_v29 = vrot.slane %v8291_v40, %v10038_v5  ;;  %v8484_v20 = vcombine.low %v15109_v14, %v15273_v51  ;;  %v7560_v18 = vsel %vm10175_vm6, %v7558_v46, %v7559_v35  ;;  %v15337_v21 = vrot.slane %v7816_v22, %v10038_v5 }
 0x397   : > { %v15321_v39 = vrot.slane %v8057_v25, %v10038_v5  ;;  %v7563_v4 = vsel %vm10175_vm6, %v7561_v41, %v7562_v23  ;;  %v7564_v59 = vrot.slane %v7562_v23, 2  ;;  %v8040_v15 = vcombine.low %v7557_v50, %v7560_v18 }
 0x398   : > { %16762 = vst [vmem:[#allocation43_spill] sm:$0xff] %v15316_v29  ;;  %v15328_v11 = vrot.slane %v8292_v49, %v10038_v5  ;;  %v8670_v34 = vcombine.low %v7560_v18, %v7563_v4  ;;  %v15331_v40 = vrot.slane %v8484_v20, %v10038_v5  ;;  %v8654_v25 = vcombine.low %v15156_v54, %v7557_v50 }
 0x399   : > { %v7566_v36 = vsel %vm10175_vm6, %v7564_v59, %v7565_v24  ;;  %16765 = vst [vmem:[#allocation46_spill] sm:$0xff] %v15337_v21  ;;  %v8881_v35 = vcombine.low %v15267_v12, %v7484_v48  ;;  %v15341_v23 = vrot.slane %v8040_v15, %v10038_v5  ;;  %v7832_v24 = vcombine.low %v15267_v12, %v15270_v52 }
 0x39a   : > { %16763 = vst [vmem:[#allocation44_spill] sm:$0xff] %v15328_v11  ;;  %16764 = vst [vmem:[#allocation45_spill] sm:$0xff] %v15331_v40  ;;  %v8041_v41 = vcombine.low %v7563_v4, %v7566_v36  ;;  %v15345_v46 = vcombine.low %v15316_v29, %v15328_v11  ;;  %v8671_v49 = vcombine.low %v7566_v36, %v7569_v44 }
 0x39b   : > { %16766 = vst [vmem:[#allocation47_spill] sm:$0xff] %v15341_v23  ;;  %v15348_v20 = vrot.slane %v8670_v34, %v10038_v5  ;;  %v15353_v54 = vrot.slane %v8654_v25, %v10038_v5  ;;  %v15356_v22 = vrot.slane %v8881_v35, %v10038_v5  ;;  %v9636_v44 = vcombine.high %v15109_v14, %v15273_v51 }
 0x39c   : > { %16767 = vst [vmem:[#allocation48_spill] sm:$0xff] %v15345_v46  ;;  %v15359_v15 = vrot.slane %v8041_v41, %v10038_v5  ;;  %v15362_v48 = vrot.slane %v8671_v49, %v10038_v5  ;;  %v7815_v34 = vcombine.low %v15273_v51, %v7349_v6  ;;  %v15383_v12 = vrot.slane %v7832_v24, %v10038_v5 }
 0x39d   : > { %16768 = vst [vmem:[#allocation49_spill] sm:$0xff] %v15348_v20  ;;  %16769 = vst [vmem:[#allocation50_spill] sm:$0xff] %v15353_v54  ;;  %v15380_v25 = vrot.slane %v9636_v44, %v10038_v5 }
 0x39e   : > { %16770 = vst [vmem:[#allocation51_spill] sm:$0xff] %v15356_v22  ;;  %16771 = vst [vmem:[#allocation52_spill] sm:$0xff] %v15359_v15  ;;  %v15388_v41 = vrot.slane %v7815_v34, %v10038_v5 }
 0x39f   : > { %16772 = vst [vmem:[#allocation53_spill] sm:$0xff] %v15362_v48  ;;  %16773 = vst [vmem:[#allocation54_spill] sm:$0xff] %v15380_v25 }
 0x3a0   : > { %16774 = vst [vmem:[#allocation55_spill] sm:$0xff] %v15383_v12  ;;  %16775 = vst [vmem:[#allocation56_spill] sm:$0xff] %v15388_v41 }
 0x3a9   : > { %v9846_v34 = vpop.f32.mrf.mxu1 }
 0x3aa   : > { %v7153_v35 = vadd.f32 %v9846_v34, %v14771_v9 }
 0x3ab   : > { %v7147_v50 = vpop.f32.mrf.mxu1 }
 0x3ac   : > { %v7205_v51 = vmax.f32 %v7153_v35, 0.0  ;;  %v7148_v4 = vadd.f32 %v14771_v9, %v7147_v50  ;;  %v16776_v35 = vrot.slane %v15287_v8, 7  ;;  %v8493_v50 = vcombine.low %v15270_v52, %v15287_v8 }
 0x3ae   : > { %v7241_v6 = vcombine.high %v7205_v51, %v7205_v51  ;;  %v15405_v59 = vrot.slane %v7205_v51, %v10038_v5  ;;  %v7204_v49 = vmax.f32 %v7148_v4, 0.0  ;;  %v7574_v36 = vrot.slane %v16776_v35, 2 }
 0x3b0   : > { %v7395_v44 = vcombine.high %v15405_v59, %v15405_v59  ;;  %v15410_v24 = vrot.slane %v7241_v6, %v10038_v5  ;;  %v7240_v14 = vcombine.high %v7204_v49, %v7204_v49  ;;  %v9624_v18 = vrot.slane %v15405_v59, 9 }
 0x3b1   : > { %v7379_v34 = vrot.slane %v7204_v49, %v10038_v5 }
 0x3b2   : > { %v15420_v4 = vcombine.high %v15410_v24, %v15410_v24  ;;  %v7591_v51 = vrot.slane %v15410_v24, 7  ;;  %v8326_v6 = vcombine.low %v7395_v44, %v15410_v24  ;;  %v15425_v29 = vrot.slane %v7240_v14, %v10038_v5 }
 0x3b3   : > { %v7380_v41 = vcombine.high %v7379_v34, %v7379_v34  ;;  %v7575_v3 = vrot.slane %v7379_v34, 7  ;;  %v7833_v49 = vcombine.low %v15287_v8, %v7379_v34  ;;  %v7588_v11 = vrot.slane %v7395_v44, 7 }
 0x3b4   : > { %v7593_v35 = vrot.slane %v7591_v51, 2  ;;  %v7485_v52 = vcombine.high %v15425_v29, %v15425_v29  ;;  %v15431_v38 = vrot.slane %v8326_v6, %v10038_v5  ;;  %v7581_v42 = vrot.slane %v15425_v29, 7 }
 0x3b5   : > { %v7577_v31 = vrot.slane %v7575_v3, 2  ;;  %v7578_v62 = vrot.slane %v7380_v41, 7  ;;  %v8309_v43 = vcombine.low %v7379_v34, %v7380_v41  ;;  %v7589_v14 = vsel %vm10175_vm6, %v9624_v18, %v7588_v11 }
 0x3b6   : > { %v8325_v25 = vcombine.low %v15425_v29, %v7485_v52  ;;  %v7584_v1 = vrot.slane %v7485_v52, 7  ;;  %v7583_v8 = vrot.slane %v7581_v42, 2  ;;  %v7590_v56 = vrot.slane %v7588_v11, 2 }
 0x3b7   : > { %v7580_v60 = vrot.slane %v7578_v62, 2  ;;  %v7849_v63 = vcombine.low %v7380_v41, %v15425_v29  ;;  %v7850_v6 = vcombine.low %v15405_v59, %v7395_v44  ;;  %v7576_v52 = vsel %vm10175_vm6, %v7574_v36, %v7575_v3 }
 0x3b8   : > { %v15441_v58 = vrot.slane %v8325_v25, %v10038_v5  ;;  %v7585_v34 = vsel %vm10175_vm6, %v7583_v8, %v7584_v1  ;;  %v7592_v18 = vsel %vm10175_vm6, %v7590_v56, %v7591_v51  ;;  %v16778_v41 = vrot.slane %v15420_v4, 7 }
 0x3b9   : > { %v7582_v11 = vsel %vm10175_vm6, %v7580_v60, %v7581_v42  ;;  %v8075_v37 = vcombine.low %v7589_v14, %v7592_v18  ;;  %v15460_v8 = vrot.slane %v7849_v63, %v10038_v5  ;;  %v15463_v56 = vrot.slane %v7850_v6, %v10038_v5 }
 0x3ba   : > { %16777 = vst [vmem:[#allocation57_spill] sm:$0xff] %v15441_v58  ;;  %v15455_v44 = vsel %vm10175_vm6, %v7593_v35, %v16778_v41  ;;  %v8341_v25 = vcombine.low %v15441_v58, %v15431_v38  ;;  %v8074_v1 = vcombine.low %v7582_v11, %v7585_v34  ;;  %v7579_v42 = vsel %vm10175_vm6, %v7577_v31, %v7578_v62 }
 0x3bb   : > { %v15466_v3 = vrot.slane %v8075_v37, %v10038_v5  ;;  %v15471_v60 = vrot.slane %v8309_v43, %v10038_v5  ;;  %v15474_v36 = vrot.slane %v8493_v50, %v10038_v5  ;;  %v8058_v35 = vcombine.low %v7576_v52, %v7579_v42 }
 0x3bc   : > { %8432 = vrot.lane.b32.xlu0 %v8341_v25, %s9973_s13  ;;  %v15478_v63 = vrot.slane %v8074_v1, %v10038_v5  ;;  %v8704_v43 = vcombine.low %v7585_v34, %v7589_v14  ;;  %v8705_v62 = vcombine.low %v7592_v18, %v15455_v44  ;;  %v8687_v31 = vcombine.low %v15306_v0, %v7576_v52 }
 0x3bd   : > { %16779 = vst [vmem:[#allocation58_spill] sm:$0xff] %v15466_v3  ;;  %16780 = vst [vmem:[#allocation59_spill] sm:$0xff] %v15474_v36  ;;  %v15490_v6 = vrot.slane %v8058_v35, %v10038_v5  ;;  %v8688_v14 = vcombine.low %v7579_v42, %v7582_v11  ;;  %v15507_v35 = vrot.slane %v7833_v49, %v10038_v5 }
 0x3be   : > { %16781 = vst [vmem:[#allocation60_spill] sm:$0xff] %v15478_v63  ;;  %v8090_v50 = vcombine.low %v15478_v63, %v15466_v3  ;;  %v15495_v25 = vrot.slane %v8704_v43, %v10038_v5  ;;  %v15498_v1 = vrot.slane %v8705_v62, %v10038_v5  ;;  %v15512_v62 = vrot.slane %v8687_v31, %v10038_v5 }
 0x3bf   : > { %16784 = vst [vmem:[#allocation63_spill] sm:$0xff] %v15507_v35  ;;  %v15515_v0 = vrot.slane %v8688_v14, %v10038_v5  ;;  %v15519_v52 = vcombine.low %v15507_v35, %v15460_v8 }
 0x3c0   : > { %16782 = vst [vmem:[#allocation61_spill] sm:$0xff] %v15495_v25  ;;  %16783 = vst [vmem:[#allocation62_spill] sm:$0xff] %v15498_v1  ;;  %8181 = vrot.lane.b32.xlu0 %v8090_v50, %s9968_s8 }
 0x3c1   : > { %16785 = vst [vmem:[#allocation64_spill] sm:$0xff] %v15512_v62  ;;  %16786 = vst [vmem:[#allocation65_spill] sm:$0xff] %v15515_v0 }
 0x3c2   : > { %16787 = vst [vmem:[#allocation66_spill] sm:$0xff] %v15519_v52 }
 0x3ec   : > { %v9849_v50 = vpop.f32.mrf.mxu1 }
 0x3ed   : > { %v7163_v14 = vadd.f32 %v9849_v50, %v14771_v9 }
 0x3ee   : > { %v7157_v18 = vpop.f32.mrf.mxu1 }
 0x3ef   : > { %v7207_v41 = vmax.f32 %v7163_v14, 0.0  ;;  %v7158_v43 = vadd.f32 %v14771_v9, %v7157_v18 }
 0x3f1   : > { %v7243_v37 = vcombine.high %v7207_v41, %v7207_v41  ;;  %v7425_v34 = vrot.slane %v7207_v41, %v10038_v5  ;;  %v7206_v11 = vmax.f32 %v7158_v43, 0.0 }
 0x3f3   : > { %v7426_v51 = vcombine.high %v7425_v34, %v7425_v34  ;;  %v15533_v49 = vrot.slane %v7243_v37, %v10038_v5  ;;  %v7242_v58 = vcombine.high %v7206_v11, %v7206_v11  ;;  %v7607_v42 = vrot.slane %v7425_v34, 7 }
 0x3f4   : > { %v7410_v63 = vrot.slane %v7206_v11, %v10038_v5  ;;  %v16789_v11 = vrot.slane %v15420_v4, 7 }
 0x3f5   : > { %v8359_v31 = vcombine.low %v7425_v34, %v7426_v51  ;;  %v7417_v35 = vrot.slane %v7242_v58, %v10038_v5  ;;  %v7487_v50 = vcombine.high %v15533_v49, %v15533_v49  ;;  %v7609_v12 = vrot.slane %v7607_v42, 2 }
 0x3f6   : > { %v8342_v9 = vcombine.low %v15420_v4, %v7410_v63  ;;  %v7486_v18 = vcombine.high %v7410_v63, %v7410_v63  ;;  %v7597_v14 = vrot.slane %v7410_v63, 7  ;;  %v7610_v17 = vrot.slane %v7426_v51, 7 }
 0x3f7   : > { %v9633_v41 = vcombine.high %v7410_v63, %v7417_v35  ;;  %v7418_v43 = vcombine.high %v7417_v35, %v7417_v35  ;;  %v8360_v37 = vcombine.low %v15533_v49, %v7487_v50  ;;  %v15542_v22 = vrot.slane %v8359_v31, %v10038_v5 }
 0x3f8   : > { %v7596_v21 = vrot.slane %v16789_v11, 2  ;;  %v7599_v58 = vrot.slane %v7597_v14, 2  ;;  %v7600_v10 = vrot.slane %v7486_v18, 7  ;;  %v15550_v53 = vrot.slane %v8342_v9, %v10038_v5 }
 0x3f9   : > { %16788 = vst [vmem:[#allocation67_spill] sm:$0xff] %v15542_v22  ;;  %v15547_v61 = vrot.slane %v8360_v37, %v10038_v5  ;;  %v9625_v57 = vrot.slane %v7417_v35, 9  ;;  %v7604_v55 = vrot.slane %v7418_v43, 7  ;;  %v15553_v3 = vrot.slane %v9633_v41, %v10038_v5 }
 0x3fa   : > { %16791 = vst [vmem:[#allocation69_spill] sm:$0xff] %v15550_v53  ;;  %v8511_v19 = vcombine.low %v7417_v35, %v7418_v43  ;;  %v7598_v31 = vsel %vm10175_vm6, %v7596_v21, %v7597_v14  ;;  %v7601_v11 = vsel %vm10175_vm6, %v7599_v58, %v7600_v10  ;;  %v15565_v52 = vsel %vm10175_vm6, %v7609_v12, %v7610_v17 }
 0x3fb   : > { %16790 = vst [vmem:[#allocation68_spill] sm:$0xff] %v15547_v61  ;;  %16792 = vst [vmem:[#allocation70_spill] sm:$0xff] %v15553_v3  ;;  %v8375_v7 = vcombine.low %v15542_v22, %v15547_v61  ;;  %v7605_v37 = vsel %vm10175_vm6, %v9625_v57, %v7604_v55  ;;  %v7606_v9 = vrot.slane %v7604_v55, 2  ;;  %v7612_v54 = vrot.slane %v7610_v17, 2 }
 0x3fc   : > { %v8092_v41 = vcombine.low %v7601_v11, %v7605_v37  ;;  %v7613_v47 = vrot.slane %v15533_v49, 7  ;;  %v7884_v21 = vcombine.low %v7426_v51, %v15533_v49  ;;  %v8721_v14 = vcombine.low %v7598_v31, %v7601_v11 }
 0x3fd   : > { %8436 = vrot.lane.b32.xlu0 %v8375_v7, %s9973_s13  ;;  %v7608_v10 = vsel %vm10175_vm6, %v7606_v9, %v7607_v42  ;;  %v7867_v58 = vcombine.low %v7410_v63, %v7417_v35  ;;  %v7883_v40 = vcombine.low %v7418_v43, %v7425_v34  ;;  %v7616_v57 = vrot.slane %v7487_v50, 7 }
 0x3fe   : > { %v7615_v55 = vrot.slane %v7613_v47, 2  ;;  %v8108_v26 = vcombine.low %v7608_v10, %v15565_v52  ;;  %v8358_v12 = vcombine.low %v15550_v53, %v15553_v3  ;;  %v8518_v17 = vrot.slane %v8511_v19, %v10038_v5 }
 0x3ff   : > { %v8091_v13 = vcombine.low %v15455_v44, %v7598_v31  ;;  %v8722_v51 = vcombine.low %v7605_v37, %v7608_v10  ;;  %v15578_v7 = vrot.slane %v8092_v41, %v10038_v5  ;;  %v15582_v42 = vsel %vm10175_vm6, %v7612_v54, %v7613_v47 }
 0x400   : > { %v15585_v34 = vrot.slane %v8108_v26, %v10038_v5  ;;  %v15588_v35 = vrot.slane %v7884_v21, %v10038_v5  ;;  %v15592_v19 = vrot.slane %v8721_v14, %v10038_v5  ;;  %v15598_v50 = vrot.slane %v7867_v58, %v10038_v5 }
 0x401   : > { %16793 = vst [vmem:[#allocation71_spill] sm:$0xff] %v15578_v7  ;;  %8434 = vrot.lane.b32.xlu0 %v8358_v12, %s9973_s13  ;;  %v15595_v44 = vrot.slane %v8722_v51, %v10038_v5  ;;  %v15601_v47 = vrot.slane %v7883_v40, %v10038_v5  ;;  %v15605_v26 = vsel %vm10175_vm6, %v7615_v55, %v7616_v57  ;;  %v15641_v57 = vld [vmem:[%s16528_s4] ss:$0 sm:$0xff] }
 0x402   : > { %16794 = vst [vmem:[#allocation72_spill] sm:$0xff] %v15585_v34  ;;  %v8900_v54 = vcombine.low %v7410_v63, %v7486_v18  ;;  %v8519_v11 = vcombine.low %v15550_v53, %v8518_v17  ;;  %v15623_v63 = vrot.slane %v8091_v13, %v10038_v5  ;;  %v8109_v18 = vcombine.low %v15582_v42, %v15605_v26 }
 0x404   : > { %v15619_v41 = vrot.slane %v8900_v54, %v10038_v5  ;;  %16796 = vst [vmem:[#allocation74_spill] sm:$0xff] %v15623_v63  ;;  %v8107_v10 = vcombine.low %v15623_v63, %v15578_v7  ;;  %v15633_v14 = vrot.slane %v8109_v18, %v10038_v5 }
 0x405   : > { %8577 = vrot.lane.b32.xlu0 %v8519_v11, %s9970_s10 }
 0x406   : > { %16795 = vst [vmem:[#allocation73_spill] sm:$0xff] %v15619_v41  ;;  %16797 = vst [vmem:[#allocation75_spill] sm:$0xff] %v15633_v14  ;;  %v8124_v58 = vcombine.low %v15585_v34, %v15633_v14 }
 0x409   : > { %8183 = vrot.lane.b32.xlu0 %v8107_v10, %s9968_s8 }
 0x40d   : > { %8185 = vrot.lane.b32.xlu0 %v8124_v58, %s9968_s8 }
 0x410   : > { %v9852_v13 = vpop.f32.mrf.mxu1 }
 0x411   : > { %v7173_v55 = vadd.f32 %v15641_v57, %v9852_v13 }
 0x412   : > { %v7167_v12 = vpop.f32.mrf.mxu1 }
 0x413   : > { %v7209_v17 = vmax.f32 %v7173_v55, 0.0  ;;  %v7168_v51 = vadd.f32 %v15641_v57, %v7167_v12 }
 0x415   : > { %v15646_v54 = vrot.slane %v7209_v17, %v10038_v5  ;;  %v7208_v11 = vmax.f32 %v7168_v51, 0.0  ;;  %v7245_v18 = vcombine.high %v7209_v17, %v7209_v17 }
 0x417   : > { %v7244_v10 = vcombine.high %v7208_v11, %v7208_v11  ;;  %v7440_v58 = vrot.slane %v7208_v11, %v10038_v5  ;;  %v15651_v31 = vcombine.high %v15646_v54, %v15646_v54  ;;  %v15658_v55 = vrot.slane %v7245_v18, %v10038_v5 }
 0x419   : > { %v7441_v43 = vcombine.high %v7440_v58, %v7440_v58  ;;  %v15654_v9 = vrot.slane %v7244_v10, %v10038_v5  ;;  %v9638_v13 = vcombine.high %v15533_v49, %v7440_v58  ;;  %v8520_v12 = vcombine.low %v15533_v49, %v7440_v58 }
 0x41a   : > { %v8918_v17 = vcombine.low %v15646_v54, %v15651_v31  ;;  %v9626_v37 = vrot.slane %v7440_v58, 9 }
 0x41b   : > { %v15665_v51 = vcombine.high %v15654_v9, %v15654_v9  ;;  %v8916_v11 = vrot.slane %v9638_v13, %v10038_v5  ;;  %v8376_v21 = vcombine.low %v7441_v43, %v15654_v9  ;;  %v8527_v10 = vrot.slane %v8520_v12, %v10038_v5 }
 0x41c   : > { %v7620_v40 = vrot.slane %v7441_v43, 7  ;;  %v8925_v3 = vrot.slane %v8918_v17, %v10038_v5  ;;  %v7917_v13 = vcombine.low %v15646_v54, %v15658_v55 }
 0x41d   : > { %v7901_v18 = vcombine.low %v15654_v9, %v15665_v51  ;;  %v8917_v49 = vcombine.low %v15588_v35, %v8916_v11  ;;  %v8377_v53 = vcombine.low %v15665_v51, %v15646_v54  ;;  %v8528_v63 = vcombine.low %v15542_v22, %v8527_v10 }
 0x41e   : > { %v15681_v12 = vrot.slane %v8376_v21, %v10038_v5  ;;  %v7621_v7 = vsel %vm10175_vm6, %v9626_v37, %v7620_v40  ;;  %v16625_v10 = vrot.slane %v15654_v9, 7  ;;  %v7622_v17 = vrot.slane %v7620_v40, 2 }
 0x41f   : > { %8969 = vrot.lane.b32.xlu1 %v8917_v49, %s9977_s29  ;;  %v15684_v34 = vrot.slane %v8377_v53, %v10038_v5  ;;  %v15687_v11 = vrot.slane %v7901_v18, %v10038_v5  ;;  %8579 = vrot.lane.b32.xlu0 %v8528_v63, %s9970_s10  ;;  %v8739_v22 = vcombine.low %v15605_v26, %v7621_v7  ;;  %v7626_v48 = vrot.slane %v15665_v51, 7 }
 0x420   : > { %16798 = vst [vmem:[#allocation76_spill] sm:$0xff] %v15681_v12  ;;  %v15701_v53 = vsel %vm10175_vm6, %v7622_v17, %v16625_v10  ;;  %v15705_v37 = vrot.slane %v7917_v13, %v10038_v5  ;;  %v7900_v18 = vcombine.low %v7440_v58, %v7441_v43  ;;  %v15789_v51 = vcombine.high %v15658_v55, %v15658_v55 }
 0x421   : > { %16799 = vst [vmem:[#allocation77_spill] sm:$0xff] %v15687_v11  ;;  %v8392_v49 = vcombine.low %v15681_v12, %v15684_v34  ;;  %v8926_v21 = vcombine.low %v15687_v11, %v8925_v3  ;;  %v8125_v40 = vcombine.low %v7621_v7, %v15701_v53  ;;  %v8738_v3 = vcombine.low %v15565_v52, %v15582_v42 }
 0x422   : > { %v8999_v26 = vcombine.low %v15687_v11, %v15705_v37  ;;  %v8753_v13 = vrot.slane %v8739_v22, %v10038_v5  ;;  %v15721_v7 = vrot.slane %v7900_v18, %v10038_v5  ;;  %v7629_v12 = vrot.slane %v15646_v54, 7 }
 0x423   : > { %8971 = vrot.lane.b32.xlu1 %v8926_v21, %s9977_s29  ;;  %8438 = vrot.lane.b32.xlu0 %v8392_v49, %s9973_s13  ;;  %v15714_v63 = vrot.slane %v8125_v40, %v10038_v5  ;;  %v8746_v42 = vrot.slane %v8738_v3, %v10038_v5  ;;  %v7628_v14 = vrot.slane %v7626_v48, 2 }
 0x424   : > { %16800 = vst [vmem:[#allocation78_spill] sm:$0xff] %v15721_v7 }
 0x425   : > { %v8754_v21 = vcombine.low %v8746_v42, %v8753_v13 }
 0x427   : > { %9050 = vrot.lane.b32.xlu1 %v8999_v26, %s9978_s11  ;;  %8581 = vrot.lane.b32.xlu0 %v8392_v49, %s9970_s10 }
 0x42b   : > { %8830 = vrot.lane.b32.xlu0 %v8754_v21, %s9972_s12 }
 0x42c   : > { %v9855_v22 = vpop.f32.mrf.mxu1 }
 0x42d   : > { %v7183_v18 = vadd.f32 %v15641_v57, %v9855_v22 }
 0x42e   : > { %v7177_v40 = vpop.f32.mrf.mxu1 }
 0x42f   : > { %v7178_v26 = vadd.f32 %v15641_v57, %v7177_v40  ;;  %v7211_v49 = vmax.f32 %v7183_v18, 0.0 }
 0x431   : > { %v7210_v17 = vmax.f32 %v7178_v26, 0.0  ;;  %v7247_v58 = vcombine.high %v7211_v49, %v7211_v49 }
 0x433   : > { %v7246_v52 = vcombine.high %v7210_v17, %v7210_v17  ;;  %v15747_v21 = vrot.slane %v7247_v58, %v10038_v5  ;;  %v15750_v22 = vrot.slane %v7210_v17, %v10038_v5  ;;  %v15765_v17 = vrot.slane %v7211_v49, %v10038_v5 }
 0x435   : > { %v15735_v3 = vrot.slane %v7246_v52, %v10038_v5  ;;  %v15757_v18 = vcombine.high %v15747_v21, %v15747_v21  ;;  %v7918_v36 = vcombine.low %v15789_v51, %v15750_v22 }
 0x437   : > { %v15739_v43 = vcombine.high %v15735_v3, %v15735_v3  ;;  %v9639_v45 = vcombine.high %v15735_v3, %v15765_v17  ;;  %v8929_v49 = vcombine.low %v15747_v21, %v15757_v18  ;;  %v8538_v62 = vcombine.low %v15735_v3, %v15765_v17 }
 0x439   : > { %v8410_v13 = vcombine.low %v15735_v3, %v15739_v43  ;;  %v8936_v28 = vrot.slane %v9639_v45, %v10038_v5  ;;  %v8943_v16 = vrot.slane %v8929_v49, %v10038_v5  ;;  %v16801_v45 = vrot.slane %v15654_v9, 7 }
 0x43a   : > { %v8529_v9 = vcombine.low %v15658_v55, %v15789_v51  ;;  %v8546_v15 = vrot.slane %v8538_v62, %v10038_v5 }
 0x43b   : > { %v15744_v42 = vrot.slane %v8410_v13, %v10038_v5  ;;  %v15761_v13 = vcombine.high %v15750_v22, %v15750_v22  ;;  %v7625_v49 = vrot.slane %v16801_v45, 2  ;;  %v7631_v45 = vrot.slane %v7629_v12, 2 }
 0x43c   : > { %v8536_v62 = vrot.slane %v8529_v9, %v10038_v5  ;;  %v7645_v9 = vrot.slane %v15735_v3, 7 }
 0x43d   : > { %8442 = vrot.lane.b32.xlu1 %v15744_v42, %s9973_s13  ;;  %v9858_v52 = vpop.f32.mrf.mxu1  ;;  %v8394_v20 = vcombine.low %v15750_v22, %v15761_v13  ;;  %v7627_v23 = vsel %vm10175_vm6, %v7625_v49, %v7626_v48  ;;  %v7639_v49 = vrot.slane %v15750_v22, 7 }
 0x43e   : > { %v7193_v40 = vadd.f32 %v15641_v57, %v9858_v52 }
 0x43f   : > { %v7187_v26 = vpop.f32.mrf.mxu1  ;;  %v15805_v7 = vrot.slane %v8394_v20, %v10038_v5  ;;  %v7632_v20 = vrot.slane %v15651_v31, 7  ;;  %v7630_v31 = vsel %vm10175_vm6, %v7628_v14, %v7629_v12  ;;  %v15852_v14 = vrot.slane %v7918_v36, %v10038_v5 }
 0x440   : > { %v7213_v58 = vmax.f32 %v7193_v40, 0.0  ;;  %v7188_v10 = vadd.f32 %v15641_v57, %v7187_v26  ;;  %v8126_v41 = vcombine.low %v7627_v23, %v7630_v31 }
 0x441   : > { %16803 = vst [vmem:[#allocation80_spill] sm:$0xff] %v15852_v14 }
 0x442   : > { %v7249_v11 = vcombine.high %v7213_v58, %v7213_v58  ;;  %v15768_v27 = vrot.slane %v7213_v58, %v10038_v5  ;;  %v7212_v52 = vmax.f32 %v7188_v10, 0.0  ;;  %v9634_v58 = vcombine.high %v15646_v54, %v15658_v55 }
 0x443   : > { %v7934_v54 = vcombine.low %v15761_v13, %v15735_v3  ;;  %v15883_v22 = vrot.slane %v8126_v41, %v10038_v5  ;;  %v7648_v41 = vrot.slane %v15739_v43, 7 }
 0x444   : > { %v15777_v40 = vcombine.high %v15768_v27, %v15768_v27  ;;  %v15780_v57 = vrot.slane %v7249_v11, %v10038_v5  ;;  %v7248_v26 = vcombine.high %v7212_v52, %v7212_v52  ;;  %v15785_v10 = vrot.slane %v7212_v52, %v10038_v5 }
 0x445   : > { %v15796_v11 = vcombine.high %v15765_v17, %v15765_v17 }
 0x446   : > { %v9026_v61 = vcombine.low %v15777_v40, %v15780_v57  ;;  %v8555_v52 = vcombine.low %v15757_v18, %v15785_v10  ;;  %v15810_v30 = vrot.slane %v7248_v26, %v10038_v5 }
 0x447   : > { %v8539_v26 = vcombine.low %v15796_v11, %v15747_v21 }
 0x448   : > { %v9033_v32 = vrot.slane %v9026_v61, %v10038_v5  ;;  %v15814_v0 = vrot.slane %v8555_v52, %v10038_v5  ;;  %v15827_v61 = vrot.slane %v9634_v58, %v10038_v5  ;;  %v8944_v52 = vcombine.low %v8936_v28, %v8943_v16 }
 0x449   : > { %v15842_v58 = vrot.slane %v7934_v54, %v10038_v5  ;;  %v9000_v28 = vcombine.low %v15765_v17, %v15796_v11  ;;  %v15855_v12 = vrot.slane %v8539_v26, %v10038_v5  ;;  %v9009_v54 = vcombine.low %v15785_v10, %v15810_v30 }
 0x44a   : > { %9058 = vrot.lane.b32.xlu1 %v9033_v32, %s9978_s11  ;;  %8587 = vrot.lane.b32.xlu0 %v15814_v0, %s9970_s10  ;;  %v15837_v32 = vcombine.high %v15810_v30, %v15810_v30  ;;  %v8409_v46 = vcombine.low %v15827_v61, %v15805_v7  ;;  %v7642_v26 = vrot.slane %v15761_v13, 7  ;;  %v8755_v13 = vcombine.low %v15701_v53, %v7627_v23 }
 0x44b   : > { %16802 = vst [vmem:[#allocation79_spill] sm:$0xff] %v15842_v58  ;;  %v8927_v1 = vcombine.low %v15852_v14, %v15842_v58  ;;  %v8554_v48 = vcombine.low %v8546_v15, %v15855_v12  ;;  %v9007_v15 = vrot.slane %v9000_v28, %v10038_v5  ;;  %v15892_v28 = vcombine.high %v15785_v10, %v15785_v10 }
 0x44c   : > { %v9010_v36 = vcombine.low %v15837_v32, %v15768_v27  ;;  %v7644_v25 = vrot.slane %v7642_v26, 2  ;;  %v7647_v23 = vrot.slane %v7645_v9, 2  ;;  %v7679_v53 = vrot.slane %v15747_v21, 7 }
 0x44d   : > { %v9008_v58 = vcombine.low %v9007_v15, %v8943_v16  ;;  %v8141_v15 = vcombine.low %v15714_v63, %v15883_v22  ;;  %v8763_v3 = vrot.slane %v8755_v13, %v10038_v5  ;;  %v8945_v43 = vcombine.low %v15785_v10, %v15892_v28 }
 0x44e   : > { %8975 = vrot.lane.b32.xlu1 %v8944_v52, %s9977_s29  ;;  %8440 = vrot.lane.b32.xlu0 %v8409_v46, %s9973_s13  ;;  %v15865_v46 = vsel %vm10175_vm6, %v7631_v45, %v7632_v20  ;;  %v15877_v20 = vrot.slane %v9009_v54, %v10038_v5  ;;  %v15880_v45 = vrot.slane %v9010_v36, %v10038_v5  ;;  %v7641_v36 = vrot.slane %v7639_v49, 2 }
 0x44f   : > { %v8756_v52 = vcombine.low %v7630_v31, %v15865_v46  ;;  %v7636_v31 = vrot.slane %v15789_v51, 7  ;;  %v9627_v51 = vrot.slane %v15658_v55, 9  ;;  %v7649_v55 = vsel %vm10175_vm6, %v7647_v23, %v7648_v41 }
 0x450   : > { %v7681_v54 = vrot.slane %v7679_v53, 2  ;;  %v8952_v41 = vrot.slane %v8945_v43, %v10038_v5  ;;  %v16821_v2 = vcombine.low %v15877_v20, %v15880_v45  ;;  %v16826_v20 = vld [vmem:[#allocation28_spill] sm:$0xff] }
 0x451   : > { %v8770_v16 = vrot.slane %v8756_v52, %v10038_v5  ;;  %v7646_v52 = vsel %vm10175_vm6, %v7644_v25, %v7645_v9  ;;  %v7638_v21 = vrot.slane %v7636_v31, 2  ;;  %v7682_v9 = vrot.slane %v15757_v18, 7 }
 0x452   : > { %8973 = vrot.lane.b32.xlu1 %v8927_v1, %s9977_s29  ;;  %8585 = vrot.lane.b32.xlu0 %v8554_v48, %s9970_s10  ;;  %v8537_v48 = vcombine.low %v8536_v62, %v15805_v7  ;;  %v7676_v62 = vrot.slane %v15796_v11, 7  ;;  %v7643_v11 = vsel %vm10175_vm6, %v7641_v36, %v7642_v26  ;;  %v8159_v23 = vcombine.low %v7646_v52, %v7649_v55 }
 0x453   : > { %v8771_v13 = vcombine.low %v8763_v3, %v8770_v16  ;;  %v7640_v14 = vsel %vm10175_vm6, %v7638_v21, %v7639_v49  ;;  %v9628_v36 = vrot.slane %v15765_v17, 9  ;;  %v15942_v3 = vsel %vm10175_vm6, %v7681_v54, %v7682_v9 }
 0x454   : > { %v7678_v25 = vrot.slane %v7676_v62, 2  ;;  %v15945_v17 = vrot.slane %v8159_v23, %v10038_v5  ;;  %v8773_v21 = vcombine.low %v7643_v11, %v7646_v52  ;;  %v7725_v52 = vrot.slane %v15780_v57, 7 }
 0x455   : > { %v15934_v49 = vsel %vm10175_vm6, %v9628_v36, %v7676_v62 }
 0x456   : > { %9054 = vrot.lane.b32.xlu1 %v9008_v58, %s9978_s11  ;;  %8583 = vrot.lane.b32.xlu0 %v8537_v48, %s9970_s10  ;;  %v15910_v58 = vcombine.high %v15780_v57, %v15780_v57  ;;  %v7637_v48 = vsel %vm10175_vm6, %v9627_v51, %v7636_v31  ;;  %v15938_v18 = vsel %vm10175_vm6, %v7678_v25, %v7679_v53 }
 0x457   : > { %v8142_v31 = vcombine.low %v15865_v46, %v7637_v48  ;;  %v8789_v46 = vcombine.low %v7649_v55, %v15934_v49  ;;  %v8790_v54 = vcombine.low %v15938_v18, %v15942_v3  ;;  %v7685_v55 = vrot.slane %v15785_v10, 7 }
 0x458   : > { %v9192_v26 = vcombine.low %v15780_v57, %v15910_v58  ;;  %v8772_v25 = vcombine.low %v7637_v48, %v7640_v14 }
 0x459   : > { %v8150_v53 = vrot.slane %v8142_v31, %v10038_v5  ;;  %v8797_v43 = vrot.slane %v8789_v46, %v10038_v5  ;;  %v7687_v36 = vrot.slane %v7685_v55, 2 }
 0x45a   : > { %9052 = vrot.lane.b32.xlu1 %v8927_v1, %s9978_s11  ;;  %8187 = vrot.lane.b32.xlu0 %v8141_v15, %s9968_s8  ;;  %v8143_v1 = vcombine.low %v7640_v14, %v7643_v11  ;;  %v9199_v16 = vrot.slane %v9192_v26, %v10038_v5  ;;  %v9174_v15 = vcombine.low %v15855_v12, %v15814_v0  ;;  %v7722_v12 = vrot.slane %v15777_v40, 7 }
 0x45b   : > { %v9173_v26 = vcombine.low %v15805_v7, %v15744_v42  ;;  %v9640_v0 = vcombine.high %v15785_v10, %v15810_v30  ;;  %v7688_v11 = vrot.slane %v15892_v28, 7  ;;  %v9176_v14 = vcombine.low %v15768_v27, %v15777_v40 }
 0x45c   : > { %v15949_v51 = vrot.slane %v8143_v1, %v10038_v5  ;;  %v8787_v1 = vrot.slane %v8773_v21, %v10038_v5  ;;  %v8780_v7 = vrot.slane %v8772_v25, %v10038_v5  ;;  %v7728_v42 = vrot.slane %v15910_v58, 7 }
 0x45d   : > { %v9081_v10 = vcombine.low %v15883_v22, %v8150_v53  ;;  %v9183_v31 = vrot.slane %v9640_v0, %v10038_v5  ;;  %v15984_v28 = vsel %vm10175_vm6, %v7687_v36, %v7688_v11  ;;  %v7724_v46 = vrot.slane %v7722_v12, 2 }
 0x45e   : > { %8832 = vrot.lane.b32.xlu0 %v8771_v13, %s9972_s12  ;;  %8977 = vrot.lane.b32.xlu1 %v8952_v41, %s9977_s29  ;;  %v8158_v62 = vcombine.low %v8150_v53, %v15949_v51  ;;  %v8804_v13 = vrot.slane %v8790_v54, %v10038_v5  ;;  %v8433_v41 = vpop.permute.xlu0 %8432  ;;  %v8788_v48 = vcombine.low %v8780_v7, %v8787_v1  ;;  %v7727_v54 = vrot.slane %v7725_v52, 2 }
 0x45f   : > { %v9190_v58 = vrot.slane %v9176_v14, %v10038_v5  ;;  %v16804_v21 = vcombine.low %v15592_v19, %v15595_v44  ;;  %v16806_v1 = vcombine.low %v15321_v39, %v15490_v6  ;;  %v7866_v19 = vcombine.low %v15410_v24, %v15420_v4 }
 0x460   : > { %v8805_v23 = vcombine.low %v8797_v43, %v8804_v13  ;;  %v7729_v43 = vsel %vm10175_vm6, %v7727_v54, %v7728_v42  ;;  %v16807_v0 = vcombine.low %v15425_v29, %v15405_v59  ;;  %v16808_v14 = vcombine.low %v15310_v33, %v15471_v60 }
 0x461   : > { %v9191_v53 = vcombine.low %v9183_v31, %v9190_v58  ;;  %v16032_v24 = vrot.slane %v7866_v19, %v10038_v5  ;;  %v16811_v58 = vld [vmem:[#allocation62_spill] sm:$0xff]  ;;  %v16818_v19 = vld [vmem:[#allocation48_spill] sm:$0xff] }
 0x462   : > { %8191 = vrot.lane.b32.xlu0 %v15945_v17, %s9968_s8  ;;  %9224 = vrot.lane.b32.xlu1 %v9199_v16, %s9980_s15  ;;  %v8182_v57 = vpop.permute.xlu0 %8181  ;;  %v7684_v16 = vrot.slane %v7682_v9, 2 }
 0x463   : > { %v7882_v4 = vcombine.low %v16032_v24, %v15598_v50 }
 0x464   : > { %v7686_v22 = vsel %vm10175_vm6, %v7684_v16, %v7685_v55  ;;  %v7719_v16 = vrot.slane %v15768_v27, 7 }
 0x465   : > { %v8806_v9 = vcombine.low %v7686_v22, %v15984_v28  ;;  %v9084_v42 = vcombine.low %v15942_v3, %v7686_v22  ;;  %v16810_v3 = vld [vmem:[#allocation61_spill] sm:$0xff] }
 0x466   : > { %8189 = vrot.lane.b32.xlu0 %v8158_v62, %s9968_s8  ;;  %9220 = vrot.lane.b32.xlu1 %v9174_v15, %s9980_s15  ;;  %v7726_v15 = vsel %vm10175_vm6, %v7724_v46, %v7725_v52  ;;  %v8509_v52 = vrot.slane %v16807_v0, %v10038_v5  ;;  %v16812_v22 = vcombine.low %v16810_v3, %v16811_v58 }
 0x467   : > { %v8813_v55 = vrot.slane %v8806_v9, %v10038_v5  ;;  %v9117_v13 = vcombine.low %v7726_v15, %v7729_v43  ;;  %v9098_v46 = vrot.slane %v9084_v42, %v10038_v5  ;;  %v9629_v15 = vrot.slane %v15810_v30, 9  ;;  %v16828_v42 = vld [vmem:[#allocation78_spill] sm:$0xff] }
 0x468   : > { %v8510_v7 = vcombine.low %v8509_v52, %v15431_v38  ;;  %v9082_v30 = vcombine.low %v15949_v51, %v15945_v17  ;;  %v16819_v52 = vld [vmem:[#allocation59_spill] sm:$0xff] }
 0x469   : > { %v9124_v44 = vrot.slane %v9117_v13, %v10038_v5  ;;  %v16820_v40 = vcombine.low %v16819_v52, %v15471_v60  ;;  %v16856_v52 = vld [vmem:[#allocation42_spill] sm:$0xff] }
 0x46a   : > { %8836 = vrot.lane.b32.xlu0 %v8805_v23, %s9972_s12  ;;  %9218 = vrot.lane.b32.xlu1 %v9173_v26, %s9980_s15  ;;  %v16805_v23 = vcombine.low %v15460_v8, %v15463_v56 }
 0x46c   : > { %v9246_v26 = vsel %vm4051_vm10, %v16805_v23, %v8182_v57  ;;  %v9083_v57 = vcombine.low %v15934_v49, %v15938_v18  ;;  %v7721_v18 = vrot.slane %v7719_v16, 2 }
 0x46d   : > { %v9259_v8 = vsel %vm4103_vm12, %v9246_v26, %v8433_v41  ;;  %v9172_v41 = vcombine.low %v15684_v34, %v15827_v61  ;;  %v16809_v61 = vcombine.low %v15601_v47, %v15588_v35 }
 0x46e   : > { %8834 = vrot.lane.b32.xlu0 %v8788_v48, %s9972_s12  ;;  %9141 = vrot.lane.b32.xlu1 %v9081_v10, %s9979_s14  ;;  %v7716_v48 = vrot.slane %v15837_v32, 7  ;;  %v9091_v27 = vrot.slane %v9083_v57, %v10038_v5  ;;  %v7723_v26 = vsel %vm10175_vm6, %v7721_v18, %v7722_v12  ;;  %v16844_v18 = vcombine.low %v15598_v50, %v15601_v47  ;;  %v16853_v50 = vld [vmem:[#allocation70_spill] sm:$0xff] }
 0x46f   : > { %v15994_v62 = vpop.permute.xlu0 %8436 }
 0x470   : > { %v7718_v34 = vrot.slane %v7716_v48, 2  ;;  %v9099_v9 = vcombine.low %v9091_v27, %v9098_v46  ;;  %v7717_v23 = vsel %vm10175_vm6, %v9629_v15, %v7716_v48  ;;  %v16830_v48 = vld [vmem:[#allocation41_spill] sm:$0xff]  ;;  %v16845_v15 = vld [vmem:[#allocation32_spill] sm:$0xff] }
 0x472   : > { %8828 = vrot.lane.b32.xlu0 %v16804_v21, %s9972_s12  ;;  %9222 = vrot.lane.b32.xlu1 %v9191_v53, %s9980_s15  ;;  %v16813_v53 = vld [vmem:[#allocation73_spill] sm:$0xff]  ;;  %v7720_v43 = vsel %vm10175_vm6, %v7718_v34, %v7719_v16  ;;  %v16815_v21 = vld [vmem:[#allocation47_spill] sm:$0xff]  ;;  %vm9463_vm6 = vcmask 818176  }
 0x473   : > { %v8435_v25 = vpop.permute.xlu0 %8434  ;;  %v16814_v49 = vcombine.low %v16813_v53, %v15601_v47  ;;  %v16838_v53 = vld [vmem:[#allocation49_spill] sm:$0xff]  ;;  %v16854_v47 = vld [vmem:[#allocation67_spill] sm:$0xff] }
 0x476   : > { %8179 = vrot.lane.b32.xlu0 %v16806_v1, %s9968_s8  ;;  %8838 = vrot.lane.b32.xlu1 %v8813_v55, %s9972_s12  ;;  %v16816_v55 = vld [vmem:[#allocation52_spill] sm:$0xff]  ;;  %v9101_v1 = vcombine.low %v7720_v43, %v7723_v26  ;;  %v16846_v43 = vld [vmem:[#allocation33_spill] sm:$0xff] }
 0x477   : > { %v8578_v11 = vpop.permute.xlu0 %8577  ;;  %v16817_v13 = vcombine.low %v16815_v21, %v16816_v55  ;;  %v16849_v26 = vld [vmem:[#allocation72_spill] sm:$0xff] }
 0x478   : > { %v16024_v36 = vsel %vm4155_vm14, %v9259_v8, %v8578_v11  ;;  %v9115_v0 = vrot.slane %v9101_v1, %v10038_v5  ;;  %v16822_v11 = vld [vmem:[#allocation64_spill] sm:$0xff] }
 0x47a   : > { %8430 = vrot.lane.b32.xlu0 %v16808_v14, %s9973_s13  ;;  %9149 = vrot.lane.b32.xlu1 %v9124_v44, %s9979_s14  ;;  %v9100_v44 = vcombine.low %v15984_v28, %v7717_v23  ;;  %v16823_v14 = vld [vmem:[#allocation65_spill] sm:$0xff]  ;;  %v16848_v23 = vld [vmem:[#allocation71_spill] sm:$0xff] }
 0x47b   : > { %v8184_v10 = vpop.permute.xlu0 %8183 }
 0x47c   : > { %v9247_v31 = vsel %vm4051_vm10, %v7882_v4, %v8184_v10  ;;  %v9108_v17 = vrot.slane %v9100_v44, %v10038_v5  ;;  %v16824_v4 = vcombine.low %v16822_v11, %v16823_v14  ;;  %v16831_v10 = vld [vmem:[#allocation27_spill] sm:$0xff] }
 0x47d   : > { %v9260_v12 = vsel %vm4103_vm12, %v9247_v31, %v8435_v25  ;;  %v16829_v25 = vcombine.low %v15588_v35, %v16828_v42  ;;  %v8290_v31 = vcombine.low %v16831_v10, %v16830_v48  ;;  %v16834_v35 = vcombine.high %v15425_v29, %v15405_v59  ;;  %v16842_v29 = vld [vmem:[#allocation31_spill] sm:$0xff] }
 0x47e   : > { %8575 = vrot.lane.b32.xlu0 %v8510_v7, %s9970_s10  ;;  %9216 = vrot.lane.b32.xlu1 %v9172_v41, %s9980_s15  ;;  %v9116_v51 = vcombine.low %v9108_v17, %v9115_v0  ;;  %v16825_v41 = vld [vmem:[#allocation29_spill] sm:$0xff]  ;;  %v16855_v0 = vcombine.low %v16853_v50, %v16854_v47  ;;  %v16859_v17 = vld [vmem:[#allocation66_spill] sm:$0xff] }
 0x47f   : > { %v8186_v54 = vpop.permute.xlu0 %8185  ;;  %v16827_v45 = vcombine.low %v16825_v41, %v16826_v20 }
 0x480   : > { %v9248_v32 = vsel %vm4051_vm10, %v16809_v61, %v8186_v54  ;;  %v16832_v54 = vld [vmem:[#allocation75_spill] sm:$0xff]  ;;  %v8898_v61 = vrot.slane %v16834_v35, %v10038_v5  ;;  %v16841_v5 = vld [vmem:[#allocation30_spill] sm:$0xff] }
 0x481   : > { %v9261_v57 = vsel %vm4103_vm12, %v9248_v32, %v15994_v62  ;;  %v16833_v34 = vcombine.low %v16832_v54, %v15714_v63  ;;  %v16835_v62 = vld [vmem:[#allocation68_spill] sm:$0xff]  ;;  %v16843_v59 = vcombine.low %v16841_v5, %v16842_v29  ;;  %v16869_v35 = vld [vmem:[#allocation34_spill] sm:$0xff] }
 0x482   : > { %8826 = vrot.lane.b32.xlu0 %v16812_v22, %s9972_s12  ;;  %8967 = vrot.lane.b32.xlu1 %v16814_v49, %s9977_s29  ;;  %v16836_v32 = vld [vmem:[#allocation76_spill] sm:$0xff]  ;;  %v8899_v63 = vcombine.low %v8898_v61, %v16032_v24  ;;  %v16839_v49 = vld [vmem:[#allocation53_spill] sm:$0xff]  ;;  %v16870_v61 = vcombine.low %v16845_v15, %v16869_v35 }
 0x483   : > { %v16837_v22 = vcombine.low %v16835_v62, %v16836_v32  ;;  %v16840_v27 = vcombine.low %v16838_v53, %v16839_v49  ;;  %v16871_v32 = vld [vmem:[#allocation35_spill] sm:$0xff]  ;;  %v16874_v53 = vld [vmem:[#allocation46_spill] sm:$0xff] }
 0x484   : > { %v16875_v49 = vld [vmem:[#allocation51_spill] sm:$0xff] }
 0x486   : > { %8177 = vrot.lane.b32.xlu0 %v16817_v13, %s9968_s8  ;;  %9145 = vrot.lane.b32.xlu1 %v9099_v9, %s9979_s14  ;;  %v16847_v13 = vcombine.low %v16845_v15, %v16846_v43 }
 0x48a   : > { %8428 = vrot.lane.b32.xlu0 %v16818_v19, %s9973_s13  ;;  %9143 = vrot.lane.b32.xlu1 %v9082_v30, %s9979_s14  ;;  %v16850_v30 = vcombine.low %v16848_v23, %v16849_v26  ;;  %v16878_v26 = vld [vmem:[#allocation5_spill] sm:$0xff] }
 0x48e   : > { %8573 = vrot.lane.b32.xlu0 %v16820_v40, %s9970_s10  ;;  %9056 = vrot.lane.b32.xlu1 %v16821_v2, %s9978_s11  ;;  %v16857_v40 = vld [vmem:[#allocation50_spill] sm:$0xff] }
 0x48f   : > { %v16858_v2 = vcombine.low %v16856_v52, %v16857_v40  ;;  %v16883_v52 = vld [vmem:[#allocation77_spill] sm:$0xff] }
 0x490   : > { %v16884_v40 = vcombine.low %v16828_v42, %v16883_v52  ;;  %v16890_v42 = vld [vmem:[#allocation18_spill] sm:$0xff] }
 0x491   : > { %v8580_v8 = vpop.permute.xlu0 %8579  ;;  %v16145_v9 = vpop.permute.xlu1 %8969 }
 0x492   : > { %v9273_v28 = vsel %vm4155_vm14, %v9260_v12, %v8580_v8  ;;  %8824 = vrot.lane.b32.xlu0 %v16824_v4, %s9972_s12  ;;  %9147 = vrot.lane.b32.xlu1 %v9116_v51, %s9979_s14  ;;  %v8996_v12 = vcombine.low %v15463_v56, %v16032_v24  ;;  %v16860_v8 = vld [vmem:[#allocation13_spill] sm:$0xff]  ;;  %v16863_v4 = vld [vmem:[#allocation74_spill] sm:$0xff] }
 0x493   : > { %v16868_v24 = vld [vmem:[#allocation69_spill] sm:$0xff] }
 0x495   : > { %v8439_v7 = vpop.permute.xlu0 %8438  ;;  %v16155_v1 = vpop.permute.xlu1 %8971 }
 0x496   : > { %8175 = vrot.lane.b32.xlu0 %v16827_v45, %s9968_s8  ;;  %9048 = vrot.lane.b32.xlu1 %v16829_v25, %s9978_s11  ;;  %v16864_v45 = vld [vmem:[#allocation58_spill] sm:$0xff] }
 0x497   : > { %v9078_v25 = vcombine.low %v16864_v45, %v16863_v4 }
 0x499   : > { %v8582_v16 = vpop.permute.xlu0 %8581  ;;  %v16171_v51 = vpop.permute.xlu1 %9050 }
 0x49a   : > { %v16111_v46 = vsel %vm4155_vm14, %v9261_v57, %v8582_v16  ;;  %8426 = vrot.lane.b32.xlu0 %v8290_v31, %s9973_s13  ;;  %9139 = vrot.lane.b32.xlu1 %v16833_v34, %s9979_s14  ;;  %v16865_v31 = vld [vmem:[#allocation8_spill] sm:$0xff]  ;;  %v9169_v34 = vcombine.low %v15431_v38, %v16868_v24 }
 0x49b   : > { %v16866_v57 = vld [vmem:[#allocation4_spill] sm:$0xff] }
 0x49c   : > { %v16867_v16 = vcombine.low %v16865_v31, %v16866_v57 }
 0x49d   : > { %v8831_v3 = vpop.permute.xlu0 %8830 }
 0x49e   : > { %v16123_v58 = vsel %vm4207_vm0, %v9273_v28, %v8831_v3  ;;  %8571 = vrot.lane.b32.xlu0 %v16818_v19, %s9970_s10  ;;  %9214 = vrot.lane.b32.xlu1 %v16837_v22, %s9980_s15  ;;  %v16851_v19 = vld [vmem:[#allocation45_spill] sm:$0xff]  ;;  %v16861_v28 = vld [vmem:[#allocation15_spill] sm:$0xff]  ;;  %v16872_v22 = vld [vmem:[#allocation36_spill] sm:$0xff] }
 0x49f   : > { %v16852_v44 = vcombine.low %v16831_v10, %v16851_v19  ;;  %v16862_v11 = vcombine.low %v16860_v8, %v16861_v28 }
 0x4a2   : > { %8822 = vrot.lane.b32.xlu0 %v16840_v27, %s9972_s12  ;;  %8965 = vrot.lane.b32.xlu1 %v8899_v63, %s9977_s29  ;;  %v16873_v63 = vcombine.low %v16871_v32, %v16872_v22  ;;  %v16876_v27 = vcombine.low %v16874_v53, %v16875_v49  ;;  %v16896_v32 = vld [vmem:[#allocation12_spill] sm:$0xff]  ;;  %v16898_v22 = vld [vmem:[#allocation55_spill] sm:$0xff] }
 0x4a6   : > { %8173 = vrot.lane.b32.xlu0 %v16843_v59, %s9968_s8  ;;  %9046 = vrot.lane.b32.xlu1 %v16844_v18, %s9978_s11  ;;  %v16877_v18 = vld [vmem:[#allocation16_spill] sm:$0xff] }
 0x4aa   : > { %8424 = vrot.lane.b32.xlu0 %v16847_v13, %s9973_s13  ;;  %9137 = vrot.lane.b32.xlu1 %v16850_v30, %s9979_s14  ;;  %v16879_v30 = vld [vmem:[#allocation7_spill] sm:$0xff] }
 0x4ab   : > { %v16880_v19 = vcombine.low %v16878_v26, %v16879_v30 }
 0x4ae   : > { %8569 = vrot.lane.b32.xlu0 %v16852_v44, %s9970_s10  ;;  %9212 = vrot.lane.b32.xlu1 %v16855_v0, %s9980_s15  ;;  %v16881_v44 = vld [vmem:[#allocation60_spill] sm:$0xff] }
 0x4af   : > { %v8443_v14 = vpop.permute.xlu1 %8442  ;;  %v16882_v50 = vcombine.low %v15490_v6, %v16881_v44 }
 0x4b2   : > { %8820 = vrot.lane.b32.xlu0 %v16858_v2, %s9972_s12  ;;  %8963 = vrot.lane.b32.xlu1 %v16859_v17, %s9977_s29 }
 0x4b6   : > { %8171 = vrot.lane.b32.xlu0 %v16862_v11, %s9968_s8  ;;  %9044 = vrot.lane.b32.xlu1 %v8996_v12, %s9978_s11  ;;  %v16885_v12 = vld [vmem:[#allocation14_spill] sm:$0xff]  ;;  %v16887_v11 = vld [vmem:[#allocation57_spill] sm:$0xff] }
 0x4b7   : > { %v16886_v8 = vcombine.low %v16885_v12, %v16866_v57  ;;  %v16888_v6 = vcombine.low %v15471_v60, %v16887_v11  ;;  %v16906_v11 = vld [vmem:[#allocation6_spill] sm:$0xff] }
 0x4ba   : > { %8422 = vrot.lane.b32.xlu0 %v16867_v16, %s9973_s13  ;;  %9135 = vrot.lane.b32.xlu1 %v9078_v25, %s9979_s14  ;;  %v16889_v25 = vld [vmem:[#allocation17_spill] sm:$0xff]  ;;  %v16893_v16 = vld [vmem:[#allocation54_spill] sm:$0xff] }
 0x4bb   : > { %v16891_v31 = vcombine.low %v16889_v25, %v16890_v42 }
 0x4bc   : > { %v16187_v54 = vpop.permute.xlu1 %9058  ;;  %v8588_v56 = vpop.permute.xlu0 %8587 }
 0x4be   : > { %8567 = vrot.lane.b32.xlu0 %v16870_v61, %s9970_s10  ;;  %9210 = vrot.lane.b32.xlu1 %v9169_v34, %s9980_s15  ;;  %v16895_v61 = vld [vmem:[#allocation3_spill] sm:$0xff] }
 0x4bf   : > { %v16897_v60 = vcombine.low %v16895_v61, %v16896_v32  ;;  %v16911_v61 = vld [vmem:[#allocation39_spill] sm:$0xff]  ;;  %v16912_v32 = vld [vmem:[#allocation38_spill] sm:$0xff] }
 0x4c0   : > { %v8976_v3 = vpop.permute.xlu1 %8975  ;;  %v8441_v62 = vpop.permute.xlu0 %8440 }
 0x4c2   : > { %8818 = vrot.lane.b32.xlu0 %v16873_v63, %s9972_s12  ;;  %8961 = vrot.lane.b32.xlu1 %v16876_v27, %s9977_s29  ;;  %v16899_v63 = vcombine.low %v16874_v53, %v16898_v22 }
 0x4c4   : > { %v8974_v38 = vpop.permute.xlu1 %8973  ;;  %v8586_v59 = vpop.permute.xlu0 %8585 }
 0x4c6   : > { %8169 = vrot.lane.b32.xlu0 %v16877_v18, %s9968_s8  ;;  %9042 = vrot.lane.b32.xlu1 %v16859_v17, %s9978_s11  ;;  %v16900_v18 = vld [vmem:[#allocation80_spill] sm:$0xff] }
 0x4c7   : > { %v16901_v26 = vcombine.low %v15705_v37, %v16900_v18 }
 0x4c8   : > { %v16208_v13 = vpop.permute.xlu1 %9054  ;;  %v8584_v23 = vpop.permute.xlu0 %8583 }
 0x4ca   : > { %8420 = vrot.lane.b32.xlu0 %v16880_v19, %s9973_s13  ;;  %9133 = vrot.lane.b32.xlu1 %v16882_v50, %s9979_s14  ;;  %v16902_v50 = vld [vmem:[#allocation10_spill] sm:$0xff] }
 0x4cc   : > { %v16218_v47 = vpop.permute.xlu1 %9052  ;;  %v8188_v0 = vpop.permute.xlu0 %8187 }
 0x4cd   : > { %v9249_v2 = vsel %vm4051_vm10, %v16884_v40, %v8188_v0  ;;  %v16903_v0 = vld [vmem:[#allocation9_spill] sm:$0xff]  ;;  %v16905_v40 = vcombine.low %v16816_v55, %v15321_v39 }
 0x4ce   : > { %v9262_v17 = vsel %vm4103_vm12, %v9249_v2, %v8439_v7  ;;  %8565 = vrot.lane.b32.xlu0 %v16886_v8, %s9970_s10  ;;  %9208 = vrot.lane.b32.xlu1 %v16888_v6, %s9980_s15  ;;  %v16892_v7 = vld [vmem:[#allocation37_spill] sm:$0xff]  ;;  %v16904_v52 = vcombine.low %v16902_v50, %v16903_v0  ;;  %v16908_v6 = vld [vmem:[#allocation44_spill] sm:$0xff] }
 0x4cf   : > { %v16894_v24 = vcombine.low %v16892_v7, %v16893_v16  ;;  %v16909_v25 = vcombine.low %v16908_v6, %v15310_v33  ;;  %v16910_v16 = vld [vmem:[#allocation79_spill] sm:$0xff]  ;;  %v16914_v33 = vld [vmem:[#allocation20_spill] sm:$0xff] }
 0x4d0   : > { %v8978_v4 = vpop.permute.xlu1 %8977  ;;  %v16233_v45 = vpop.permute.xlu0 %8832  ;;  %v16928_v6 = vld [vmem:[#allocation23_spill] sm:$0xff] }
 0x4d2   : > { %8816 = vrot.lane.b32.xlu0 %v16891_v31, %s9972_s12  ;;  %8959 = vrot.lane.b32.xlu1 %v16894_v24, %s9977_s29 }
 0x4d4   : > { %v9225_v34 = vpop.permute.xlu1 %9224  ;;  %v8192_v35 = vpop.permute.xlu0 %8191 }
 0x4d5   : > { %v9251_v24 = vsel %vm4051_vm10, %v16910_v16, %v8192_v35  ;;  %v16917_v35 = vld [vmem:[#allocation56_spill] sm:$0xff] }
 0x4d6   : > { %8167 = vrot.lane.b32.xlu0 %v16897_v60, %s9968_s8  ;;  %9040 = vrot.lane.b32.xlu1 %v16899_v63, %s9978_s11  ;;  %v16913_v60 = vcombine.low %v16911_v61, %v16912_v32  ;;  %v16918_v18 = vcombine.low %v16892_v7, %v16917_v35 }
 0x4d8   : > { %v16251_v49 = vpop.permute.xlu1 %9220  ;;  %v8190_v27 = vpop.permute.xlu0 %8189 }
 0x4d9   : > { %v9250_v19 = vsel %vm4051_vm10, %v16901_v26, %v8190_v27  ;;  %v16920_v26 = vld [vmem:[#allocation24_spill] sm:$0xff] }
 0x4da   : > { %v9263_v44 = vsel %vm4103_vm12, %v9250_v19, %v8441_v62  ;;  %8418 = vrot.lane.b32.xlu0 %v16904_v52, %s9973_s13  ;;  %9131 = vrot.lane.b32.xlu1 %v16905_v40, %s9979_s14  ;;  %v16907_v62 = vcombine.low %v16906_v11, %v16879_v30 }
 0x4db   : > { %v9276_v2 = vsel %vm4155_vm14, %v9263_v44, %v8586_v59  ;;  %v9275_v59 = vsel %vm4155_vm14, %v9262_v17, %v8584_v23  ;;  %v9264_v17 = vsel %vm4103_vm12, %v9251_v24, %v8443_v14  ;;  %v16922_v14 = vcombine.low %v16826_v20, %v16815_v21 }
 0x4dc   : > { %v16267_v12 = vpop.permute.xlu1 %9218  ;;  %v8837_v8 = vpop.permute.xlu0 %8836  ;;  %v9277_v50 = vsel %vm4155_vm14, %v9264_v17, %v8588_v56  ;;  %v16932_v24 = vcombine.low %v16842_v29, %v16825_v41  ;;  %v16934_v41 = vld [vmem:[#allocation26_spill] sm:$0xff] }
 0x4dd   : > { %v9289_v37 = vsel %vm4207_vm0, %v9276_v2, %v8837_v8  ;;  %v16923_v2 = vcombine.low %v16861_v28, %v16841_v5  ;;  %v16926_v28 = vmov 0.0   ;;  %v16935_v29 = vcombine.low %v16934_v41, %v16928_v6 }
 0x4de   : > { %8563 = vrot.lane.b32.xlu0 %v16907_v62, %s9970_s10  ;;  %9206 = vrot.lane.b32.xlu1 %v16909_v25, %s9980_s15  ;;  %v9302_v39 = vsel %vm6894_vm2, %v9289_v37, %v8976_v3  ;;  %v16915_v3 = vld [vmem:[#allocation22_spill] sm:$0xff]  ;;  %v16924_v62 = vld [vmem:[#allocation43_spill] sm:$0xff] }
 0x4df   : > { %v16916_v63 = vcombine.low %v16914_v33, %v16915_v3  ;;  %v16925_v21 = vcombine.low %v16830_v48, %v16924_v62  ;;  %v9344_v33 = vld [vmem:[%s16530_s6] sm:$0xff]  ;;  %v16933_v3 = vcombine.low %v16846_v43, %v16831_v10 }
 0x4e0   : > { %v16279_v55 = vpop.permute.xlu1 %9141  ;;  %v8835_v42 = vpop.permute.xlu0 %8834 }
 0x4e1   : > { %v9288_v31 = vsel %vm4207_vm0, %v9275_v59, %v8835_v42 }
 0x4e2   : > { %v9301_v30 = vsel %vm6894_vm2, %v9288_v31, %v8974_v38  ;;  %8957 = vrot.lane.b32.xlu1 %v16913_v60, %s9977_s29  ;;  %8814 = vrot.lane.b32.xlu0 %v16916_v63, %s9972_s12  ;;  %v16919_v38 = vld [vmem:[#allocation19_spill] sm:$0xff]  ;;  %v9981_v63 = vmov 0  }
 0x4e3   : > { %v16921_v19 = vcombine.low %v16919_v38, %v16920_v26  ;;  %9922 = vset.pattern.permute.xlu0 %v9981_v63 }
 0x4e4   : > { %v9223_v27 = vpop.permute.xlu1 %9222  ;;  %v16294_v23 = vpop.permute.xlu0 %8828 }
 0x4e6   : > { %9038 = vrot.lane.b32.xlu1 %v16918_v18, %s9978_s11  ;;  %8953 = vrot.lane.b32.xlu0 %v16921_v19, %s9977_s29  ;;  %v9287_v19 = vsel %vm4207_vm0, %v16111_v46, %v16233_v45 }
 0x4e7   : > { %v9300_v46 = vsel %vm6894_vm2, %v9287_v19, %v16155_v1 }
 0x4e8   : > { %v8839_v44 = vpop.permute.xlu1 %8838  ;;  %v16306_v0 = vpop.permute.xlu0 %8179 }
 0x4e9   : > { %v9290_v52 = vsel %vm4207_vm0, %v9277_v50, %v8839_v44 }
 0x4ea   : > { %v9303_v40 = vsel %vm6894_vm2, %v9290_v52, %v8978_v4  ;;  %9129 = vrot.lane.b32.xlu1 %v16922_v14, %s9979_s14  ;;  %9125 = vrot.lane.b32.xlu0 %v16923_v2, %s9979_s14  ;;  %v9314_v52 = vsel %vm6913_vm3, %v9301_v30, %v16208_v13  ;;  %v16936_v14 = vcombine.low %v16866_v57, %v16845_v15 }
 0x4eb   : > { %v9316_v8 = vsel %vm6913_vm3, %v9303_v40, %v16187_v54  ;;  %v16927_v54 = vld [vmem:[#allocation25_spill] sm:$0xff]  ;;  %v9313_v30 = vsel %vm6913_vm3, %v9300_v46, %v16218_v47 }
 0x4ec   : > { %v9150_v56 = vpop.permute.xlu1 %9149  ;;  %v16320_v37 = vpop.permute.xlu0 %8430  ;;  %v16929_v25 = vcombine.low %v16927_v54, %v16928_v6 }
 0x4ed   : > { %v9329_v11 = vsel %vm6932_vm4, %v9316_v8, %v9150_v56 }
 0x4ee   : > { %v9342_v4 = vsel %vm6951_vm5, %v9329_v11, %v9225_v34  ;;  %9204 = vrot.lane.b32.xlu1 %v16925_v21, %s9980_s15  ;;  %v16930_v34 = vld [vmem:[#allocation40_spill] sm:$0xff]  ;;  %9347 = vperm.xlu0 %9922, %v9344_v33  }
 0x4ef   : > { %9860 = vmatpush3.xpose.msk.msra.mxu1 %vm6986_vm7, %v9342_v4  ;;  %v16931_v48 = vcombine.low %v16930_v34, %v16912_v32  ;;  %v9285_v4 = vsel %vm4207_vm0, %v16024_v36, %v16294_v23  ;;  %v16937_v23 = vld [vmem:[#allocation63_spill] sm:$0xff] }
 0x4f0   : > { %v9217_v20 = vpop.permute.xlu1 %9216  ;;  %v16329_v5 = vpop.permute.xlu0 %8575  ;;  %9861 = vmatprep.subr.mxu1 %v16926_v28 }
 0x4f2   : > { %8955 = vrot.lane.b32.xlu1 %v16929_v25, %s9977_s29  ;;  %s9526_s29 = sshll.u32 %s16949_s25, 3 }
 0x4f4   : > { %v8968_v59 = vpop.permute.xlu1 %8967  ;;  %v16336_v42 = vpop.permute.xlu0 %8826 }
 0x4f6   : > { %9036 = vrot.lane.b32.xlu1 %v16931_v48, %s9978_s11 }
 0x4f8   : > { %v9146_v31 = vpop.permute.xlu1 %9145  ;;  %v16342_v16 = vpop.permute.xlu0 %8177 }
 0x4f9   : > { %v9327_v45 = vsel %vm6932_vm4, %v9314_v52, %v9146_v31 }
 0x4fa   : > { %9127 = vrot.lane.b32.xlu1 %v16932_v24, %s9979_s14  ;;  %v9340_v13 = vsel %vm6951_vm5, %v9327_v45, %v16251_v49 }
 0x4fc   : > { %v9144_v61 = vpop.permute.xlu1 %9143  ;;  %v16348_v60 = vpop.permute.xlu0 %8428 }
 0x4fd   : > { %v9326_v15 = vsel %vm6932_vm4, %v9313_v30, %v9144_v61 }
 0x4fe   : > { %9202 = vrot.lane.b32.xlu1 %v16933_v3, %s9980_s15  ;;  %v9339_v8 = vsel %vm6951_vm5, %v9326_v15, %v16267_v12 }
 0x500   : > { %v9057_v17 = vpop.permute.xlu1 %9056  ;;  %v16357_v18 = vpop.permute.xlu0 %8573 }
 0x501   : > { %v9315_v44 = vsel %vm6913_vm3, %v9302_v39, %v9057_v17 }
 0x502   : > { %9034 = vrot.lane.b32.xlu1 %v16935_v29, %s9978_s11 }
 0x504   : > { %v9148_v50 = vpop.permute.xlu1 %9147  ;;  %v16367_v10 = vpop.permute.xlu0 %8824 }
 0x505   : > { %v9328_v43 = vsel %vm6932_vm4, %v9315_v44, %v9148_v50 }
 0x506   : > { %v9341_v40 = vsel %vm6951_vm5, %v9328_v43, %v9223_v27  ;;  %9200 = vrot.lane.b32.xlu1 %v16936_v14, %s9980_s15  ;;  %v9299_v27 = vsel %vm6894_vm2, %v16123_v58, %v16145_v9  ;;  %v9298_v9 = vsel %vm6894_vm2, %v9285_v4, %v8968_v59  ;;  %s276_s15 = scalar_lea.vmem %s16531_s7, %s9526_s29 }
 0x507   : > { %9862 = vmatpush3.xpose.msk.msra.mxu1 %vm6986_vm7, %v9341_v40  ;;  %v9312_v47 = vsel %vm6913_vm3, %v9299_v27, %v16171_v51 }
 0x508   : > { %v9049_v39 = vpop.permute.xlu1 %9048  ;;  %v16381_v2 = vpop.permute.xlu0 %8175  ;;  %9863 = vmatprep.subr.mxu1 %v16926_v28  ;;  %v9325_v11 = vsel %vm6932_vm4, %v9312_v47, %v16279_v55 }
 0x509   : > { %v9338_v58 = vsel %vm6951_vm5, %v9325_v11, %v9217_v20  ;;  %v9311_v12 = vsel %vm6913_vm3, %v9298_v9, %v9049_v39  ;;  %v16938_v20 = vcombine.low %v16898_v22, %v16937_v23 }
 0x50b   : > { %9864 = vmatpush3.xpose.msk.msra.mxu1 %vm6986_vm7, %v9340_v13  ;;  %v9245_v25 = vsel %vm4051_vm10, %v16938_v20, %v16306_v0 }
 0x50c   : > { %v9140_v1 = vpop.permute.xlu1 %9139  ;;  %v8427_v57 = vpop.permute.xlu0 %8426  ;;  %9865 = vmatprep.subr.mxu1 %v16926_v28  ;;  %v9258_v59 = vsel %vm4103_vm12, %v9245_v25, %v16320_v37 }
 0x50d   : > { %v9324_v21 = vsel %vm6932_vm4, %v9311_v12, %v9140_v1  ;;  %v9271_v48 = vsel %vm4155_vm14, %v9258_v59, %v16329_v5 }
 0x50e   : > { %v9284_v61 = vsel %vm4207_vm0, %v9271_v48, %v16336_v42  ;;  %v16939_v42 = vcombine.low %v16917_v35, %v16874_v53 }
 0x50f   : > { %9866 = vmatpush3.xpose.msk.msra.mxu1 %vm6986_vm7, %v9339_v8 }
 0x510   : > { %v9215_v49 = vpop.permute.xlu1 %9214  ;;  %v8572_v56 = vpop.permute.xlu0 %8571  ;;  %9867 = vmatprep.subr.mxu1 %v16926_v28  ;;  %v9244_v44 = vsel %vm4051_vm10, %v16939_v42, %v16342_v16  ;;  %v16943_v42 = vld [vmem:[#allocation21_spill] sm:$0xff] }
 0x511   : > { %v9337_v55 = vsel %vm6951_vm5, %v9324_v21, %v9215_v49  ;;  %v9257_v50 = vsel %vm4103_vm12, %v9244_v44, %v16348_v60  ;;  %v16944_v44 = vcombine.low %v16943_v42, %v16919_v38 }
 0x512   : > { %v9270_v43 = vsel %vm4155_vm14, %v9257_v50, %v16357_v18 }
 0x513   : > { %9868 = vmatpush3.xpose.msk.msra.mxu1 %vm6986_vm7, %v9338_v58  ;;  %v9283_v40 = vsel %vm4207_vm0, %v9270_v43, %v16367_v10  ;;  %v16940_v10 = vcombine.low %v16912_v32, %v16892_v7 }
 0x514   : > { %v8966_v51 = vpop.permute.xlu1 %8965  ;;  %v8823_v62 = vpop.permute.xlu0 %8822  ;;  %9869 = vmatprep.subr.mxu1 %v16926_v28 }
 0x515   : > { %v9297_v33 = vsel %vm6894_vm2, %v9284_v61, %v8966_v51  ;;  %v9243_v13 = vsel %vm4051_vm10, %v16940_v10, %v16381_v2 }
 0x516   : > { %v9256_v30 = vsel %vm4103_vm12, %v9243_v13, %v8427_v57 }
 0x517   : > { %9870 = vmatpush3.xpose.msk.msra.mxu1 %vm6986_vm7, %v9337_v55  ;;  %v9269_v1 = vsel %vm4155_vm14, %v9256_v30, %v8572_v56  ;;  %v16941_v56 = vcombine.low %v16928_v6, %v16930_v34 }
 0x518   : > { %v9047_v54 = vpop.permute.xlu1 %9046  ;;  %v8174_v36 = vpop.permute.xlu0 %8173  ;;  %9871 = vmatprep.subr.mxu1 %v16926_v28  ;;  %v9282_v8 = vsel %vm4207_vm0, %v9269_v1, %v8823_v62 }
 0x519   : > { %v9310_v3 = vsel %vm6913_vm3, %v9297_v33, %v9047_v54  ;;  %v9242_v9 = vsel %vm4051_vm10, %v16941_v56, %v8174_v36 }
 0x51c   : > { %v9138_v31 = vpop.permute.xlu1 %9137  ;;  %v8425_v24 = vpop.permute.xlu0 %8424 }
 0x51d   : > { %v9323_v63 = vsel %vm6932_vm4, %v9310_v3, %v9138_v31  ;;  %v9255_v12 = vsel %vm4103_vm12, %v9242_v9, %v8425_v24  ;;  %v16942_v31 = vcombine.low %v16920_v26, %v16934_v41 }
 0x520   : > { %v9213_v22 = vpop.permute.xlu1 %9212  ;;  %v8570_v17 = vpop.permute.xlu0 %8569 }
 0x521   : > { %v9336_v0 = vsel %vm6951_vm5, %v9323_v63, %v9213_v22  ;;  %v9268_v51 = vsel %vm4155_vm14, %v9255_v12, %v8570_v17 }
 0x522   : > { %9872 = vmatpush3.xpose.msk.msra.mxu1 %vm6986_vm7, %v9336_v0 }
 0x523   : > { %9873 = vmatprep.subr.mxu1 %v16926_v28 }
 0x524   : > { %v8964_v37 = vpop.permute.xlu1 %8963  ;;  %v8821_v5 = vpop.permute.xlu0 %8820 }
 0x525   : > { %v9296_v14 = vsel %vm6894_vm2, %v9283_v40, %v8964_v37  ;;  %v9281_v21 = vsel %vm4207_vm0, %v9268_v51, %v8821_v5 }
 0x528   : > { %v9045_v29 = vpop.permute.xlu1 %9044  ;;  %v8172_v19 = vpop.permute.xlu0 %8171 }
 0x529   : > { %v9309_v46 = vsel %vm6913_vm3, %v9296_v14, %v9045_v29  ;;  %v9241_v24 = vsel %vm4051_vm10, %v16942_v31, %v8172_v19 }
 0x52c   : > { %v9136_v52 = vpop.permute.xlu1 %9135  ;;  %v8423_v45 = vpop.permute.xlu0 %8422 }
 0x52d   : > { %v9322_v39 = vsel %vm6932_vm4, %v9309_v46, %v9136_v52  ;;  %v9254_v61 = vsel %vm4103_vm12, %v9241_v24, %v8423_v45 }
 0x530   : > { %v9211_v53 = vpop.permute.xlu1 %9210  ;;  %v8568_v60 = vpop.permute.xlu0 %8567 }
 0x531   : > { %v9335_v35 = vsel %vm6951_vm5, %v9322_v39, %v9211_v53  ;;  %v9267_v33 = vsel %vm4155_vm14, %v9254_v61, %v8568_v60  ;;  %v16945_v53 = vld [vmem:[#allocation11_spill] sm:$0xff] }
 0x532   : > { %9874 = vmatpush3.xpose.msk.msra.mxu1 %vm6986_vm7, %v9335_v35  ;;  %v16946_v35 = vld [vmem:[#allocation2_spill] sm:$0xff] }
 0x533   : > { %9875 = vmatprep.subr.mxu1 %v16926_v28 }
 0x534   : > { %v8962_v16 = vpop.permute.xlu1 %8961  ;;  %v8819_v15 = vpop.permute.xlu0 %8818 }
 0x535   : > { %v9295_v47 = vsel %vm6894_vm2, %v9282_v8, %v8962_v16  ;;  %v9280_v63 = vsel %vm4207_vm0, %v9267_v33, %v8819_v15  ;;  %v16947_v16 = vcombine.low %v16945_v53, %v16946_v35 }
 0x538   : > { %v9043_v18 = vpop.permute.xlu1 %9042  ;;  %v8170_v58 = vpop.permute.xlu0 %8169 }
 0x539   : > { %v9308_v49 = vsel %vm6913_vm3, %v9295_v47, %v9043_v18  ;;  %v9240_v50 = vsel %vm4051_vm10, %v16944_v44, %v8170_v58 }
 0x53c   : > { %v9134_v27 = vpop.permute.xlu1 %9133  ;;  %v8421_v2 = vpop.permute.xlu0 %8420 }
 0x53d   : > { %v9321_v11 = vsel %vm6932_vm4, %v9308_v49, %v9134_v27  ;;  %v9253_v43 = vsel %vm4103_vm12, %v9240_v50, %v8421_v2 }
 0x540   : > { %v9209_v4 = vpop.permute.xlu1 %9208  ;;  %v8566_v55 = vpop.permute.xlu0 %8565 }
 0x541   : > { %v9334_v7 = vsel %vm6951_vm5, %v9321_v11, %v9209_v4  ;;  %v9266_v40 = vsel %vm4155_vm14, %v9253_v43, %v8566_v55 }
 0x542   : > { %9876 = vmatpush3.xpose.msk.msra.mxu1 %vm6986_vm7, %v9334_v7  ;;  %v9343_v7 = vld [vmem:[%s16529_s5] sm:$0xff] }
 0x543   : > { %9877 = vmatprep.subr.mxu1 %v16926_v28 }
 0x544   : > { %v8960_v32 = vpop.permute.xlu1 %8959  ;;  %v8817_v6 = vpop.permute.xlu0 %8816 }
 0x545   : > { %v9294_v54 = vsel %vm6894_vm2, %v9281_v21, %v8960_v32  ;;  %v9279_v46 = vsel %vm4207_vm0, %v9266_v40, %v8817_v6 }
 0x548   : > { %v9041_v57 = vpop.permute.xlu1 %9040  ;;  %v8168_v48 = vpop.permute.xlu0 %8167 }
 0x549   : > { %v9307_v23 = vsel %vm6913_vm3, %v9294_v54, %v9041_v57  ;;  %v9239_v60 = vsel %vm4051_vm10, %v16947_v16, %v8168_v48 }
 0x54c   : > { %v9132_v62 = vpop.permute.xlu1 %9131  ;;  %v8419_v17 = vpop.permute.xlu0 %8418 }
 0x54d   : > { %v9320_v20 = vsel %vm6932_vm4, %v9307_v23, %v9132_v62  ;;  %v9252_v10 = vsel %vm4103_vm12, %v9239_v60, %v8419_v17 }
 0x550   : > { %v9207_v25 = vpop.permute.xlu1 %9206  ;;  %v8564_v41 = vpop.permute.xlu0 %8563 }
 0x551   : > { %v9333_v59 = vsel %vm6951_vm5, %v9320_v20, %v9207_v25  ;;  %v9265_v15 = vsel %vm4155_vm14, %v9252_v10, %v8564_v41 }
 0x552   : > { %9878 = vmatpush3.xpose.msk.msra.mxu1 %vm6986_vm7, %v9333_v59 }
 0x553   : > { %9879 = vmatprep.subr.mxu1 %v16926_v28 }
 0x554   : > { %v8958_v34 = vpop.permute.xlu1 %8957  ;;  %v8815_v52 = vpop.permute.xlu0 %8814 }
 0x555   : > { %v9293_v22 = vsel %vm6894_vm2, %v9280_v63, %v8958_v34  ;;  %v9278_v1 = vsel %vm4207_vm0, %v9265_v15, %v8815_v52 }
 0x558   : > { %v9039_v36 = vpop.permute.xlu1 %9038  ;;  %v8954_v13 = vpop.permute.xlu0 %8953 }
 0x559   : > { %v9306_v0 = vsel %vm6913_vm3, %v9293_v22, %v9039_v36  ;;  %v9291_v27 = vsel %vm6894_vm2, %v9278_v1, %v8954_v13 }
 0x55c   : > { %v9130_v3 = vpop.permute.xlu1 %9129  ;;  %v9126_v49 = vpop.permute.xlu0 %9125 }
 0x55d   : > { %v9319_v37 = vsel %vm6932_vm4, %v9306_v0, %v9130_v3 }
 0x560   : > { %v9205_v5 = vpop.permute.xlu1 %9204 }
 0x561   : > { %v9332_v29 = vsel %vm6951_vm5, %v9319_v37, %v9205_v5 }
 0x562   : > { %9880 = vmatpush3.xpose.msk.msra.mxu1 %vm6986_vm7, %v9332_v29 }
 0x563   : > { %9881 = vmatprep.subr.mxu1 %v16926_v28 }
 0x564   : > { %v8956_v26 = vpop.permute.xlu1 %8955 }
 0x565   : > { %v9292_v45 = vsel %vm6894_vm2, %v9279_v46, %v8956_v26 }
 0x568   : > { %v9037_v19 = vpop.permute.xlu1 %9036 }
 0x569   : > { %v9305_v39 = vsel %vm6913_vm3, %v9292_v45, %v9037_v19 }
 0x56c   : > { %v9128_v14 = vpop.permute.xlu1 %9127 }
 0x56d   : > { %v9318_v38 = vsel %vm6932_vm4, %v9305_v39, %v9128_v14 }
 0x570   : > { %v9203_v18 = vpop.permute.xlu1 %9202 }
 0x571   : > { %v9331_v30 = vsel %vm6951_vm5, %v9318_v38, %v9203_v18 }
 0x572   : > { %9882 = vmatpush3.xpose.msk.msra.mxu1 %vm6986_vm7, %v9331_v30 }
 0x573   : > { %9883 = vmatprep.subr.mxu1 %v16926_v28  ;;  %v9348_v28 = vpop.permute.xlu0 %9347 }
 0x574   : > { %v9035_v8 = vpop.permute.xlu1 %9034 }
 0x575   : > { %v9304_v47 = vsel %vm6913_vm3, %v9291_v27, %v9035_v8 }
 0x576   : > { %v9317_v4 = vsel %vm6932_vm4, %v9304_v47, %v9126_v49 }
 0x578   : > { %v9201_v11 = vpop.permute.xlu1 %9200 }
 0x579   : > { %v9330_v58 = vsel %vm6951_vm5, %v9317_v4, %v9201_v11 }
 0x57a   : > { %9884 = vmatpush3.xpose.msk.msra.mxu1 %vm6986_vm7, %v9330_v58 }
 0x57d   : > { %9886 = vmatmul.mubr.msk.f32.vlgmr.msra.gmra.mxu1 %vm6986_vm7, %v9343_v7 }
 0x63d   : > { %v9458_v32 = vpop.f32.mrf.mxu1 }
 0x63e   : > { %v9459_v2 = vadd.f32 %v9458_v32, %v9348_v28 }
 0x63f   : > { %v9887_v57 = vpop.f32.mrf.mxu1 }
 0x640   : > { %v9462_v56 = vmax.f32 %v9459_v2, 0.0 }
 0x642   : > { %v9464_v9 = vsel %vm9463_vm6, %v9462_v56, 0.0 }
 0x643   : > { %9465 = vst [vmem:[%s276_s15] sm:$0xff] %v9464_v9 }
 0x644 PF: > { %s17_s24 = sadd.s32 1, %s9964_s24  }
 0x645   : > { %p14_p4 = scmp.ge.s32.totalorder %s17_s24, 4  }
 0x647   :  { %16 = sbr.rel (!%p14_p4) target bundleno = 1 (0x1), region = 78 }

</bundles_post_ra>
